<compile_context>
chip_gen: v5e
topology: v5e:2x2
jax: 0.10.0
libtpu: 0.0.40
codegen_flags: <defaults>
</compile_context>

<pallas_src>
import functools
import math

import numpy as np
import jax
import jax.numpy as jnp
from jax import lax
from jax.experimental import pallas as pl
from jax.experimental.pallas import tpu as pltpu


# MXU operands (v5e/v6e/v7x MXUs are bf16-native).  Accumulation stays float32
# via preferred_element_type; every elementwise / softmax / norm op stays f32.
MXU_DTYPE = jnp.bfloat16

_LOG_EPS = float(np.log(1e-6))        # log(0 + 1e-6) -> masked keys
_LOG_1P_EPS = float(np.log1p(1e-6))   # log(1 + 1e-6) -> valid keys


def _vmem():
    return pl.BlockSpec(memory_space=pltpu.MemorySpace.VMEM)


def _mm(w, x):
    """2-D matmul on the MXU: bf16 operands, f32 accumulation."""
    return jnp.dot(w.astype(MXU_DTYPE), x.astype(MXU_DTYPE),
                   preferred_element_type=jnp.float32)


def _shift_lanes(a, d, direction):
    """Zero-filled shift of a (C, L) array along the lane (length) axis."""
    c, L = a.shape
    z = jnp.zeros((c, d), jnp.float32)
    if direction > 0:                                  # result[:, t] = a[:, t-d]
        return jnp.concatenate([z, a[:, :L - d]], axis=-1)
    return jnp.concatenate([a[:, d:], z], axis=-1)     # result[:, t] = a[:, t+d]


# ----------------------------------------------------------------------------
# Sliding-window self attention (bl == dilation, bl >= 2) — in-kernel helper
# ----------------------------------------------------------------------------

def _sliding_window_attention(q, k, v, mask, bl):
    """ASFormer AttLayer._sliding_window_self_att (+ the F.relu before conv_out).

    q, k: (cq, L); v: (cv, L); mask: (1, L).  Returns relu(context): (cv, L).
    """
    cq, L = q.shape
    cv = v.shape[0]
    half = bl // 2
    nb = -(-L // bl)
    Lp = nb * bl
    W = bl + 2 * half
    scale = 1.0 / math.sqrt(cq)

    def pad_tail(a, n):
        if n == 0:
            return a
        return jnp.concatenate([a, jnp.zeros((a.shape[0], n), jnp.float32)], axis=-1)

    def pad_halo(a):
        z = jnp.zeros((a.shape[0], half), jnp.float32)
        return jnp.concatenate([z, pad_tail(a, Lp - L), z], axis=-1)   # (c, Lp+2*half)

    q_lp = pad_tail(q, Lp - L)
    k_h = pad_halo(k)
    v_h = pad_halo(v)
    m_h = pad_halo(mask)

    # Overlapping windows, built in-register from VMEM-resident activations.
    # TODO(synk): at production L, replace this static unroll with a window-tiled
    # grid (halo via BlockSpec index_map) or a lane-aligned reshape; the sub-(8,128)
    # reshape/transpose path is avoided here for Mosaic lowering robustness, and
    # after the dilation==1 specialization nb <= L/2 = 8 at these shapes, so each
    # window is a single-vreg slice.
    q_win = jnp.stack([q_lp[:, i * bl:(i + 1) * bl] for i in range(nb)], axis=0)
    k_win = jnp.stack([k_h[:, i * bl:i * bl + W] for i in range(nb)], axis=0)
    v_win = jnp.stack([v_h[:, i * bl:i * bl + W] for i in range(nb)], axis=0)
    m_win = jnp.stack([m_h[:, i * bl:i * bl + W] for i in range(nb)], axis=0)

    # Reference construct_window_mask() sets window_mask[:, :, i:i+bl] = 1 for
    # every i (all rows), i.e. a row-uniform mask: columns [0, 2*bl-1) are valid.
    col = lax.broadcasted_iota(jnp.int32, (1, 1, W), 2)
    fmask = jnp.where(col < 2 * bl - 1, m_win, 0.0)                      # (nb, 1, W)

    energy = lax.dot_general(q_win.astype(MXU_DTYPE), k_win.astype(MXU_DTYPE),
                             (((1,), (1,)), ((0,), (0,))),
                             preferred_element_type=jnp.float32)         # (nb, bl, W)
    # log(mask + 1e-6) for a binary mask == select between two constants (VPU).
    logits = energy * scale + jnp.where(fmask > 0.0, _LOG_1P_EPS, _LOG_EPS)
    logits = logits - jnp.max(logits, axis=-1, keepdims=True)
    e = jnp.exp(logits)
    att = e * pl.reciprocal(jnp.sum(e, axis=-1, keepdims=True), approx=True)
    att = att * fmask

    ctx = lax.dot_general(v_win.astype(MXU_DTYPE), att.astype(MXU_DTYPE),
                          (((2,), (2,)), ((0,), (0,))),
                          preferred_element_type=jnp.float32)            # (nb, cv, bl)
    ctx = jnp.maximum(ctx, 0.0)                                          # F.relu
    flat = jnp.concatenate([ctx[i] for i in range(nb)], axis=-1)         # (cv, Lp)
    return flat[:, :L] if Lp != L else flat


# ----------------------------------------------------------------------------
# One AttModule (ConvFeedForward -> InstanceNorm -> AttLayer -> conv_1x1 -> res)
# ----------------------------------------------------------------------------

def _att_module(x, v_src, mask, w, l, d, alpha, decoder):
    F_, L = x.shape

    # --- ConvFeedForward: dilated k=3 conv as ONE packed matmul --------------
    # Rows [k*F:(k+1)*F] of the packed weight hold tap k applied to un-shifted
    # x; shifting the matmul OUTPUTS reproduces out[t] = W0 x[t-d] + W1 x[t]
    # + W2 x[t+d] + b with zero boundary (shift commutes with the channel dot).
    y = _mm(w['ff_w'][l], x)                                  # (3F, L)
    y0, y1, y2 = y[:F_], y[F_:2 * F_], y[2 * F_:]             # sublane-aligned splits
    ff = _shift_lanes(y0, d, +1) + y1 + _shift_lanes(y2, d, -1) + w['ff_b'][l]
    ff = jnp.maximum(ff, 0.0)                                 # ReLU

    # --- InstanceNorm1d (affine=False, eps=1e-5, biased variance over L) -----
    mu = jnp.mean(ff, axis=-1, keepdims=True)
    var = jnp.mean(jnp.square(ff - mu), axis=-1, keepdims=True)
    normed = (ff - mu) * lax.rsqrt(var + 1e-5)

    # --- AttLayer (sliding_att, bl == dilation) -------------------------------
    v = _mm(w['v_w'][l], v_src if decoder else normed) + w['v_b'][l]
    if d == 1:
        # bl == 1: each query attends to exactly one key; softmax over a single
        # element is 1 so the attention output is v * padding_mask.  The Q/K
        # projections, energy matmul and softmax are mathematically dead.
        ctx = jnp.maximum(v * mask, 0.0)
    else:
        q = _mm(w['q_w'][l], normed) + w['q_b'][l]            # separate Q / K matmuls
        k = _mm(w['k_w'][l], normed) + w['k_b'][l]            # (no misaligned split)
        ctx = _sliding_window_attention(q, k, v, mask, d)
    att_out = (_mm(w['o_w'][l], ctx) + w['o_b'][l]) * mask    # conv_out + mask

    # --- epilogue: alpha*att + ff -> conv_1x1 -> (dropout=id) -> residual*mask
    mid = alpha * att_out + ff
    mid = _mm(w['c_w'][l], mid) + w['c_b'][l]
    return (x + mid) * mask


# ----------------------------------------------------------------------------
# Fused stage kernel (encoder or one decoder): ONE pallas_call per stage
# ----------------------------------------------------------------------------

def _stage_kernel(*refs, num_layers, alpha, decoder):
    if decoder:
        x_ref, fenc_ref, mask_ref = refs[0], refs[1], refs[2]
        w_refs = refs[3:-3]
    else:
        x_ref, mask_ref = refs[0], refs[1]
        fenc_ref = None
        w_refs = refs[2:-3]
    out_ref, feat_ref, dec_ref = refs[-3], refs[-2], refs[-1]
    (in_w, in_b, ff_w, ff_b, q_w, q_b, k_w, k_b,
     v_w, v_b, o_w, o_b, c_w, c_b, out_w, out_b) = w_refs
    w = dict(ff_w=ff_w, ff_b=ff_b, q_w=q_w, q_b=q_b, k_w=k_w, k_b=k_b,
             v_w=v_w, v_b=v_b, o_w=o_w, o_b=o_b, c_w=c_w, c_b=c_b)

    mask = mask_ref[...]                                      # (1, L)

    # Stage input 1x1 conv.  (Encoder Dropout2d channel masking and AttModule's
    # nn.Dropout are identities at inference.)
    feat = _mm(in_w[...], x_ref[...]) + in_b[...]             # (F, L)

    # Decoder value source: encoder feature * mask, loaded/masked ONCE per stage
    # (matches MyTransformer.forward passing `feature * mask` to every decoder).
    v_src = (fenc_ref[...] * mask) if decoder else None

    for l in range(num_layers):                               # static unroll
        feat = _att_module(feat, v_src, mask, w, l, 2 ** l, alpha, decoder)

    logits = _mm(out_w[...], feat) + out_b[...]               # (num_classes, L)
    out = logits * mask
    out_ref[...] = out
    feat_ref[...] = feat

    # Fused next-stage decoder input: F.softmax(out, dim=classes) * mask.
    m0 = jnp.max(out, axis=0, keepdims=True)
    e0 = jnp.exp(out - m0)
    dec = e0 * pl.reciprocal(jnp.sum(e0, axis=0, keepdims=True), approx=True)
    dec_ref[...] = dec * mask


def stage_forward(x, fenc, mask_row, p, num_layers, alpha, decoder):
    """One encoder/decoder stage as a single pallas_call.

    x: (C_in, L); fenc: (F, L) or None; mask_row: (1, L).
    Returns (out, feature, next_decoder_input), each (·, L) float32.
    """
    num_f_maps = p['in_w'].shape[0]
    num_classes = p['out_w'].shape[0]
    L = x.shape[-1]
    kern = functools.partial(_stage_kernel, num_layers=num_layers,
                             alpha=float(alpha), decoder=decoder)
    inputs = [x] + ([fenc] if decoder else []) + [
        mask_row,
        p['in_w'], p['in_b'], p['ff_w'], p['ff_b'],
        p['q_w'], p['q_b'], p['k_w'], p['k_b'],
        p['v_w'], p['v_b'], p['o_w'], p['o_b'],
        p['c_w'], p['c_b'], p['out_w'], p['out_b']]
    out_shape = (jax.ShapeDtypeStruct((num_classes, L), jnp.float32),
                 jax.ShapeDtypeStruct((num_f_maps, L), jnp.float32),
                 jax.ShapeDtypeStruct((num_classes, L), jnp.float32))
    return pl.pallas_call(
        kern,
        out_shape=out_shape,
        in_specs=[_vmem()] * len(inputs),
        out_specs=(_vmem(), _vmem(), _vmem()),
        # Actual residency at these shapes is << 1 MiB; explicit cap keeps a
        # double-buffering-safe budget if the shapes are scaled up.
        compiler_params=pltpu.CompilerParams(vmem_limit_bytes=32 * 1024 * 1024),
    )(*inputs)


# ----------------------------------------------------------------------------
# Model forward (glue is just 3 pallas_calls + one stack)
# ----------------------------------------------------------------------------

def my_transformer_fwd(x, mask, params, num_decoders, num_layers):
    """x: (1, C_in, L), mask: (1, num_classes, L) -> (num_decoders+1, 1, num_classes, L)."""
    assert x.shape[0] == 1, "sliding_att requires batch size 1"
    mask_row = mask[0, 0:1, :]                                # (1, L)
    out, feat, dec_in = stage_forward(x[0], None, mask_row, params['encoder'],
                                      num_layers, 1.0, False)
    outs = [out]
    for s in range(num_decoders):
        alpha = math.exp(-3.0 * s)                            # exponential_descrease(s)
        out, feat, dec_in = stage_forward(dec_in, feat, mask_row,
                                          params['decoders'][s],
                                          num_layers, alpha, True)
        outs.append(out)
    return jnp.stack(outs)[:, None, :, :]


# ----------------------------------------------------------------------------
# Deterministic parameter initialization (PyTorch Conv1d-style uniform bounds)
# ----------------------------------------------------------------------------

def init_conv1d(key, out_ch, in_ch, ksize):
    wkey, bkey = jax.random.split(key)
    bound = 1.0 / math.sqrt(in_ch * ksize)
    w = jax.random.uniform(wkey, (out_ch, in_ch, ksize), jnp.float32, -bound, bound)
    b = jax.random.uniform(bkey, (out_ch,), jnp.float32, -bound, bound)
    return w, b


def init_attmodule(key, in_ch, out_ch, r1, r2):
    ks = jax.random.split(key, 6)
    ff_w3, ff_b = init_conv1d(ks[0], out_ch, in_ch, 3)
    q_w, q_b = init_conv1d(ks[1], in_ch // r1, in_ch, 1)
    k_w, k_b = init_conv1d(ks[2], in_ch // r1, in_ch, 1)
    v_w, v_b = init_conv1d(ks[3], out_ch // r2, out_ch, 1)
    o_w, o_b = init_conv1d(ks[4], out_ch, out_ch // r2, 1)
    c_w, c_b = init_conv1d(ks[5], out_ch, out_ch, 1)
    # Pack the 3 dilated-conv taps row-wise: rows [k*out:(k+1)*out] hold tap k,
    # so the conv is one (3*out, in) @ (in, L) matmul; the per-tap output shifts
    # (x[t-d], x[t], x[t+d]) are applied to the matmul result inside the kernel.
    ff_w = jnp.transpose(ff_w3, (2, 0, 1)).reshape(3 * out_ch, in_ch)
    return dict(
        ff_w=ff_w, ff_b=ff_b.reshape(-1, 1),
        q_w=q_w[..., 0], q_b=q_b.reshape(-1, 1),
        k_w=k_w[..., 0], k_b=k_b.reshape(-1, 1),
        v_w=v_w[..., 0], v_b=v_b.reshape(-1, 1),
        o_w=o_w[..., 0], o_b=o_b.reshape(-1, 1),
        c_w=c_w[..., 0], c_b=c_b.reshape(-1, 1),
    )


def init_stage(key, num_layers, r1, r2, num_f_maps, input_dim, num_classes):
    ks = jax.random.split(key, num_layers + 2)
    in_w, in_b = init_conv1d(ks[0], num_f_maps, input_dim, 1)
    layer_ps = [init_attmodule(ks[1 + i], num_f_maps, num_f_maps, r1, r2)
                for i in range(num_layers)]
    out_w, out_b = init_conv1d(ks[-1], num_classes, num_f_maps, 1)
    # Stack per-layer weights along a leading layer axis (one VMEM ref per kind).
    p = {k: jnp.stack([lp[k] for lp in layer_ps]) for k in layer_ps[0]}
    # MXU operand weights pre-cast to bf16 once; biases (and all VPU math) stay f32.
    for name in ('ff_w', 'q_w', 'k_w', 'v_w', 'o_w', 'c_w'):
        p[name] = p[name].astype(MXU_DTYPE)
    p.update(in_w=in_w[..., 0].astype(MXU_DTYPE), in_b=in_b.reshape(-1, 1),
             out_w=out_w[..., 0].astype(MXU_DTYPE), out_b=out_b.reshape(-1, 1))
    return p


def init_transformer(key, num_decoders, num_layers, r1, r2,
                     num_f_maps, input_dim, num_classes):
    ks = jax.random.split(key, num_decoders + 1)
    enc = init_stage(ks[0], num_layers, r1, r2, num_f_maps, input_dim, num_classes)
    decs = [init_stage(ks[1 + s], num_layers, r1, r2, num_f_maps,
                       num_classes, num_classes)
            for s in range(num_decoders)]
    return dict(encoder=enc, decoders=decs)


# ----------------------------------------------------------------------------

if __name__ == "__main__":
    num_decoders = 2
    num_layers = 3            # dilations / sliding-window block lengths: 1, 2, 4
    r1 = r2 = 2
    num_f_maps = 8
    input_dim = 16
    num_classes = 6
    channel_masking_rate = 0.3  # Dropout2d -> identity at inference
    L = 16

    key = jax.random.PRNGKey(0)
    kx, kp = jax.random.split(key)

    x = jax.random.normal(kx, (1, input_dim, L), dtype=jnp.float32)
    valid = 13
    mask1d = (jnp.arange(L) < valid).astype(jnp.float32)
    mask = jnp.broadcast_to(mask1d[None, None, :], (1, num_classes, L)).astype(jnp.float32)

    params = init_transformer(kp, num_decoders, num_layers, r1, r2,
                              num_f_maps, input_dim, num_classes)

    fwd = jax.jit(functools.partial(my_transformer_fwd,
                                    num_decoders=num_decoders,
                                    num_layers=num_layers))
    out = fwd(x, mask, params)
    out = jax.block_until_ready(out)

    assert out.shape == (num_decoders + 1, 1, num_classes, L), out.shape
    assert bool(jnp.all(jnp.isfinite(out)))
    print("KERNEL_OK")
</pallas_src>

<mosaic_0001>
module attributes {stable_mosaic.version = 11 : i64} {
  func.func @_stage_kernel(%arg0: memref<6x16xf32, #tpu.memory_space<vmem>>, %arg1: memref<8x16xf32, #tpu.memory_space<vmem>>, %arg2: memref<1x16xf32, #tpu.memory_space<vmem>>, %arg3: memref<8x6xbf16, #tpu.memory_space<vmem>>, %arg4: memref<8x1xf32, #tpu.memory_space<vmem>>, %arg5: memref<3x24x8xbf16, #tpu.memory_space<vmem>>, %arg6: memref<3x8x1xf32, #tpu.memory_space<vmem>>, %arg7: memref<3x4x8xbf16, #tpu.memory_space<vmem>>, %arg8: memref<3x4x1xf32, #tpu.memory_space<vmem>>, %arg9: memref<3x4x8xbf16, #tpu.memory_space<vmem>>, %arg10: memref<3x4x1xf32, #tpu.memory_space<vmem>>, %arg11: memref<3x4x8xbf16, #tpu.memory_space<vmem>>, %arg12: memref<3x4x1xf32, #tpu.memory_space<vmem>>, %arg13: memref<3x8x4xbf16, #tpu.memory_space<vmem>>, %arg14: memref<3x8x1xf32, #tpu.memory_space<vmem>>, %arg15: memref<3x8x8xbf16, #tpu.memory_space<vmem>>, %arg16: memref<3x8x1xf32, #tpu.memory_space<vmem>>, %arg17: memref<6x8xbf16, #tpu.memory_space<vmem>>, %arg18: memref<6x1xf32, #tpu.memory_space<vmem>>, %arg19: memref<6x16xf32, #tpu.memory_space<vmem>>, %arg20: memref<8x16xf32, #tpu.memory_space<vmem>>, %arg21: memref<6x16xf32, #tpu.memory_space<vmem>>) attributes {dimension_semantics = [], scalar_prefetch = 0 : i64, scratch_operands = 0 : i64, tpu.core_type = #tpu.core_type<tc>} {
    %c0 = arith.constant 0 : index
    %c0_0 = arith.constant 0 : index
    %0 = vector.load %arg2[%c0, %c0_0] : memref<1x16xf32, #tpu.memory_space<vmem>>, vector<1x16xf32>
    %c0_1 = arith.constant 0 : index
    %c0_2 = arith.constant 0 : index
    %1 = vector.load %arg3[%c0_1, %c0_2] : memref<8x6xbf16, #tpu.memory_space<vmem>>, vector<8x6xbf16>
    %c0_3 = arith.constant 0 : index
    %c0_4 = arith.constant 0 : index
    %2 = vector.load %arg0[%c0_3, %c0_4] : memref<6x16xf32, #tpu.memory_space<vmem>>, vector<6x16xf32>
    %3 = arith.truncf %2 : vector<6x16xf32> to vector<6x16xbf16>
    %cst = arith.constant dense<0.000000e+00> : vector<8x16xf32>
    %4 = tpu.matmul %1, %3, %cst {dimension_numbers = #tpu.dot_dimension_numbers<[1], [0], [0], [1], [0, 0, 1, 1], [], []>} : vector<8x6xbf16>, vector<6x16xbf16>, vector<8x16xf32> -> vector<8x16xf32>
    %c0_5 = arith.constant 0 : index
    %c0_6 = arith.constant 0 : index
    %5 = vector.load %arg4[%c0_5, %c0_6] : memref<8x1xf32, #tpu.memory_space<vmem>>, vector<8x1xf32>
    %6 = vector.broadcast %5 : vector<8x1xf32> to vector<8x16xf32>
    %7 = arith.addf %4, %6 : vector<8x16xf32>
    %c0_7 = arith.constant 0 : index
    %c0_8 = arith.constant 0 : index
    %8 = vector.load %arg1[%c0_7, %c0_8] : memref<8x16xf32, #tpu.memory_space<vmem>>, vector<8x16xf32>
    %9 = vector.broadcast %0 : vector<1x16xf32> to vector<8x16xf32>
    %10 = arith.mulf %8, %9 : vector<8x16xf32>
    %c0_9 = arith.constant 0 : index
    %c0_10 = arith.constant 0 : index
    %c0_11 = arith.constant 0 : index
    %11 = vector.load %arg5[%c0_9, %c0_10, %c0_11] : memref<3x24x8xbf16, #tpu.memory_space<vmem>>, vector<1x24x8xbf16>
    %12 = vector.shape_cast %11 : vector<1x24x8xbf16> to vector<24x8xbf16>
    %13 = arith.truncf %7 : vector<8x16xf32> to vector<8x16xbf16>
    %cst_12 = arith.constant dense<0.000000e+00> : vector<24x16xf32>
    %14 = tpu.matmul %12, %13, %cst_12 {dimension_numbers = #tpu.dot_dimension_numbers<[1], [0], [0], [1], [0, 0, 1, 1], [], []>} : vector<24x8xbf16>, vector<8x16xbf16>, vector<24x16xf32> -> vector<24x16xf32>
    %15 = vector.extract_strided_slice %14 {offsets = [0, 0], sizes = [8, 16], strides = [1, 1]} : vector<24x16xf32> to vector<8x16xf32>
    %16 = vector.extract_strided_slice %14 {offsets = [8, 0], sizes = [8, 16], strides = [1, 1]} : vector<24x16xf32> to vector<8x16xf32>
    %17 = vector.extract_strided_slice %14 {offsets = [16, 0], sizes = [8, 16], strides = [1, 1]} : vector<24x16xf32> to vector<8x16xf32>
    %cst_13 = arith.constant 0.000000e+00 : f32
    %18 = vector.broadcast %cst_13 : f32 to vector<8x1xf32>
    %19 = vector.extract_strided_slice %15 {offsets = [0, 0], sizes = [8, 15], strides = [1, 1]} : vector<8x16xf32> to vector<8x15xf32>
    %20 = tpu.concatenate %18, %19 in 1 : vector<8x1xf32>, vector<8x15xf32> -> vector<8x16xf32>
    %21 = arith.addf %20, %16 : vector<8x16xf32>
    %cst_14 = arith.constant 0.000000e+00 : f32
    %22 = vector.broadcast %cst_14 : f32 to vector<8x1xf32>
    %23 = vector.extract_strided_slice %17 {offsets = [0, 1], sizes = [8, 15], strides = [1, 1]} : vector<8x16xf32> to vector<8x15xf32>
    %24 = tpu.concatenate %23, %22 in 1 : vector<8x15xf32>, vector<8x1xf32> -> vector<8x16xf32>
    %25 = arith.addf %21, %24 : vector<8x16xf32>
    %c0_15 = arith.constant 0 : index
    %c0_16 = arith.constant 0 : index
    %c0_17 = arith.constant 0 : index
    %26 = vector.load %arg6[%c0_15, %c0_16, %c0_17] : memref<3x8x1xf32, #tpu.memory_space<vmem>>, vector<1x8x1xf32>
    %27 = vector.shape_cast %26 : vector<1x8x1xf32> to vector<8x1xf32>
    %28 = vector.broadcast %27 : vector<8x1xf32> to vector<8x16xf32>
    %29 = arith.addf %25, %28 : vector<8x16xf32>
    %cst_18 = arith.constant 0.000000e+00 : f32
    %30 = vector.broadcast %cst_18 : f32 to vector<8x16xf32>
    %31 = arith.maximumf %29, %30 : vector<8x16xf32>
    %c0_19 = arith.constant 0 : index
    %c0_20 = arith.constant 0 : index
    %c0_21 = arith.constant 0 : index
    %32 = vector.load %arg11[%c0_19, %c0_20, %c0_21] : memref<3x4x8xbf16, #tpu.memory_space<vmem>>, vector<1x4x8xbf16>
    %33 = vector.shape_cast %32 : vector<1x4x8xbf16> to vector<4x8xbf16>
    %34 = arith.truncf %10 : vector<8x16xf32> to vector<8x16xbf16>
    %cst_22 = arith.constant dense<0.000000e+00> : vector<4x16xf32>
    %35 = tpu.matmul %33, %34, %cst_22 {dimension_numbers = #tpu.dot_dimension_numbers<[1], [0], [0], [1], [0, 0, 1, 1], [], []>} : vector<4x8xbf16>, vector<8x16xbf16>, vector<4x16xf32> -> vector<4x16xf32>
    %c0_23 = arith.constant 0 : index
    %c0_24 = arith.constant 0 : index
    %c0_25 = arith.constant 0 : index
    %36 = vector.load %arg12[%c0_23, %c0_24, %c0_25] : memref<3x4x1xf32, #tpu.memory_space<vmem>>, vector<1x4x1xf32>
    %37 = vector.shape_cast %36 : vector<1x4x1xf32> to vector<4x1xf32>
    %38 = vector.broadcast %37 : vector<4x1xf32> to vector<4x16xf32>
    %39 = arith.addf %35, %38 : vector<4x16xf32>
    %40 = vector.broadcast %0 : vector<1x16xf32> to vector<4x16xf32>
    %41 = arith.mulf %39, %40 : vector<4x16xf32>
    %cst_26 = arith.constant 0.000000e+00 : f32
    %42 = vector.broadcast %cst_26 : f32 to vector<4x16xf32>
    %43 = arith.maximumf %41, %42 : vector<4x16xf32>
    %c0_27 = arith.constant 0 : index
    %c0_28 = arith.constant 0 : index
    %c0_29 = arith.constant 0 : index
    %44 = vector.load %arg13[%c0_27, %c0_28, %c0_29] : memref<3x8x4xbf16, #tpu.memory_space<vmem>>, vector<1x8x4xbf16>
    %45 = vector.shape_cast %44 : vector<1x8x4xbf16> to vector<8x4xbf16>
    %46 = arith.truncf %43 : vector<4x16xf32> to vector<4x16xbf16>
    %cst_30 = arith.constant dense<0.000000e+00> : vector<8x16xf32>
    %47 = tpu.matmul %45, %46, %cst_30 {dimension_numbers = #tpu.dot_dimension_numbers<[1], [0], [0], [1], [0, 0, 1, 1], [], []>} : vector<8x4xbf16>, vector<4x16xbf16>, vector<8x16xf32> -> vector<8x16xf32>
    %c0_31 = arith.constant 0 : index
    %c0_32 = arith.constant 0 : index
    %c0_33 = arith.constant 0 : index
    %48 = vector.load %arg14[%c0_31, %c0_32, %c0_33] : memref<3x8x1xf32, #tpu.memory_space<vmem>>, vector<1x8x1xf32>
    %49 = vector.shape_cast %48 : vector<1x8x1xf32> to vector<8x1xf32>
    %50 = vector.broadcast %49 : vector<8x1xf32> to vector<8x16xf32>
    %51 = arith.addf %47, %50 : vector<8x16xf32>
    %52 = vector.broadcast %0 : vector<1x16xf32> to vector<8x16xf32>
    %53 = arith.mulf %51, %52 : vector<8x16xf32>
    %cst_34 = arith.constant 1.000000e+00 : f32
    %54 = vector.broadcast %cst_34 : f32 to vector<8x16xf32>
    %55 = arith.mulf %54, %53 : vector<8x16xf32>
    %56 = arith.addf %55, %31 : vector<8x16xf32>
    %c0_35 = arith.constant 0 : index
    %c0_36 = arith.constant 0 : index
    %c0_37 = arith.constant 0 : index
    %57 = vector.load %arg15[%c0_35, %c0_36, %c0_37] : memref<3x8x8xbf16, #tpu.memory_space<vmem>>, vector<1x8x8xbf16>
    %58 = vector.shape_cast %57 : vector<1x8x8xbf16> to vector<8x8xbf16>
    %59 = arith.truncf %56 : vector<8x16xf32> to vector<8x16xbf16>
    %cst_38 = arith.constant dense<0.000000e+00> : vector<8x16xf32>
    %60 = tpu.matmul %58, %59, %cst_38 {dimension_numbers = #tpu.dot_dimension_numbers<[1], [0], [0], [1], [0, 0, 1, 1], [], []>} : vector<8x8xbf16>, vector<8x16xbf16>, vector<8x16xf32> -> vector<8x16xf32>
    %c0_39 = arith.constant 0 : index
    %c0_40 = arith.constant 0 : index
    %c0_41 = arith.constant 0 : index
    %61 = vector.load %arg16[%c0_39, %c0_40, %c0_41] : memref<3x8x1xf32, #tpu.memory_space<vmem>>, vector<1x8x1xf32>
    %62 = vector.shape_cast %61 : vector<1x8x1xf32> to vector<8x1xf32>
    %63 = vector.broadcast %62 : vector<8x1xf32> to vector<8x16xf32>
    %64 = arith.addf %60, %63 : vector<8x16xf32>
    %65 = arith.addf %7, %64 : vector<8x16xf32>
    %66 = vector.broadcast %0 : vector<1x16xf32> to vector<8x16xf32>
    %67 = arith.mulf %65, %66 : vector<8x16xf32>
    %c1 = arith.constant 1 : index
    %c0_42 = arith.constant 0 : index
    %c0_43 = arith.constant 0 : index
    %68 = vector.load %arg5[%c1, %c0_42, %c0_43] : memref<3x24x8xbf16, #tpu.memory_space<vmem>>, vector<1x24x8xbf16>
    %69 = vector.shape_cast %68 : vector<1x24x8xbf16> to vector<24x8xbf16>
    %70 = arith.truncf %67 : vector<8x16xf32> to vector<8x16xbf16>
    %cst_44 = arith.constant dense<0.000000e+00> : vector<24x16xf32>
    %71 = tpu.matmul %69, %70, %cst_44 {dimension_numbers = #tpu.dot_dimension_numbers<[1], [0], [0], [1], [0, 0, 1, 1], [], []>} : vector<24x8xbf16>, vector<8x16xbf16>, vector<24x16xf32> -> vector<24x16xf32>
    %72 = vector.extract_strided_slice %71 {offsets = [0, 0], sizes = [8, 16], strides = [1, 1]} : vector<24x16xf32> to vector<8x16xf32>
    %73 = vector.extract_strided_slice %71 {offsets = [8, 0], sizes = [8, 16], strides = [1, 1]} : vector<24x16xf32> to vector<8x16xf32>
    %74 = vector.extract_strided_slice %71 {offsets = [16, 0], sizes = [8, 16], strides = [1, 1]} : vector<24x16xf32> to vector<8x16xf32>
    %cst_45 = arith.constant 0.000000e+00 : f32
    %75 = vector.broadcast %cst_45 : f32 to vector<8x2xf32>
    %76 = vector.extract_strided_slice %72 {offsets = [0, 0], sizes = [8, 14], strides = [1, 1]} : vector<8x16xf32> to vector<8x14xf32>
    %77 = tpu.concatenate %75, %76 in 1 : vector<8x2xf32>, vector<8x14xf32> -> vector<8x16xf32>
    %78 = arith.addf %77, %73 : vector<8x16xf32>
    %cst_46 = arith.constant 0.000000e+00 : f32
    %79 = vector.broadcast %cst_46 : f32 to vector<8x2xf32>
    %80 = vector.extract_strided_slice %74 {offsets = [0, 2], sizes = [8, 14], strides = [1, 1]} : vector<8x16xf32> to vector<8x14xf32>
    %81 = tpu.concatenate %80, %79 in 1 : vector<8x14xf32>, vector<8x2xf32> -> vector<8x16xf32>
    %82 = arith.addf %78, %81 : vector<8x16xf32>
    %c1_47 = arith.constant 1 : index
    %c0_48 = arith.constant 0 : index
    %c0_49 = arith.constant 0 : index
    %83 = vector.load %arg6[%c1_47, %c0_48, %c0_49] : memref<3x8x1xf32, #tpu.memory_space<vmem>>, vector<1x8x1xf32>
    %84 = vector.shape_cast %83 : vector<1x8x1xf32> to vector<8x1xf32>
    %85 = vector.broadcast %84 : vector<8x1xf32> to vector<8x16xf32>
    %86 = arith.addf %82, %85 : vector<8x16xf32>
    %cst_50 = arith.constant 0.000000e+00 : f32
    %87 = vector.broadcast %cst_50 : f32 to vector<8x16xf32>
    %88 = arith.maximumf %86, %87 : vector<8x16xf32>
    %cst_51 = arith.constant dense<0.000000e+00> : vector<8xf32>
    %89 = vector.multi_reduction <add>, %88, %cst_51 [1] : vector<8x16xf32> to vector<8xf32>
    %90 = vector.shape_cast %89 : vector<8xf32> to vector<8x1xf32>
    %cst_52 = arith.constant 1.600000e+01 : f32
    %91 = vector.broadcast %cst_52 : f32 to vector<8x1xf32>
    %92 = arith.divf %90, %91 : vector<8x1xf32>
    %93 = vector.broadcast %92 : vector<8x1xf32> to vector<8x16xf32>
    %94 = arith.subf %88, %93 : vector<8x16xf32>
    %95 = arith.mulf %94, %94 : vector<8x16xf32>
    %cst_53 = arith.constant dense<0.000000e+00> : vector<8xf32>
    %96 = vector.multi_reduction <add>, %95, %cst_53 [1] : vector<8x16xf32> to vector<8xf32>
    %97 = vector.shape_cast %96 : vector<8xf32> to vector<8x1xf32>
    %cst_54 = arith.constant 1.600000e+01 : f32
    %98 = vector.broadcast %cst_54 : f32 to vector<8x1xf32>
    %99 = arith.divf %97, %98 : vector<8x1xf32>
    %100 = vector.broadcast %92 : vector<8x1xf32> to vector<8x16xf32>
    %101 = arith.subf %88, %100 : vector<8x16xf32>
    %cst_55 = arith.constant 9.99999974E-6 : f32
    %102 = vector.broadcast %cst_55 : f32 to vector<8x1xf32>
    %103 = arith.addf %99, %102 : vector<8x1xf32>
    %104 = math.rsqrt %103 : vector<8x1xf32>
    %105 = vector.broadcast %104 : vector<8x1xf32> to vector<8x16xf32>
    %106 = arith.mulf %101, %105 : vector<8x16xf32>
    %c1_56 = arith.constant 1 : index
    %c0_57 = arith.constant 0 : index
    %c0_58 = arith.constant 0 : index
    %107 = vector.load %arg11[%c1_56, %c0_57, %c0_58] : memref<3x4x8xbf16, #tpu.memory_space<vmem>>, vector<1x4x8xbf16>
    %108 = vector.shape_cast %107 : vector<1x4x8xbf16> to vector<4x8xbf16>
    %109 = arith.truncf %10 : vector<8x16xf32> to vector<8x16xbf16>
    %cst_59 = arith.constant dense<0.000000e+00> : vector<4x16xf32>
    %110 = tpu.matmul %108, %109, %cst_59 {dimension_numbers = #tpu.dot_dimension_numbers<[1], [0], [0], [1], [0, 0, 1, 1], [], []>} : vector<4x8xbf16>, vector<8x16xbf16>, vector<4x16xf32> -> vector<4x16xf32>
    %c1_60 = arith.constant 1 : index
    %c0_61 = arith.constant 0 : index
    %c0_62 = arith.constant 0 : index
    %111 = vector.load %arg12[%c1_60, %c0_61, %c0_62] : memref<3x4x1xf32, #tpu.memory_space<vmem>>, vector<1x4x1xf32>
    %112 = vector.shape_cast %111 : vector<1x4x1xf32> to vector<4x1xf32>
    %113 = vector.broadcast %112 : vector<4x1xf32> to vector<4x16xf32>
    %114 = arith.addf %110, %113 : vector<4x16xf32>
    %c1_63 = arith.constant 1 : index
    %c0_64 = arith.constant 0 : index
    %c0_65 = arith.constant 0 : index
    %115 = vector.load %arg7[%c1_63, %c0_64, %c0_65] : memref<3x4x8xbf16, #tpu.memory_space<vmem>>, vector<1x4x8xbf16>
    %116 = vector.shape_cast %115 : vector<1x4x8xbf16> to vector<4x8xbf16>
    %117 = arith.truncf %106 : vector<8x16xf32> to vector<8x16xbf16>
    %cst_66 = arith.constant dense<0.000000e+00> : vector<4x16xf32>
    %118 = tpu.matmul %116, %117, %cst_66 {dimension_numbers = #tpu.dot_dimension_numbers<[1], [0], [0], [1], [0, 0, 1, 1], [], []>} : vector<4x8xbf16>, vector<8x16xbf16>, vector<4x16xf32> -> vector<4x16xf32>
    %c1_67 = arith.constant 1 : index
    %c0_68 = arith.constant 0 : index
    %c0_69 = arith.constant 0 : index
    %119 = vector.load %arg8[%c1_67, %c0_68, %c0_69] : memref<3x4x1xf32, #tpu.memory_space<vmem>>, vector<1x4x1xf32>
    %120 = vector.shape_cast %119 : vector<1x4x1xf32> to vector<4x1xf32>
    %121 = vector.broadcast %120 : vector<4x1xf32> to vector<4x16xf32>
    %122 = arith.addf %118, %121 : vector<4x16xf32>
    %c1_70 = arith.constant 1 : index
    %c0_71 = arith.constant 0 : index
    %c0_72 = arith.constant 0 : index
    %123 = vector.load %arg9[%c1_70, %c0_71, %c0_72] : memref<3x4x8xbf16, #tpu.memory_space<vmem>>, vector<1x4x8xbf16>
    %124 = vector.shape_cast %123 : vector<1x4x8xbf16> to vector<4x8xbf16>
    %125 = arith.truncf %106 : vector<8x16xf32> to vector<8x16xbf16>
    %cst_73 = arith.constant dense<0.000000e+00> : vector<4x16xf32>
    %126 = tpu.matmul %124, %125, %cst_73 {dimension_numbers = #tpu.dot_dimension_numbers<[1], [0], [0], [1], [0, 0, 1, 1], [], []>} : vector<4x8xbf16>, vector<8x16xbf16>, vector<4x16xf32> -> vector<4x16xf32>
    %c1_74 = arith.constant 1 : index
    %c0_75 = arith.constant 0 : index
    %c0_76 = arith.constant 0 : index
    %127 = vector.load %arg10[%c1_74, %c0_75, %c0_76] : memref<3x4x1xf32, #tpu.memory_space<vmem>>, vector<1x4x1xf32>
    %128 = vector.shape_cast %127 : vector<1x4x1xf32> to vector<4x1xf32>
    %129 = vector.broadcast %128 : vector<4x1xf32> to vector<4x16xf32>
    %130 = arith.addf %126, %129 : vector<4x16xf32>
    %cst_77 = arith.constant 0.000000e+00 : f32
    %131 = vector.broadcast %cst_77 : f32 to vector<4x1xf32>
    %132 = tpu.concatenate %131, %130, %131 in 1 : vector<4x1xf32>, vector<4x16xf32>, vector<4x1xf32> -> vector<4x18xf32>
    %cst_78 = arith.constant 0.000000e+00 : f32
    %133 = vector.broadcast %cst_78 : f32 to vector<4x1xf32>
    %134 = tpu.concatenate %133, %114, %133 in 1 : vector<4x1xf32>, vector<4x16xf32>, vector<4x1xf32> -> vector<4x18xf32>
    %cst_79 = arith.constant 0.000000e+00 : f32
    %135 = vector.broadcast %cst_79 : f32 to vector<1x1xf32>
    %136 = tpu.concatenate %135, %0, %135 in 1 : vector<1x1xf32>, vector<1x16xf32>, vector<1x1xf32> -> vector<1x18xf32>
    %137 = vector.extract_strided_slice %122 {offsets = [0, 0], sizes = [4, 2], strides = [1, 1]} : vector<4x16xf32> to vector<4x2xf32>
    %138 = vector.extract_strided_slice %122 {offsets = [0, 2], sizes = [4, 2], strides = [1, 1]} : vector<4x16xf32> to vector<4x2xf32>
    %139 = vector.extract_strided_slice %122 {offsets = [0, 4], sizes = [4, 2], strides = [1, 1]} : vector<4x16xf32> to vector<4x2xf32>
    %140 = vector.extract_strided_slice %122 {offsets = [0, 6], sizes = [4, 2], strides = [1, 1]} : vector<4x16xf32> to vector<4x2xf32>
    %141 = vector.extract_strided_slice %122 {offsets = [0, 8], sizes = [4, 2], strides = [1, 1]} : vector<4x16xf32> to vector<4x2xf32>
    %142 = vector.extract_strided_slice %122 {offsets = [0, 10], sizes = [4, 2], strides = [1, 1]} : vector<4x16xf32> to vector<4x2xf32>
    %143 = vector.extract_strided_slice %122 {offsets = [0, 12], sizes = [4, 2], strides = [1, 1]} : vector<4x16xf32> to vector<4x2xf32>
    %144 = vector.extract_strided_slice %122 {offsets = [0, 14], sizes = [4, 2], strides = [1, 1]} : vector<4x16xf32> to vector<4x2xf32>
    %145 = vector.shape_cast %137 : vector<4x2xf32> to vector<1x4x2xf32>
    %146 = vector.shape_cast %138 : vector<4x2xf32> to vector<1x4x2xf32>
    %147 = vector.shape_cast %139 : vector<4x2xf32> to vector<1x4x2xf32>
    %148 = vector.shape_cast %140 : vector<4x2xf32> to vector<1x4x2xf32>
    %149 = vector.shape_cast %141 : vector<4x2xf32> to vector<1x4x2xf32>
    %150 = vector.shape_cast %142 : vector<4x2xf32> to vector<1x4x2xf32>
    %151 = vector.shape_cast %143 : vector<4x2xf32> to vector<1x4x2xf32>
    %152 = vector.shape_cast %144 : vector<4x2xf32> to vector<1x4x2xf32>
    %153 = tpu.concatenate %145, %146, %147, %148, %149, %150, %151, %152 in 0 : vector<1x4x2xf32>, vector<1x4x2xf32>, vector<1x4x2xf32>, vector<1x4x2xf32>, vector<1x4x2xf32>, vector<1x4x2xf32>, vector<1x4x2xf32>, vector<1x4x2xf32> -> vector<8x4x2xf32>
    %154 = vector.extract_strided_slice %132 {offsets = [0, 0], sizes = [4, 4], strides = [1, 1]} : vector<4x18xf32> to vector<4x4xf32>
    %155 = vector.extract_strided_slice %132 {offsets = [0, 2], sizes = [4, 4], strides = [1, 1]} : vector<4x18xf32> to vector<4x4xf32>
    %156 = vector.extract_strided_slice %132 {offsets = [0, 4], sizes = [4, 4], strides = [1, 1]} : vector<4x18xf32> to vector<4x4xf32>
    %157 = vector.extract_strided_slice %132 {offsets = [0, 6], sizes = [4, 4], strides = [1, 1]} : vector<4x18xf32> to vector<4x4xf32>
    %158 = vector.extract_strided_slice %132 {offsets = [0, 8], sizes = [4, 4], strides = [1, 1]} : vector<4x18xf32> to vector<4x4xf32>
    %159 = vector.extract_strided_slice %132 {offsets = [0, 10], sizes = [4, 4], strides = [1, 1]} : vector<4x18xf32> to vector<4x4xf32>
    %160 = vector.extract_strided_slice %132 {offsets = [0, 12], sizes = [4, 4], strides = [1, 1]} : vector<4x18xf32> to vector<4x4xf32>
    %161 = vector.extract_strided_slice %132 {offsets = [0, 14], sizes = [4, 4], strides = [1, 1]} : vector<4x18xf32> to vector<4x4xf32>
    %162 = vector.shape_cast %154 : vector<4x4xf32> to vector<1x4x4xf32>
    %163 = vector.shape_cast %155 : vector<4x4xf32> to vector<1x4x4xf32>
    %164 = vector.shape_cast %156 : vector<4x4xf32> to vector<1x4x4xf32>
    %165 = vector.shape_cast %157 : vector<4x4xf32> to vector<1x4x4xf32>
    %166 = vector.shape_cast %158 : vector<4x4xf32> to vector<1x4x4xf32>
    %167 = vector.shape_cast %159 : vector<4x4xf32> to vector<1x4x4xf32>
    %168 = vector.shape_cast %160 : vector<4x4xf32> to vector<1x4x4xf32>
    %169 = vector.shape_cast %161 : vector<4x4xf32> to vector<1x4x4xf32>
    %170 = tpu.concatenate %162, %163, %164, %165, %166, %167, %168, %169 in 0 : vector<1x4x4xf32>, vector<1x4x4xf32>, vector<1x4x4xf32>, vector<1x4x4xf32>, vector<1x4x4xf32>, vector<1x4x4xf32>, vector<1x4x4xf32>, vector<1x4x4xf32> -> vector<8x4x4xf32>
    %171 = vector.extract_strided_slice %134 {offsets = [0, 0], sizes = [4, 4], strides = [1, 1]} : vector<4x18xf32> to vector<4x4xf32>
    %172 = vector.extract_strided_slice %134 {offsets = [0, 2], sizes = [4, 4], strides = [1, 1]} : vector<4x18xf32> to vector<4x4xf32>
    %173 = vector.extract_strided_slice %134 {offsets = [0, 4], sizes = [4, 4], strides = [1, 1]} : vector<4x18xf32> to vector<4x4xf32>
    %174 = vector.extract_strided_slice %134 {offsets = [0, 6], sizes = [4, 4], strides = [1, 1]} : vector<4x18xf32> to vector<4x4xf32>
    %175 = vector.extract_strided_slice %134 {offsets = [0, 8], sizes = [4, 4], strides = [1, 1]} : vector<4x18xf32> to vector<4x4xf32>
    %176 = vector.extract_strided_slice %134 {offsets = [0, 10], sizes = [4, 4], strides = [1, 1]} : vector<4x18xf32> to vector<4x4xf32>
    %177 = vector.extract_strided_slice %134 {offsets = [0, 12], sizes = [4, 4], strides = [1, 1]} : vector<4x18xf32> to vector<4x4xf32>
    %178 = vector.extract_strided_slice %134 {offsets = [0, 14], sizes = [4, 4], strides = [1, 1]} : vector<4x18xf32> to vector<4x4xf32>
    %179 = vector.shape_cast %171 : vector<4x4xf32> to vector<1x4x4xf32>
    %180 = vector.shape_cast %172 : vector<4x4xf32> to vector<1x4x4xf32>
    %181 = vector.shape_cast %173 : vector<4x4xf32> to vector<1x4x4xf32>
    %182 = vector.shape_cast %174 : vector<4x4xf32> to vector<1x4x4xf32>
    %183 = vector.shape_cast %175 : vector<4x4xf32> to vector<1x4x4xf32>
    %184 = vector.shape_cast %176 : vector<4x4xf32> to vector<1x4x4xf32>
    %185 = vector.shape_cast %177 : vector<4x4xf32> to vector<1x4x4xf32>
    %186 = vector.shape_cast %178 : vector<4x4xf32> to vector<1x4x4xf32>
    %187 = tpu.concatenate %179, %180, %181, %182, %183, %184, %185, %186 in 0 : vector<1x4x4xf32>, vector<1x4x4xf32>, vector<1x4x4xf32>, vector<1x4x4xf32>, vector<1x4x4xf32>, vector<1x4x4xf32>, vector<1x4x4xf32>, vector<1x4x4xf32> -> vector<8x4x4xf32>
    %188 = vector.extract_strided_slice %136 {offsets = [0, 0], sizes = [1, 4], strides = [1, 1]} : vector<1x18xf32> to vector<1x4xf32>
    %189 = vector.extract_strided_slice %136 {offsets = [0, 2], sizes = [1, 4], strides = [1, 1]} : vector<1x18xf32> to vector<1x4xf32>
    %190 = vector.extract_strided_slice %136 {offsets = [0, 4], sizes = [1, 4], strides = [1, 1]} : vector<1x18xf32> to vector<1x4xf32>
    %191 = vector.extract_strided_slice %136 {offsets = [0, 6], sizes = [1, 4], strides = [1, 1]} : vector<1x18xf32> to vector<1x4xf32>
    %192 = vector.extract_strided_slice %136 {offsets = [0, 8], sizes = [1, 4], strides = [1, 1]} : vector<1x18xf32> to vector<1x4xf32>
    %193 = vector.extract_strided_slice %136 {offsets = [0, 10], sizes = [1, 4], strides = [1, 1]} : vector<1x18xf32> to vector<1x4xf32>
    %194 = vector.extract_strided_slice %136 {offsets = [0, 12], sizes = [1, 4], strides = [1, 1]} : vector<1x18xf32> to vector<1x4xf32>
    %195 = vector.extract_strided_slice %136 {offsets = [0, 14], sizes = [1, 4], strides = [1, 1]} : vector<1x18xf32> to vector<1x4xf32>
    %196 = vector.shape_cast %188 : vector<1x4xf32> to vector<1x1x4xf32>
    %197 = vector.shape_cast %189 : vector<1x4xf32> to vector<1x1x4xf32>
    %198 = vector.shape_cast %190 : vector<1x4xf32> to vector<1x1x4xf32>
    %199 = vector.shape_cast %191 : vector<1x4xf32> to vector<1x1x4xf32>
    %200 = vector.shape_cast %192 : vector<1x4xf32> to vector<1x1x4xf32>
    %201 = vector.shape_cast %193 : vector<1x4xf32> to vector<1x1x4xf32>
    %202 = vector.shape_cast %194 : vector<1x4xf32> to vector<1x1x4xf32>
    %203 = vector.shape_cast %195 : vector<1x4xf32> to vector<1x1x4xf32>
    %204 = tpu.concatenate %196, %197, %198, %199, %200, %201, %202, %203 in 0 : vector<1x1x4xf32>, vector<1x1x4xf32>, vector<1x1x4xf32>, vector<1x1x4xf32>, vector<1x1x4xf32>, vector<1x1x4xf32>, vector<1x1x4xf32>, vector<1x1x4xf32> -> vector<8x1x4xf32>
    %205 = tpu.iota {dimensions = array<i32: 2>} : vector<1x1x4xi32>
    %c3_i32 = arith.constant 3 : i32
    %206 = vector.broadcast %c3_i32 : i32 to vector<1x1x4xi32>
    %207 = arith.cmpi slt, %205, %206 : vector<1x1x4xi32>
    %cst_80 = arith.constant 0.000000e+00 : f32
    %208 = vector.shape_cast %207 : vector<1x1x4xi1> to vector<1x1x4xi1>
    %209 = vector.broadcast %208 : vector<1x1x4xi1> to vector<8x1x4xi1>
    %210 = vector.broadcast %cst_80 : f32 to vector<8x1x4xf32>
    %211 = arith.select %209, %204, %210 : vector<8x1x4xi1>, vector<8x1x4xf32>
    %212 = arith.truncf %153 : vector<8x4x2xf32> to vector<8x4x2xbf16>
    %213 = arith.truncf %170 : vector<8x4x4xf32> to vector<8x4x4xbf16>
    %cst_81 = arith.constant dense<0.000000e+00> : vector<8x2x4xf32>
    %214 = tpu.matmul %212, %213, %cst_81 {dimension_numbers = #tpu.dot_dimension_numbers<[1], [1], [2], [2], [0, 0, 0, 2, 1, 2], [0], [0]>} : vector<8x4x2xbf16>, vector<8x4x4xbf16>, vector<8x2x4xf32> -> vector<8x2x4xf32>
    %cst_82 = arith.constant 5.000000e-01 : f32
    %215 = vector.broadcast %cst_82 : f32 to vector<8x2x4xf32>
    %216 = arith.mulf %214, %215 : vector<8x2x4xf32>
    %cst_83 = arith.constant 0.000000e+00 : f32
    %217 = vector.broadcast %cst_83 : f32 to vector<8x1x4xf32>
    %218 = arith.cmpf ogt, %211, %217 : vector<8x1x4xf32>
    %cst_84 = arith.constant 9.99999543E-7 : f32
    %cst_85 = arith.constant -13.8155107 : f32
    %219 = vector.broadcast %cst_84 : f32 to vector<8x1x4xf32>
    %220 = vector.broadcast %cst_85 : f32 to vector<8x1x4xf32>
    %221 = arith.select %218, %219, %220 : vector<8x1x4xi1>, vector<8x1x4xf32>
    %222 = vector.broadcast %221 : vector<8x1x4xf32> to vector<8x2x4xf32>
    %223 = arith.addf %216, %222 : vector<8x2x4xf32>
    %cst_86 = arith.constant dense<0xFF800000> : vector<8x2xf32>
    %224 = vector.multi_reduction <maximumf>, %223, %cst_86 [2] : vector<8x2x4xf32> to vector<8x2xf32>
    %225 = vector.shape_cast %224 : vector<8x2xf32> to vector<8x2x1xf32>
    %226 = vector.broadcast %225 : vector<8x2x1xf32> to vector<8x2x4xf32>
    %227 = arith.subf %223, %226 : vector<8x2x4xf32>
    %228 = math.exp %227 : vector<8x2x4xf32>
    %cst_87 = arith.constant dense<0.000000e+00> : vector<8x2xf32>
    %229 = vector.multi_reduction <add>, %228, %cst_87 [2] : vector<8x2x4xf32> to vector<8x2xf32>
    %230 = vector.shape_cast %229 : vector<8x2xf32> to vector<8x2x1xf32>
    %231 = tpu.reciprocal %230 {approx = true} : vector<8x2x1xf32> -> vector<8x2x1xf32>
    %232 = vector.broadcast %231 : vector<8x2x1xf32> to vector<8x2x4xf32>
    %233 = arith.mulf %228, %232 : vector<8x2x4xf32>
    %234 = vector.broadcast %211 : vector<8x1x4xf32> to vector<8x2x4xf32>
    %235 = arith.mulf %233, %234 : vector<8x2x4xf32>
    %236 = arith.truncf %187 : vector<8x4x4xf32> to vector<8x4x4xbf16>
    %237 = arith.truncf %235 : vector<8x2x4xf32> to vector<8x2x4xbf16>
    %cst_88 = arith.constant dense<0.000000e+00> : vector<8x4x2xf32>
    %238 = tpu.matmul %236, %237, %cst_88 {dimension_numbers = #tpu.dot_dimension_numbers<[2], [2], [1], [1], [0, 0, 0, 1, 1, 1], [0], [0]>} : vector<8x4x4xbf16>, vector<8x2x4xbf16>, vector<8x4x2xf32> -> vector<8x4x2xf32>
    %cst_89 = arith.constant 0.000000e+00 : f32
    %239 = vector.broadcast %cst_89 : f32 to vector<8x4x2xf32>
    %240 = arith.maximumf %238, %239 : vector<8x4x2xf32>
    %241 = vector.extract_strided_slice %240 {offsets = [0, 0, 0], sizes = [1, 4, 2], strides = [1, 1, 1]} : vector<8x4x2xf32> to vector<1x4x2xf32>
    %242 = vector.shape_cast %241 : vector<1x4x2xf32> to vector<4x2xf32>
    %243 = vector.extract_strided_slice %240 {offsets = [1, 0, 0], sizes = [1, 4, 2], strides = [1, 1, 1]} : vector<8x4x2xf32> to vector<1x4x2xf32>
    %244 = vector.shape_cast %243 : vector<1x4x2xf32> to vector<4x2xf32>
    %245 = vector.extract_strided_slice %240 {offsets = [2, 0, 0], sizes = [1, 4, 2], strides = [1, 1, 1]} : vector<8x4x2xf32> to vector<1x4x2xf32>
    %246 = vector.shape_cast %245 : vector<1x4x2xf32> to vector<4x2xf32>
    %247 = vector.extract_strided_slice %240 {offsets = [3, 0, 0], sizes = [1, 4, 2], strides = [1, 1, 1]} : vector<8x4x2xf32> to vector<1x4x2xf32>
    %248 = vector.shape_cast %247 : vector<1x4x2xf32> to vector<4x2xf32>
    %249 = vector.extract_strided_slice %240 {offsets = [4, 0, 0], sizes = [1, 4, 2], strides = [1, 1, 1]} : vector<8x4x2xf32> to vector<1x4x2xf32>
    %250 = vector.shape_cast %249 : vector<1x4x2xf32> to vector<4x2xf32>
    %251 = vector.extract_strided_slice %240 {offsets = [5, 0, 0], sizes = [1, 4, 2], strides = [1, 1, 1]} : vector<8x4x2xf32> to vector<1x4x2xf32>
    %252 = vector.shape_cast %251 : vector<1x4x2xf32> to vector<4x2xf32>
    %253 = vector.extract_strided_slice %240 {offsets = [6, 0, 0], sizes = [1, 4, 2], strides = [1, 1, 1]} : vector<8x4x2xf32> to vector<1x4x2xf32>
    %254 = vector.shape_cast %253 : vector<1x4x2xf32> to vector<4x2xf32>
    %255 = vector.extract_strided_slice %240 {offsets = [7, 0, 0], sizes = [1, 4, 2], strides = [1, 1, 1]} : vector<8x4x2xf32> to vector<1x4x2xf32>
    %256 = vector.shape_cast %255 : vector<1x4x2xf32> to vector<4x2xf32>
    %257 = tpu.concatenate %242, %244, %246, %248, %250, %252, %254, %256 in 1 : vector<4x2xf32>, vector<4x2xf32>, vector<4x2xf32>, vector<4x2xf32>, vector<4x2xf32>, vector<4x2xf32>, vector<4x2xf32>, vector<4x2xf32> -> vector<4x16xf32>
    %c1_90 = arith.constant 1 : index
    %c0_91 = arith.constant 0 : index
    %c0_92 = arith.constant 0 : index
    %258 = vector.load %arg13[%c1_90, %c0_91, %c0_92] : memref<3x8x4xbf16, #tpu.memory_space<vmem>>, vector<1x8x4xbf16>
    %259 = vector.shape_cast %258 : vector<1x8x4xbf16> to vector<8x4xbf16>
    %260 = arith.truncf %257 : vector<4x16xf32> to vector<4x16xbf16>
    %cst_93 = arith.constant dense<0.000000e+00> : vector<8x16xf32>
    %261 = tpu.matmul %259, %260, %cst_93 {dimension_numbers = #tpu.dot_dimension_numbers<[1], [0], [0], [1], [0, 0, 1, 1], [], []>} : vector<8x4xbf16>, vector<4x16xbf16>, vector<8x16xf32> -> vector<8x16xf32>
    %c1_94 = arith.constant 1 : index
    %c0_95 = arith.constant 0 : index
    %c0_96 = arith.constant 0 : index
    %262 = vector.load %arg14[%c1_94, %c0_95, %c0_96] : memref<3x8x1xf32, #tpu.memory_space<vmem>>, vector<1x8x1xf32>
    %263 = vector.shape_cast %262 : vector<1x8x1xf32> to vector<8x1xf32>
    %264 = vector.broadcast %263 : vector<8x1xf32> to vector<8x16xf32>
    %265 = arith.addf %261, %264 : vector<8x16xf32>
    %266 = vector.broadcast %0 : vector<1x16xf32> to vector<8x16xf32>
    %267 = arith.mulf %265, %266 : vector<8x16xf32>
    %cst_97 = arith.constant 1.000000e+00 : f32
    %268 = vector.broadcast %cst_97 : f32 to vector<8x16xf32>
    %269 = arith.mulf %268, %267 : vector<8x16xf32>
    %270 = arith.addf %269, %88 : vector<8x16xf32>
    %c1_98 = arith.constant 1 : index
    %c0_99 = arith.constant 0 : index
    %c0_100 = arith.constant 0 : index
    %271 = vector.load %arg15[%c1_98, %c0_99, %c0_100] : memref<3x8x8xbf16, #tpu.memory_space<vmem>>, vector<1x8x8xbf16>
    %272 = vector.shape_cast %271 : vector<1x8x8xbf16> to vector<8x8xbf16>
    %273 = arith.truncf %270 : vector<8x16xf32> to vector<8x16xbf16>
    %cst_101 = arith.constant dense<0.000000e+00> : vector<8x16xf32>
    %274 = tpu.matmul %272, %273, %cst_101 {dimension_numbers = #tpu.dot_dimension_numbers<[1], [0], [0], [1], [0, 0, 1, 1], [], []>} : vector<8x8xbf16>, vector<8x16xbf16>, vector<8x16xf32> -> vector<8x16xf32>
    %c1_102 = arith.constant 1 : index
    %c0_103 = arith.constant 0 : index
    %c0_104 = arith.constant 0 : index
    %275 = vector.load %arg16[%c1_102, %c0_103, %c0_104] : memref<3x8x1xf32, #tpu.memory_space<vmem>>, vector<1x8x1xf32>
    %276 = vector.shape_cast %275 : vector<1x8x1xf32> to vector<8x1xf32>
    %277 = vector.broadcast %276 : vector<8x1xf32> to vector<8x16xf32>
    %278 = arith.addf %274, %277 : vector<8x16xf32>
    %279 = arith.addf %67, %278 : vector<8x16xf32>
    %280 = vector.broadcast %0 : vector<1x16xf32> to vector<8x16xf32>
    %281 = arith.mulf %279, %280 : vector<8x16xf32>
    %c2 = arith.constant 2 : index
    %c0_105 = arith.constant 0 : index
    %c0_106 = arith.constant 0 : index
    %282 = vector.load %arg5[%c2, %c0_105, %c0_106] : memref<3x24x8xbf16, #tpu.memory_space<vmem>>, vector<1x24x8xbf16>
    %283 = vector.shape_cast %282 : vector<1x24x8xbf16> to vector<24x8xbf16>
    %284 = arith.truncf %281 : vector<8x16xf32> to vector<8x16xbf16>
    %cst_107 = arith.constant dense<0.000000e+00> : vector<24x16xf32>
    %285 = tpu.matmul %283, %284, %cst_107 {dimension_numbers = #tpu.dot_dimension_numbers<[1], [0], [0], [1], [0, 0, 1, 1], [], []>} : vector<24x8xbf16>, vector<8x16xbf16>, vector<24x16xf32> -> vector<24x16xf32>
    %286 = vector.extract_strided_slice %285 {offsets = [0, 0], sizes = [8, 16], strides = [1, 1]} : vector<24x16xf32> to vector<8x16xf32>
    %287 = vector.extract_strided_slice %285 {offsets = [8, 0], sizes = [8, 16], strides = [1, 1]} : vector<24x16xf32> to vector<8x16xf32>
    %288 = vector.extract_strided_slice %285 {offsets = [16, 0], sizes = [8, 16], strides = [1, 1]} : vector<24x16xf32> to vector<8x16xf32>
    %cst_108 = arith.constant 0.000000e+00 : f32
    %289 = vector.broadcast %cst_108 : f32 to vector<8x4xf32>
    %290 = vector.extract_strided_slice %286 {offsets = [0, 0], sizes = [8, 12], strides = [1, 1]} : vector<8x16xf32> to vector<8x12xf32>
    %291 = tpu.concatenate %289, %290 in 1 : vector<8x4xf32>, vector<8x12xf32> -> vector<8x16xf32>
    %292 = arith.addf %291, %287 : vector<8x16xf32>
    %cst_109 = arith.constant 0.000000e+00 : f32
    %293 = vector.broadcast %cst_109 : f32 to vector<8x4xf32>
    %294 = vector.extract_strided_slice %288 {offsets = [0, 4], sizes = [8, 12], strides = [1, 1]} : vector<8x16xf32> to vector<8x12xf32>
    %295 = tpu.concatenate %294, %293 in 1 : vector<8x12xf32>, vector<8x4xf32> -> vector<8x16xf32>
    %296 = arith.addf %292, %295 : vector<8x16xf32>
    %c2_110 = arith.constant 2 : index
    %c0_111 = arith.constant 0 : index
    %c0_112 = arith.constant 0 : index
    %297 = vector.load %arg6[%c2_110, %c0_111, %c0_112] : memref<3x8x1xf32, #tpu.memory_space<vmem>>, vector<1x8x1xf32>
    %298 = vector.shape_cast %297 : vector<1x8x1xf32> to vector<8x1xf32>
    %299 = vector.broadcast %298 : vector<8x1xf32> to vector<8x16xf32>
    %300 = arith.addf %296, %299 : vector<8x16xf32>
    %cst_113 = arith.constant 0.000000e+00 : f32
    %301 = vector.broadcast %cst_113 : f32 to vector<8x16xf32>
    %302 = arith.maximumf %300, %301 : vector<8x16xf32>
    %cst_114 = arith.constant dense<0.000000e+00> : vector<8xf32>
    %303 = vector.multi_reduction <add>, %302, %cst_114 [1] : vector<8x16xf32> to vector<8xf32>
    %304 = vector.shape_cast %303 : vector<8xf32> to vector<8x1xf32>
    %cst_115 = arith.constant 1.600000e+01 : f32
    %305 = vector.broadcast %cst_115 : f32 to vector<8x1xf32>
    %306 = arith.divf %304, %305 : vector<8x1xf32>
    %307 = vector.broadcast %306 : vector<8x1xf32> to vector<8x16xf32>
    %308 = arith.subf %302, %307 : vector<8x16xf32>
    %309 = arith.mulf %308, %308 : vector<8x16xf32>
    %cst_116 = arith.constant dense<0.000000e+00> : vector<8xf32>
    %310 = vector.multi_reduction <add>, %309, %cst_116 [1] : vector<8x16xf32> to vector<8xf32>
    %311 = vector.shape_cast %310 : vector<8xf32> to vector<8x1xf32>
    %cst_117 = arith.constant 1.600000e+01 : f32
    %312 = vector.broadcast %cst_117 : f32 to vector<8x1xf32>
    %313 = arith.divf %311, %312 : vector<8x1xf32>
    %314 = vector.broadcast %306 : vector<8x1xf32> to vector<8x16xf32>
    %315 = arith.subf %302, %314 : vector<8x16xf32>
    %cst_118 = arith.constant 9.99999974E-6 : f32
    %316 = vector.broadcast %cst_118 : f32 to vector<8x1xf32>
    %317 = arith.addf %313, %316 : vector<8x1xf32>
    %318 = math.rsqrt %317 : vector<8x1xf32>
    %319 = vector.broadcast %318 : vector<8x1xf32> to vector<8x16xf32>
    %320 = arith.mulf %315, %319 : vector<8x16xf32>
    %c2_119 = arith.constant 2 : index
    %c0_120 = arith.constant 0 : index
    %c0_121 = arith.constant 0 : index
    %321 = vector.load %arg11[%c2_119, %c0_120, %c0_121] : memref<3x4x8xbf16, #tpu.memory_space<vmem>>, vector<1x4x8xbf16>
    %322 = vector.shape_cast %321 : vector<1x4x8xbf16> to vector<4x8xbf16>
    %323 = arith.truncf %10 : vector<8x16xf32> to vector<8x16xbf16>
    %cst_122 = arith.constant dense<0.000000e+00> : vector<4x16xf32>
    %324 = tpu.matmul %322, %323, %cst_122 {dimension_numbers = #tpu.dot_dimension_numbers<[1], [0], [0], [1], [0, 0, 1, 1], [], []>} : vector<4x8xbf16>, vector<8x16xbf16>, vector<4x16xf32> -> vector<4x16xf32>
    %c2_123 = arith.constant 2 : index
    %c0_124 = arith.constant 0 : index
    %c0_125 = arith.constant 0 : index
    %325 = vector.load %arg12[%c2_123, %c0_124, %c0_125] : memref<3x4x1xf32, #tpu.memory_space<vmem>>, vector<1x4x1xf32>
    %326 = vector.shape_cast %325 : vector<1x4x1xf32> to vector<4x1xf32>
    %327 = vector.broadcast %326 : vector<4x1xf32> to vector<4x16xf32>
    %328 = arith.addf %324, %327 : vector<4x16xf32>
    %c2_126 = arith.constant 2 : index
    %c0_127 = arith.constant 0 : index
    %c0_128 = arith.constant 0 : index
    %329 = vector.load %arg7[%c2_126, %c0_127, %c0_128] : memref<3x4x8xbf16, #tpu.memory_space<vmem>>, vector<1x4x8xbf16>
    %330 = vector.shape_cast %329 : vector<1x4x8xbf16> to vector<4x8xbf16>
    %331 = arith.truncf %320 : vector<8x16xf32> to vector<8x16xbf16>
    %cst_129 = arith.constant dense<0.000000e+00> : vector<4x16xf32>
    %332 = tpu.matmul %330, %331, %cst_129 {dimension_numbers = #tpu.dot_dimension_numbers<[1], [0], [0], [1], [0, 0, 1, 1], [], []>} : vector<4x8xbf16>, vector<8x16xbf16>, vector<4x16xf32> -> vector<4x16xf32>
    %c2_130 = arith.constant 2 : index
    %c0_131 = arith.constant 0 : index
    %c0_132 = arith.constant 0 : index
    %333 = vector.load %arg8[%c2_130, %c0_131, %c0_132] : memref<3x4x1xf32, #tpu.memory_space<vmem>>, vector<1x4x1xf32>
    %334 = vector.shape_cast %333 : vector<1x4x1xf32> to vector<4x1xf32>
    %335 = vector.broadcast %334 : vector<4x1xf32> to vector<4x16xf32>
    %336 = arith.addf %332, %335 : vector<4x16xf32>
    %c2_133 = arith.constant 2 : index
    %c0_134 = arith.constant 0 : index
    %c0_135 = arith.constant 0 : index
    %337 = vector.load %arg9[%c2_133, %c0_134, %c0_135] : memref<3x4x8xbf16, #tpu.memory_space<vmem>>, vector<1x4x8xbf16>
    %338 = vector.shape_cast %337 : vector<1x4x8xbf16> to vector<4x8xbf16>
    %339 = arith.truncf %320 : vector<8x16xf32> to vector<8x16xbf16>
    %cst_136 = arith.constant dense<0.000000e+00> : vector<4x16xf32>
    %340 = tpu.matmul %338, %339, %cst_136 {dimension_numbers = #tpu.dot_dimension_numbers<[1], [0], [0], [1], [0, 0, 1, 1], [], []>} : vector<4x8xbf16>, vector<8x16xbf16>, vector<4x16xf32> -> vector<4x16xf32>
    %c2_137 = arith.constant 2 : index
    %c0_138 = arith.constant 0 : index
    %c0_139 = arith.constant 0 : index
    %341 = vector.load %arg10[%c2_137, %c0_138, %c0_139] : memref<3x4x1xf32, #tpu.memory_space<vmem>>, vector<1x4x1xf32>
    %342 = vector.shape_cast %341 : vector<1x4x1xf32> to vector<4x1xf32>
    %343 = vector.broadcast %342 : vector<4x1xf32> to vector<4x16xf32>
    %344 = arith.addf %340, %343 : vector<4x16xf32>
    %cst_140 = arith.constant 0.000000e+00 : f32
    %345 = vector.broadcast %cst_140 : f32 to vector<4x2xf32>
    %346 = tpu.concatenate %345, %344, %345 in 1 : vector<4x2xf32>, vector<4x16xf32>, vector<4x2xf32> -> vector<4x20xf32>
    %cst_141 = arith.constant 0.000000e+00 : f32
    %347 = vector.broadcast %cst_141 : f32 to vector<4x2xf32>
    %348 = tpu.concatenate %347, %328, %347 in 1 : vector<4x2xf32>, vector<4x16xf32>, vector<4x2xf32> -> vector<4x20xf32>
    %cst_142 = arith.constant 0.000000e+00 : f32
    %349 = vector.broadcast %cst_142 : f32 to vector<1x2xf32>
    %350 = tpu.concatenate %349, %0, %349 in 1 : vector<1x2xf32>, vector<1x16xf32>, vector<1x2xf32> -> vector<1x20xf32>
    %351 = vector.extract_strided_slice %336 {offsets = [0, 0], sizes = [4, 4], strides = [1, 1]} : vector<4x16xf32> to vector<4x4xf32>
    %352 = vector.extract_strided_slice %336 {offsets = [0, 4], sizes = [4, 4], strides = [1, 1]} : vector<4x16xf32> to vector<4x4xf32>
    %353 = vector.extract_strided_slice %336 {offsets = [0, 8], sizes = [4, 4], strides = [1, 1]} : vector<4x16xf32> to vector<4x4xf32>
    %354 = vector.extract_strided_slice %336 {offsets = [0, 12], sizes = [4, 4], strides = [1, 1]} : vector<4x16xf32> to vector<4x4xf32>
    %355 = vector.shape_cast %351 : vector<4x4xf32> to vector<1x4x4xf32>
    %356 = vector.shape_cast %352 : vector<4x4xf32> to vector<1x4x4xf32>
    %357 = vector.shape_cast %353 : vector<4x4xf32> to vector<1x4x4xf32>
    %358 = vector.shape_cast %354 : vector<4x4xf32> to vector<1x4x4xf32>
    %359 = tpu.concatenate %355, %356, %357, %358 in 0 : vector<1x4x4xf32>, vector<1x4x4xf32>, vector<1x4x4xf32>, vector<1x4x4xf32> -> vector<4x4x4xf32>
    %360 = vector.extract_strided_slice %346 {offsets = [0, 0], sizes = [4, 8], strides = [1, 1]} : vector<4x20xf32> to vector<4x8xf32>
    %361 = vector.extract_strided_slice %346 {offsets = [0, 4], sizes = [4, 8], strides = [1, 1]} : vector<4x20xf32> to vector<4x8xf32>
    %362 = vector.extract_strided_slice %346 {offsets = [0, 8], sizes = [4, 8], strides = [1, 1]} : vector<4x20xf32> to vector<4x8xf32>
    %363 = vector.extract_strided_slice %346 {offsets = [0, 12], sizes = [4, 8], strides = [1, 1]} : vector<4x20xf32> to vector<4x8xf32>
    %364 = vector.shape_cast %360 : vector<4x8xf32> to vector<1x4x8xf32>
    %365 = vector.shape_cast %361 : vector<4x8xf32> to vector<1x4x8xf32>
    %366 = vector.shape_cast %362 : vector<4x8xf32> to vector<1x4x8xf32>
    %367 = vector.shape_cast %363 : vector<4x8xf32> to vector<1x4x8xf32>
    %368 = tpu.concatenate %364, %365, %366, %367 in 0 : vector<1x4x8xf32>, vector<1x4x8xf32>, vector<1x4x8xf32>, vector<1x4x8xf32> -> vector<4x4x8xf32>
    %369 = vector.extract_strided_slice %348 {offsets = [0, 0], sizes = [4, 8], strides = [1, 1]} : vector<4x20xf32> to vector<4x8xf32>
    %370 = vector.extract_strided_slice %348 {offsets = [0, 4], sizes = [4, 8], strides = [1, 1]} : vector<4x20xf32> to vector<4x8xf32>
    %371 = vector.extract_strided_slice %348 {offsets = [0, 8], sizes = [4, 8], strides = [1, 1]} : vector<4x20xf32> to vector<4x8xf32>
    %372 = vector.extract_strided_slice %348 {offsets = [0, 12], sizes = [4, 8], strides = [1, 1]} : vector<4x20xf32> to vector<4x8xf32>
    %373 = vector.shape_cast %369 : vector<4x8xf32> to vector<1x4x8xf32>
    %374 = vector.shape_cast %370 : vector<4x8xf32> to vector<1x4x8xf32>
    %375 = vector.shape_cast %371 : vector<4x8xf32> to vector<1x4x8xf32>
    %376 = vector.shape_cast %372 : vector<4x8xf32> to vector<1x4x8xf32>
    %377 = tpu.concatenate %373, %374, %375, %376 in 0 : vector<1x4x8xf32>, vector<1x4x8xf32>, vector<1x4x8xf32>, vector<1x4x8xf32> -> vector<4x4x8xf32>
    %378 = vector.extract_strided_slice %350 {offsets = [0, 0], sizes = [1, 8], strides = [1, 1]} : vector<1x20xf32> to vector<1x8xf32>
    %379 = vector.extract_strided_slice %350 {offsets = [0, 4], sizes = [1, 8], strides = [1, 1]} : vector<1x20xf32> to vector<1x8xf32>
    %380 = vector.extract_strided_slice %350 {offsets = [0, 8], sizes = [1, 8], strides = [1, 1]} : vector<1x20xf32> to vector<1x8xf32>
    %381 = vector.extract_strided_slice %350 {offsets = [0, 12], sizes = [1, 8], strides = [1, 1]} : vector<1x20xf32> to vector<1x8xf32>
    %382 = vector.shape_cast %378 : vector<1x8xf32> to vector<1x1x8xf32>
    %383 = vector.shape_cast %379 : vector<1x8xf32> to vector<1x1x8xf32>
    %384 = vector.shape_cast %380 : vector<1x8xf32> to vector<1x1x8xf32>
    %385 = vector.shape_cast %381 : vector<1x8xf32> to vector<1x1x8xf32>
    %386 = tpu.concatenate %382, %383, %384, %385 in 0 : vector<1x1x8xf32>, vector<1x1x8xf32>, vector<1x1x8xf32>, vector<1x1x8xf32> -> vector<4x1x8xf32>
    %387 = tpu.iota {dimensions = array<i32: 2>} : vector<1x1x8xi32>
    %c7_i32 = arith.constant 7 : i32
    %388 = vector.broadcast %c7_i32 : i32 to vector<1x1x8xi32>
    %389 = arith.cmpi slt, %387, %388 : vector<1x1x8xi32>
    %cst_143 = arith.constant 0.000000e+00 : f32
    %390 = vector.shape_cast %389 : vector<1x1x8xi1> to vector<1x1x8xi1>
    %391 = vector.broadcast %390 : vector<1x1x8xi1> to vector<4x1x8xi1>
    %392 = vector.broadcast %cst_143 : f32 to vector<4x1x8xf32>
    %393 = arith.select %391, %386, %392 : vector<4x1x8xi1>, vector<4x1x8xf32>
    %394 = arith.truncf %359 : vector<4x4x4xf32> to vector<4x4x4xbf16>
    %395 = arith.truncf %368 : vector<4x4x8xf32> to vector<4x4x8xbf16>
    %cst_144 = arith.constant dense<0.000000e+00> : vector<4x4x8xf32>
    %396 = tpu.matmul %394, %395, %cst_144 {dimension_numbers = #tpu.dot_dimension_numbers<[1], [1], [2], [2], [0, 0, 0, 2, 1, 2], [0], [0]>} : vector<4x4x4xbf16>, vector<4x4x8xbf16>, vector<4x4x8xf32> -> vector<4x4x8xf32>
    %cst_145 = arith.constant 5.000000e-01 : f32
    %397 = vector.broadcast %cst_145 : f32 to vector<4x4x8xf32>
    %398 = arith.mulf %396, %397 : vector<4x4x8xf32>
    %cst_146 = arith.constant 0.000000e+00 : f32
    %399 = vector.broadcast %cst_146 : f32 to vector<4x1x8xf32>
    %400 = arith.cmpf ogt, %393, %399 : vector<4x1x8xf32>
    %cst_147 = arith.constant 9.99999543E-7 : f32
    %cst_148 = arith.constant -13.8155107 : f32
    %401 = vector.broadcast %cst_147 : f32 to vector<4x1x8xf32>
    %402 = vector.broadcast %cst_148 : f32 to vector<4x1x8xf32>
    %403 = arith.select %400, %401, %402 : vector<4x1x8xi1>, vector<4x1x8xf32>
    %404 = vector.broadcast %403 : vector<4x1x8xf32> to vector<4x4x8xf32>
    %405 = arith.addf %398, %404 : vector<4x4x8xf32>
    %cst_149 = arith.constant dense<0xFF800000> : vector<4x4xf32>
    %406 = vector.multi_reduction <maximumf>, %405, %cst_149 [2] : vector<4x4x8xf32> to vector<4x4xf32>
    %407 = vector.shape_cast %406 : vector<4x4xf32> to vector<4x4x1xf32>
    %408 = vector.broadcast %407 : vector<4x4x1xf32> to vector<4x4x8xf32>
    %409 = arith.subf %405, %408 : vector<4x4x8xf32>
    %410 = math.exp %409 : vector<4x4x8xf32>
    %cst_150 = arith.constant dense<0.000000e+00> : vector<4x4xf32>
    %411 = vector.multi_reduction <add>, %410, %cst_150 [2] : vector<4x4x8xf32> to vector<4x4xf32>
    %412 = vector.shape_cast %411 : vector<4x4xf32> to vector<4x4x1xf32>
    %413 = tpu.reciprocal %412 {approx = true} : vector<4x4x1xf32> -> vector<4x4x1xf32>
    %414 = vector.broadcast %413 : vector<4x4x1xf32> to vector<4x4x8xf32>
    %415 = arith.mulf %410, %414 : vector<4x4x8xf32>
    %416 = vector.broadcast %393 : vector<4x1x8xf32> to vector<4x4x8xf32>
    %417 = arith.mulf %415, %416 : vector<4x4x8xf32>
    %418 = arith.truncf %377 : vector<4x4x8xf32> to vector<4x4x8xbf16>
    %419 = arith.truncf %417 : vector<4x4x8xf32> to vector<4x4x8xbf16>
    %cst_151 = arith.constant dense<0.000000e+00> : vector<4x4x4xf32>
    %420 = tpu.matmul %418, %419, %cst_151 {dimension_numbers = #tpu.dot_dimension_numbers<[2], [2], [1], [1], [0, 0, 0, 1, 1, 1], [0], [0]>} : vector<4x4x8xbf16>, vector<4x4x8xbf16>, vector<4x4x4xf32> -> vector<4x4x4xf32>
    %cst_152 = arith.constant 0.000000e+00 : f32
    %421 = vector.broadcast %cst_152 : f32 to vector<4x4x4xf32>
    %422 = arith.maximumf %420, %421 : vector<4x4x4xf32>
    %423 = vector.extract_strided_slice %422 {offsets = [0, 0, 0], sizes = [1, 4, 4], strides = [1, 1, 1]} : vector<4x4x4xf32> to vector<1x4x4xf32>
    %424 = vector.shape_cast %423 : vector<1x4x4xf32> to vector<4x4xf32>
    %425 = vector.extract_strided_slice %422 {offsets = [1, 0, 0], sizes = [1, 4, 4], strides = [1, 1, 1]} : vector<4x4x4xf32> to vector<1x4x4xf32>
    %426 = vector.shape_cast %425 : vector<1x4x4xf32> to vector<4x4xf32>
    %427 = vector.extract_strided_slice %422 {offsets = [2, 0, 0], sizes = [1, 4, 4], strides = [1, 1, 1]} : vector<4x4x4xf32> to vector<1x4x4xf32>
    %428 = vector.shape_cast %427 : vector<1x4x4xf32> to vector<4x4xf32>
    %429 = vector.extract_strided_slice %422 {offsets = [3, 0, 0], sizes = [1, 4, 4], strides = [1, 1, 1]} : vector<4x4x4xf32> to vector<1x4x4xf32>
    %430 = vector.shape_cast %429 : vector<1x4x4xf32> to vector<4x4xf32>
    %431 = tpu.concatenate %424, %426, %428, %430 in 1 : vector<4x4xf32>, vector<4x4xf32>, vector<4x4xf32>, vector<4x4xf32> -> vector<4x16xf32>
    %c2_153 = arith.constant 2 : index
    %c0_154 = arith.constant 0 : index
    %c0_155 = arith.constant 0 : index
    %432 = vector.load %arg13[%c2_153, %c0_154, %c0_155] : memref<3x8x4xbf16, #tpu.memory_space<vmem>>, vector<1x8x4xbf16>
    %433 = vector.shape_cast %432 : vector<1x8x4xbf16> to vector<8x4xbf16>
    %434 = arith.truncf %431 : vector<4x16xf32> to vector<4x16xbf16>
    %cst_156 = arith.constant dense<0.000000e+00> : vector<8x16xf32>
    %435 = tpu.matmul %433, %434, %cst_156 {dimension_numbers = #tpu.dot_dimension_numbers<[1], [0], [0], [1], [0, 0, 1, 1], [], []>} : vector<8x4xbf16>, vector<4x16xbf16>, vector<8x16xf32> -> vector<8x16xf32>
    %c2_157 = arith.constant 2 : index
    %c0_158 = arith.constant 0 : index
    %c0_159 = arith.constant 0 : index
    %436 = vector.load %arg14[%c2_157, %c0_158, %c0_159] : memref<3x8x1xf32, #tpu.memory_space<vmem>>, vector<1x8x1xf32>
    %437 = vector.shape_cast %436 : vector<1x8x1xf32> to vector<8x1xf32>
    %438 = vector.broadcast %437 : vector<8x1xf32> to vector<8x16xf32>
    %439 = arith.addf %435, %438 : vector<8x16xf32>
    %440 = vector.broadcast %0 : vector<1x16xf32> to vector<8x16xf32>
    %441 = arith.mulf %439, %440 : vector<8x16xf32>
    %cst_160 = arith.constant 1.000000e+00 : f32
    %442 = vector.broadcast %cst_160 : f32 to vector<8x16xf32>
    %443 = arith.mulf %442, %441 : vector<8x16xf32>
    %444 = arith.addf %443, %302 : vector<8x16xf32>
    %c2_161 = arith.constant 2 : index
    %c0_162 = arith.constant 0 : index
    %c0_163 = arith.constant 0 : index
    %445 = vector.load %arg15[%c2_161, %c0_162, %c0_163] : memref<3x8x8xbf16, #tpu.memory_space<vmem>>, vector<1x8x8xbf16>
    %446 = vector.shape_cast %445 : vector<1x8x8xbf16> to vector<8x8xbf16>
    %447 = arith.truncf %444 : vector<8x16xf32> to vector<8x16xbf16>
    %cst_164 = arith.constant dense<0.000000e+00> : vector<8x16xf32>
    %448 = tpu.matmul %446, %447, %cst_164 {dimension_numbers = #tpu.dot_dimension_numbers<[1], [0], [0], [1], [0, 0, 1, 1], [], []>} : vector<8x8xbf16>, vector<8x16xbf16>, vector<8x16xf32> -> vector<8x16xf32>
    %c2_165 = arith.constant 2 : index
    %c0_166 = arith.constant 0 : index
    %c0_167 = arith.constant 0 : index
    %449 = vector.load %arg16[%c2_165, %c0_166, %c0_167] : memref<3x8x1xf32, #tpu.memory_space<vmem>>, vector<1x8x1xf32>
    %450 = vector.shape_cast %449 : vector<1x8x1xf32> to vector<8x1xf32>
    %451 = vector.broadcast %450 : vector<8x1xf32> to vector<8x16xf32>
    %452 = arith.addf %448, %451 : vector<8x16xf32>
    %453 = arith.addf %281, %452 : vector<8x16xf32>
    %454 = vector.broadcast %0 : vector<1x16xf32> to vector<8x16xf32>
    %455 = arith.mulf %453, %454 : vector<8x16xf32>
    %c0_168 = arith.constant 0 : index
    %c0_169 = arith.constant 0 : index
    %456 = vector.load %arg17[%c0_168, %c0_169] : memref<6x8xbf16, #tpu.memory_space<vmem>>, vector<6x8xbf16>
    %457 = arith.truncf %455 : vector<8x16xf32> to vector<8x16xbf16>
    %cst_170 = arith.constant dense<0.000000e+00> : vector<6x16xf32>
    %458 = tpu.matmul %456, %457, %cst_170 {dimension_numbers = #tpu.dot_dimension_numbers<[1], [0], [0], [1], [0, 0, 1, 1], [], []>} : vector<6x8xbf16>, vector<8x16xbf16>, vector<6x16xf32> -> vector<6x16xf32>
    %c0_171 = arith.constant 0 : index
    %c0_172 = arith.constant 0 : index
    %459 = vector.load %arg18[%c0_171, %c0_172] : memref<6x1xf32, #tpu.memory_space<vmem>>, vector<6x1xf32>
    %460 = vector.broadcast %459 : vector<6x1xf32> to vector<6x16xf32>
    %461 = arith.addf %458, %460 : vector<6x16xf32>
    %462 = vector.broadcast %0 : vector<1x16xf32> to vector<6x16xf32>
    %463 = arith.mulf %461, %462 : vector<6x16xf32>
    %c0_173 = arith.constant 0 : index
    %c0_174 = arith.constant 0 : index
    %464 = vector.load %arg19[%c0_173, %c0_174] : memref<6x16xf32, #tpu.memory_space<vmem>>, vector<6x16xf32>
    tpu.vector_store %arg19[%c0_173, %c0_174], %463 {strides = array<i32>} : memref<6x16xf32, #tpu.memory_space<vmem>>, vector<6x16xf32>,
    %c0_175 = arith.constant 0 : index
    %c0_176 = arith.constant 0 : index
    %465 = vector.load %arg20[%c0_175, %c0_176] : memref<8x16xf32, #tpu.memory_space<vmem>>, vector<8x16xf32>
    tpu.vector_store %arg20[%c0_175, %c0_176], %455 {strides = array<i32>} : memref<8x16xf32, #tpu.memory_space<vmem>>, vector<8x16xf32>,
    %cst_177 = arith.constant dense<0xFF800000> : vector<16xf32>
    %466 = vector.multi_reduction <maximumf>, %463, %cst_177 [0] : vector<6x16xf32> to vector<16xf32>
    %467 = vector.shape_cast %466 : vector<16xf32> to vector<1x16xf32>
    %468 = vector.broadcast %467 : vector<1x16xf32> to vector<6x16xf32>
    %469 = arith.subf %463, %468 : vector<6x16xf32>
    %470 = math.exp %469 : vector<6x16xf32>
    %cst_178 = arith.constant dense<0.000000e+00> : vector<16xf32>
    %471 = vector.multi_reduction <add>, %470, %cst_178 [0] : vector<6x16xf32> to vector<16xf32>
    %472 = vector.shape_cast %471 : vector<16xf32> to vector<1x16xf32>
    %473 = tpu.reciprocal %472 {approx = true} : vector<1x16xf32> -> vector<1x16xf32>
    %474 = vector.broadcast %473 : vector<1x16xf32> to vector<6x16xf32>
    %475 = arith.mulf %470, %474 : vector<6x16xf32>
    %476 = vector.broadcast %0 : vector<1x16xf32> to vector<6x16xf32>
    %477 = arith.mulf %475, %476 : vector<6x16xf32>
    %c0_179 = arith.constant 0 : index
    %c0_180 = arith.constant 0 : index
    %478 = vector.load %arg21[%c0_179, %c0_180] : memref<6x16xf32, #tpu.memory_space<vmem>>, vector<6x16xf32>
    tpu.vector_store %arg21[%c0_179, %c0_180], %477 {strides = array<i32>} : memref<6x16xf32, #tpu.memory_space<vmem>>, vector<6x16xf32>,
    return
  }
}

module attributes {stable_mosaic.version = 11 : i64} {
  func.func @_stage_kernel(%arg0: memref<16x16xf32, #tpu.memory_space<vmem>>, %arg1: memref<1x16xf32, #tpu.memory_space<vmem>>, %arg2: memref<8x16xbf16, #tpu.memory_space<vmem>>, %arg3: memref<8x1xf32, #tpu.memory_space<vmem>>, %arg4: memref<3x24x8xbf16, #tpu.memory_space<vmem>>, %arg5: memref<3x8x1xf32, #tpu.memory_space<vmem>>, %arg6: memref<3x4x8xbf16, #tpu.memory_space<vmem>>, %arg7: memref<3x4x1xf32, #tpu.memory_space<vmem>>, %arg8: memref<3x4x8xbf16, #tpu.memory_space<vmem>>, %arg9: memref<3x4x1xf32, #tpu.memory_space<vmem>>, %arg10: memref<3x4x8xbf16, #tpu.memory_space<vmem>>, %arg11: memref<3x4x1xf32, #tpu.memory_space<vmem>>, %arg12: memref<3x8x4xbf16, #tpu.memory_space<vmem>>, %arg13: memref<3x8x1xf32, #tpu.memory_space<vmem>>, %arg14: memref<3x8x8xbf16, #tpu.memory_space<vmem>>, %arg15: memref<3x8x1xf32, #tpu.memory_space<vmem>>, %arg16: memref<6x8xbf16, #tpu.memory_space<vmem>>, %arg17: memref<6x1xf32, #tpu.memory_space<vmem>>, %arg18: memref<6x16xf32, #tpu.memory_space<vmem>>, %arg19: memref<8x16xf32, #tpu.memory_space<vmem>>, %arg20: memref<6x16xf32, #tpu.memory_space<vmem>>) attributes {dimension_semantics = [], scalar_prefetch = 0 : i64, scratch_operands = 0 : i64, tpu.core_type = #tpu.core_type<tc>} {
    %c0 = arith.constant 0 : index
    %c0_0 = arith.constant 0 : index
    %0 = vector.load %arg1[%c0, %c0_0] : memref<1x16xf32, #tpu.memory_space<vmem>>, vector<1x16xf32>
    %c0_1 = arith.constant 0 : index
    %c0_2 = arith.constant 0 : index
    %1 = vector.load %arg2[%c0_1, %c0_2] : memref<8x16xbf16, #tpu.memory_space<vmem>>, vector<8x16xbf16>
    %c0_3 = arith.constant 0 : index
    %c0_4 = arith.constant 0 : index
    %2 = vector.load %arg0[%c0_3, %c0_4] : memref<16x16xf32, #tpu.memory_space<vmem>>, vector<16x16xf32>
    %3 = arith.truncf %2 : vector<16x16xf32> to vector<16x16xbf16>
    %cst = arith.constant dense<0.000000e+00> : vector<8x16xf32>
    %4 = tpu.matmul %1, %3, %cst {dimension_numbers = #tpu.dot_dimension_numbers<[1], [0], [0], [1], [0, 0, 1, 1], [], []>} : vector<8x16xbf16>, vector<16x16xbf16>, vector<8x16xf32> -> vector<8x16xf32>
    %c0_5 = arith.constant 0 : index
    %c0_6 = arith.constant 0 : index
    %5 = vector.load %arg3[%c0_5, %c0_6] : memref<8x1xf32, #tpu.memory_space<vmem>>, vector<8x1xf32>
    %6 = vector.broadcast %5 : vector<8x1xf32> to vector<8x16xf32>
    %7 = arith.addf %4, %6 : vector<8x16xf32>
    %c0_7 = arith.constant 0 : index
    %c0_8 = arith.constant 0 : index
    %c0_9 = arith.constant 0 : index
    %8 = vector.load %arg4[%c0_7, %c0_8, %c0_9] : memref<3x24x8xbf16, #tpu.memory_space<vmem>>, vector<1x24x8xbf16>
    %9 = vector.shape_cast %8 : vector<1x24x8xbf16> to vector<24x8xbf16>
    %10 = arith.truncf %7 : vector<8x16xf32> to vector<8x16xbf16>
    %cst_10 = arith.constant dense<0.000000e+00> : vector<24x16xf32>
    %11 = tpu.matmul %9, %10, %cst_10 {dimension_numbers = #tpu.dot_dimension_numbers<[1], [0], [0], [1], [0, 0, 1, 1], [], []>} : vector<24x8xbf16>, vector<8x16xbf16>, vector<24x16xf32> -> vector<24x16xf32>
    %12 = vector.extract_strided_slice %11 {offsets = [0, 0], sizes = [8, 16], strides = [1, 1]} : vector<24x16xf32> to vector<8x16xf32>
    %13 = vector.extract_strided_slice %11 {offsets = [8, 0], sizes = [8, 16], strides = [1, 1]} : vector<24x16xf32> to vector<8x16xf32>
    %14 = vector.extract_strided_slice %11 {offsets = [16, 0], sizes = [8, 16], strides = [1, 1]} : vector<24x16xf32> to vector<8x16xf32>
    %cst_11 = arith.constant 0.000000e+00 : f32
    %15 = vector.broadcast %cst_11 : f32 to vector<8x1xf32>
    %16 = vector.extract_strided_slice %12 {offsets = [0, 0], sizes = [8, 15], strides = [1, 1]} : vector<8x16xf32> to vector<8x15xf32>
    %17 = tpu.concatenate %15, %16 in 1 : vector<8x1xf32>, vector<8x15xf32> -> vector<8x16xf32>
    %18 = arith.addf %17, %13 : vector<8x16xf32>
    %cst_12 = arith.constant 0.000000e+00 : f32
    %19 = vector.broadcast %cst_12 : f32 to vector<8x1xf32>
    %20 = vector.extract_strided_slice %14 {offsets = [0, 1], sizes = [8, 15], strides = [1, 1]} : vector<8x16xf32> to vector<8x15xf32>
    %21 = tpu.concatenate %20, %19 in 1 : vector<8x15xf32>, vector<8x1xf32> -> vector<8x16xf32>
    %22 = arith.addf %18, %21 : vector<8x16xf32>
    %c0_13 = arith.constant 0 : index
    %c0_14 = arith.constant 0 : index
    %c0_15 = arith.constant 0 : index
    %23 = vector.load %arg5[%c0_13, %c0_14, %c0_15] : memref<3x8x1xf32, #tpu.memory_space<vmem>>, vector<1x8x1xf32>
    %24 = vector.shape_cast %23 : vector<1x8x1xf32> to vector<8x1xf32>
    %25 = vector.broadcast %24 : vector<8x1xf32> to vector<8x16xf32>
    %26 = arith.addf %22, %25 : vector<8x16xf32>
    %cst_16 = arith.constant 0.000000e+00 : f32
    %27 = vector.broadcast %cst_16 : f32 to vector<8x16xf32>
    %28 = arith.maximumf %26, %27 : vector<8x16xf32>
    %cst_17 = arith.constant dense<0.000000e+00> : vector<8xf32>
    %29 = vector.multi_reduction <add>, %28, %cst_17 [1] : vector<8x16xf32> to vector<8xf32>
    %30 = vector.shape_cast %29 : vector<8xf32> to vector<8x1xf32>
    %cst_18 = arith.constant 1.600000e+01 : f32
    %31 = vector.broadcast %cst_18 : f32 to vector<8x1xf32>
    %32 = arith.divf %30, %31 : vector<8x1xf32>
    %33 = vector.broadcast %32 : vector<8x1xf32> to vector<8x16xf32>
    %34 = arith.subf %28, %33 : vector<8x16xf32>
    %35 = arith.mulf %34, %34 : vector<8x16xf32>
    %cst_19 = arith.constant dense<0.000000e+00> : vector<8xf32>
    %36 = vector.multi_reduction <add>, %35, %cst_19 [1] : vector<8x16xf32> to vector<8xf32>
    %37 = vector.shape_cast %36 : vector<8xf32> to vector<8x1xf32>
    %cst_20 = arith.constant 1.600000e+01 : f32
    %38 = vector.broadcast %cst_20 : f32 to vector<8x1xf32>
    %39 = arith.divf %37, %38 : vector<8x1xf32>
    %40 = vector.broadcast %32 : vector<8x1xf32> to vector<8x16xf32>
    %41 = arith.subf %28, %40 : vector<8x16xf32>
    %cst_21 = arith.constant 9.99999974E-6 : f32
    %42 = vector.broadcast %cst_21 : f32 to vector<8x1xf32>
    %43 = arith.addf %39, %42 : vector<8x1xf32>
    %44 = math.rsqrt %43 : vector<8x1xf32>
    %45 = vector.broadcast %44 : vector<8x1xf32> to vector<8x16xf32>
    %46 = arith.mulf %41, %45 : vector<8x16xf32>
    %c0_22 = arith.constant 0 : index
    %c0_23 = arith.constant 0 : index
    %c0_24 = arith.constant 0 : index
    %47 = vector.load %arg10[%c0_22, %c0_23, %c0_24] : memref<3x4x8xbf16, #tpu.memory_space<vmem>>, vector<1x4x8xbf16>
    %48 = vector.shape_cast %47 : vector<1x4x8xbf16> to vector<4x8xbf16>
    %49 = arith.truncf %46 : vector<8x16xf32> to vector<8x16xbf16>
    %cst_25 = arith.constant dense<0.000000e+00> : vector<4x16xf32>
    %50 = tpu.matmul %48, %49, %cst_25 {dimension_numbers = #tpu.dot_dimension_numbers<[1], [0], [0], [1], [0, 0, 1, 1], [], []>} : vector<4x8xbf16>, vector<8x16xbf16>, vector<4x16xf32> -> vector<4x16xf32>
    %c0_26 = arith.constant 0 : index
    %c0_27 = arith.constant 0 : index
    %c0_28 = arith.constant 0 : index
    %51 = vector.load %arg11[%c0_26, %c0_27, %c0_28] : memref<3x4x1xf32, #tpu.memory_space<vmem>>, vector<1x4x1xf32>
    %52 = vector.shape_cast %51 : vector<1x4x1xf32> to vector<4x1xf32>
    %53 = vector.broadcast %52 : vector<4x1xf32> to vector<4x16xf32>
    %54 = arith.addf %50, %53 : vector<4x16xf32>
    %55 = vector.broadcast %0 : vector<1x16xf32> to vector<4x16xf32>
    %56 = arith.mulf %54, %55 : vector<4x16xf32>
    %cst_29 = arith.constant 0.000000e+00 : f32
    %57 = vector.broadcast %cst_29 : f32 to vector<4x16xf32>
    %58 = arith.maximumf %56, %57 : vector<4x16xf32>
    %c0_30 = arith.constant 0 : index
    %c0_31 = arith.constant 0 : index
    %c0_32 = arith.constant 0 : index
    %59 = vector.load %arg12[%c0_30, %c0_31, %c0_32] : memref<3x8x4xbf16, #tpu.memory_space<vmem>>, vector<1x8x4xbf16>
    %60 = vector.shape_cast %59 : vector<1x8x4xbf16> to vector<8x4xbf16>
    %61 = arith.truncf %58 : vector<4x16xf32> to vector<4x16xbf16>
    %cst_33 = arith.constant dense<0.000000e+00> : vector<8x16xf32>
    %62 = tpu.matmul %60, %61, %cst_33 {dimension_numbers = #tpu.dot_dimension_numbers<[1], [0], [0], [1], [0, 0, 1, 1], [], []>} : vector<8x4xbf16>, vector<4x16xbf16>, vector<8x16xf32> -> vector<8x16xf32>
    %c0_34 = arith.constant 0 : index
    %c0_35 = arith.constant 0 : index
    %c0_36 = arith.constant 0 : index
    %63 = vector.load %arg13[%c0_34, %c0_35, %c0_36] : memref<3x8x1xf32, #tpu.memory_space<vmem>>, vector<1x8x1xf32>
    %64 = vector.shape_cast %63 : vector<1x8x1xf32> to vector<8x1xf32>
    %65 = vector.broadcast %64 : vector<8x1xf32> to vector<8x16xf32>
    %66 = arith.addf %62, %65 : vector<8x16xf32>
    %67 = vector.broadcast %0 : vector<1x16xf32> to vector<8x16xf32>
    %68 = arith.mulf %66, %67 : vector<8x16xf32>
    %cst_37 = arith.constant 1.000000e+00 : f32
    %69 = vector.broadcast %cst_37 : f32 to vector<8x16xf32>
    %70 = arith.mulf %69, %68 : vector<8x16xf32>
    %71 = arith.addf %70, %28 : vector<8x16xf32>
    %c0_38 = arith.constant 0 : index
    %c0_39 = arith.constant 0 : index
    %c0_40 = arith.constant 0 : index
    %72 = vector.load %arg14[%c0_38, %c0_39, %c0_40] : memref<3x8x8xbf16, #tpu.memory_space<vmem>>, vector<1x8x8xbf16>
    %73 = vector.shape_cast %72 : vector<1x8x8xbf16> to vector<8x8xbf16>
    %74 = arith.truncf %71 : vector<8x16xf32> to vector<8x16xbf16>
    %cst_41 = arith.constant dense<0.000000e+00> : vector<8x16xf32>
    %75 = tpu.matmul %73, %74, %cst_41 {dimension_numbers = #tpu.dot_dimension_numbers<[1], [0], [0], [1], [0, 0, 1, 1], [], []>} : vector<8x8xbf16>, vector<8x16xbf16>, vector<8x16xf32> -> vector<8x16xf32>
    %c0_42 = arith.constant 0 : index
    %c0_43 = arith.constant 0 : index
    %c0_44 = arith.constant 0 : index
    %76 = vector.load %arg15[%c0_42, %c0_43, %c0_44] : memref<3x8x1xf32, #tpu.memory_space<vmem>>, vector<1x8x1xf32>
    %77 = vector.shape_cast %76 : vector<1x8x1xf32> to vector<8x1xf32>
    %78 = vector.broadcast %77 : vector<8x1xf32> to vector<8x16xf32>
    %79 = arith.addf %75, %78 : vector<8x16xf32>
    %80 = arith.addf %7, %79 : vector<8x16xf32>
    %81 = vector.broadcast %0 : vector<1x16xf32> to vector<8x16xf32>
    %82 = arith.mulf %80, %81 : vector<8x16xf32>
    %c1 = arith.constant 1 : index
    %c0_45 = arith.constant 0 : index
    %c0_46 = arith.constant 0 : index
    %83 = vector.load %arg4[%c1, %c0_45, %c0_46] : memref<3x24x8xbf16, #tpu.memory_space<vmem>>, vector<1x24x8xbf16>
    %84 = vector.shape_cast %83 : vector<1x24x8xbf16> to vector<24x8xbf16>
    %85 = arith.truncf %82 : vector<8x16xf32> to vector<8x16xbf16>
    %cst_47 = arith.constant dense<0.000000e+00> : vector<24x16xf32>
    %86 = tpu.matmul %84, %85, %cst_47 {dimension_numbers = #tpu.dot_dimension_numbers<[1], [0], [0], [1], [0, 0, 1, 1], [], []>} : vector<24x8xbf16>, vector<8x16xbf16>, vector<24x16xf32> -> vector<24x16xf32>
    %87 = vector.extract_strided_slice %86 {offsets = [0, 0], sizes = [8, 16], strides = [1, 1]} : vector<24x16xf32> to vector<8x16xf32>
    %88 = vector.extract_strided_slice %86 {offsets = [8, 0], sizes = [8, 16], strides = [1, 1]} : vector<24x16xf32> to vector<8x16xf32>
    %89 = vector.extract_strided_slice %86 {offsets = [16, 0], sizes = [8, 16], strides = [1, 1]} : vector<24x16xf32> to vector<8x16xf32>
    %cst_48 = arith.constant 0.000000e+00 : f32
    %90 = vector.broadcast %cst_48 : f32 to vector<8x2xf32>
    %91 = vector.extract_strided_slice %87 {offsets = [0, 0], sizes = [8, 14], strides = [1, 1]} : vector<8x16xf32> to vector<8x14xf32>
    %92 = tpu.concatenate %90, %91 in 1 : vector<8x2xf32>, vector<8x14xf32> -> vector<8x16xf32>
    %93 = arith.addf %92, %88 : vector<8x16xf32>
    %cst_49 = arith.constant 0.000000e+00 : f32
    %94 = vector.broadcast %cst_49 : f32 to vector<8x2xf32>
    %95 = vector.extract_strided_slice %89 {offsets = [0, 2], sizes = [8, 14], strides = [1, 1]} : vector<8x16xf32> to vector<8x14xf32>
    %96 = tpu.concatenate %95, %94 in 1 : vector<8x14xf32>, vector<8x2xf32> -> vector<8x16xf32>
    %97 = arith.addf %93, %96 : vector<8x16xf32>
    %c1_50 = arith.constant 1 : index
    %c0_51 = arith.constant 0 : index
    %c0_52 = arith.constant 0 : index
    %98 = vector.load %arg5[%c1_50, %c0_51, %c0_52] : memref<3x8x1xf32, #tpu.memory_space<vmem>>, vector<1x8x1xf32>
    %99 = vector.shape_cast %98 : vector<1x8x1xf32> to vector<8x1xf32>
    %100 = vector.broadcast %99 : vector<8x1xf32> to vector<8x16xf32>
    %101 = arith.addf %97, %100 : vector<8x16xf32>
    %cst_53 = arith.constant 0.000000e+00 : f32
    %102 = vector.broadcast %cst_53 : f32 to vector<8x16xf32>
    %103 = arith.maximumf %101, %102 : vector<8x16xf32>
    %cst_54 = arith.constant dense<0.000000e+00> : vector<8xf32>
    %104 = vector.multi_reduction <add>, %103, %cst_54 [1] : vector<8x16xf32> to vector<8xf32>
    %105 = vector.shape_cast %104 : vector<8xf32> to vector<8x1xf32>
    %cst_55 = arith.constant 1.600000e+01 : f32
    %106 = vector.broadcast %cst_55 : f32 to vector<8x1xf32>
    %107 = arith.divf %105, %106 : vector<8x1xf32>
    %108 = vector.broadcast %107 : vector<8x1xf32> to vector<8x16xf32>
    %109 = arith.subf %103, %108 : vector<8x16xf32>
    %110 = arith.mulf %109, %109 : vector<8x16xf32>
    %cst_56 = arith.constant dense<0.000000e+00> : vector<8xf32>
    %111 = vector.multi_reduction <add>, %110, %cst_56 [1] : vector<8x16xf32> to vector<8xf32>
    %112 = vector.shape_cast %111 : vector<8xf32> to vector<8x1xf32>
    %cst_57 = arith.constant 1.600000e+01 : f32
    %113 = vector.broadcast %cst_57 : f32 to vector<8x1xf32>
    %114 = arith.divf %112, %113 : vector<8x1xf32>
    %115 = vector.broadcast %107 : vector<8x1xf32> to vector<8x16xf32>
    %116 = arith.subf %103, %115 : vector<8x16xf32>
    %cst_58 = arith.constant 9.99999974E-6 : f32
    %117 = vector.broadcast %cst_58 : f32 to vector<8x1xf32>
    %118 = arith.addf %114, %117 : vector<8x1xf32>
    %119 = math.rsqrt %118 : vector<8x1xf32>
    %120 = vector.broadcast %119 : vector<8x1xf32> to vector<8x16xf32>
    %121 = arith.mulf %116, %120 : vector<8x16xf32>
    %c1_59 = arith.constant 1 : index
    %c0_60 = arith.constant 0 : index
    %c0_61 = arith.constant 0 : index
    %122 = vector.load %arg10[%c1_59, %c0_60, %c0_61] : memref<3x4x8xbf16, #tpu.memory_space<vmem>>, vector<1x4x8xbf16>
    %123 = vector.shape_cast %122 : vector<1x4x8xbf16> to vector<4x8xbf16>
    %124 = arith.truncf %121 : vector<8x16xf32> to vector<8x16xbf16>
    %cst_62 = arith.constant dense<0.000000e+00> : vector<4x16xf32>
    %125 = tpu.matmul %123, %124, %cst_62 {dimension_numbers = #tpu.dot_dimension_numbers<[1], [0], [0], [1], [0, 0, 1, 1], [], []>} : vector<4x8xbf16>, vector<8x16xbf16>, vector<4x16xf32> -> vector<4x16xf32>
    %c1_63 = arith.constant 1 : index
    %c0_64 = arith.constant 0 : index
    %c0_65 = arith.constant 0 : index
    %126 = vector.load %arg11[%c1_63, %c0_64, %c0_65] : memref<3x4x1xf32, #tpu.memory_space<vmem>>, vector<1x4x1xf32>
    %127 = vector.shape_cast %126 : vector<1x4x1xf32> to vector<4x1xf32>
    %128 = vector.broadcast %127 : vector<4x1xf32> to vector<4x16xf32>
    %129 = arith.addf %125, %128 : vector<4x16xf32>
    %c1_66 = arith.constant 1 : index
    %c0_67 = arith.constant 0 : index
    %c0_68 = arith.constant 0 : index
    %130 = vector.load %arg6[%c1_66, %c0_67, %c0_68] : memref<3x4x8xbf16, #tpu.memory_space<vmem>>, vector<1x4x8xbf16>
    %131 = vector.shape_cast %130 : vector<1x4x8xbf16> to vector<4x8xbf16>
    %132 = arith.truncf %121 : vector<8x16xf32> to vector<8x16xbf16>
    %cst_69 = arith.constant dense<0.000000e+00> : vector<4x16xf32>
    %133 = tpu.matmul %131, %132, %cst_69 {dimension_numbers = #tpu.dot_dimension_numbers<[1], [0], [0], [1], [0, 0, 1, 1], [], []>} : vector<4x8xbf16>, vector<8x16xbf16>, vector<4x16xf32> -> vector<4x16xf32>
    %c1_70 = arith.constant 1 : index
    %c0_71 = arith.constant 0 : index
    %c0_72 = arith.constant 0 : index
    %134 = vector.load %arg7[%c1_70, %c0_71, %c0_72] : memref<3x4x1xf32, #tpu.memory_space<vmem>>, vector<1x4x1xf32>
    %135 = vector.shape_cast %134 : vector<1x4x1xf32> to vector<4x1xf32>
    %136 = vector.broadcast %135 : vector<4x1xf32> to vector<4x16xf32>
    %137 = arith.addf %133, %136 : vector<4x16xf32>
    %c1_73 = arith.constant 1 : index
    %c0_74 = arith.constant 0 : index
    %c0_75 = arith.constant 0 : index
    %138 = vector.load %arg8[%c1_73, %c0_74, %c0_75] : memref<3x4x8xbf16, #tpu.memory_space<vmem>>, vector<1x4x8xbf16>
    %139 = vector.shape_cast %138 : vector<1x4x8xbf16> to vector<4x8xbf16>
    %140 = arith.truncf %121 : vector<8x16xf32> to vector<8x16xbf16>
    %cst_76 = arith.constant dense<0.000000e+00> : vector<4x16xf32>
    %141 = tpu.matmul %139, %140, %cst_76 {dimension_numbers = #tpu.dot_dimension_numbers<[1], [0], [0], [1], [0, 0, 1, 1], [], []>} : vector<4x8xbf16>, vector<8x16xbf16>, vector<4x16xf32> -> vector<4x16xf32>
    %c1_77 = arith.constant 1 : index
    %c0_78 = arith.constant 0 : index
    %c0_79 = arith.constant 0 : index
    %142 = vector.load %arg9[%c1_77, %c0_78, %c0_79] : memref<3x4x1xf32, #tpu.memory_space<vmem>>, vector<1x4x1xf32>
    %143 = vector.shape_cast %142 : vector<1x4x1xf32> to vector<4x1xf32>
    %144 = vector.broadcast %143 : vector<4x1xf32> to vector<4x16xf32>
    %145 = arith.addf %141, %144 : vector<4x16xf32>
    %cst_80 = arith.constant 0.000000e+00 : f32
    %146 = vector.broadcast %cst_80 : f32 to vector<4x1xf32>
    %147 = tpu.concatenate %146, %145, %146 in 1 : vector<4x1xf32>, vector<4x16xf32>, vector<4x1xf32> -> vector<4x18xf32>
    %cst_81 = arith.constant 0.000000e+00 : f32
    %148 = vector.broadcast %cst_81 : f32 to vector<4x1xf32>
    %149 = tpu.concatenate %148, %129, %148 in 1 : vector<4x1xf32>, vector<4x16xf32>, vector<4x1xf32> -> vector<4x18xf32>
    %cst_82 = arith.constant 0.000000e+00 : f32
    %150 = vector.broadcast %cst_82 : f32 to vector<1x1xf32>
    %151 = tpu.concatenate %150, %0, %150 in 1 : vector<1x1xf32>, vector<1x16xf32>, vector<1x1xf32> -> vector<1x18xf32>
    %152 = vector.extract_strided_slice %137 {offsets = [0, 0], sizes = [4, 2], strides = [1, 1]} : vector<4x16xf32> to vector<4x2xf32>
    %153 = vector.extract_strided_slice %137 {offsets = [0, 2], sizes = [4, 2], strides = [1, 1]} : vector<4x16xf32> to vector<4x2xf32>
    %154 = vector.extract_strided_slice %137 {offsets = [0, 4], sizes = [4, 2], strides = [1, 1]} : vector<4x16xf32> to vector<4x2xf32>
    %155 = vector.extract_strided_slice %137 {offsets = [0, 6], sizes = [4, 2], strides = [1, 1]} : vector<4x16xf32> to vector<4x2xf32>
    %156 = vector.extract_strided_slice %137 {offsets = [0, 8], sizes = [4, 2], strides = [1, 1]} : vector<4x16xf32> to vector<4x2xf32>
    %157 = vector.extract_strided_slice %137 {offsets = [0, 10], sizes = [4, 2], strides = [1, 1]} : vector<4x16xf32> to vector<4x2xf32>
    %158 = vector.extract_strided_slice %137 {offsets = [0, 12], sizes = [4, 2], strides = [1, 1]} : vector<4x16xf32> to vector<4x2xf32>
    %159 = vector.extract_strided_slice %137 {offsets = [0, 14], sizes = [4, 2], strides = [1, 1]} : vector<4x16xf32> to vector<4x2xf32>
    %160 = vector.shape_cast %152 : vector<4x2xf32> to vector<1x4x2xf32>
    %161 = vector.shape_cast %153 : vector<4x2xf32> to vector<1x4x2xf32>
    %162 = vector.shape_cast %154 : vector<4x2xf32> to vector<1x4x2xf32>
    %163 = vector.shape_cast %155 : vector<4x2xf32> to vector<1x4x2xf32>
    %164 = vector.shape_cast %156 : vector<4x2xf32> to vector<1x4x2xf32>
    %165 = vector.shape_cast %157 : vector<4x2xf32> to vector<1x4x2xf32>
    %166 = vector.shape_cast %158 : vector<4x2xf32> to vector<1x4x2xf32>
    %167 = vector.shape_cast %159 : vector<4x2xf32> to vector<1x4x2xf32>
    %168 = tpu.concatenate %160, %161, %162, %163, %164, %165, %166, %167 in 0 : vector<1x4x2xf32>, vector<1x4x2xf32>, vector<1x4x2xf32>, vector<1x4x2xf32>, vector<1x4x2xf32>, vector<1x4x2xf32>, vector<1x4x2xf32>, vector<1x4x2xf32> -> vector<8x4x2xf32>
    %169 = vector.extract_strided_slice %147 {offsets = [0, 0], sizes = [4, 4], strides = [1, 1]} : vector<4x18xf32> to vector<4x4xf32>
    %170 = vector.extract_strided_slice %147 {offsets = [0, 2], sizes = [4, 4], strides = [1, 1]} : vector<4x18xf32> to vector<4x4xf32>
    %171 = vector.extract_strided_slice %147 {offsets = [0, 4], sizes = [4, 4], strides = [1, 1]} : vector<4x18xf32> to vector<4x4xf32>
    %172 = vector.extract_strided_slice %147 {offsets = [0, 6], sizes = [4, 4], strides = [1, 1]} : vector<4x18xf32> to vector<4x4xf32>
    %173 = vector.extract_strided_slice %147 {offsets = [0, 8], sizes = [4, 4], strides = [1, 1]} : vector<4x18xf32> to vector<4x4xf32>
    %174 = vector.extract_strided_slice %147 {offsets = [0, 10], sizes = [4, 4], strides = [1, 1]} : vector<4x18xf32> to vector<4x4xf32>
    %175 = vector.extract_strided_slice %147 {offsets = [0, 12], sizes = [4, 4], strides = [1, 1]} : vector<4x18xf32> to vector<4x4xf32>
    %176 = vector.extract_strided_slice %147 {offsets = [0, 14], sizes = [4, 4], strides = [1, 1]} : vector<4x18xf32> to vector<4x4xf32>
    %177 = vector.shape_cast %169 : vector<4x4xf32> to vector<1x4x4xf32>
    %178 = vector.shape_cast %170 : vector<4x4xf32> to vector<1x4x4xf32>
    %179 = vector.shape_cast %171 : vector<4x4xf32> to vector<1x4x4xf32>
    %180 = vector.shape_cast %172 : vector<4x4xf32> to vector<1x4x4xf32>
    %181 = vector.shape_cast %173 : vector<4x4xf32> to vector<1x4x4xf32>
    %182 = vector.shape_cast %174 : vector<4x4xf32> to vector<1x4x4xf32>
    %183 = vector.shape_cast %175 : vector<4x4xf32> to vector<1x4x4xf32>
    %184 = vector.shape_cast %176 : vector<4x4xf32> to vector<1x4x4xf32>
    %185 = tpu.concatenate %177, %178, %179, %180, %181, %182, %183, %184 in 0 : vector<1x4x4xf32>, vector<1x4x4xf32>, vector<1x4x4xf32>, vector<1x4x4xf32>, vector<1x4x4xf32>, vector<1x4x4xf32>, vector<1x4x4xf32>, vector<1x4x4xf32> -> vector<8x4x4xf32>
    %186 = vector.extract_strided_slice %149 {offsets = [0, 0], sizes = [4, 4], strides = [1, 1]} : vector<4x18xf32> to vector<4x4xf32>
    %187 = vector.extract_strided_slice %149 {offsets = [0, 2], sizes = [4, 4], strides = [1, 1]} : vector<4x18xf32> to vector<4x4xf32>
    %188 = vector.extract_strided_slice %149 {offsets = [0, 4], sizes = [4, 4], strides = [1, 1]} : vector<4x18xf32> to vector<4x4xf32>
    %189 = vector.extract_strided_slice %149 {offsets = [0, 6], sizes = [4, 4], strides = [1, 1]} : vector<4x18xf32> to vector<4x4xf32>
    %190 = vector.extract_strided_slice %149 {offsets = [0, 8], sizes = [4, 4], strides = [1, 1]} : vector<4x18xf32> to vector<4x4xf32>
    %191 = vector.extract_strided_slice %149 {offsets = [0, 10], sizes = [4, 4], strides = [1, 1]} : vector<4x18xf32> to vector<4x4xf32>
    %192 = vector.extract_strided_slice %149 {offsets = [0, 12], sizes = [4, 4], strides = [1, 1]} : vector<4x18xf32> to vector<4x4xf32>
    %193 = vector.extract_strided_slice %149 {offsets = [0, 14], sizes = [4, 4], strides = [1, 1]} : vector<4x18xf32> to vector<4x4xf32>
    %194 = vector.shape_cast %186 : vector<4x4xf32> to vector<1x4x4xf32>
    %195 = vector.shape_cast %187 : vector<4x4xf32> to vector<1x4x4xf32>
    %196 = vector.shape_cast %188 : vector<4x4xf32> to vector<1x4x4xf32>
    %197 = vector.shape_cast %189 : vector<4x4xf32> to vector<1x4x4xf32>
    %198 = vector.shape_cast %190 : vector<4x4xf32> to vector<1x4x4xf32>
    %199 = vector.shape_cast %191 : vector<4x4xf32> to vector<1x4x4xf32>
    %200 = vector.shape_cast %192 : vector<4x4xf32> to vector<1x4x4xf32>
    %201 = vector.shape_cast %193 : vector<4x4xf32> to vector<1x4x4xf32>
    %202 = tpu.concatenate %194, %195, %196, %197, %198, %199, %200, %201 in 0 : vector<1x4x4xf32>, vector<1x4x4xf32>, vector<1x4x4xf32>, vector<1x4x4xf32>, vector<1x4x4xf32>, vector<1x4x4xf32>, vector<1x4x4xf32>, vector<1x4x4xf32> -> vector<8x4x4xf32>
    %203 = vector.extract_strided_slice %151 {offsets = [0, 0], sizes = [1, 4], strides = [1, 1]} : vector<1x18xf32> to vector<1x4xf32>
    %204 = vector.extract_strided_slice %151 {offsets = [0, 2], sizes = [1, 4], strides = [1, 1]} : vector<1x18xf32> to vector<1x4xf32>
    %205 = vector.extract_strided_slice %151 {offsets = [0, 4], sizes = [1, 4], strides = [1, 1]} : vector<1x18xf32> to vector<1x4xf32>
    %206 = vector.extract_strided_slice %151 {offsets = [0, 6], sizes = [1, 4], strides = [1, 1]} : vector<1x18xf32> to vector<1x4xf32>
    %207 = vector.extract_strided_slice %151 {offsets = [0, 8], sizes = [1, 4], strides = [1, 1]} : vector<1x18xf32> to vector<1x4xf32>
    %208 = vector.extract_strided_slice %151 {offsets = [0, 10], sizes = [1, 4], strides = [1, 1]} : vector<1x18xf32> to vector<1x4xf32>
    %209 = vector.extract_strided_slice %151 {offsets = [0, 12], sizes = [1, 4], strides = [1, 1]} : vector<1x18xf32> to vector<1x4xf32>
    %210 = vector.extract_strided_slice %151 {offsets = [0, 14], sizes = [1, 4], strides = [1, 1]} : vector<1x18xf32> to vector<1x4xf32>
    %211 = vector.shape_cast %203 : vector<1x4xf32> to vector<1x1x4xf32>
    %212 = vector.shape_cast %204 : vector<1x4xf32> to vector<1x1x4xf32>
    %213 = vector.shape_cast %205 : vector<1x4xf32> to vector<1x1x4xf32>
    %214 = vector.shape_cast %206 : vector<1x4xf32> to vector<1x1x4xf32>
    %215 = vector.shape_cast %207 : vector<1x4xf32> to vector<1x1x4xf32>
    %216 = vector.shape_cast %208 : vector<1x4xf32> to vector<1x1x4xf32>
    %217 = vector.shape_cast %209 : vector<1x4xf32> to vector<1x1x4xf32>
    %218 = vector.shape_cast %210 : vector<1x4xf32> to vector<1x1x4xf32>
    %219 = tpu.concatenate %211, %212, %213, %214, %215, %216, %217, %218 in 0 : vector<1x1x4xf32>, vector<1x1x4xf32>, vector<1x1x4xf32>, vector<1x1x4xf32>, vector<1x1x4xf32>, vector<1x1x4xf32>, vector<1x1x4xf32>, vector<1x1x4xf32> -> vector<8x1x4xf32>
    %220 = tpu.iota {dimensions = array<i32: 2>} : vector<1x1x4xi32>
    %c3_i32 = arith.constant 3 : i32
    %221 = vector.broadcast %c3_i32 : i32 to vector<1x1x4xi32>
    %222 = arith.cmpi slt, %220, %221 : vector<1x1x4xi32>
    %cst_83 = arith.constant 0.000000e+00 : f32
    %223 = vector.shape_cast %222 : vector<1x1x4xi1> to vector<1x1x4xi1>
    %224 = vector.broadcast %223 : vector<1x1x4xi1> to vector<8x1x4xi1>
    %225 = vector.broadcast %cst_83 : f32 to vector<8x1x4xf32>
    %226 = arith.select %224, %219, %225 : vector<8x1x4xi1>, vector<8x1x4xf32>
    %227 = arith.truncf %168 : vector<8x4x2xf32> to vector<8x4x2xbf16>
    %228 = arith.truncf %185 : vector<8x4x4xf32> to vector<8x4x4xbf16>
    %cst_84 = arith.constant dense<0.000000e+00> : vector<8x2x4xf32>
    %229 = tpu.matmul %227, %228, %cst_84 {dimension_numbers = #tpu.dot_dimension_numbers<[1], [1], [2], [2], [0, 0, 0, 2, 1, 2], [0], [0]>} : vector<8x4x2xbf16>, vector<8x4x4xbf16>, vector<8x2x4xf32> -> vector<8x2x4xf32>
    %cst_85 = arith.constant 5.000000e-01 : f32
    %230 = vector.broadcast %cst_85 : f32 to vector<8x2x4xf32>
    %231 = arith.mulf %229, %230 : vector<8x2x4xf32>
    %cst_86 = arith.constant 0.000000e+00 : f32
    %232 = vector.broadcast %cst_86 : f32 to vector<8x1x4xf32>
    %233 = arith.cmpf ogt, %226, %232 : vector<8x1x4xf32>
    %cst_87 = arith.constant 9.99999543E-7 : f32
    %cst_88 = arith.constant -13.8155107 : f32
    %234 = vector.broadcast %cst_87 : f32 to vector<8x1x4xf32>
    %235 = vector.broadcast %cst_88 : f32 to vector<8x1x4xf32>
    %236 = arith.select %233, %234, %235 : vector<8x1x4xi1>, vector<8x1x4xf32>
    %237 = vector.broadcast %236 : vector<8x1x4xf32> to vector<8x2x4xf32>
    %238 = arith.addf %231, %237 : vector<8x2x4xf32>
    %cst_89 = arith.constant dense<0xFF800000> : vector<8x2xf32>
    %239 = vector.multi_reduction <maximumf>, %238, %cst_89 [2] : vector<8x2x4xf32> to vector<8x2xf32>
    %240 = vector.shape_cast %239 : vector<8x2xf32> to vector<8x2x1xf32>
    %241 = vector.broadcast %240 : vector<8x2x1xf32> to vector<8x2x4xf32>
    %242 = arith.subf %238, %241 : vector<8x2x4xf32>
    %243 = math.exp %242 : vector<8x2x4xf32>
    %cst_90 = arith.constant dense<0.000000e+00> : vector<8x2xf32>
    %244 = vector.multi_reduction <add>, %243, %cst_90 [2] : vector<8x2x4xf32> to vector<8x2xf32>
    %245 = vector.shape_cast %244 : vector<8x2xf32> to vector<8x2x1xf32>
    %246 = tpu.reciprocal %245 {approx = true} : vector<8x2x1xf32> -> vector<8x2x1xf32>
    %247 = vector.broadcast %246 : vector<8x2x1xf32> to vector<8x2x4xf32>
    %248 = arith.mulf %243, %247 : vector<8x2x4xf32>
    %249 = vector.broadcast %226 : vector<8x1x4xf32> to vector<8x2x4xf32>
    %250 = arith.mulf %248, %249 : vector<8x2x4xf32>
    %251 = arith.truncf %202 : vector<8x4x4xf32> to vector<8x4x4xbf16>
    %252 = arith.truncf %250 : vector<8x2x4xf32> to vector<8x2x4xbf16>
    %cst_91 = arith.constant dense<0.000000e+00> : vector<8x4x2xf32>
    %253 = tpu.matmul %251, %252, %cst_91 {dimension_numbers = #tpu.dot_dimension_numbers<[2], [2], [1], [1], [0, 0, 0, 1, 1, 1], [0], [0]>} : vector<8x4x4xbf16>, vector<8x2x4xbf16>, vector<8x4x2xf32> -> vector<8x4x2xf32>
    %cst_92 = arith.constant 0.000000e+00 : f32
    %254 = vector.broadcast %cst_92 : f32 to vector<8x4x2xf32>
    %255 = arith.maximumf %253, %254 : vector<8x4x2xf32>
    %256 = vector.extract_strided_slice %255 {offsets = [0, 0, 0], sizes = [1, 4, 2], strides = [1, 1, 1]} : vector<8x4x2xf32> to vector<1x4x2xf32>
    %257 = vector.shape_cast %256 : vector<1x4x2xf32> to vector<4x2xf32>
    %258 = vector.extract_strided_slice %255 {offsets = [1, 0, 0], sizes = [1, 4, 2], strides = [1, 1, 1]} : vector<8x4x2xf32> to vector<1x4x2xf32>
    %259 = vector.shape_cast %258 : vector<1x4x2xf32> to vector<4x2xf32>
    %260 = vector.extract_strided_slice %255 {offsets = [2, 0, 0], sizes = [1, 4, 2], strides = [1, 1, 1]} : vector<8x4x2xf32> to vector<1x4x2xf32>
    %261 = vector.shape_cast %260 : vector<1x4x2xf32> to vector<4x2xf32>
    %262 = vector.extract_strided_slice %255 {offsets = [3, 0, 0], sizes = [1, 4, 2], strides = [1, 1, 1]} : vector<8x4x2xf32> to vector<1x4x2xf32>
    %263 = vector.shape_cast %262 : vector<1x4x2xf32> to vector<4x2xf32>
    %264 = vector.extract_strided_slice %255 {offsets = [4, 0, 0], sizes = [1, 4, 2], strides = [1, 1, 1]} : vector<8x4x2xf32> to vector<1x4x2xf32>
    %265 = vector.shape_cast %264 : vector<1x4x2xf32> to vector<4x2xf32>
    %266 = vector.extract_strided_slice %255 {offsets = [5, 0, 0], sizes = [1, 4, 2], strides = [1, 1, 1]} : vector<8x4x2xf32> to vector<1x4x2xf32>
    %267 = vector.shape_cast %266 : vector<1x4x2xf32> to vector<4x2xf32>
    %268 = vector.extract_strided_slice %255 {offsets = [6, 0, 0], sizes = [1, 4, 2], strides = [1, 1, 1]} : vector<8x4x2xf32> to vector<1x4x2xf32>
    %269 = vector.shape_cast %268 : vector<1x4x2xf32> to vector<4x2xf32>
    %270 = vector.extract_strided_slice %255 {offsets = [7, 0, 0], sizes = [1, 4, 2], strides = [1, 1, 1]} : vector<8x4x2xf32> to vector<1x4x2xf32>
    %271 = vector.shape_cast %270 : vector<1x4x2xf32> to vector<4x2xf32>
    %272 = tpu.concatenate %257, %259, %261, %263, %265, %267, %269, %271 in 1 : vector<4x2xf32>, vector<4x2xf32>, vector<4x2xf32>, vector<4x2xf32>, vector<4x2xf32>, vector<4x2xf32>, vector<4x2xf32>, vector<4x2xf32> -> vector<4x16xf32>
    %c1_93 = arith.constant 1 : index
    %c0_94 = arith.constant 0 : index
    %c0_95 = arith.constant 0 : index
    %273 = vector.load %arg12[%c1_93, %c0_94, %c0_95] : memref<3x8x4xbf16, #tpu.memory_space<vmem>>, vector<1x8x4xbf16>
    %274 = vector.shape_cast %273 : vector<1x8x4xbf16> to vector<8x4xbf16>
    %275 = arith.truncf %272 : vector<4x16xf32> to vector<4x16xbf16>
    %cst_96 = arith.constant dense<0.000000e+00> : vector<8x16xf32>
    %276 = tpu.matmul %274, %275, %cst_96 {dimension_numbers = #tpu.dot_dimension_numbers<[1], [0], [0], [1], [0, 0, 1, 1], [], []>} : vector<8x4xbf16>, vector<4x16xbf16>, vector<8x16xf32> -> vector<8x16xf32>
    %c1_97 = arith.constant 1 : index
    %c0_98 = arith.constant 0 : index
    %c0_99 = arith.constant 0 : index
    %277 = vector.load %arg13[%c1_97, %c0_98, %c0_99] : memref<3x8x1xf32, #tpu.memory_space<vmem>>, vector<1x8x1xf32>
    %278 = vector.shape_cast %277 : vector<1x8x1xf32> to vector<8x1xf32>
    %279 = vector.broadcast %278 : vector<8x1xf32> to vector<8x16xf32>
    %280 = arith.addf %276, %279 : vector<8x16xf32>
    %281 = vector.broadcast %0 : vector<1x16xf32> to vector<8x16xf32>
    %282 = arith.mulf %280, %281 : vector<8x16xf32>
    %cst_100 = arith.constant 1.000000e+00 : f32
    %283 = vector.broadcast %cst_100 : f32 to vector<8x16xf32>
    %284 = arith.mulf %283, %282 : vector<8x16xf32>
    %285 = arith.addf %284, %103 : vector<8x16xf32>
    %c1_101 = arith.constant 1 : index
    %c0_102 = arith.constant 0 : index
    %c0_103 = arith.constant 0 : index
    %286 = vector.load %arg14[%c1_101, %c0_102, %c0_103] : memref<3x8x8xbf16, #tpu.memory_space<vmem>>, vector<1x8x8xbf16>
    %287 = vector.shape_cast %286 : vector<1x8x8xbf16> to vector<8x8xbf16>
    %288 = arith.truncf %285 : vector<8x16xf32> to vector<8x16xbf16>
    %cst_104 = arith.constant dense<0.000000e+00> : vector<8x16xf32>
    %289 = tpu.matmul %287, %288, %cst_104 {dimension_numbers = #tpu.dot_dimension_numbers<[1], [0], [0], [1], [0, 0, 1, 1], [], []>} : vector<8x8xbf16>, vector<8x16xbf16>, vector<8x16xf32> -> vector<8x16xf32>
    %c1_105 = arith.constant 1 : index
    %c0_106 = arith.constant 0 : index
    %c0_107 = arith.constant 0 : index
    %290 = vector.load %arg15[%c1_105, %c0_106, %c0_107] : memref<3x8x1xf32, #tpu.memory_space<vmem>>, vector<1x8x1xf32>
    %291 = vector.shape_cast %290 : vector<1x8x1xf32> to vector<8x1xf32>
    %292 = vector.broadcast %291 : vector<8x1xf32> to vector<8x16xf32>
    %293 = arith.addf %289, %292 : vector<8x16xf32>
    %294 = arith.addf %82, %293 : vector<8x16xf32>
    %295 = vector.broadcast %0 : vector<1x16xf32> to vector<8x16xf32>
    %296 = arith.mulf %294, %295 : vector<8x16xf32>
    %c2 = arith.constant 2 : index
    %c0_108 = arith.constant 0 : index
    %c0_109 = arith.constant 0 : index
    %297 = vector.load %arg4[%c2, %c0_108, %c0_109] : memref<3x24x8xbf16, #tpu.memory_space<vmem>>, vector<1x24x8xbf16>
    %298 = vector.shape_cast %297 : vector<1x24x8xbf16> to vector<24x8xbf16>
    %299 = arith.truncf %296 : vector<8x16xf32> to vector<8x16xbf16>
    %cst_110 = arith.constant dense<0.000000e+00> : vector<24x16xf32>
    %300 = tpu.matmul %298, %299, %cst_110 {dimension_numbers = #tpu.dot_dimension_numbers<[1], [0], [0], [1], [0, 0, 1, 1], [], []>} : vector<24x8xbf16>, vector<8x16xbf16>, vector<24x16xf32> -> vector<24x16xf32>
    %301 = vector.extract_strided_slice %300 {offsets = [0, 0], sizes = [8, 16], strides = [1, 1]} : vector<24x16xf32> to vector<8x16xf32>
    %302 = vector.extract_strided_slice %300 {offsets = [8, 0], sizes = [8, 16], strides = [1, 1]} : vector<24x16xf32> to vector<8x16xf32>
    %303 = vector.extract_strided_slice %300 {offsets = [16, 0], sizes = [8, 16], strides = [1, 1]} : vector<24x16xf32> to vector<8x16xf32>
    %cst_111 = arith.constant 0.000000e+00 : f32
    %304 = vector.broadcast %cst_111 : f32 to vector<8x4xf32>
    %305 = vector.extract_strided_slice %301 {offsets = [0, 0], sizes = [8, 12], strides = [1, 1]} : vector<8x16xf32> to vector<8x12xf32>
    %306 = tpu.concatenate %304, %305 in 1 : vector<8x4xf32>, vector<8x12xf32> -> vector<8x16xf32>
    %307 = arith.addf %306, %302 : vector<8x16xf32>
    %cst_112 = arith.constant 0.000000e+00 : f32
    %308 = vector.broadcast %cst_112 : f32 to vector<8x4xf32>
    %309 = vector.extract_strided_slice %303 {offsets = [0, 4], sizes = [8, 12], strides = [1, 1]} : vector<8x16xf32> to vector<8x12xf32>
    %310 = tpu.concatenate %309, %308 in 1 : vector<8x12xf32>, vector<8x4xf32> -> vector<8x16xf32>
    %311 = arith.addf %307, %310 : vector<8x16xf32>
    %c2_113 = arith.constant 2 : index
    %c0_114 = arith.constant 0 : index
    %c0_115 = arith.constant 0 : index
    %312 = vector.load %arg5[%c2_113, %c0_114, %c0_115] : memref<3x8x1xf32, #tpu.memory_space<vmem>>, vector<1x8x1xf32>
    %313 = vector.shape_cast %312 : vector<1x8x1xf32> to vector<8x1xf32>
    %314 = vector.broadcast %313 : vector<8x1xf32> to vector<8x16xf32>
    %315 = arith.addf %311, %314 : vector<8x16xf32>
    %cst_116 = arith.constant 0.000000e+00 : f32
    %316 = vector.broadcast %cst_116 : f32 to vector<8x16xf32>
    %317 = arith.maximumf %315, %316 : vector<8x16xf32>
    %cst_117 = arith.constant dense<0.000000e+00> : vector<8xf32>
    %318 = vector.multi_reduction <add>, %317, %cst_117 [1] : vector<8x16xf32> to vector<8xf32>
    %319 = vector.shape_cast %318 : vector<8xf32> to vector<8x1xf32>
    %cst_118 = arith.constant 1.600000e+01 : f32
    %320 = vector.broadcast %cst_118 : f32 to vector<8x1xf32>
    %321 = arith.divf %319, %320 : vector<8x1xf32>
    %322 = vector.broadcast %321 : vector<8x1xf32> to vector<8x16xf32>
    %323 = arith.subf %317, %322 : vector<8x16xf32>
    %324 = arith.mulf %323, %323 : vector<8x16xf32>
    %cst_119 = arith.constant dense<0.000000e+00> : vector<8xf32>
    %325 = vector.multi_reduction <add>, %324, %cst_119 [1] : vector<8x16xf32> to vector<8xf32>
    %326 = vector.shape_cast %325 : vector<8xf32> to vector<8x1xf32>
    %cst_120 = arith.constant 1.600000e+01 : f32
    %327 = vector.broadcast %cst_120 : f32 to vector<8x1xf32>
    %328 = arith.divf %326, %327 : vector<8x1xf32>
    %329 = vector.broadcast %321 : vector<8x1xf32> to vector<8x16xf32>
    %330 = arith.subf %317, %329 : vector<8x16xf32>
    %cst_121 = arith.constant 9.99999974E-6 : f32
    %331 = vector.broadcast %cst_121 : f32 to vector<8x1xf32>
    %332 = arith.addf %328, %331 : vector<8x1xf32>
    %333 = math.rsqrt %332 : vector<8x1xf32>
    %334 = vector.broadcast %333 : vector<8x1xf32> to vector<8x16xf32>
    %335 = arith.mulf %330, %334 : vector<8x16xf32>
    %c2_122 = arith.constant 2 : index
    %c0_123 = arith.constant 0 : index
    %c0_124 = arith.constant 0 : index
    %336 = vector.load %arg10[%c2_122, %c0_123, %c0_124] : memref<3x4x8xbf16, #tpu.memory_space<vmem>>, vector<1x4x8xbf16>
    %337 = vector.shape_cast %336 : vector<1x4x8xbf16> to vector<4x8xbf16>
    %338 = arith.truncf %335 : vector<8x16xf32> to vector<8x16xbf16>
    %cst_125 = arith.constant dense<0.000000e+00> : vector<4x16xf32>
    %339 = tpu.matmul %337, %338, %cst_125 {dimension_numbers = #tpu.dot_dimension_numbers<[1], [0], [0], [1], [0, 0, 1, 1], [], []>} : vector<4x8xbf16>, vector<8x16xbf16>, vector<4x16xf32> -> vector<4x16xf32>
    %c2_126 = arith.constant 2 : index
    %c0_127 = arith.constant 0 : index
    %c0_128 = arith.constant 0 : index
    %340 = vector.load %arg11[%c2_126, %c0_127, %c0_128] : memref<3x4x1xf32, #tpu.memory_space<vmem>>, vector<1x4x1xf32>
    %341 = vector.shape_cast %340 : vector<1x4x1xf32> to vector<4x1xf32>
    %342 = vector.broadcast %341 : vector<4x1xf32> to vector<4x16xf32>
    %343 = arith.addf %339, %342 : vector<4x16xf32>
    %c2_129 = arith.constant 2 : index
    %c0_130 = arith.constant 0 : index
    %c0_131 = arith.constant 0 : index
    %344 = vector.load %arg6[%c2_129, %c0_130, %c0_131] : memref<3x4x8xbf16, #tpu.memory_space<vmem>>, vector<1x4x8xbf16>
    %345 = vector.shape_cast %344 : vector<1x4x8xbf16> to vector<4x8xbf16>
    %346 = arith.truncf %335 : vector<8x16xf32> to vector<8x16xbf16>
    %cst_132 = arith.constant dense<0.000000e+00> : vector<4x16xf32>
    %347 = tpu.matmul %345, %346, %cst_132 {dimension_numbers = #tpu.dot_dimension_numbers<[1], [0], [0], [1], [0, 0, 1, 1], [], []>} : vector<4x8xbf16>, vector<8x16xbf16>, vector<4x16xf32> -> vector<4x16xf32>
    %c2_133 = arith.constant 2 : index
    %c0_134 = arith.constant 0 : index
    %c0_135 = arith.constant 0 : index
    %348 = vector.load %arg7[%c2_133, %c0_134, %c0_135] : memref<3x4x1xf32, #tpu.memory_space<vmem>>, vector<1x4x1xf32>
    %349 = vector.shape_cast %348 : vector<1x4x1xf32> to vector<4x1xf32>
    %350 = vector.broadcast %349 : vector<4x1xf32> to vector<4x16xf32>
    %351 = arith.addf %347, %350 : vector<4x16xf32>
    %c2_136 = arith.constant 2 : index
    %c0_137 = arith.constant 0 : index
    %c0_138 = arith.constant 0 : index
    %352 = vector.load %arg8[%c2_136, %c0_137, %c0_138] : memref<3x4x8xbf16, #tpu.memory_space<vmem>>, vector<1x4x8xbf16>
    %353 = vector.shape_cast %352 : vector<1x4x8xbf16> to vector<4x8xbf16>
    %354 = arith.truncf %335 : vector<8x16xf32> to vector<8x16xbf16>
    %cst_139 = arith.constant dense<0.000000e+00> : vector<4x16xf32>
    %355 = tpu.matmul %353, %354, %cst_139 {dimension_numbers = #tpu.dot_dimension_numbers<[1], [0], [0], [1], [0, 0, 1, 1], [], []>} : vector<4x8xbf16>, vector<8x16xbf16>, vector<4x16xf32> -> vector<4x16xf32>
    %c2_140 = arith.constant 2 : index
    %c0_141 = arith.constant 0 : index
    %c0_142 = arith.constant 0 : index
    %356 = vector.load %arg9[%c2_140, %c0_141, %c0_142] : memref<3x4x1xf32, #tpu.memory_space<vmem>>, vector<1x4x1xf32>
    %357 = vector.shape_cast %356 : vector<1x4x1xf32> to vector<4x1xf32>
    %358 = vector.broadcast %357 : vector<4x1xf32> to vector<4x16xf32>
    %359 = arith.addf %355, %358 : vector<4x16xf32>
    %cst_143 = arith.constant 0.000000e+00 : f32
    %360 = vector.broadcast %cst_143 : f32 to vector<4x2xf32>
    %361 = tpu.concatenate %360, %359, %360 in 1 : vector<4x2xf32>, vector<4x16xf32>, vector<4x2xf32> -> vector<4x20xf32>
    %cst_144 = arith.constant 0.000000e+00 : f32
    %362 = vector.broadcast %cst_144 : f32 to vector<4x2xf32>
    %363 = tpu.concatenate %362, %343, %362 in 1 : vector<4x2xf32>, vector<4x16xf32>, vector<4x2xf32> -> vector<4x20xf32>
    %cst_145 = arith.constant 0.000000e+00 : f32
    %364 = vector.broadcast %cst_145 : f32 to vector<1x2xf32>
    %365 = tpu.concatenate %364, %0, %364 in 1 : vector<1x2xf32>, vector<1x16xf32>, vector<1x2xf32> -> vector<1x20xf32>
    %366 = vector.extract_strided_slice %351 {offsets = [0, 0], sizes = [4, 4], strides = [1, 1]} : vector<4x16xf32> to vector<4x4xf32>
    %367 = vector.extract_strided_slice %351 {offsets = [0, 4], sizes = [4, 4], strides = [1, 1]} : vector<4x16xf32> to vector<4x4xf32>
    %368 = vector.extract_strided_slice %351 {offsets = [0, 8], sizes = [4, 4], strides = [1, 1]} : vector<4x16xf32> to vector<4x4xf32>
    %369 = vector.extract_strided_slice %351 {offsets = [0, 12], sizes = [4, 4], strides = [1, 1]} : vector<4x16xf32> to vector<4x4xf32>
    %370 = vector.shape_cast %366 : vector<4x4xf32> to vector<1x4x4xf32>
    %371 = vector.shape_cast %367 : vector<4x4xf32> to vector<1x4x4xf32>
    %372 = vector.shape_cast %368 : vector<4x4xf32> to vector<1x4x4xf32>
    %373 = vector.shape_cast %369 : vector<4x4xf32> to vector<1x4x4xf32>
    %374 = tpu.concatenate %370, %371, %372, %373 in 0 : vector<1x4x4xf32>, vector<1x4x4xf32>, vector<1x4x4xf32>, vector<1x4x4xf32> -> vector<4x4x4xf32>
    %375 = vector.extract_strided_slice %361 {offsets = [0, 0], sizes = [4, 8], strides = [1, 1]} : vector<4x20xf32> to vector<4x8xf32>
    %376 = vector.extract_strided_slice %361 {offsets = [0, 4], sizes = [4, 8], strides = [1, 1]} : vector<4x20xf32> to vector<4x8xf32>
    %377 = vector.extract_strided_slice %361 {offsets = [0, 8], sizes = [4, 8], strides = [1, 1]} : vector<4x20xf32> to vector<4x8xf32>
    %378 = vector.extract_strided_slice %361 {offsets = [0, 12], sizes = [4, 8], strides = [1, 1]} : vector<4x20xf32> to vector<4x8xf32>
    %379 = vector.shape_cast %375 : vector<4x8xf32> to vector<1x4x8xf32>
    %380 = vector.shape_cast %376 : vector<4x8xf32> to vector<1x4x8xf32>
    %381 = vector.shape_cast %377 : vector<4x8xf32> to vector<1x4x8xf32>
    %382 = vector.shape_cast %378 : vector<4x8xf32> to vector<1x4x8xf32>
    %383 = tpu.concatenate %379, %380, %381, %382 in 0 : vector<1x4x8xf32>, vector<1x4x8xf32>, vector<1x4x8xf32>, vector<1x4x8xf32> -> vector<4x4x8xf32>
    %384 = vector.extract_strided_slice %363 {offsets = [0, 0], sizes = [4, 8], strides = [1, 1]} : vector<4x20xf32> to vector<4x8xf32>
    %385 = vector.extract_strided_slice %363 {offsets = [0, 4], sizes = [4, 8], strides = [1, 1]} : vector<4x20xf32> to vector<4x8xf32>
    %386 = vector.extract_strided_slice %363 {offsets = [0, 8], sizes = [4, 8], strides = [1, 1]} : vector<4x20xf32> to vector<4x8xf32>
    %387 = vector.extract_strided_slice %363 {offsets = [0, 12], sizes = [4, 8], strides = [1, 1]} : vector<4x20xf32> to vector<4x8xf32>
    %388 = vector.shape_cast %384 : vector<4x8xf32> to vector<1x4x8xf32>
    %389 = vector.shape_cast %385 : vector<4x8xf32> to vector<1x4x8xf32>
    %390 = vector.shape_cast %386 : vector<4x8xf32> to vector<1x4x8xf32>
    %391 = vector.shape_cast %387 : vector<4x8xf32> to vector<1x4x8xf32>
    %392 = tpu.concatenate %388, %389, %390, %391 in 0 : vector<1x4x8xf32>, vector<1x4x8xf32>, vector<1x4x8xf32>, vector<1x4x8xf32> -> vector<4x4x8xf32>
    %393 = vector.extract_strided_slice %365 {offsets = [0, 0], sizes = [1, 8], strides = [1, 1]} : vector<1x20xf32> to vector<1x8xf32>
    %394 = vector.extract_strided_slice %365 {offsets = [0, 4], sizes = [1, 8], strides = [1, 1]} : vector<1x20xf32> to vector<1x8xf32>
    %395 = vector.extract_strided_slice %365 {offsets = [0, 8], sizes = [1, 8], strides = [1, 1]} : vector<1x20xf32> to vector<1x8xf32>
    %396 = vector.extract_strided_slice %365 {offsets = [0, 12], sizes = [1, 8], strides = [1, 1]} : vector<1x20xf32> to vector<1x8xf32>
    %397 = vector.shape_cast %393 : vector<1x8xf32> to vector<1x1x8xf32>
    %398 = vector.shape_cast %394 : vector<1x8xf32> to vector<1x1x8xf32>
    %399 = vector.shape_cast %395 : vector<1x8xf32> to vector<1x1x8xf32>
    %400 = vector.shape_cast %396 : vector<1x8xf32> to vector<1x1x8xf32>
    %401 = tpu.concatenate %397, %398, %399, %400 in 0 : vector<1x1x8xf32>, vector<1x1x8xf32>, vector<1x1x8xf32>, vector<1x1x8xf32> -> vector<4x1x8xf32>
    %402 = tpu.iota {dimensions = array<i32: 2>} : vector<1x1x8xi32>
    %c7_i32 = arith.constant 7 : i32
    %403 = vector.broadcast %c7_i32 : i32 to vector<1x1x8xi32>
    %404 = arith.cmpi slt, %402, %403 : vector<1x1x8xi32>
    %cst_146 = arith.constant 0.000000e+00 : f32
    %405 = vector.shape_cast %404 : vector<1x1x8xi1> to vector<1x1x8xi1>
    %406 = vector.broadcast %405 : vector<1x1x8xi1> to vector<4x1x8xi1>
    %407 = vector.broadcast %cst_146 : f32 to vector<4x1x8xf32>
    %408 = arith.select %406, %401, %407 : vector<4x1x8xi1>, vector<4x1x8xf32>
    %409 = arith.truncf %374 : vector<4x4x4xf32> to vector<4x4x4xbf16>
    %410 = arith.truncf %383 : vector<4x4x8xf32> to vector<4x4x8xbf16>
    %cst_147 = arith.constant dense<0.000000e+00> : vector<4x4x8xf32>
    %411 = tpu.matmul %409, %410, %cst_147 {dimension_numbers = #tpu.dot_dimension_numbers<[1], [1], [2], [2], [0, 0, 0, 2, 1, 2], [0], [0]>} : vector<4x4x4xbf16>, vector<4x4x8xbf16>, vector<4x4x8xf32> -> vector<4x4x8xf32>
    %cst_148 = arith.constant 5.000000e-01 : f32
    %412 = vector.broadcast %cst_148 : f32 to vector<4x4x8xf32>
    %413 = arith.mulf %411, %412 : vector<4x4x8xf32>
    %cst_149 = arith.constant 0.000000e+00 : f32
    %414 = vector.broadcast %cst_149 : f32 to vector<4x1x8xf32>
    %415 = arith.cmpf ogt, %408, %414 : vector<4x1x8xf32>
    %cst_150 = arith.constant 9.99999543E-7 : f32
    %cst_151 = arith.constant -13.8155107 : f32
    %416 = vector.broadcast %cst_150 : f32 to vector<4x1x8xf32>
    %417 = vector.broadcast %cst_151 : f32 to vector<4x1x8xf32>
    %418 = arith.select %415, %416, %417 : vector<4x1x8xi1>, vector<4x1x8xf32>
    %419 = vector.broadcast %418 : vector<4x1x8xf32> to vector<4x4x8xf32>
    %420 = arith.addf %413, %419 : vector<4x4x8xf32>
    %cst_152 = arith.constant dense<0xFF800000> : vector<4x4xf32>
    %421 = vector.multi_reduction <maximumf>, %420, %cst_152 [2] : vector<4x4x8xf32> to vector<4x4xf32>
    %422 = vector.shape_cast %421 : vector<4x4xf32> to vector<4x4x1xf32>
    %423 = vector.broadcast %422 : vector<4x4x1xf32> to vector<4x4x8xf32>
    %424 = arith.subf %420, %423 : vector<4x4x8xf32>
    %425 = math.exp %424 : vector<4x4x8xf32>
    %cst_153 = arith.constant dense<0.000000e+00> : vector<4x4xf32>
    %426 = vector.multi_reduction <add>, %425, %cst_153 [2] : vector<4x4x8xf32> to vector<4x4xf32>
    %427 = vector.shape_cast %426 : vector<4x4xf32> to vector<4x4x1xf32>
    %428 = tpu.reciprocal %427 {approx = true} : vector<4x4x1xf32> -> vector<4x4x1xf32>
    %429 = vector.broadcast %428 : vector<4x4x1xf32> to vector<4x4x8xf32>
    %430 = arith.mulf %425, %429 : vector<4x4x8xf32>
    %431 = vector.broadcast %408 : vector<4x1x8xf32> to vector<4x4x8xf32>
    %432 = arith.mulf %430, %431 : vector<4x4x8xf32>
    %433 = arith.truncf %392 : vector<4x4x8xf32> to vector<4x4x8xbf16>
    %434 = arith.truncf %432 : vector<4x4x8xf32> to vector<4x4x8xbf16>
    %cst_154 = arith.constant dense<0.000000e+00> : vector<4x4x4xf32>
    %435 = tpu.matmul %433, %434, %cst_154 {dimension_numbers = #tpu.dot_dimension_numbers<[2], [2], [1], [1], [0, 0, 0, 1, 1, 1], [0], [0]>} : vector<4x4x8xbf16>, vector<4x4x8xbf16>, vector<4x4x4xf32> -> vector<4x4x4xf32>
    %cst_155 = arith.constant 0.000000e+00 : f32
    %436 = vector.broadcast %cst_155 : f32 to vector<4x4x4xf32>
    %437 = arith.maximumf %435, %436 : vector<4x4x4xf32>
    %438 = vector.extract_strided_slice %437 {offsets = [0, 0, 0], sizes = [1, 4, 4], strides = [1, 1, 1]} : vector<4x4x4xf32> to vector<1x4x4xf32>
    %439 = vector.shape_cast %438 : vector<1x4x4xf32> to vector<4x4xf32>
    %440 = vector.extract_strided_slice %437 {offsets = [1, 0, 0], sizes = [1, 4, 4], strides = [1, 1, 1]} : vector<4x4x4xf32> to vector<1x4x4xf32>
    %441 = vector.shape_cast %440 : vector<1x4x4xf32> to vector<4x4xf32>
    %442 = vector.extract_strided_slice %437 {offsets = [2, 0, 0], sizes = [1, 4, 4], strides = [1, 1, 1]} : vector<4x4x4xf32> to vector<1x4x4xf32>
    %443 = vector.shape_cast %442 : vector<1x4x4xf32> to vector<4x4xf32>
    %444 = vector.extract_strided_slice %437 {offsets = [3, 0, 0], sizes = [1, 4, 4], strides = [1, 1, 1]} : vector<4x4x4xf32> to vector<1x4x4xf32>
    %445 = vector.shape_cast %444 : vector<1x4x4xf32> to vector<4x4xf32>
    %446 = tpu.concatenate %439, %441, %443, %445 in 1 : vector<4x4xf32>, vector<4x4xf32>, vector<4x4xf32>, vector<4x4xf32> -> vector<4x16xf32>
    %c2_156 = arith.constant 2 : index
    %c0_157 = arith.constant 0 : index
    %c0_158 = arith.constant 0 : index
    %447 = vector.load %arg12[%c2_156, %c0_157, %c0_158] : memref<3x8x4xbf16, #tpu.memory_space<vmem>>, vector<1x8x4xbf16>
    %448 = vector.shape_cast %447 : vector<1x8x4xbf16> to vector<8x4xbf16>
    %449 = arith.truncf %446 : vector<4x16xf32> to vector<4x16xbf16>
    %cst_159 = arith.constant dense<0.000000e+00> : vector<8x16xf32>
    %450 = tpu.matmul %448, %449, %cst_159 {dimension_numbers = #tpu.dot_dimension_numbers<[1], [0], [0], [1], [0, 0, 1, 1], [], []>} : vector<8x4xbf16>, vector<4x16xbf16>, vector<8x16xf32> -> vector<8x16xf32>
    %c2_160 = arith.constant 2 : index
    %c0_161 = arith.constant 0 : index
    %c0_162 = arith.constant 0 : index
    %451 = vector.load %arg13[%c2_160, %c0_161, %c0_162] : memref<3x8x1xf32, #tpu.memory_space<vmem>>, vector<1x8x1xf32>
    %452 = vector.shape_cast %451 : vector<1x8x1xf32> to vector<8x1xf32>
    %453 = vector.broadcast %452 : vector<8x1xf32> to vector<8x16xf32>
    %454 = arith.addf %450, %453 : vector<8x16xf32>
    %455 = vector.broadcast %0 : vector<1x16xf32> to vector<8x16xf32>
    %456 = arith.mulf %454, %455 : vector<8x16xf32>
    %cst_163 = arith.constant 1.000000e+00 : f32
    %457 = vector.broadcast %cst_163 : f32 to vector<8x16xf32>
    %458 = arith.mulf %457, %456 : vector<8x16xf32>
    %459 = arith.addf %458, %317 : vector<8x16xf32>
    %c2_164 = arith.constant 2 : index
    %c0_165 = arith.constant 0 : index
    %c0_166 = arith.constant 0 : index
    %460 = vector.load %arg14[%c2_164, %c0_165, %c0_166] : memref<3x8x8xbf16, #tpu.memory_space<vmem>>, vector<1x8x8xbf16>
    %461 = vector.shape_cast %460 : vector<1x8x8xbf16> to vector<8x8xbf16>
    %462 = arith.truncf %459 : vector<8x16xf32> to vector<8x16xbf16>
    %cst_167 = arith.constant dense<0.000000e+00> : vector<8x16xf32>
    %463 = tpu.matmul %461, %462, %cst_167 {dimension_numbers = #tpu.dot_dimension_numbers<[1], [0], [0], [1], [0, 0, 1, 1], [], []>} : vector<8x8xbf16>, vector<8x16xbf16>, vector<8x16xf32> -> vector<8x16xf32>
    %c2_168 = arith.constant 2 : index
    %c0_169 = arith.constant 0 : index
    %c0_170 = arith.constant 0 : index
    %464 = vector.load %arg15[%c2_168, %c0_169, %c0_170] : memref<3x8x1xf32, #tpu.memory_space<vmem>>, vector<1x8x1xf32>
    %465 = vector.shape_cast %464 : vector<1x8x1xf32> to vector<8x1xf32>
    %466 = vector.broadcast %465 : vector<8x1xf32> to vector<8x16xf32>
    %467 = arith.addf %463, %466 : vector<8x16xf32>
    %468 = arith.addf %296, %467 : vector<8x16xf32>
    %469 = vector.broadcast %0 : vector<1x16xf32> to vector<8x16xf32>
    %470 = arith.mulf %468, %469 : vector<8x16xf32>
    %c0_171 = arith.constant 0 : index
    %c0_172 = arith.constant 0 : index
    %471 = vector.load %arg16[%c0_171, %c0_172] : memref<6x8xbf16, #tpu.memory_space<vmem>>, vector<6x8xbf16>
    %472 = arith.truncf %470 : vector<8x16xf32> to vector<8x16xbf16>
    %cst_173 = arith.constant dense<0.000000e+00> : vector<6x16xf32>
    %473 = tpu.matmul %471, %472, %cst_173 {dimension_numbers = #tpu.dot_dimension_numbers<[1], [0], [0], [1], [0, 0, 1, 1], [], []>} : vector<6x8xbf16>, vector<8x16xbf16>, vector<6x16xf32> -> vector<6x16xf32>
    %c0_174 = arith.constant 0 : index
    %c0_175 = arith.constant 0 : index
    %474 = vector.load %arg17[%c0_174, %c0_175] : memref<6x1xf32, #tpu.memory_space<vmem>>, vector<6x1xf32>
    %475 = vector.broadcast %474 : vector<6x1xf32> to vector<6x16xf32>
    %476 = arith.addf %473, %475 : vector<6x16xf32>
    %477 = vector.broadcast %0 : vector<1x16xf32> to vector<6x16xf32>
    %478 = arith.mulf %476, %477 : vector<6x16xf32>
    %c0_176 = arith.constant 0 : index
    %c0_177 = arith.constant 0 : index
    %479 = vector.load %arg18[%c0_176, %c0_177] : memref<6x16xf32, #tpu.memory_space<vmem>>, vector<6x16xf32>
    tpu.vector_store %arg18[%c0_176, %c0_177], %478 {strides = array<i32>} : memref<6x16xf32, #tpu.memory_space<vmem>>, vector<6x16xf32>,
    %c0_178 = arith.constant 0 : index
    %c0_179 = arith.constant 0 : index
    %480 = vector.load %arg19[%c0_178, %c0_179] : memref<8x16xf32, #tpu.memory_space<vmem>>, vector<8x16xf32>
    tpu.vector_store %arg19[%c0_178, %c0_179], %470 {strides = array<i32>} : memref<8x16xf32, #tpu.memory_space<vmem>>, vector<8x16xf32>,
    %cst_180 = arith.constant dense<0xFF800000> : vector<16xf32>
    %481 = vector.multi_reduction <maximumf>, %478, %cst_180 [0] : vector<6x16xf32> to vector<16xf32>
    %482 = vector.shape_cast %481 : vector<16xf32> to vector<1x16xf32>
    %483 = vector.broadcast %482 : vector<1x16xf32> to vector<6x16xf32>
    %484 = arith.subf %478, %483 : vector<6x16xf32>
    %485 = math.exp %484 : vector<6x16xf32>
    %cst_181 = arith.constant dense<0.000000e+00> : vector<16xf32>
    %486 = vector.multi_reduction <add>, %485, %cst_181 [0] : vector<6x16xf32> to vector<16xf32>
    %487 = vector.shape_cast %486 : vector<16xf32> to vector<1x16xf32>
    %488 = tpu.reciprocal %487 {approx = true} : vector<1x16xf32> -> vector<1x16xf32>
    %489 = vector.broadcast %488 : vector<1x16xf32> to vector<6x16xf32>
    %490 = arith.mulf %485, %489 : vector<6x16xf32>
    %491 = vector.broadcast %0 : vector<1x16xf32> to vector<6x16xf32>
    %492 = arith.mulf %490, %491 : vector<6x16xf32>
    %c0_182 = arith.constant 0 : index
    %c0_183 = arith.constant 0 : index
    %493 = vector.load %arg20[%c0_182, %c0_183] : memref<6x16xf32, #tpu.memory_space<vmem>>, vector<6x16xf32>
    tpu.vector_store %arg20[%c0_182, %c0_183], %492 {strides = array<i32>} : memref<6x16xf32, #tpu.memory_space<vmem>>, vector<6x16xf32>,
    return
  }
}

module attributes {stable_mosaic.version = 11 : i64} {
  func.func @_stage_kernel(%arg0: memref<6x16xf32, #tpu.memory_space<vmem>>, %arg1: memref<8x16xf32, #tpu.memory_space<vmem>>, %arg2: memref<1x16xf32, #tpu.memory_space<vmem>>, %arg3: memref<8x6xbf16, #tpu.memory_space<vmem>>, %arg4: memref<8x1xf32, #tpu.memory_space<vmem>>, %arg5: memref<3x24x8xbf16, #tpu.memory_space<vmem>>, %arg6: memref<3x8x1xf32, #tpu.memory_space<vmem>>, %arg7: memref<3x4x8xbf16, #tpu.memory_space<vmem>>, %arg8: memref<3x4x1xf32, #tpu.memory_space<vmem>>, %arg9: memref<3x4x8xbf16, #tpu.memory_space<vmem>>, %arg10: memref<3x4x1xf32, #tpu.memory_space<vmem>>, %arg11: memref<3x4x8xbf16, #tpu.memory_space<vmem>>, %arg12: memref<3x4x1xf32, #tpu.memory_space<vmem>>, %arg13: memref<3x8x4xbf16, #tpu.memory_space<vmem>>, %arg14: memref<3x8x1xf32, #tpu.memory_space<vmem>>, %arg15: memref<3x8x8xbf16, #tpu.memory_space<vmem>>, %arg16: memref<3x8x1xf32, #tpu.memory_space<vmem>>, %arg17: memref<6x8xbf16, #tpu.memory_space<vmem>>, %arg18: memref<6x1xf32, #tpu.memory_space<vmem>>, %arg19: memref<6x16xf32, #tpu.memory_space<vmem>>, %arg20: memref<8x16xf32, #tpu.memory_space<vmem>>, %arg21: memref<6x16xf32, #tpu.memory_space<vmem>>) attributes {dimension_semantics = [], scalar_prefetch = 0 : i64, scratch_operands = 0 : i64, tpu.core_type = #tpu.core_type<tc>} {
    %c0 = arith.constant 0 : index
    %c0_0 = arith.constant 0 : index
    %0 = vector.load %arg2[%c0, %c0_0] : memref<1x16xf32, #tpu.memory_space<vmem>>, vector<1x16xf32>
    %c0_1 = arith.constant 0 : index
    %c0_2 = arith.constant 0 : index
    %1 = vector.load %arg3[%c0_1, %c0_2] : memref<8x6xbf16, #tpu.memory_space<vmem>>, vector<8x6xbf16>
    %c0_3 = arith.constant 0 : index
    %c0_4 = arith.constant 0 : index
    %2 = vector.load %arg0[%c0_3, %c0_4] : memref<6x16xf32, #tpu.memory_space<vmem>>, vector<6x16xf32>
    %3 = arith.truncf %2 : vector<6x16xf32> to vector<6x16xbf16>
    %cst = arith.constant dense<0.000000e+00> : vector<8x16xf32>
    %4 = tpu.matmul %1, %3, %cst {dimension_numbers = #tpu.dot_dimension_numbers<[1], [0], [0], [1], [0, 0, 1, 1], [], []>} : vector<8x6xbf16>, vector<6x16xbf16>, vector<8x16xf32> -> vector<8x16xf32>
    %c0_5 = arith.constant 0 : index
    %c0_6 = arith.constant 0 : index
    %5 = vector.load %arg4[%c0_5, %c0_6] : memref<8x1xf32, #tpu.memory_space<vmem>>, vector<8x1xf32>
    %6 = vector.broadcast %5 : vector<8x1xf32> to vector<8x16xf32>
    %7 = arith.addf %4, %6 : vector<8x16xf32>
    %c0_7 = arith.constant 0 : index
    %c0_8 = arith.constant 0 : index
    %8 = vector.load %arg1[%c0_7, %c0_8] : memref<8x16xf32, #tpu.memory_space<vmem>>, vector<8x16xf32>
    %9 = vector.broadcast %0 : vector<1x16xf32> to vector<8x16xf32>
    %10 = arith.mulf %8, %9 : vector<8x16xf32>
    %c0_9 = arith.constant 0 : index
    %c0_10 = arith.constant 0 : index
    %c0_11 = arith.constant 0 : index
    %11 = vector.load %arg5[%c0_9, %c0_10, %c0_11] : memref<3x24x8xbf16, #tpu.memory_space<vmem>>, vector<1x24x8xbf16>
    %12 = vector.shape_cast %11 : vector<1x24x8xbf16> to vector<24x8xbf16>
    %13 = arith.truncf %7 : vector<8x16xf32> to vector<8x16xbf16>
    %cst_12 = arith.constant dense<0.000000e+00> : vector<24x16xf32>
    %14 = tpu.matmul %12, %13, %cst_12 {dimension_numbers = #tpu.dot_dimension_numbers<[1], [0], [0], [1], [0, 0, 1, 1], [], []>} : vector<24x8xbf16>, vector<8x16xbf16>, vector<24x16xf32> -> vector<24x16xf32>
    %15 = vector.extract_strided_slice %14 {offsets = [0, 0], sizes = [8, 16], strides = [1, 1]} : vector<24x16xf32> to vector<8x16xf32>
    %16 = vector.extract_strided_slice %14 {offsets = [8, 0], sizes = [8, 16], strides = [1, 1]} : vector<24x16xf32> to vector<8x16xf32>
    %17 = vector.extract_strided_slice %14 {offsets = [16, 0], sizes = [8, 16], strides = [1, 1]} : vector<24x16xf32> to vector<8x16xf32>
    %cst_13 = arith.constant 0.000000e+00 : f32
    %18 = vector.broadcast %cst_13 : f32 to vector<8x1xf32>
    %19 = vector.extract_strided_slice %15 {offsets = [0, 0], sizes = [8, 15], strides = [1, 1]} : vector<8x16xf32> to vector<8x15xf32>
    %20 = tpu.concatenate %18, %19 in 1 : vector<8x1xf32>, vector<8x15xf32> -> vector<8x16xf32>
    %21 = arith.addf %20, %16 : vector<8x16xf32>
    %cst_14 = arith.constant 0.000000e+00 : f32
    %22 = vector.broadcast %cst_14 : f32 to vector<8x1xf32>
    %23 = vector.extract_strided_slice %17 {offsets = [0, 1], sizes = [8, 15], strides = [1, 1]} : vector<8x16xf32> to vector<8x15xf32>
    %24 = tpu.concatenate %23, %22 in 1 : vector<8x15xf32>, vector<8x1xf32> -> vector<8x16xf32>
    %25 = arith.addf %21, %24 : vector<8x16xf32>
    %c0_15 = arith.constant 0 : index
    %c0_16 = arith.constant 0 : index
    %c0_17 = arith.constant 0 : index
    %26 = vector.load %arg6[%c0_15, %c0_16, %c0_17] : memref<3x8x1xf32, #tpu.memory_space<vmem>>, vector<1x8x1xf32>
    %27 = vector.shape_cast %26 : vector<1x8x1xf32> to vector<8x1xf32>
    %28 = vector.broadcast %27 : vector<8x1xf32> to vector<8x16xf32>
    %29 = arith.addf %25, %28 : vector<8x16xf32>
    %cst_18 = arith.constant 0.000000e+00 : f32
    %30 = vector.broadcast %cst_18 : f32 to vector<8x16xf32>
    %31 = arith.maximumf %29, %30 : vector<8x16xf32>
    %c0_19 = arith.constant 0 : index
    %c0_20 = arith.constant 0 : index
    %c0_21 = arith.constant 0 : index
    %32 = vector.load %arg11[%c0_19, %c0_20, %c0_21] : memref<3x4x8xbf16, #tpu.memory_space<vmem>>, vector<1x4x8xbf16>
    %33 = vector.shape_cast %32 : vector<1x4x8xbf16> to vector<4x8xbf16>
    %34 = arith.truncf %10 : vector<8x16xf32> to vector<8x16xbf16>
    %cst_22 = arith.constant dense<0.000000e+00> : vector<4x16xf32>
    %35 = tpu.matmul %33, %34, %cst_22 {dimension_numbers = #tpu.dot_dimension_numbers<[1], [0], [0], [1], [0, 0, 1, 1], [], []>} : vector<4x8xbf16>, vector<8x16xbf16>, vector<4x16xf32> -> vector<4x16xf32>
    %c0_23 = arith.constant 0 : index
    %c0_24 = arith.constant 0 : index
    %c0_25 = arith.constant 0 : index
    %36 = vector.load %arg12[%c0_23, %c0_24, %c0_25] : memref<3x4x1xf32, #tpu.memory_space<vmem>>, vector<1x4x1xf32>
    %37 = vector.shape_cast %36 : vector<1x4x1xf32> to vector<4x1xf32>
    %38 = vector.broadcast %37 : vector<4x1xf32> to vector<4x16xf32>
    %39 = arith.addf %35, %38 : vector<4x16xf32>
    %40 = vector.broadcast %0 : vector<1x16xf32> to vector<4x16xf32>
    %41 = arith.mulf %39, %40 : vector<4x16xf32>
    %cst_26 = arith.constant 0.000000e+00 : f32
    %42 = vector.broadcast %cst_26 : f32 to vector<4x16xf32>
    %43 = arith.maximumf %41, %42 : vector<4x16xf32>
    %c0_27 = arith.constant 0 : index
    %c0_28 = arith.constant 0 : index
    %c0_29 = arith.constant 0 : index
    %44 = vector.load %arg13[%c0_27, %c0_28, %c0_29] : memref<3x8x4xbf16, #tpu.memory_space<vmem>>, vector<1x8x4xbf16>
    %45 = vector.shape_cast %44 : vector<1x8x4xbf16> to vector<8x4xbf16>
    %46 = arith.truncf %43 : vector<4x16xf32> to vector<4x16xbf16>
    %cst_30 = arith.constant dense<0.000000e+00> : vector<8x16xf32>
    %47 = tpu.matmul %45, %46, %cst_30 {dimension_numbers = #tpu.dot_dimension_numbers<[1], [0], [0], [1], [0, 0, 1, 1], [], []>} : vector<8x4xbf16>, vector<4x16xbf16>, vector<8x16xf32> -> vector<8x16xf32>
    %c0_31 = arith.constant 0 : index
    %c0_32 = arith.constant 0 : index
    %c0_33 = arith.constant 0 : index
    %48 = vector.load %arg14[%c0_31, %c0_32, %c0_33] : memref<3x8x1xf32, #tpu.memory_space<vmem>>, vector<1x8x1xf32>
    %49 = vector.shape_cast %48 : vector<1x8x1xf32> to vector<8x1xf32>
    %50 = vector.broadcast %49 : vector<8x1xf32> to vector<8x16xf32>
    %51 = arith.addf %47, %50 : vector<8x16xf32>
    %52 = vector.broadcast %0 : vector<1x16xf32> to vector<8x16xf32>
    %53 = arith.mulf %51, %52 : vector<8x16xf32>
    %cst_34 = arith.constant 0.0497870669 : f32
    %54 = vector.broadcast %cst_34 : f32 to vector<8x16xf32>
    %55 = arith.mulf %54, %53 : vector<8x16xf32>
    %56 = arith.addf %55, %31 : vector<8x16xf32>
    %c0_35 = arith.constant 0 : index
    %c0_36 = arith.constant 0 : index
    %c0_37 = arith.constant 0 : index
    %57 = vector.load %arg15[%c0_35, %c0_36, %c0_37] : memref<3x8x8xbf16, #tpu.memory_space<vmem>>, vector<1x8x8xbf16>
    %58 = vector.shape_cast %57 : vector<1x8x8xbf16> to vector<8x8xbf16>
    %59 = arith.truncf %56 : vector<8x16xf32> to vector<8x16xbf16>
    %cst_38 = arith.constant dense<0.000000e+00> : vector<8x16xf32>
    %60 = tpu.matmul %58, %59, %cst_38 {dimension_numbers = #tpu.dot_dimension_numbers<[1], [0], [0], [1], [0, 0, 1, 1], [], []>} : vector<8x8xbf16>, vector<8x16xbf16>, vector<8x16xf32> -> vector<8x16xf32>
    %c0_39 = arith.constant 0 : index
    %c0_40 = arith.constant 0 : index
    %c0_41 = arith.constant 0 : index
    %61 = vector.load %arg16[%c0_39, %c0_40, %c0_41] : memref<3x8x1xf32, #tpu.memory_space<vmem>>, vector<1x8x1xf32>
    %62 = vector.shape_cast %61 : vector<1x8x1xf32> to vector<8x1xf32>
    %63 = vector.broadcast %62 : vector<8x1xf32> to vector<8x16xf32>
    %64 = arith.addf %60, %63 : vector<8x16xf32>
    %65 = arith.addf %7, %64 : vector<8x16xf32>
    %66 = vector.broadcast %0 : vector<1x16xf32> to vector<8x16xf32>
    %67 = arith.mulf %65, %66 : vector<8x16xf32>
    %c1 = arith.constant 1 : index
    %c0_42 = arith.constant 0 : index
    %c0_43 = arith.constant 0 : index
    %68 = vector.load %arg5[%c1, %c0_42, %c0_43] : memref<3x24x8xbf16, #tpu.memory_space<vmem>>, vector<1x24x8xbf16>
    %69 = vector.shape_cast %68 : vector<1x24x8xbf16> to vector<24x8xbf16>
    %70 = arith.truncf %67 : vector<8x16xf32> to vector<8x16xbf16>
    %cst_44 = arith.constant dense<0.000000e+00> : vector<24x16xf32>
    %71 = tpu.matmul %69, %70, %cst_44 {dimension_numbers = #tpu.dot_dimension_numbers<[1], [0], [0], [1], [0, 0, 1, 1], [], []>} : vector<24x8xbf16>, vector<8x16xbf16>, vector<24x16xf32> -> vector<24x16xf32>
    %72 = vector.extract_strided_slice %71 {offsets = [0, 0], sizes = [8, 16], strides = [1, 1]} : vector<24x16xf32> to vector<8x16xf32>
    %73 = vector.extract_strided_slice %71 {offsets = [8, 0], sizes = [8, 16], strides = [1, 1]} : vector<24x16xf32> to vector<8x16xf32>
    %74 = vector.extract_strided_slice %71 {offsets = [16, 0], sizes = [8, 16], strides = [1, 1]} : vector<24x16xf32> to vector<8x16xf32>
    %cst_45 = arith.constant 0.000000e+00 : f32
    %75 = vector.broadcast %cst_45 : f32 to vector<8x2xf32>
    %76 = vector.extract_strided_slice %72 {offsets = [0, 0], sizes = [8, 14], strides = [1, 1]} : vector<8x16xf32> to vector<8x14xf32>
    %77 = tpu.concatenate %75, %76 in 1 : vector<8x2xf32>, vector<8x14xf32> -> vector<8x16xf32>
    %78 = arith.addf %77, %73 : vector<8x16xf32>
    %cst_46 = arith.constant 0.000000e+00 : f32
    %79 = vector.broadcast %cst_46 : f32 to vector<8x2xf32>
    %80 = vector.extract_strided_slice %74 {offsets = [0, 2], sizes = [8, 14], strides = [1, 1]} : vector<8x16xf32> to vector<8x14xf32>
    %81 = tpu.concatenate %80, %79 in 1 : vector<8x14xf32>, vector<8x2xf32> -> vector<8x16xf32>
    %82 = arith.addf %78, %81 : vector<8x16xf32>
    %c1_47 = arith.constant 1 : index
    %c0_48 = arith.constant 0 : index
    %c0_49 = arith.constant 0 : index
    %83 = vector.load %arg6[%c1_47, %c0_48, %c0_49] : memref<3x8x1xf32, #tpu.memory_space<vmem>>, vector<1x8x1xf32>
    %84 = vector.shape_cast %83 : vector<1x8x1xf32> to vector<8x1xf32>
    %85 = vector.broadcast %84 : vector<8x1xf32> to vector<8x16xf32>
    %86 = arith.addf %82, %85 : vector<8x16xf32>
    %cst_50 = arith.constant 0.000000e+00 : f32
    %87 = vector.broadcast %cst_50 : f32 to vector<8x16xf32>
    %88 = arith.maximumf %86, %87 : vector<8x16xf32>
    %cst_51 = arith.constant dense<0.000000e+00> : vector<8xf32>
    %89 = vector.multi_reduction <add>, %88, %cst_51 [1] : vector<8x16xf32> to vector<8xf32>
    %90 = vector.shape_cast %89 : vector<8xf32> to vector<8x1xf32>
    %cst_52 = arith.constant 1.600000e+01 : f32
    %91 = vector.broadcast %cst_52 : f32 to vector<8x1xf32>
    %92 = arith.divf %90, %91 : vector<8x1xf32>
    %93 = vector.broadcast %92 : vector<8x1xf32> to vector<8x16xf32>
    %94 = arith.subf %88, %93 : vector<8x16xf32>
    %95 = arith.mulf %94, %94 : vector<8x16xf32>
    %cst_53 = arith.constant dense<0.000000e+00> : vector<8xf32>
    %96 = vector.multi_reduction <add>, %95, %cst_53 [1] : vector<8x16xf32> to vector<8xf32>
    %97 = vector.shape_cast %96 : vector<8xf32> to vector<8x1xf32>
    %cst_54 = arith.constant 1.600000e+01 : f32
    %98 = vector.broadcast %cst_54 : f32 to vector<8x1xf32>
    %99 = arith.divf %97, %98 : vector<8x1xf32>
    %100 = vector.broadcast %92 : vector<8x1xf32> to vector<8x16xf32>
    %101 = arith.subf %88, %100 : vector<8x16xf32>
    %cst_55 = arith.constant 9.99999974E-6 : f32
    %102 = vector.broadcast %cst_55 : f32 to vector<8x1xf32>
    %103 = arith.addf %99, %102 : vector<8x1xf32>
    %104 = math.rsqrt %103 : vector<8x1xf32>
    %105 = vector.broadcast %104 : vector<8x1xf32> to vector<8x16xf32>
    %106 = arith.mulf %101, %105 : vector<8x16xf32>
    %c1_56 = arith.constant 1 : index
    %c0_57 = arith.constant 0 : index
    %c0_58 = arith.constant 0 : index
    %107 = vector.load %arg11[%c1_56, %c0_57, %c0_58] : memref<3x4x8xbf16, #tpu.memory_space<vmem>>, vector<1x4x8xbf16>
    %108 = vector.shape_cast %107 : vector<1x4x8xbf16> to vector<4x8xbf16>
    %109 = arith.truncf %10 : vector<8x16xf32> to vector<8x16xbf16>
    %cst_59 = arith.constant dense<0.000000e+00> : vector<4x16xf32>
    %110 = tpu.matmul %108, %109, %cst_59 {dimension_numbers = #tpu.dot_dimension_numbers<[1], [0], [0], [1], [0, 0, 1, 1], [], []>} : vector<4x8xbf16>, vector<8x16xbf16>, vector<4x16xf32> -> vector<4x16xf32>
    %c1_60 = arith.constant 1 : index
    %c0_61 = arith.constant 0 : index
    %c0_62 = arith.constant 0 : index
    %111 = vector.load %arg12[%c1_60, %c0_61, %c0_62] : memref<3x4x1xf32, #tpu.memory_space<vmem>>, vector<1x4x1xf32>
    %112 = vector.shape_cast %111 : vector<1x4x1xf32> to vector<4x1xf32>
    %113 = vector.broadcast %112 : vector<4x1xf32> to vector<4x16xf32>
    %114 = arith.addf %110, %113 : vector<4x16xf32>
    %c1_63 = arith.constant 1 : index
    %c0_64 = arith.constant 0 : index
    %c0_65 = arith.constant 0 : index
    %115 = vector.load %arg7[%c1_63, %c0_64, %c0_65] : memref<3x4x8xbf16, #tpu.memory_space<vmem>>, vector<1x4x8xbf16>
    %116 = vector.shape_cast %115 : vector<1x4x8xbf16> to vector<4x8xbf16>
    %117 = arith.truncf %106 : vector<8x16xf32> to vector<8x16xbf16>
    %cst_66 = arith.constant dense<0.000000e+00> : vector<4x16xf32>
    %118 = tpu.matmul %116, %117, %cst_66 {dimension_numbers = #tpu.dot_dimension_numbers<[1], [0], [0], [1], [0, 0, 1, 1], [], []>} : vector<4x8xbf16>, vector<8x16xbf16>, vector<4x16xf32> -> vector<4x16xf32>
    %c1_67 = arith.constant 1 : index
    %c0_68 = arith.constant 0 : index
    %c0_69 = arith.constant 0 : index
    %119 = vector.load %arg8[%c1_67, %c0_68, %c0_69] : memref<3x4x1xf32, #tpu.memory_space<vmem>>, vector<1x4x1xf32>
    %120 = vector.shape_cast %119 : vector<1x4x1xf32> to vector<4x1xf32>
    %121 = vector.broadcast %120 : vector<4x1xf32> to vector<4x16xf32>
    %122 = arith.addf %118, %121 : vector<4x16xf32>
    %c1_70 = arith.constant 1 : index
    %c0_71 = arith.constant 0 : index
    %c0_72 = arith.constant 0 : index
    %123 = vector.load %arg9[%c1_70, %c0_71, %c0_72] : memref<3x4x8xbf16, #tpu.memory_space<vmem>>, vector<1x4x8xbf16>
    %124 = vector.shape_cast %123 : vector<1x4x8xbf16> to vector<4x8xbf16>
    %125 = arith.truncf %106 : vector<8x16xf32> to vector<8x16xbf16>
    %cst_73 = arith.constant dense<0.000000e+00> : vector<4x16xf32>
    %126 = tpu.matmul %124, %125, %cst_73 {dimension_numbers = #tpu.dot_dimension_numbers<[1], [0], [0], [1], [0, 0, 1, 1], [], []>} : vector<4x8xbf16>, vector<8x16xbf16>, vector<4x16xf32> -> vector<4x16xf32>
    %c1_74 = arith.constant 1 : index
    %c0_75 = arith.constant 0 : index
    %c0_76 = arith.constant 0 : index
    %127 = vector.load %arg10[%c1_74, %c0_75, %c0_76] : memref<3x4x1xf32, #tpu.memory_space<vmem>>, vector<1x4x1xf32>
    %128 = vector.shape_cast %127 : vector<1x4x1xf32> to vector<4x1xf32>
    %129 = vector.broadcast %128 : vector<4x1xf32> to vector<4x16xf32>
    %130 = arith.addf %126, %129 : vector<4x16xf32>
    %cst_77 = arith.constant 0.000000e+00 : f32
    %131 = vector.broadcast %cst_77 : f32 to vector<4x1xf32>
    %132 = tpu.concatenate %131, %130, %131 in 1 : vector<4x1xf32>, vector<4x16xf32>, vector<4x1xf32> -> vector<4x18xf32>
    %cst_78 = arith.constant 0.000000e+00 : f32
    %133 = vector.broadcast %cst_78 : f32 to vector<4x1xf32>
    %134 = tpu.concatenate %133, %114, %133 in 1 : vector<4x1xf32>, vector<4x16xf32>, vector<4x1xf32> -> vector<4x18xf32>
    %cst_79 = arith.constant 0.000000e+00 : f32
    %135 = vector.broadcast %cst_79 : f32 to vector<1x1xf32>
    %136 = tpu.concatenate %135, %0, %135 in 1 : vector<1x1xf32>, vector<1x16xf32>, vector<1x1xf32> -> vector<1x18xf32>
    %137 = vector.extract_strided_slice %122 {offsets = [0, 0], sizes = [4, 2], strides = [1, 1]} : vector<4x16xf32> to vector<4x2xf32>
    %138 = vector.extract_strided_slice %122 {offsets = [0, 2], sizes = [4, 2], strides = [1, 1]} : vector<4x16xf32> to vector<4x2xf32>
    %139 = vector.extract_strided_slice %122 {offsets = [0, 4], sizes = [4, 2], strides = [1, 1]} : vector<4x16xf32> to vector<4x2xf32>
    %140 = vector.extract_strided_slice %122 {offsets = [0, 6], sizes = [4, 2], strides = [1, 1]} : vector<4x16xf32> to vector<4x2xf32>
    %141 = vector.extract_strided_slice %122 {offsets = [0, 8], sizes = [4, 2], strides = [1, 1]} : vector<4x16xf32> to vector<4x2xf32>
    %142 = vector.extract_strided_slice %122 {offsets = [0, 10], sizes = [4, 2], strides = [1, 1]} : vector<4x16xf32> to vector<4x2xf32>
    %143 = vector.extract_strided_slice %122 {offsets = [0, 12], sizes = [4, 2], strides = [1, 1]} : vector<4x16xf32> to vector<4x2xf32>
    %144 = vector.extract_strided_slice %122 {offsets = [0, 14], sizes = [4, 2], strides = [1, 1]} : vector<4x16xf32> to vector<4x2xf32>
    %145 = vector.shape_cast %137 : vector<4x2xf32> to vector<1x4x2xf32>
    %146 = vector.shape_cast %138 : vector<4x2xf32> to vector<1x4x2xf32>
    %147 = vector.shape_cast %139 : vector<4x2xf32> to vector<1x4x2xf32>
    %148 = vector.shape_cast %140 : vector<4x2xf32> to vector<1x4x2xf32>
    %149 = vector.shape_cast %141 : vector<4x2xf32> to vector<1x4x2xf32>
    %150 = vector.shape_cast %142 : vector<4x2xf32> to vector<1x4x2xf32>
    %151 = vector.shape_cast %143 : vector<4x2xf32> to vector<1x4x2xf32>
    %152 = vector.shape_cast %144 : vector<4x2xf32> to vector<1x4x2xf32>
    %153 = tpu.concatenate %145, %146, %147, %148, %149, %150, %151, %152 in 0 : vector<1x4x2xf32>, vector<1x4x2xf32>, vector<1x4x2xf32>, vector<1x4x2xf32>, vector<1x4x2xf32>, vector<1x4x2xf32>, vector<1x4x2xf32>, vector<1x4x2xf32> -> vector<8x4x2xf32>
    %154 = vector.extract_strided_slice %132 {offsets = [0, 0], sizes = [4, 4], strides = [1, 1]} : vector<4x18xf32> to vector<4x4xf32>
    %155 = vector.extract_strided_slice %132 {offsets = [0, 2], sizes = [4, 4], strides = [1, 1]} : vector<4x18xf32> to vector<4x4xf32>
    %156 = vector.extract_strided_slice %132 {offsets = [0, 4], sizes = [4, 4], strides = [1, 1]} : vector<4x18xf32> to vector<4x4xf32>
    %157 = vector.extract_strided_slice %132 {offsets = [0, 6], sizes = [4, 4], strides = [1, 1]} : vector<4x18xf32> to vector<4x4xf32>
    %158 = vector.extract_strided_slice %132 {offsets = [0, 8], sizes = [4, 4], strides = [1, 1]} : vector<4x18xf32> to vector<4x4xf32>
    %159 = vector.extract_strided_slice %132 {offsets = [0, 10], sizes = [4, 4], strides = [1, 1]} : vector<4x18xf32> to vector<4x4xf32>
    %160 = vector.extract_strided_slice %132 {offsets = [0, 12], sizes = [4, 4], strides = [1, 1]} : vector<4x18xf32> to vector<4x4xf32>
    %161 = vector.extract_strided_slice %132 {offsets = [0, 14], sizes = [4, 4], strides = [1, 1]} : vector<4x18xf32> to vector<4x4xf32>
    %162 = vector.shape_cast %154 : vector<4x4xf32> to vector<1x4x4xf32>
    %163 = vector.shape_cast %155 : vector<4x4xf32> to vector<1x4x4xf32>
    %164 = vector.shape_cast %156 : vector<4x4xf32> to vector<1x4x4xf32>
    %165 = vector.shape_cast %157 : vector<4x4xf32> to vector<1x4x4xf32>
    %166 = vector.shape_cast %158 : vector<4x4xf32> to vector<1x4x4xf32>
    %167 = vector.shape_cast %159 : vector<4x4xf32> to vector<1x4x4xf32>
    %168 = vector.shape_cast %160 : vector<4x4xf32> to vector<1x4x4xf32>
    %169 = vector.shape_cast %161 : vector<4x4xf32> to vector<1x4x4xf32>
    %170 = tpu.concatenate %162, %163, %164, %165, %166, %167, %168, %169 in 0 : vector<1x4x4xf32>, vector<1x4x4xf32>, vector<1x4x4xf32>, vector<1x4x4xf32>, vector<1x4x4xf32>, vector<1x4x4xf32>, vector<1x4x4xf32>, vector<1x4x4xf32> -> vector<8x4x4xf32>
    %171 = vector.extract_strided_slice %134 {offsets = [0, 0], sizes = [4, 4], strides = [1, 1]} : vector<4x18xf32> to vector<4x4xf32>
    %172 = vector.extract_strided_slice %134 {offsets = [0, 2], sizes = [4, 4], strides = [1, 1]} : vector<4x18xf32> to vector<4x4xf32>
    %173 = vector.extract_strided_slice %134 {offsets = [0, 4], sizes = [4, 4], strides = [1, 1]} : vector<4x18xf32> to vector<4x4xf32>
    %174 = vector.extract_strided_slice %134 {offsets = [0, 6], sizes = [4, 4], strides = [1, 1]} : vector<4x18xf32> to vector<4x4xf32>
    %175 = vector.extract_strided_slice %134 {offsets = [0, 8], sizes = [4, 4], strides = [1, 1]} : vector<4x18xf32> to vector<4x4xf32>
    %176 = vector.extract_strided_slice %134 {offsets = [0, 10], sizes = [4, 4], strides = [1, 1]} : vector<4x18xf32> to vector<4x4xf32>
    %177 = vector.extract_strided_slice %134 {offsets = [0, 12], sizes = [4, 4], strides = [1, 1]} : vector<4x18xf32> to vector<4x4xf32>
    %178 = vector.extract_strided_slice %134 {offsets = [0, 14], sizes = [4, 4], strides = [1, 1]} : vector<4x18xf32> to vector<4x4xf32>
    %179 = vector.shape_cast %171 : vector<4x4xf32> to vector<1x4x4xf32>
    %180 = vector.shape_cast %172 : vector<4x4xf32> to vector<1x4x4xf32>
    %181 = vector.shape_cast %173 : vector<4x4xf32> to vector<1x4x4xf32>
    %182 = vector.shape_cast %174 : vector<4x4xf32> to vector<1x4x4xf32>
    %183 = vector.shape_cast %175 : vector<4x4xf32> to vector<1x4x4xf32>
    %184 = vector.shape_cast %176 : vector<4x4xf32> to vector<1x4x4xf32>
    %185 = vector.shape_cast %177 : vector<4x4xf32> to vector<1x4x4xf32>
    %186 = vector.shape_cast %178 : vector<4x4xf32> to vector<1x4x4xf32>
    %187 = tpu.concatenate %179, %180, %181, %182, %183, %184, %185, %186 in 0 : vector<1x4x4xf32>, vector<1x4x4xf32>, vector<1x4x4xf32>, vector<1x4x4xf32>, vector<1x4x4xf32>, vector<1x4x4xf32>, vector<1x4x4xf32>, vector<1x4x4xf32> -> vector<8x4x4xf32>
    %188 = vector.extract_strided_slice %136 {offsets = [0, 0], sizes = [1, 4], strides = [1, 1]} : vector<1x18xf32> to vector<1x4xf32>
    %189 = vector.extract_strided_slice %136 {offsets = [0, 2], sizes = [1, 4], strides = [1, 1]} : vector<1x18xf32> to vector<1x4xf32>
    %190 = vector.extract_strided_slice %136 {offsets = [0, 4], sizes = [1, 4], strides = [1, 1]} : vector<1x18xf32> to vector<1x4xf32>
    %191 = vector.extract_strided_slice %136 {offsets = [0, 6], sizes = [1, 4], strides = [1, 1]} : vector<1x18xf32> to vector<1x4xf32>
    %192 = vector.extract_strided_slice %136 {offsets = [0, 8], sizes = [1, 4], strides = [1, 1]} : vector<1x18xf32> to vector<1x4xf32>
    %193 = vector.extract_strided_slice %136 {offsets = [0, 10], sizes = [1, 4], strides = [1, 1]} : vector<1x18xf32> to vector<1x4xf32>
    %194 = vector.extract_strided_slice %136 {offsets = [0, 12], sizes = [1, 4], strides = [1, 1]} : vector<1x18xf32> to vector<1x4xf32>
    %195 = vector.extract_strided_slice %136 {offsets = [0, 14], sizes = [1, 4], strides = [1, 1]} : vector<1x18xf32> to vector<1x4xf32>
    %196 = vector.shape_cast %188 : vector<1x4xf32> to vector<1x1x4xf32>
    %197 = vector.shape_cast %189 : vector<1x4xf32> to vector<1x1x4xf32>
    %198 = vector.shape_cast %190 : vector<1x4xf32> to vector<1x1x4xf32>
    %199 = vector.shape_cast %191 : vector<1x4xf32> to vector<1x1x4xf32>
    %200 = vector.shape_cast %192 : vector<1x4xf32> to vector<1x1x4xf32>
    %201 = vector.shape_cast %193 : vector<1x4xf32> to vector<1x1x4xf32>
    %202 = vector.shape_cast %194 : vector<1x4xf32> to vector<1x1x4xf32>
    %203 = vector.shape_cast %195 : vector<1x4xf32> to vector<1x1x4xf32>
    %204 = tpu.concatenate %196, %197, %198, %199, %200, %201, %202, %203 in 0 : vector<1x1x4xf32>, vector<1x1x4xf32>, vector<1x1x4xf32>, vector<1x1x4xf32>, vector<1x1x4xf32>, vector<1x1x4xf32>, vector<1x1x4xf32>, vector<1x1x4xf32> -> vector<8x1x4xf32>
    %205 = tpu.iota {dimensions = array<i32: 2>} : vector<1x1x4xi32>
    %c3_i32 = arith.constant 3 : i32
    %206 = vector.broadcast %c3_i32 : i32 to vector<1x1x4xi32>
    %207 = arith.cmpi slt, %205, %206 : vector<1x1x4xi32>
    %cst_80 = arith.constant 0.000000e+00 : f32
    %208 = vector.shape_cast %207 : vector<1x1x4xi1> to vector<1x1x4xi1>
    %209 = vector.broadcast %208 : vector<1x1x4xi1> to vector<8x1x4xi1>
    %210 = vector.broadcast %cst_80 : f32 to vector<8x1x4xf32>
    %211 = arith.select %209, %204, %210 : vector<8x1x4xi1>, vector<8x1x4xf32>
    %212 = arith.truncf %153 : vector<8x4x2xf32> to vector<8x4x2xbf16>
    %213 = arith.truncf %170 : vector<8x4x4xf32> to vector<8x4x4xbf16>
    %cst_81 = arith.constant dense<0.000000e+00> : vector<8x2x4xf32>
    %214 = tpu.matmul %212, %213, %cst_81 {dimension_numbers = #tpu.dot_dimension_numbers<[1], [1], [2], [2], [0, 0, 0, 2, 1, 2], [0], [0]>} : vector<8x4x2xbf16>, vector<8x4x4xbf16>, vector<8x2x4xf32> -> vector<8x2x4xf32>
    %cst_82 = arith.constant 5.000000e-01 : f32
    %215 = vector.broadcast %cst_82 : f32 to vector<8x2x4xf32>
    %216 = arith.mulf %214, %215 : vector<8x2x4xf32>
    %cst_83 = arith.constant 0.000000e+00 : f32
    %217 = vector.broadcast %cst_83 : f32 to vector<8x1x4xf32>
    %218 = arith.cmpf ogt, %211, %217 : vector<8x1x4xf32>
    %cst_84 = arith.constant 9.99999543E-7 : f32
    %cst_85 = arith.constant -13.8155107 : f32
    %219 = vector.broadcast %cst_84 : f32 to vector<8x1x4xf32>
    %220 = vector.broadcast %cst_85 : f32 to vector<8x1x4xf32>
    %221 = arith.select %218, %219, %220 : vector<8x1x4xi1>, vector<8x1x4xf32>
    %222 = vector.broadcast %221 : vector<8x1x4xf32> to vector<8x2x4xf32>
    %223 = arith.addf %216, %222 : vector<8x2x4xf32>
    %cst_86 = arith.constant dense<0xFF800000> : vector<8x2xf32>
    %224 = vector.multi_reduction <maximumf>, %223, %cst_86 [2] : vector<8x2x4xf32> to vector<8x2xf32>
    %225 = vector.shape_cast %224 : vector<8x2xf32> to vector<8x2x1xf32>
    %226 = vector.broadcast %225 : vector<8x2x1xf32> to vector<8x2x4xf32>
    %227 = arith.subf %223, %226 : vector<8x2x4xf32>
    %228 = math.exp %227 : vector<8x2x4xf32>
    %cst_87 = arith.constant dense<0.000000e+00> : vector<8x2xf32>
    %229 = vector.multi_reduction <add>, %228, %cst_87 [2] : vector<8x2x4xf32> to vector<8x2xf32>
    %230 = vector.shape_cast %229 : vector<8x2xf32> to vector<8x2x1xf32>
    %231 = tpu.reciprocal %230 {approx = true} : vector<8x2x1xf32> -> vector<8x2x1xf32>
    %232 = vector.broadcast %231 : vector<8x2x1xf32> to vector<8x2x4xf32>
    %233 = arith.mulf %228, %232 : vector<8x2x4xf32>
    %234 = vector.broadcast %211 : vector<8x1x4xf32> to vector<8x2x4xf32>
    %235 = arith.mulf %233, %234 : vector<8x2x4xf32>
    %236 = arith.truncf %187 : vector<8x4x4xf32> to vector<8x4x4xbf16>
    %237 = arith.truncf %235 : vector<8x2x4xf32> to vector<8x2x4xbf16>
    %cst_88 = arith.constant dense<0.000000e+00> : vector<8x4x2xf32>
    %238 = tpu.matmul %236, %237, %cst_88 {dimension_numbers = #tpu.dot_dimension_numbers<[2], [2], [1], [1], [0, 0, 0, 1, 1, 1], [0], [0]>} : vector<8x4x4xbf16>, vector<8x2x4xbf16>, vector<8x4x2xf32> -> vector<8x4x2xf32>
    %cst_89 = arith.constant 0.000000e+00 : f32
    %239 = vector.broadcast %cst_89 : f32 to vector<8x4x2xf32>
    %240 = arith.maximumf %238, %239 : vector<8x4x2xf32>
    %241 = vector.extract_strided_slice %240 {offsets = [0, 0, 0], sizes = [1, 4, 2], strides = [1, 1, 1]} : vector<8x4x2xf32> to vector<1x4x2xf32>
    %242 = vector.shape_cast %241 : vector<1x4x2xf32> to vector<4x2xf32>
    %243 = vector.extract_strided_slice %240 {offsets = [1, 0, 0], sizes = [1, 4, 2], strides = [1, 1, 1]} : vector<8x4x2xf32> to vector<1x4x2xf32>
    %244 = vector.shape_cast %243 : vector<1x4x2xf32> to vector<4x2xf32>
    %245 = vector.extract_strided_slice %240 {offsets = [2, 0, 0], sizes = [1, 4, 2], strides = [1, 1, 1]} : vector<8x4x2xf32> to vector<1x4x2xf32>
    %246 = vector.shape_cast %245 : vector<1x4x2xf32> to vector<4x2xf32>
    %247 = vector.extract_strided_slice %240 {offsets = [3, 0, 0], sizes = [1, 4, 2], strides = [1, 1, 1]} : vector<8x4x2xf32> to vector<1x4x2xf32>
    %248 = vector.shape_cast %247 : vector<1x4x2xf32> to vector<4x2xf32>
    %249 = vector.extract_strided_slice %240 {offsets = [4, 0, 0], sizes = [1, 4, 2], strides = [1, 1, 1]} : vector<8x4x2xf32> to vector<1x4x2xf32>
    %250 = vector.shape_cast %249 : vector<1x4x2xf32> to vector<4x2xf32>
    %251 = vector.extract_strided_slice %240 {offsets = [5, 0, 0], sizes = [1, 4, 2], strides = [1, 1, 1]} : vector<8x4x2xf32> to vector<1x4x2xf32>
    %252 = vector.shape_cast %251 : vector<1x4x2xf32> to vector<4x2xf32>
    %253 = vector.extract_strided_slice %240 {offsets = [6, 0, 0], sizes = [1, 4, 2], strides = [1, 1, 1]} : vector<8x4x2xf32> to vector<1x4x2xf32>
    %254 = vector.shape_cast %253 : vector<1x4x2xf32> to vector<4x2xf32>
    %255 = vector.extract_strided_slice %240 {offsets = [7, 0, 0], sizes = [1, 4, 2], strides = [1, 1, 1]} : vector<8x4x2xf32> to vector<1x4x2xf32>
    %256 = vector.shape_cast %255 : vector<1x4x2xf32> to vector<4x2xf32>
    %257 = tpu.concatenate %242, %244, %246, %248, %250, %252, %254, %256 in 1 : vector<4x2xf32>, vector<4x2xf32>, vector<4x2xf32>, vector<4x2xf32>, vector<4x2xf32>, vector<4x2xf32>, vector<4x2xf32>, vector<4x2xf32> -> vector<4x16xf32>
    %c1_90 = arith.constant 1 : index
    %c0_91 = arith.constant 0 : index
    %c0_92 = arith.constant 0 : index
    %258 = vector.load %arg13[%c1_90, %c0_91, %c0_92] : memref<3x8x4xbf16, #tpu.memory_space<vmem>>, vector<1x8x4xbf16>
    %259 = vector.shape_cast %258 : vector<1x8x4xbf16> to vector<8x4xbf16>
    %260 = arith.truncf %257 : vector<4x16xf32> to vector<4x16xbf16>
    %cst_93 = arith.constant dense<0.000000e+00> : vector<8x16xf32>
    %261 = tpu.matmul %259, %260, %cst_93 {dimension_numbers = #tpu.dot_dimension_numbers<[1], [0], [0], [1], [0, 0, 1, 1], [], []>} : vector<8x4xbf16>, vector<4x16xbf16>, vector<8x16xf32> -> vector<8x16xf32>
    %c1_94 = arith.constant 1 : index
    %c0_95 = arith.constant 0 : index
    %c0_96 = arith.constant 0 : index
    %262 = vector.load %arg14[%c1_94, %c0_95, %c0_96] : memref<3x8x1xf32, #tpu.memory_space<vmem>>, vector<1x8x1xf32>
    %263 = vector.shape_cast %262 : vector<1x8x1xf32> to vector<8x1xf32>
    %264 = vector.broadcast %263 : vector<8x1xf32> to vector<8x16xf32>
    %265 = arith.addf %261, %264 : vector<8x16xf32>
    %266 = vector.broadcast %0 : vector<1x16xf32> to vector<8x16xf32>
    %267 = arith.mulf %265, %266 : vector<8x16xf32>
    %cst_97 = arith.constant 0.0497870669 : f32
    %268 = vector.broadcast %cst_97 : f32 to vector<8x16xf32>
    %269 = arith.mulf %268, %267 : vector<8x16xf32>
    %270 = arith.addf %269, %88 : vector<8x16xf32>
    %c1_98 = arith.constant 1 : index
    %c0_99 = arith.constant 0 : index
    %c0_100 = arith.constant 0 : index
    %271 = vector.load %arg15[%c1_98, %c0_99, %c0_100] : memref<3x8x8xbf16, #tpu.memory_space<vmem>>, vector<1x8x8xbf16>
    %272 = vector.shape_cast %271 : vector<1x8x8xbf16> to vector<8x8xbf16>
    %273 = arith.truncf %270 : vector<8x16xf32> to vector<8x16xbf16>
    %cst_101 = arith.constant dense<0.000000e+00> : vector<8x16xf32>
    %274 = tpu.matmul %272, %273, %cst_101 {dimension_numbers = #tpu.dot_dimension_numbers<[1], [0], [0], [1], [0, 0, 1, 1], [], []>} : vector<8x8xbf16>, vector<8x16xbf16>, vector<8x16xf32> -> vector<8x16xf32>
    %c1_102 = arith.constant 1 : index
    %c0_103 = arith.constant 0 : index
    %c0_104 = arith.constant 0 : index
    %275 = vector.load %arg16[%c1_102, %c0_103, %c0_104] : memref<3x8x1xf32, #tpu.memory_space<vmem>>, vector<1x8x1xf32>
    %276 = vector.shape_cast %275 : vector<1x8x1xf32> to vector<8x1xf32>
    %277 = vector.broadcast %276 : vector<8x1xf32> to vector<8x16xf32>
    %278 = arith.addf %274, %277 : vector<8x16xf32>
    %279 = arith.addf %67, %278 : vector<8x16xf32>
    %280 = vector.broadcast %0 : vector<1x16xf32> to vector<8x16xf32>
    %281 = arith.mulf %279, %280 : vector<8x16xf32>
    %c2 = arith.constant 2 : index
    %c0_105 = arith.constant 0 : index
    %c0_106 = arith.constant 0 : index
    %282 = vector.load %arg5[%c2, %c0_105, %c0_106] : memref<3x24x8xbf16, #tpu.memory_space<vmem>>, vector<1x24x8xbf16>
    %283 = vector.shape_cast %282 : vector<1x24x8xbf16> to vector<24x8xbf16>
    %284 = arith.truncf %281 : vector<8x16xf32> to vector<8x16xbf16>
    %cst_107 = arith.constant dense<0.000000e+00> : vector<24x16xf32>
    %285 = tpu.matmul %283, %284, %cst_107 {dimension_numbers = #tpu.dot_dimension_numbers<[1], [0], [0], [1], [0, 0, 1, 1], [], []>} : vector<24x8xbf16>, vector<8x16xbf16>, vector<24x16xf32> -> vector<24x16xf32>
    %286 = vector.extract_strided_slice %285 {offsets = [0, 0], sizes = [8, 16], strides = [1, 1]} : vector<24x16xf32> to vector<8x16xf32>
    %287 = vector.extract_strided_slice %285 {offsets = [8, 0], sizes = [8, 16], strides = [1, 1]} : vector<24x16xf32> to vector<8x16xf32>
    %288 = vector.extract_strided_slice %285 {offsets = [16, 0], sizes = [8, 16], strides = [1, 1]} : vector<24x16xf32> to vector<8x16xf32>
    %cst_108 = arith.constant 0.000000e+00 : f32
    %289 = vector.broadcast %cst_108 : f32 to vector<8x4xf32>
    %290 = vector.extract_strided_slice %286 {offsets = [0, 0], sizes = [8, 12], strides = [1, 1]} : vector<8x16xf32> to vector<8x12xf32>
    %291 = tpu.concatenate %289, %290 in 1 : vector<8x4xf32>, vector<8x12xf32> -> vector<8x16xf32>
    %292 = arith.addf %291, %287 : vector<8x16xf32>
    %cst_109 = arith.constant 0.000000e+00 : f32
    %293 = vector.broadcast %cst_109 : f32 to vector<8x4xf32>
    %294 = vector.extract_strided_slice %288 {offsets = [0, 4], sizes = [8, 12], strides = [1, 1]} : vector<8x16xf32> to vector<8x12xf32>
    %295 = tpu.concatenate %294, %293 in 1 : vector<8x12xf32>, vector<8x4xf32> -> vector<8x16xf32>
    %296 = arith.addf %292, %295 : vector<8x16xf32>
    %c2_110 = arith.constant 2 : index
    %c0_111 = arith.constant 0 : index
    %c0_112 = arith.constant 0 : index
    %297 = vector.load %arg6[%c2_110, %c0_111, %c0_112] : memref<3x8x1xf32, #tpu.memory_space<vmem>>, vector<1x8x1xf32>
    %298 = vector.shape_cast %297 : vector<1x8x1xf32> to vector<8x1xf32>
    %299 = vector.broadcast %298 : vector<8x1xf32> to vector<8x16xf32>
    %300 = arith.addf %296, %299 : vector<8x16xf32>
    %cst_113 = arith.constant 0.000000e+00 : f32
    %301 = vector.broadcast %cst_113 : f32 to vector<8x16xf32>
    %302 = arith.maximumf %300, %301 : vector<8x16xf32>
    %cst_114 = arith.constant dense<0.000000e+00> : vector<8xf32>
    %303 = vector.multi_reduction <add>, %302, %cst_114 [1] : vector<8x16xf32> to vector<8xf32>
    %304 = vector.shape_cast %303 : vector<8xf32> to vector<8x1xf32>
    %cst_115 = arith.constant 1.600000e+01 : f32
    %305 = vector.broadcast %cst_115 : f32 to vector<8x1xf32>
    %306 = arith.divf %304, %305 : vector<8x1xf32>
    %307 = vector.broadcast %306 : vector<8x1xf32> to vector<8x16xf32>
    %308 = arith.subf %302, %307 : vector<8x16xf32>
    %309 = arith.mulf %308, %308 : vector<8x16xf32>
    %cst_116 = arith.constant dense<0.000000e+00> : vector<8xf32>
    %310 = vector.multi_reduction <add>, %309, %cst_116 [1] : vector<8x16xf32> to vector<8xf32>
    %311 = vector.shape_cast %310 : vector<8xf32> to vector<8x1xf32>
    %cst_117 = arith.constant 1.600000e+01 : f32
    %312 = vector.broadcast %cst_117 : f32 to vector<8x1xf32>
    %313 = arith.divf %311, %312 : vector<8x1xf32>
    %314 = vector.broadcast %306 : vector<8x1xf32> to vector<8x16xf32>
    %315 = arith.subf %302, %314 : vector<8x16xf32>
    %cst_118 = arith.constant 9.99999974E-6 : f32
    %316 = vector.broadcast %cst_118 : f32 to vector<8x1xf32>
    %317 = arith.addf %313, %316 : vector<8x1xf32>
    %318 = math.rsqrt %317 : vector<8x1xf32>
    %319 = vector.broadcast %318 : vector<8x1xf32> to vector<8x16xf32>
    %320 = arith.mulf %315, %319 : vector<8x16xf32>
    %c2_119 = arith.constant 2 : index
    %c0_120 = arith.constant 0 : index
    %c0_121 = arith.constant 0 : index
    %321 = vector.load %arg11[%c2_119, %c0_120, %c0_121] : memref<3x4x8xbf16, #tpu.memory_space<vmem>>, vector<1x4x8xbf16>
    %322 = vector.shape_cast %321 : vector<1x4x8xbf16> to vector<4x8xbf16>
    %323 = arith.truncf %10 : vector<8x16xf32> to vector<8x16xbf16>
    %cst_122 = arith.constant dense<0.000000e+00> : vector<4x16xf32>
    %324 = tpu.matmul %322, %323, %cst_122 {dimension_numbers = #tpu.dot_dimension_numbers<[1], [0], [0], [1], [0, 0, 1, 1], [], []>} : vector<4x8xbf16>, vector<8x16xbf16>, vector<4x16xf32> -> vector<4x16xf32>
    %c2_123 = arith.constant 2 : index
    %c0_124 = arith.constant 0 : index
    %c0_125 = arith.constant 0 : index
    %325 = vector.load %arg12[%c2_123, %c0_124, %c0_125] : memref<3x4x1xf32, #tpu.memory_space<vmem>>, vector<1x4x1xf32>
    %326 = vector.shape_cast %325 : vector<1x4x1xf32> to vector<4x1xf32>
    %327 = vector.broadcast %326 : vector<4x1xf32> to vector<4x16xf32>
    %328 = arith.addf %324, %327 : vector<4x16xf32>
    %c2_126 = arith.constant 2 : index
    %c0_127 = arith.constant 0 : index
    %c0_128 = arith.constant 0 : index
    %329 = vector.load %arg7[%c2_126, %c0_127, %c0_128] : memref<3x4x8xbf16, #tpu.memory_space<vmem>>, vector<1x4x8xbf16>
    %330 = vector.shape_cast %329 : vector<1x4x8xbf16> to vector<4x8xbf16>
    %331 = arith.truncf %320 : vector<8x16xf32> to vector<8x16xbf16>
    %cst_129 = arith.constant dense<0.000000e+00> : vector<4x16xf32>
    %332 = tpu.matmul %330, %331, %cst_129 {dimension_numbers = #tpu.dot_dimension_numbers<[1], [0], [0], [1], [0, 0, 1, 1], [], []>} : vector<4x8xbf16>, vector<8x16xbf16>, vector<4x16xf32> -> vector<4x16xf32>
    %c2_130 = arith.constant 2 : index
    %c0_131 = arith.constant 0 : index
    %c0_132 = arith.constant 0 : index
    %333 = vector.load %arg8[%c2_130, %c0_131, %c0_132] : memref<3x4x1xf32, #tpu.memory_space<vmem>>, vector<1x4x1xf32>
    %334 = vector.shape_cast %333 : vector<1x4x1xf32> to vector<4x1xf32>
    %335 = vector.broadcast %334 : vector<4x1xf32> to vector<4x16xf32>
    %336 = arith.addf %332, %335 : vector<4x16xf32>
    %c2_133 = arith.constant 2 : index
    %c0_134 = arith.constant 0 : index
    %c0_135 = arith.constant 0 : index
    %337 = vector.load %arg9[%c2_133, %c0_134, %c0_135] : memref<3x4x8xbf16, #tpu.memory_space<vmem>>, vector<1x4x8xbf16>
    %338 = vector.shape_cast %337 : vector<1x4x8xbf16> to vector<4x8xbf16>
    %339 = arith.truncf %320 : vector<8x16xf32> to vector<8x16xbf16>
    %cst_136 = arith.constant dense<0.000000e+00> : vector<4x16xf32>
    %340 = tpu.matmul %338, %339, %cst_136 {dimension_numbers = #tpu.dot_dimension_numbers<[1], [0], [0], [1], [0, 0, 1, 1], [], []>} : vector<4x8xbf16>, vector<8x16xbf16>, vector<4x16xf32> -> vector<4x16xf32>
    %c2_137 = arith.constant 2 : index
    %c0_138 = arith.constant 0 : index
    %c0_139 = arith.constant 0 : index
    %341 = vector.load %arg10[%c2_137, %c0_138, %c0_139] : memref<3x4x1xf32, #tpu.memory_space<vmem>>, vector<1x4x1xf32>
    %342 = vector.shape_cast %341 : vector<1x4x1xf32> to vector<4x1xf32>
    %343 = vector.broadcast %342 : vector<4x1xf32> to vector<4x16xf32>
    %344 = arith.addf %340, %343 : vector<4x16xf32>
    %cst_140 = arith.constant 0.000000e+00 : f32
    %345 = vector.broadcast %cst_140 : f32 to vector<4x2xf32>
    %346 = tpu.concatenate %345, %344, %345 in 1 : vector<4x2xf32>, vector<4x16xf32>, vector<4x2xf32> -> vector<4x20xf32>
    %cst_141 = arith.constant 0.000000e+00 : f32
    %347 = vector.broadcast %cst_141 : f32 to vector<4x2xf32>
    %348 = tpu.concatenate %347, %328, %347 in 1 : vector<4x2xf32>, vector<4x16xf32>, vector<4x2xf32> -> vector<4x20xf32>
    %cst_142 = arith.constant 0.000000e+00 : f32
    %349 = vector.broadcast %cst_142 : f32 to vector<1x2xf32>
    %350 = tpu.concatenate %349, %0, %349 in 1 : vector<1x2xf32>, vector<1x16xf32>, vector<1x2xf32> -> vector<1x20xf32>
    %351 = vector.extract_strided_slice %336 {offsets = [0, 0], sizes = [4, 4], strides = [1, 1]} : vector<4x16xf32> to vector<4x4xf32>
    %352 = vector.extract_strided_slice %336 {offsets = [0, 4], sizes = [4, 4], strides = [1, 1]} : vector<4x16xf32> to vector<4x4xf32>
    %353 = vector.extract_strided_slice %336 {offsets = [0, 8], sizes = [4, 4], strides = [1, 1]} : vector<4x16xf32> to vector<4x4xf32>
    %354 = vector.extract_strided_slice %336 {offsets = [0, 12], sizes = [4, 4], strides = [1, 1]} : vector<4x16xf32> to vector<4x4xf32>
    %355 = vector.shape_cast %351 : vector<4x4xf32> to vector<1x4x4xf32>
    %356 = vector.shape_cast %352 : vector<4x4xf32> to vector<1x4x4xf32>
    %357 = vector.shape_cast %353 : vector<4x4xf32> to vector<1x4x4xf32>
    %358 = vector.shape_cast %354 : vector<4x4xf32> to vector<1x4x4xf32>
    %359 = tpu.concatenate %355, %356, %357, %358 in 0 : vector<1x4x4xf32>, vector<1x4x4xf32>, vector<1x4x4xf32>, vector<1x4x4xf32> -> vector<4x4x4xf32>
    %360 = vector.extract_strided_slice %346 {offsets = [0, 0], sizes = [4, 8], strides = [1, 1]} : vector<4x20xf32> to vector<4x8xf32>
    %361 = vector.extract_strided_slice %346 {offsets = [0, 4], sizes = [4, 8], strides = [1, 1]} : vector<4x20xf32> to vector<4x8xf32>
    %362 = vector.extract_strided_slice %346 {offsets = [0, 8], sizes = [4, 8], strides = [1, 1]} : vector<4x20xf32> to vector<4x8xf32>
    %363 = vector.extract_strided_slice %346 {offsets = [0, 12], sizes = [4, 8], strides = [1, 1]} : vector<4x20xf32> to vector<4x8xf32>
    %364 = vector.shape_cast %360 : vector<4x8xf32> to vector<1x4x8xf32>
    %365 = vector.shape_cast %361 : vector<4x8xf32> to vector<1x4x8xf32>
    %366 = vector.shape_cast %362 : vector<4x8xf32> to vector<1x4x8xf32>
    %367 = vector.shape_cast %363 : vector<4x8xf32> to vector<1x4x8xf32>
    %368 = tpu.concatenate %364, %365, %366, %367 in 0 : vector<1x4x8xf32>, vector<1x4x8xf32>, vector<1x4x8xf32>, vector<1x4x8xf32> -> vector<4x4x8xf32>
    %369 = vector.extract_strided_slice %348 {offsets = [0, 0], sizes = [4, 8], strides = [1, 1]} : vector<4x20xf32> to vector<4x8xf32>
    %370 = vector.extract_strided_slice %348 {offsets = [0, 4], sizes = [4, 8], strides = [1, 1]} : vector<4x20xf32> to vector<4x8xf32>
    %371 = vector.extract_strided_slice %348 {offsets = [0, 8], sizes = [4, 8], strides = [1, 1]} : vector<4x20xf32> to vector<4x8xf32>
    %372 = vector.extract_strided_slice %348 {offsets = [0, 12], sizes = [4, 8], strides = [1, 1]} : vector<4x20xf32> to vector<4x8xf32>
    %373 = vector.shape_cast %369 : vector<4x8xf32> to vector<1x4x8xf32>
    %374 = vector.shape_cast %370 : vector<4x8xf32> to vector<1x4x8xf32>
    %375 = vector.shape_cast %371 : vector<4x8xf32> to vector<1x4x8xf32>
    %376 = vector.shape_cast %372 : vector<4x8xf32> to vector<1x4x8xf32>
    %377 = tpu.concatenate %373, %374, %375, %376 in 0 : vector<1x4x8xf32>, vector<1x4x8xf32>, vector<1x4x8xf32>, vector<1x4x8xf32> -> vector<4x4x8xf32>
    %378 = vector.extract_strided_slice %350 {offsets = [0, 0], sizes = [1, 8], strides = [1, 1]} : vector<1x20xf32> to vector<1x8xf32>
    %379 = vector.extract_strided_slice %350 {offsets = [0, 4], sizes = [1, 8], strides = [1, 1]} : vector<1x20xf32> to vector<1x8xf32>
    %380 = vector.extract_strided_slice %350 {offsets = [0, 8], sizes = [1, 8], strides = [1, 1]} : vector<1x20xf32> to vector<1x8xf32>
    %381 = vector.extract_strided_slice %350 {offsets = [0, 12], sizes = [1, 8], strides = [1, 1]} : vector<1x20xf32> to vector<1x8xf32>
    %382 = vector.shape_cast %378 : vector<1x8xf32> to vector<1x1x8xf32>
    %383 = vector.shape_cast %379 : vector<1x8xf32> to vector<1x1x8xf32>
    %384 = vector.shape_cast %380 : vector<1x8xf32> to vector<1x1x8xf32>
    %385 = vector.shape_cast %381 : vector<1x8xf32> to vector<1x1x8xf32>
    %386 = tpu.concatenate %382, %383, %384, %385 in 0 : vector<1x1x8xf32>, vector<1x1x8xf32>, vector<1x1x8xf32>, vector<1x1x8xf32> -> vector<4x1x8xf32>
    %387 = tpu.iota {dimensions = array<i32: 2>} : vector<1x1x8xi32>
    %c7_i32 = arith.constant 7 : i32
    %388 = vector.broadcast %c7_i32 : i32 to vector<1x1x8xi32>
    %389 = arith.cmpi slt, %387, %388 : vector<1x1x8xi32>
    %cst_143 = arith.constant 0.000000e+00 : f32
    %390 = vector.shape_cast %389 : vector<1x1x8xi1> to vector<1x1x8xi1>
    %391 = vector.broadcast %390 : vector<1x1x8xi1> to vector<4x1x8xi1>
    %392 = vector.broadcast %cst_143 : f32 to vector<4x1x8xf32>
    %393 = arith.select %391, %386, %392 : vector<4x1x8xi1>, vector<4x1x8xf32>
    %394 = arith.truncf %359 : vector<4x4x4xf32> to vector<4x4x4xbf16>
    %395 = arith.truncf %368 : vector<4x4x8xf32> to vector<4x4x8xbf16>
    %cst_144 = arith.constant dense<0.000000e+00> : vector<4x4x8xf32>
    %396 = tpu.matmul %394, %395, %cst_144 {dimension_numbers = #tpu.dot_dimension_numbers<[1], [1], [2], [2], [0, 0, 0, 2, 1, 2], [0], [0]>} : vector<4x4x4xbf16>, vector<4x4x8xbf16>, vector<4x4x8xf32> -> vector<4x4x8xf32>
    %cst_145 = arith.constant 5.000000e-01 : f32
    %397 = vector.broadcast %cst_145 : f32 to vector<4x4x8xf32>
    %398 = arith.mulf %396, %397 : vector<4x4x8xf32>
    %cst_146 = arith.constant 0.000000e+00 : f32
    %399 = vector.broadcast %cst_146 : f32 to vector<4x1x8xf32>
    %400 = arith.cmpf ogt, %393, %399 : vector<4x1x8xf32>
    %cst_147 = arith.constant 9.99999543E-7 : f32
    %cst_148 = arith.constant -13.8155107 : f32
    %401 = vector.broadcast %cst_147 : f32 to vector<4x1x8xf32>
    %402 = vector.broadcast %cst_148 : f32 to vector<4x1x8xf32>
    %403 = arith.select %400, %401, %402 : vector<4x1x8xi1>, vector<4x1x8xf32>
    %404 = vector.broadcast %403 : vector<4x1x8xf32> to vector<4x4x8xf32>
    %405 = arith.addf %398, %404 : vector<4x4x8xf32>
    %cst_149 = arith.constant dense<0xFF800000> : vector<4x4xf32>
    %406 = vector.multi_reduction <maximumf>, %405, %cst_149 [2] : vector<4x4x8xf32> to vector<4x4xf32>
    %407 = vector.shape_cast %406 : vector<4x4xf32> to vector<4x4x1xf32>
    %408 = vector.broadcast %407 : vector<4x4x1xf32> to vector<4x4x8xf32>
    %409 = arith.subf %405, %408 : vector<4x4x8xf32>
    %410 = math.exp %409 : vector<4x4x8xf32>
    %cst_150 = arith.constant dense<0.000000e+00> : vector<4x4xf32>
    %411 = vector.multi_reduction <add>, %410, %cst_150 [2] : vector<4x4x8xf32> to vector<4x4xf32>
    %412 = vector.shape_cast %411 : vector<4x4xf32> to vector<4x4x1xf32>
    %413 = tpu.reciprocal %412 {approx = true} : vector<4x4x1xf32> -> vector<4x4x1xf32>
    %414 = vector.broadcast %413 : vector<4x4x1xf32> to vector<4x4x8xf32>
    %415 = arith.mulf %410, %414 : vector<4x4x8xf32>
    %416 = vector.broadcast %393 : vector<4x1x8xf32> to vector<4x4x8xf32>
    %417 = arith.mulf %415, %416 : vector<4x4x8xf32>
    %418 = arith.truncf %377 : vector<4x4x8xf32> to vector<4x4x8xbf16>
    %419 = arith.truncf %417 : vector<4x4x8xf32> to vector<4x4x8xbf16>
    %cst_151 = arith.constant dense<0.000000e+00> : vector<4x4x4xf32>
    %420 = tpu.matmul %418, %419, %cst_151 {dimension_numbers = #tpu.dot_dimension_numbers<[2], [2], [1], [1], [0, 0, 0, 1, 1, 1], [0], [0]>} : vector<4x4x8xbf16>, vector<4x4x8xbf16>, vector<4x4x4xf32> -> vector<4x4x4xf32>
    %cst_152 = arith.constant 0.000000e+00 : f32
    %421 = vector.broadcast %cst_152 : f32 to vector<4x4x4xf32>
    %422 = arith.maximumf %420, %421 : vector<4x4x4xf32>
    %423 = vector.extract_strided_slice %422 {offsets = [0, 0, 0], sizes = [1, 4, 4], strides = [1, 1, 1]} : vector<4x4x4xf32> to vector<1x4x4xf32>
    %424 = vector.shape_cast %423 : vector<1x4x4xf32> to vector<4x4xf32>
    %425 = vector.extract_strided_slice %422 {offsets = [1, 0, 0], sizes = [1, 4, 4], strides = [1, 1, 1]} : vector<4x4x4xf32> to vector<1x4x4xf32>
    %426 = vector.shape_cast %425 : vector<1x4x4xf32> to vector<4x4xf32>
    %427 = vector.extract_strided_slice %422 {offsets = [2, 0, 0], sizes = [1, 4, 4], strides = [1, 1, 1]} : vector<4x4x4xf32> to vector<1x4x4xf32>
    %428 = vector.shape_cast %427 : vector<1x4x4xf32> to vector<4x4xf32>
    %429 = vector.extract_strided_slice %422 {offsets = [3, 0, 0], sizes = [1, 4, 4], strides = [1, 1, 1]} : vector<4x4x4xf32> to vector<1x4x4xf32>
    %430 = vector.shape_cast %429 : vector<1x4x4xf32> to vector<4x4xf32>
    %431 = tpu.concatenate %424, %426, %428, %430 in 1 : vector<4x4xf32>, vector<4x4xf32>, vector<4x4xf32>, vector<4x4xf32> -> vector<4x16xf32>
    %c2_153 = arith.constant 2 : index
    %c0_154 = arith.constant 0 : index
    %c0_155 = arith.constant 0 : index
    %432 = vector.load %arg13[%c2_153, %c0_154, %c0_155] : memref<3x8x4xbf16, #tpu.memory_space<vmem>>, vector<1x8x4xbf16>
    %433 = vector.shape_cast %432 : vector<1x8x4xbf16> to vector<8x4xbf16>
    %434 = arith.truncf %431 : vector<4x16xf32> to vector<4x16xbf16>
    %cst_156 = arith.constant dense<0.000000e+00> : vector<8x16xf32>
    %435 = tpu.matmul %433, %434, %cst_156 {dimension_numbers = #tpu.dot_dimension_numbers<[1], [0], [0], [1], [0, 0, 1, 1], [], []>} : vector<8x4xbf16>, vector<4x16xbf16>, vector<8x16xf32> -> vector<8x16xf32>
    %c2_157 = arith.constant 2 : index
    %c0_158 = arith.constant 0 : index
    %c0_159 = arith.constant 0 : index
    %436 = vector.load %arg14[%c2_157, %c0_158, %c0_159] : memref<3x8x1xf32, #tpu.memory_space<vmem>>, vector<1x8x1xf32>
    %437 = vector.shape_cast %436 : vector<1x8x1xf32> to vector<8x1xf32>
    %438 = vector.broadcast %437 : vector<8x1xf32> to vector<8x16xf32>
    %439 = arith.addf %435, %438 : vector<8x16xf32>
    %440 = vector.broadcast %0 : vector<1x16xf32> to vector<8x16xf32>
    %441 = arith.mulf %439, %440 : vector<8x16xf32>
    %cst_160 = arith.constant 0.0497870669 : f32
    %442 = vector.broadcast %cst_160 : f32 to vector<8x16xf32>
    %443 = arith.mulf %442, %441 : vector<8x16xf32>
    %444 = arith.addf %443, %302 : vector<8x16xf32>
    %c2_161 = arith.constant 2 : index
    %c0_162 = arith.constant 0 : index
    %c0_163 = arith.constant 0 : index
    %445 = vector.load %arg15[%c2_161, %c0_162, %c0_163] : memref<3x8x8xbf16, #tpu.memory_space<vmem>>, vector<1x8x8xbf16>
    %446 = vector.shape_cast %445 : vector<1x8x8xbf16> to vector<8x8xbf16>
    %447 = arith.truncf %444 : vector<8x16xf32> to vector<8x16xbf16>
    %cst_164 = arith.constant dense<0.000000e+00> : vector<8x16xf32>
    %448 = tpu.matmul %446, %447, %cst_164 {dimension_numbers = #tpu.dot_dimension_numbers<[1], [0], [0], [1], [0, 0, 1, 1], [], []>} : vector<8x8xbf16>, vector<8x16xbf16>, vector<8x16xf32> -> vector<8x16xf32>
    %c2_165 = arith.constant 2 : index
    %c0_166 = arith.constant 0 : index
    %c0_167 = arith.constant 0 : index
    %449 = vector.load %arg16[%c2_165, %c0_166, %c0_167] : memref<3x8x1xf32, #tpu.memory_space<vmem>>, vector<1x8x1xf32>
    %450 = vector.shape_cast %449 : vector<1x8x1xf32> to vector<8x1xf32>
    %451 = vector.broadcast %450 : vector<8x1xf32> to vector<8x16xf32>
    %452 = arith.addf %448, %451 : vector<8x16xf32>
    %453 = arith.addf %281, %452 : vector<8x16xf32>
    %454 = vector.broadcast %0 : vector<1x16xf32> to vector<8x16xf32>
    %455 = arith.mulf %453, %454 : vector<8x16xf32>
    %c0_168 = arith.constant 0 : index
    %c0_169 = arith.constant 0 : index
    %456 = vector.load %arg17[%c0_168, %c0_169] : memref<6x8xbf16, #tpu.memory_space<vmem>>, vector<6x8xbf16>
    %457 = arith.truncf %455 : vector<8x16xf32> to vector<8x16xbf16>
    %cst_170 = arith.constant dense<0.000000e+00> : vector<6x16xf32>
    %458 = tpu.matmul %456, %457, %cst_170 {dimension_numbers = #tpu.dot_dimension_numbers<[1], [0], [0], [1], [0, 0, 1, 1], [], []>} : vector<6x8xbf16>, vector<8x16xbf16>, vector<6x16xf32> -> vector<6x16xf32>
    %c0_171 = arith.constant 0 : index
    %c0_172 = arith.constant 0 : index
    %459 = vector.load %arg18[%c0_171, %c0_172] : memref<6x1xf32, #tpu.memory_space<vmem>>, vector<6x1xf32>
    %460 = vector.broadcast %459 : vector<6x1xf32> to vector<6x16xf32>
    %461 = arith.addf %458, %460 : vector<6x16xf32>
    %462 = vector.broadcast %0 : vector<1x16xf32> to vector<6x16xf32>
    %463 = arith.mulf %461, %462 : vector<6x16xf32>
    %c0_173 = arith.constant 0 : index
    %c0_174 = arith.constant 0 : index
    %464 = vector.load %arg19[%c0_173, %c0_174] : memref<6x16xf32, #tpu.memory_space<vmem>>, vector<6x16xf32>
    tpu.vector_store %arg19[%c0_173, %c0_174], %463 {strides = array<i32>} : memref<6x16xf32, #tpu.memory_space<vmem>>, vector<6x16xf32>,
    %c0_175 = arith.constant 0 : index
    %c0_176 = arith.constant 0 : index
    %465 = vector.load %arg20[%c0_175, %c0_176] : memref<8x16xf32, #tpu.memory_space<vmem>>, vector<8x16xf32>
    tpu.vector_store %arg20[%c0_175, %c0_176], %455 {strides = array<i32>} : memref<8x16xf32, #tpu.memory_space<vmem>>, vector<8x16xf32>,
    %cst_177 = arith.constant dense<0xFF800000> : vector<16xf32>
    %466 = vector.multi_reduction <maximumf>, %463, %cst_177 [0] : vector<6x16xf32> to vector<16xf32>
    %467 = vector.shape_cast %466 : vector<16xf32> to vector<1x16xf32>
    %468 = vector.broadcast %467 : vector<1x16xf32> to vector<6x16xf32>
    %469 = arith.subf %463, %468 : vector<6x16xf32>
    %470 = math.exp %469 : vector<6x16xf32>
    %cst_178 = arith.constant dense<0.000000e+00> : vector<16xf32>
    %471 = vector.multi_reduction <add>, %470, %cst_178 [0] : vector<6x16xf32> to vector<16xf32>
    %472 = vector.shape_cast %471 : vector<16xf32> to vector<1x16xf32>
    %473 = tpu.reciprocal %472 {approx = true} : vector<1x16xf32> -> vector<1x16xf32>
    %474 = vector.broadcast %473 : vector<1x16xf32> to vector<6x16xf32>
    %475 = arith.mulf %470, %474 : vector<6x16xf32>
    %476 = vector.broadcast %0 : vector<1x16xf32> to vector<6x16xf32>
    %477 = arith.mulf %475, %476 : vector<6x16xf32>
    %c0_179 = arith.constant 0 : index
    %c0_180 = arith.constant 0 : index
    %478 = vector.load %arg21[%c0_179, %c0_180] : memref<6x16xf32, #tpu.memory_space<vmem>>, vector<6x16xf32>
    tpu.vector_store %arg21[%c0_179, %c0_180], %477 {strides = array<i32>} : memref<6x16xf32, #tpu.memory_space<vmem>>, vector<6x16xf32>,
    return
  }
}

</mosaic_0001>

<bundles_post_ra>
// kernel: my_transformer_fwd.4
= control target key start
LH: loop header
LB: loop body
LE: loop exit
PB: predicated region body
PF: predicated region fallthrough
CT: control target
= control target key end

     0   :  { %v2158_v0 = vmov 0   ;;  %vm80_vm0 = vcmask 1042432   ;;  %vm76_vm1 = vcmask 48128   ;;  %vm121_vm2 = vcmask 1043456   ;;  %s2160_s23 = smov 127   ;;  %s2167_s25 = smov 114   ;;  %s2823_s4 = inlined_call_operand.vmem [shape: f32[8,1], index: 4, kind: input, shape index: {}]   ;;  %s2824_s0 = inlined_call_operand.vmem [shape: f32[6,16], index: 0, kind: input, shape index: {}]   ;;  %s2825_s1 = inlined_call_operand.vmem [shape: f32[8,16], index: 1, kind: input, shape index: {}]   ;;  %s2826_s2 = inlined_call_operand.vmem [shape: f32[1,16], index: 2, kind: input, shape index: {}]   ;;  %s2827_s3 = inlined_call_operand.vmem [shape: bf16[8,6], index: 3, kind: input, shape index: {}]   ;;  %s2828_s12 = inlined_call_operand.vmem [shape: f32[3,4,1], index: 12, kind: input, shape index: {}]   ;;  %s2829_s11 = inlined_call_operand.vmem [shape: bf16[3,4,8], index: 11, kind: input, shape index: {}]   ;;  %s2830_s16 = inlined_call_operand.vmem [shape: f32[3,8,1], index: 16, kind: input, shape index: {}]   ;;  %s2831_s6 = inlined_call_operand.vmem [shape: f32[3,8,1], index: 6, kind: input, shape index: {}]   ;;  %s2832_s10 = inlined_call_operand.vmem [shape: f32[3,4,1], index: 10, kind: input, shape index: {}]   ;;  %s2833_s8 = inlined_call_operand.vmem [shape: f32[3,4,1], index: 8, kind: input, shape index: {}]   ;;  %s2834_s5 = inlined_call_operand.vmem [shape: bf16[3,24,8], index: 5, kind: input, shape index: {}]   ;;  %s2835_s13 = inlined_call_operand.vmem [shape: bf16[3,8,4], index: 13, kind: input, shape index: {}]   ;;  %s2836_s14 = inlined_call_operand.vmem [shape: f32[3,8,1], index: 14, kind: input, shape index: {}]   ;;  %s2837_s15 = inlined_call_operand.vmem [shape: bf16[3,8,8], index: 15, kind: input, shape index: {}]   ;;  %s2838_s7 = inlined_call_operand.vmem [shape: bf16[3,4,8], index: 7, kind: input, shape index: {}]   ;;  %s2839_s9 = inlined_call_operand.vmem [shape: bf16[3,4,8], index: 9, kind: input, shape index: {}]   ;;  %s2840_s18 = inlined_call_operand.vmem [shape: f32[6,1], index: 18, kind: input, shape index: {}]   ;;  %s2841_s20 = inlined_call_operand.vmem [shape: f32[8,16], index: 20, kind: output, shape index: {1}]   ;;  %s2842_s17 = inlined_call_operand.vmem [shape: bf16[6,8], index: 17, kind: input, shape index: {}]   ;;  %s2843_s19 = inlined_call_operand.vmem [shape: f32[6,16], index: 19, kind: output, shape index: {0}]   ;;  %s2844_s21 = inlined_call_operand.vmem [shape: f32[6,16], index: 21, kind: output, shape index: {2}]  }
   0x1   :  { %2848 = sst [smem:[#allocation2_spill]] %s2823_s4  ;;  %2045 = vset.pattern.permute.xlu0 %v2158_v0  ;;  %2046 = vset.pattern.permute.xlu2 %v2158_v0  ;;  %vm114_vm3 = vcmask 64512   ;;  %v165_v12 = vld [vmem:[%s2829_s11] sm:$0x3]  ;;  %v1957_v14 = vld [vmem:[%s2831_s6 + $0x8] sm:$0xff]  ;;  %vm206_vm4 = vcmask 1041408  }
   0x2   :  { %2849 = sst [smem:[#allocation3_spill]] %s2824_s0  ;;  %v227_v13 = vld [vmem:[%s2830_s16] sm:$0xff]  ;;  %v104_v28 = vld [vmem:[%s2834_s5 + $0x8] sm:$0xf]  ;;  %vm202_vm5 = vcmask 31744   ;;  %vm147_vm6 = vcmask 7168  }
   0x3   :  { %2850 = sst [smem:[#allocation4_spill]] %s2825_s1  ;;  %v1965_v15 = vld [vmem:[%s2832_s10 + $0x4] sm:$0xf]  ;;  %v111_v31 = vunpack.c.l.b16 %v104_v28  ;;  %v194_v34 = vld [vmem:[%s2835_s13] sm:$0xf]  ;;  %vm154_vm7 = vcmask 121856  }
   0x4   :  { %2851 = sst [smem:[#allocation5_spill]] %s2826_s2  ;;  %v1962_v16 = vld [vmem:[%s2833_s8 + $0x4] sm:$0xf]  ;;  %v225_v59 = vld [vmem:[%s2837_s15] sm:$0xf]  ;;  %vm298_vm8 = vcmask 15360  }
   0x5   :  { %2852 = sst [smem:[#allocation6_spill]] %s2827_s3  ;;  %v2023_v22 = vld [vmem:[%s2834_s5] sm:$0xff]  ;;  %v113_v35 = vpack.c.b16 %v111_v31, %v111_v31  ;;  %s2162_s3 = smov 126   ;;  %vm305_vm9 = vcmask 113664   ;;  %vm317_vm10 = vcmask 130048   ;;  %vm431_vm15 = vcmask 138240  }
   0x6   :  { %2853 = sst [smem:[#allocation7_spill]] %s2828_s12  ;;  %v157_v36 = vld [vmem:[%s2831_s6] sm:$0xff]  ;;  %s2159_s12 = smov 1  }
   0x7   :  { %s2854_s26 = sld [smem:[#allocation2_spill]]  ;;  %160 = vperm.xlu2 %2046, %v157_v36   ;;  %v196_v37 = vld [vmem:[%s2836_s14] sm:$0xff]  ;;  %s2164_s0 = smov 120  }
   0x8   :  { %s2855_s28 = sld [smem:[#allocation3_spill]]  ;;  %s2166_s1 = smov 122  }
   0x9   :  { %s2856_s4 = sld [smem:[#allocation4_spill]]  ;;  %s2168_s27 = smov 118  }
   0xa   :  { %s2857_s22 = sld [smem:[#allocation5_spill]]  ;;  %s2169_s2 = smov 116  }
   0xb   :  { %s2858_s24 = sld [smem:[#allocation6_spill]]  ;;  %s2847_s29 = smov 12  }
   0xd   :  { %v70_v1 = vld [vmem:[%s2854_s26] sm:$0xff]  ;;  %s2859_s26 = sld [smem:[#allocation7_spill]] }
   0xe   :  { %v68_v2 = vld [vmem:[%s2855_s28] sm:$0x3f]  ;;  %73 = vperm.xlu0 %2045, %v70_v1   ;;  %s2161_s28 = smov 2  }
   0xf   :  { %v69_v3 = vpack.c.bf16 %v68_v2, %v68_v2  ;;  %v97_v4 = vld [vmem:[%s2856_s4] sm:$0xff]  ;;  %199 = vperm.xlu2 %2046, %v196_v37   ;;  %s2176_s4 = smov 14  }
  0x10   :  { %v2301_v5 = vld [vmem:[%s2857_s22] ss:$0 sm:$0xff] }
  0x11   :  { %v82_v6 = vsel %vm80_vm0, %v69_v3, 0  ;;  %v101_v7 = vmul.f32 %v2301_v5, %v97_v4  ;;  %v67_v8 = vld [vmem:[%s2858_s24] sm:$0xf]  ;;  %s2165_s24 = smov 124  }
  0x12   :  { %91 = vmatpush.bf16.msra.mxu0 %v82_v6  ;;  %v2024_v6 = vld [vmem:[%s2834_s5 + $0xc] sm:$0xff] }
  0x13   :  { %v166_v9 = vpack.c.bf16 %v101_v7, %v101_v7  ;;  %v167_v10 = vld [vmem:[%s2859_s26] sm:$0xf]  ;;  %v1950_v7 = vld [vmem:[%s2834_s5 + $0x14] sm:$0xf] }
  0x15   :  { %1938 = vmatmul.msk.bf16.vlgmr.msra.gmra.mxu0 %vm76_vm1, %v67_v8  ;;  %v2312_v11 = vsel %vm121_vm2, %v166_v9, 0  ;;  %v264_v8 = vunpack.c.l.b16 %v1950_v7  ;;  %v1958_v7 = vld [vmem:[%s2829_s11 + $0x2] sm:$0x3] }
  0x16   :  { %186 = vmatpush.bf16.msra.mxu2 %v2312_v11  ;;  %170 = vperm.xlu0 %2045, %v167_v10  }
  0x17   :  { %v266_v9 = vpack.c.b16 %v264_v8, %v264_v8 }
  0x19   :  { %1945 = vmatmul.msk.bf16.vlgmr.msra.gmra.mxu2 %vm114_vm3, %v165_v12 }
  0x1e   :  { %230 = vperm.xlu0 %2045, %v227_v13  }
  0x26   :  { %312 = vperm.xlu0 %2045, %v1957_v14  }
  0x2e   :  { %407 = vperm.xlu0 %2045, %v1965_v15  }
  0x36   :  { %379 = vperm.xlu0 %2045, %v1962_v16  }
  0x61   :  { %v161_v44 = vpop.permute.xlu2 %160 }
  0x69   :  { %v200_v47 = vpop.permute.xlu2 %199 }
  0x80   :  { %v74_v17 = vpop.permute.xlu0 %73 }
  0x88   :  { %v171_v24 = vpop.permute.xlu0 %170 }
  0x90   :  { %v231_v60 = vpop.permute.xlu0 %230 }
  0x92   :  { %v93_v18 = vpop.f32.mrf.mxu0 }
  0x93   :  { %v2331_v19 = vadd.f32 %v93_v18, %v74_v17 }
  0x95   :  { %v105_v20 = vpack.c.bf16 %v2331_v19, %v2331_v19 }
  0x97   :  { %v123_v21 = vsel %vm121_vm2, %v105_v20, 0 }
  0x98   :  { %132 = vmatpush.bf16.msra.mxu1 %v123_v21  ;;  %v313_v21 = vpop.permute.xlu0 %312 }
  0x9a   :  { %v95_v23 = vpop.f32.mrf.mxu0 }
  0x9b   :  { %1943 = vmatmul.msk.bf16.vlgmr.msra.gmra.mxu1 %vm114_vm3, %v2023_v22 }
  0x9c   :  { %v188_v25 = vpop.f32.mrf.mxu2 }
  0x9d   :  { %v189_v26 = vadd.f32 %v188_v25, %v171_v24  ;;  %v2163_v25 = vmov 16.0  }
  0x9e   :  { %2099 = vrcp.f32 %v2163_v25 }
  0x9f   :  { %v192_v27 = vmul.f32 %v2301_v5, %v189_v26 }
  0xa1   :  { %v193_v29 = vmax.f32 %v192_v27, 0.0 }
  0xa3   :  { %v195_v30 = vpack.c.bf16 %v193_v29, %v193_v29 }
  0xa4   :  { %v190_v32 = vpop.f32.mrf.mxu2  ;;  %v2100_v26 = vpop.eup %2099 }
  0xa5   :  { %v208_v33 = vsel %vm206_vm4, %v195_v30, 0  ;;  %v322_v27 = vmul.f32 16.0, %v2100_v26  ;;  %vm326_vm11 = vweird.f32 %v2100_v26 }
  0xa6   :  { %217 = vmatpush.bf16.msra.mxu3 %v208_v33 }
  0xa7   :  { %v323_v28 = vsub.f32 1.0, %v322_v27 }
  0xa9   :  { %1946 = vmatmul.msk.bf16.vlgmr.msra.gmra.mxu3 %vm202_vm5, %v194_v34  ;;  %v324_v29 = vmul.f32 %v2100_v26, %v323_v28 }
  0xaa   :  { %366 = vmatpush.bf16.msrb.mxu3 %v2312_v11 }
  0xab   :  { %1944 = vmatmul.msk.bf16.gmra.mxu1 %vm114_vm3, %v113_v35  ;;  %v325_v30 = vadd.f32 %v2100_v26, %v324_v29 }
  0xad   :  { %v2388_v31 = vsel %vm326_vm11, %v2100_v26, %v325_v30  ;;  %vm881_vm11 = vcmask 25600  }
  0xb9   :  { %1960 = vmatmul.msk.bf16.vlgmr.msrb.gmra.mxu3 %vm114_vm3, %v1958_v7 }
 0x118   :  { %v134_v38 = vpop.f32.mrf.mxu1 }
 0x119   :  { %144 = vrot.lane.b32.xlu1 %v134_v38, %s2159_s12 }
 0x120   :  { %v136_v39 = vpop.f32.mrf.mxu1 }
 0x128   :  { %v139_v40 = vpop.f32.mrf.mxu1 }
 0x129   :  { %151 = vrot.lane.b32.xlu1 %v139_v40, %s2160_s23 }
 0x12c   :  { %v219_v42 = vpop.f32.mrf.mxu3 }
 0x12d   :  { %v220_v51 = vadd.f32 %v219_v42, %v200_v47 }
 0x12f   :  { %v223_v54 = vmul.f32 %v2301_v5, %v220_v51  ;;  %v1964_v51 = vld [vmem:[%s2839_s9 + $0x2] sm:$0x3] }
 0x130   :  { %v141_v41 = vpop.f32.mrf.mxu1 }
 0x134   :  { %v221_v43 = vpop.f32.mrf.mxu3 }
 0x18b   :  { %v145_v45 = vpop.permute.xlu1 %144 }
 0x18c   :  { %v148_v46 = vsel %vm147_vm6, 0.0, %v145_v45 }
 0x18d   :  { %v149_v48 = vadd.f32 %v148_v46, %v136_v39 }
 0x19b   :  { %v152_v49 = vpop.permute.xlu1 %151 }
 0x19c   :  { %v155_v50 = vsel %vm154_vm7, %v152_v49, 0.0 }
 0x19d   :  { %v156_v52 = vadd.f32 %v155_v50, %v149_v48  ;;  %v1961_v50 = vld [vmem:[%s2838_s7 + $0x2] sm:$0x3] }
 0x19f   :  { %v163_v53 = vadd.f32 %v161_v44, %v156_v52  ;;  %v408_v52 = vpop.permute.xlu0 %407 }
 0x1a1   :  { %v164_v55 = vmax.f32 %v163_v53, 0.0 }
 0x1a3   :  { %v224_v56 = vadd.f32 %v223_v54, %v164_v55 }
 0x1a5   :  { %v226_v57 = vpack.c.bf16 %v224_v56, %v224_v56 }
 0x1a7   :  { %v237_v58 = vsel %vm121_vm2, %v226_v57, 0 }
 0x1a8   :  { %246 = vmatpush.bf16.msrb.mxu0 %v237_v58  ;;  %v380_v58 = vpop.permute.xlu0 %379 }
 0x1ab   :  { %1947 = vmatmul.msk.bf16.vlgmr.msrb.gmra.mxu0 %vm114_vm3, %v225_v59 }
 0x228   :  { %v248_v61 = vpop.f32.mrf.mxu0 }
 0x229   :  { %v249_v62 = vadd.f32 %v248_v61, %v231_v60 }
 0x22b   :  { %v252_v63 = vadd.f32 %v249_v62, %v2331_v19 }
 0x22d   :  { %v2367_v1 = vmul.f32 %v2301_v5, %v252_v63 }
 0x22f   :  { %v258_v2 = vpack.c.bf16 %v2367_v1, %v2367_v1 }
 0x230   :  { %v250_v3 = vpop.f32.mrf.mxu0 }
 0x231   :  { %v274_v4 = vsel %vm121_vm2, %v258_v2, 0 }
 0x232   :  { %283 = vmatpush.bf16.msrb.mxu2 %v274_v4 }
 0x235   :  { %1955 = vmatmul.msk.bf16.vlgmr.msrb.gmra.mxu2 %vm114_vm3, %v2024_v6 }
 0x245   :  { %1956 = vmatmul.msk.bf16.gmra.mxu2 %vm114_vm3, %v266_v9 }
 0x2b8   :  { %v285_v10 = vpop.f32.mrf.mxu2 }
 0x2b9   :  { %295 = vrot.lane.b32.xlu1 %v285_v10, %s2161_s28 }
 0x2c0   :  { %v287_v12 = vpop.f32.mrf.mxu2 }
 0x2c8   :  { %v290_v13 = vpop.f32.mrf.mxu2 }
 0x2c9   :  { %302 = vrot.lane.b32.xlu2 %v290_v13, %s2162_s3 }
 0x2d0   :  { %v292_v14 = vpop.f32.mrf.mxu2 }
 0x323   :  { %v303_v15 = vpop.permute.xlu2 %302 }
 0x324   :  { %v306_v18 = vsel %vm305_vm9, %v303_v15, 0.0 }
 0x32b   :  { %v296_v16 = vpop.permute.xlu1 %295 }
 0x32c   :  { %v299_v17 = vsel %vm298_vm8, 0.0, %v296_v16 }
 0x32d   :  { %v300_v19 = vadd.f32 %v299_v17, %v287_v12 }
 0x32f   :  { %v307_v20 = vadd.f32 %v306_v18, %v300_v19 }
 0x331   :  { %v315_v22 = vadd.f32 %v313_v21, %v307_v20 }
 0x333   :  { %v2384_v23 = vmax.f32 %v315_v22, 0.0 }
 0x335   :  { %v318_v24 = vsel %vm317_vm10, %v2384_v23, 0.0 }
 0x336   :  { %319 = vadd.xlane.f32.xlu1 %v318_v24 }
 0x3a9   :  { %v320_v32 = vpop.xlane.xlu1 %319 }
 0x3aa   :  { %v328_v33 = vmul.f32 %v2388_v31, %v320_v32 }
 0x3ac   :  { %v329_v34 = vsub.f32 %v2384_v23, %v328_v33 }
 0x3ae   :  { %v330_v35 = vmul.f32 %v329_v34, %v329_v34 }
 0x3b0   :  { %v331_v36 = vsel %vm317_vm10, %v330_v35, 0.0 }
 0x3b1   :  { %332 = vadd.xlane.f32.xlu2 %v331_v36 }
 0x424   :  { %v333_v37 = vpop.xlane.xlu2 %332 }
 0x425   :  { %v334_v38 = vmul.f32 %v333_v37, %v2388_v31 }
 0x427   :  { %v335_v39 = vadd.f32 1e-05, %v334_v38 }
 0x429   :  { %2101 = vrsqrt.f32 %v335_v39  ;;  %vm342_vm13 = vweird.f32 %v335_v39 }
 0x42f   :  { %v2102_v40 = vpop.eup %2101 }
 0x430   :  { %v337_v41 = vmul.f32 %v2102_v40, %v335_v39  ;;  %vm343_vm12 = vweird.f32 %v2102_v40 }
 0x431   :  { %vm344_vm14 = vmor %vm342_vm13, %vm343_vm12 }
 0x432   :  { %v338_v42 = vmul.f32 %v2102_v40, %v337_v41 }
 0x434   :  { %v339_v43 = vmul.f32 0.5, %v338_v42 }
 0x436   :  { %v340_v44 = vsub.f32 1.5, %v339_v43 }
 0x438   :  { %v341_v45 = vmul.f32 %v2102_v40, %v340_v44 }
 0x43a   :  { %v345_v46 = vsel %vm344_vm14, %v2102_v40, %v341_v45 }
 0x43b   :  { %v346_v47 = vmul.f32 %v345_v46, %v329_v34 }
 0x43d   :  { %v374_v48 = vpack.c.bf16 %v346_v47, %v346_v47 }
 0x43f   :  { %v386_v49 = vsel %vm121_vm2, %v374_v48, 0 }
 0x440   :  { %395 = vmatpush.bf16.msra.mxu0 %v386_v49  ;;  %420 = vmatpush.bf16.msrb.mxu1 %v386_v49 }
 0x443   :  { %1963 = vmatmul.msk.bf16.vlgmr.msra.gmra.mxu0 %vm114_vm3, %v1961_v50  ;;  %1966 = vmatmul.msk.bf16.vlgmr.msrb.gmra.mxu1 %vm114_vm3, %v1964_v51 }
 0x4c0   :  { %v397_v53 = vpop.f32.mrf.mxu0  ;;  %v422_v54 = vpop.f32.mrf.mxu1 }
 0x4c1   :  { %v423_v55 = vadd.f32 %v422_v54, %v408_v52  ;;  %v398_v60 = vadd.f32 %v397_v53, %v380_v58 }
 0x4c3   :  { %427 = vrot.lane.b32.xlu0 %v423_v55, %s2159_s12  ;;  %v545_v21 = vpack.c.bf16 %v398_v60, %v398_v60 }
 0x4c8   :  { %v424_v56 = vpop.f32.mrf.mxu1  ;;  %v399_v57 = vpop.f32.mrf.mxu0 }
 0x4cb   :  { %439 = vrot.lane.b32.xlu0 %v2301_v5, %s2159_s12 }
 0x535   :  { %v428_v59 = vpop.permute.xlu0 %427 }
 0x536   :  { %v430_v61 = vsel %vm147_vm6, 0.0, %v428_v59 }
 0x537   :  { %v432_v62 = vsel %vm431_vm15, %v430_v61, 0.0  ;;  %v2453_v61 = vpop.f32.mrf.mxu3 }
 0x538   :  { %v2062_v63 = vpack.i.bf16 %v432_v62, %v398_v60  ;;  %v553_v2 = vpack.c.bf16 %v432_v62, %v432_v62  ;;  %v1959_v60 = vld [vmem:[%s2859_s26 + $0x4] sm:$0xf] }
 0x53a   :  { %2063 = vrot.lane.b32.xlu1 %v2062_v63, %s2164_s0  ;;  %2058 = vrot.lane.b32.xlu2 %v2062_v63, %s2165_s24  ;;  %v581_v3 = vsel %vm206_vm4, %v553_v2, 0 }
 0x53b   :  { %2048 = vrot.lane.b32.xlu0 %v2062_v63, %s2166_s1  ;;  %590 = vmatpush.bf16.msra.mxu3 %v581_v3 }
 0x53d   :  { %v440_v5 = vpop.permute.xlu0 %439 }
 0x53e   :  { %v442_v4 = vsel %vm147_vm6, 0.0, %v440_v5  ;;  %v2170_v5 = vmov -13.815511  }
 0x53f   :  { %v2414_v6 = vsel %vm431_vm15, %v442_v4, 0.0  ;;  %v370_v62 = vpop.f32.mrf.mxu3 }
 0x542   :  { %511 = vrot.lane.b32.xlu1 %v2414_v6, %s2162_s3 }
 0x543   :  { %2053 = vrot.lane.b32.xlu0 %v2062_v63, %s2162_s3 }
 0x54b   :  { %2068 = vrot.lane.b32.xlu0 %v2062_v63, %s2167_s25 }
 0x553   :  { %2073 = vrot.lane.b32.xlu0 %v2062_v63, %s2168_s27 }
 0x55b   :  { %2078 = vrot.lane.b32.xlu0 %v2062_v63, %s2169_s2  ;;  %v532_v63 = vlaneseq }
 0x55d   :  { %v2457_v2 = vand.u32 127, %v532_v63 }
 0x55f   :  { %vm534_vm0 = vcmp.lt.s32.totalorder %v2457_v2, 3 }
 0x560   :  { %v2463_v3 = vsel %vm534_vm0, %v2414_v6, 0.0 }
 0x561   :  { %vm849_vm7 = vcmp.gt.f32.partialorder %v2463_v3, 0.0 }
 0x562   :  { %v857_v4 = vsel %vm849_vm7, 9.999995e-07, %v2170_v5 }
 0x594   :  { %v2059_v8 = vpop.permute.xlu2 %2058 }
 0x595   :  { %v2061_v9 = vunpack.i.h.bf16 %v2059_v8  ;;  %v2060_v25 = vunpack.i.l.bf16 %v2059_v8 }
 0x597   :  { %v555_v10 = vpack.c.bf16 %v2061_v9, %v2061_v9  ;;  %v547_v29 = vpack.c.bf16 %v2060_v25, %v2060_v25  ;;  %v865_v9 = vperm.slane %v857_v4, 0 }
 0x599   :  { %v651_v12 = vsel %vm206_vm4, %v555_v10, 0 }
 0x59a   :  { %660 = vmatpush.bf16.msra.mxu1 %v651_v12 }
 0x5ac   :  { %v2064_v13 = vpop.permute.xlu1 %2063 }
 0x5ad   :  { %v2066_v14 = vunpack.i.h.bf16 %v2064_v13  ;;  %v2049_v15 = vpop.permute.xlu0 %2048  ;;  %v2065_v34 = vunpack.i.l.bf16 %v2064_v13 }
 0x5ae   :  { %v2051_v16 = vunpack.i.h.bf16 %v2049_v15  ;;  %v2050_v17 = vunpack.i.l.bf16 %v2049_v15 }
 0x5af   :  { %v557_v18 = vpack.c.bf16 %v2066_v14, %v2066_v14  ;;  %v549_v38 = vpack.c.bf16 %v2065_v34, %v2065_v34 }
 0x5b0   :  { %v556_v19 = vpack.c.bf16 %v2051_v16, %v2051_v16  ;;  %v548_v20 = vpack.c.bf16 %v2050_v17, %v2050_v17 }
 0x5b1   :  { %v721_v22 = vsel %vm206_vm4, %v557_v18, 0 }
 0x5b2   :  { %2082 = vxpose.binary.xlu2.c.b16.start.end [1/2] (short) (narrow) %v548_v20, %v545_v21, 16  ;;  %v686_v24 = vsel %vm206_vm4, %v556_v19, 0 }
 0x5b3   :  { %695 = vmatpush.bf16.msra.mxu2 %v686_v24  ;;  %730 = vmatpush.bf16.msrb.mxu3 %v721_v22 }
 0x5b4   :  { %v512_v55 = vpop.permute.xlu1 %511 }
 0x5b5   :  { %v2054_v26 = vpop.permute.xlu0 %2053  ;;  %v2471_v13 = vsel %vm534_vm0, %v512_v55, 0.0 }
 0x5b6   :  { %v2056_v27 = vunpack.i.h.bf16 %v2054_v26  ;;  %v2055_v28 = vunpack.i.l.bf16 %v2054_v26  ;;  %vm850_vm12 = vcmp.gt.f32.partialorder %v2471_v13, 0.0 }
 0x5b7   :  { %v858_v17 = vsel %vm850_vm12, 9.999995e-07, %v2170_v5 }
 0x5b8   :  { %v554_v30 = vpack.c.bf16 %v2056_v27, %v2056_v27  ;;  %v546_v32 = vpack.c.bf16 %v2055_v28, %v2055_v28  ;;  %v866_v21 = vperm.slane %v858_v17, 0 }
 0x5ba   :  { %2085 = vxpose.binary.xlu1.c.b16.start.end [1/2] (short) (narrow) %v547_v29, %v546_v32, 16  ;;  %v616_v33 = vsel %vm206_vm4, %v554_v30, 0 }
 0x5bb   :  { %625 = vmatpush.bf16.msrb.mxu0 %v616_v33 }
 0x5bd   :  { %v2069_v35 = vpop.permute.xlu0 %2068 }
 0x5be   :  { %v2071_v36 = vunpack.i.h.bf16 %v2069_v35  ;;  %v2070_v37 = vunpack.i.l.bf16 %v2069_v35 }
 0x5c0   :  { %v560_v39 = vpack.c.bf16 %v2071_v36, %v2071_v36  ;;  %v552_v40 = vpack.c.bf16 %v2070_v37, %v2070_v37 }
 0x5c2   :  { %2088 = vxpose.binary.xlu0.c.b16.start.end [1/2] (short) (narrow) %v552_v40, %v549_v38, 16  ;;  %v826_v41 = vsel %vm206_vm4, %v560_v39, 0 }
 0x5c3   :  { %835 = vmatpush.bf16.msrb.mxu2 %v826_v41 }
 0x5c5   :  { %v2074_v42 = vpop.permute.xlu0 %2073 }
 0x5c6   :  { %v2076_v43 = vunpack.i.h.bf16 %v2074_v42  ;;  %v2075_v50 = vunpack.i.l.bf16 %v2074_v42 }
 0x5c8   :  { %v558_v44 = vpack.c.bf16 %v2076_v43, %v2076_v43  ;;  %v550_v52 = vpack.c.bf16 %v2075_v50, %v2075_v50 }
 0x5ca   :  { %v756_v45 = vsel %vm206_vm4, %v558_v44, 0 }
 0x5cb   :  { %765 = vmatpush.bf16.msra.mxu0 %v756_v45 }
 0x5cd   :  { %v2079_v46 = vpop.permute.xlu0 %2078 }
 0x5ce   :  { %v2081_v47 = vunpack.i.h.bf16 %v2079_v46  ;;  %v2080_v51 = vunpack.i.l.bf16 %v2079_v46 }
 0x5d0   :  { %v559_v48 = vpack.c.bf16 %v2081_v47, %v2081_v47  ;;  %v551_v53 = vpack.c.bf16 %v2080_v51, %v2080_v51 }
 0x5d2   :  { %v791_v49 = vsel %vm206_vm4, %v559_v48, 0 }
 0x5d3   :  { %800 = vmatpush.bf16.msrb.mxu1 %v791_v49 }
 0x60d   :  { %2094 = vset.pattern.permute.xlu1 %v2158_v0 }
 0x614   :  { %514 = vrot.lane.b32.xlu1 %v2414_v6, %s2165_s24 }
 0x61b   :  { %517 = vrot.lane.b32.xlu2 %v2414_v6, %s2166_s1 }
 0x61c   :  { %529 = vrot.lane.b32.xlu1 %v2414_v6, %s2167_s25 }
 0x624   :  { %353 = vperm.xlu1 %2094, %v1959_v60  }
 0x630   :  { %520 = vrot.lane.b32.xlu0 %v2414_v6, %s2164_s0 }
 0x638   :  { %523 = vrot.lane.b32.xlu0 %v2414_v6, %s2168_s27 }
 0x641   :  { %2091 = vxpose.binary.xlu2.c.b16.start.end [1/2] (short) (narrow) %v551_v53, %v550_v52, 16 }
 0x653   :  { %v2083_v0 = vpop.trf.xlu2 }
 0x654   :  { %1967 = vmatmul.msk.bf16.vlgmr.msra.gmra.mxu3 %vm202_vm5, %v2083_v0 }
 0x65b   :  { %v2084_v54 = vpop.trf.xlu2 }
 0x65c   :  { %1970 = vmatmul.msk.bf16.vlgmr.msra.gmra.mxu2 %vm202_vm5, %v2084_v54 }
 0x666   :  { %v2086_v56 = vpop.trf.xlu1 }
 0x667   :  { %1968 = vmatmul.msk.bf16.vlgmr.msrb.gmra.mxu0 %vm202_vm5, %v2086_v56 }
 0x66e   :  { %v2089_v57 = vpop.trf.xlu0  ;;  %v2087_v58 = vpop.trf.xlu1 }
 0x66f   :  { %1969 = vmatmul.msk.bf16.vlgmr.msra.gmra.mxu1 %vm202_vm5, %v2087_v58  ;;  %1971 = vmatmul.msk.bf16.vlgmr.msrb.gmra.mxu3 %vm202_vm5, %v2089_v57 }
 0x675   :  { %v518_v10 = vpop.permute.xlu2 %517 }
 0x676   :  { %v2090_v59 = vpop.trf.xlu0  ;;  %v2489_v28 = vsel %vm534_vm0, %v518_v10, 0.0 }
 0x677   :  { %1974 = vmatmul.msk.bf16.vlgmr.msrb.gmra.mxu2 %vm202_vm5, %v2090_v59  ;;  %vm852_vm14 = vcmp.gt.f32.partialorder %v2489_v28, 0.0 }
 0x678   :  { %v860_v39 = vsel %vm852_vm14, 9.999995e-07, %v2170_v5 }
 0x679   :  { %v868_v45 = vperm.slane %v860_v39, 0 }
 0x686   :  { %v515_v16 = vpop.permute.xlu1 %514 }
 0x687   :  { %v2480_v19 = vsel %vm534_vm0, %v515_v16, 0.0 }
 0x688   :  { %vm851_vm13 = vcmp.gt.f32.partialorder %v2480_v19, 0.0 }
 0x689   :  { %v859_v29 = vsel %vm851_vm13, 9.999995e-07, %v2170_v5 }
 0x68a   :  { %v867_v35 = vperm.slane %v859_v29, 0 }
 0x68e   :  { %v530_v37 = vpop.permute.xlu1 %529 }
 0x68f   :  { %v2504_v43 = vsel %vm534_vm0, %v530_v37, 0.0 }
 0x690   :  { %vm856_vm12 = vcmp.gt.f32.partialorder %v2504_v43, 0.0 }
 0x691   :  { %v864_v52 = vsel %vm856_vm12, 9.999995e-07, %v2170_v5 }
 0x692   :  { %v872_v55 = vperm.slane %v864_v52, 0 }
 0x696   :  { %v354_v60 = vpop.permute.xlu1 %353 }
 0x697   :  { %v369_v62 = vadd.f32 %v2453_v61, %v354_v60 }
 0x6a2   :  { %v521_v24 = vpop.permute.xlu0 %520 }
 0x6a3   :  { %v2494_v30 = vsel %vm534_vm0, %v521_v24, 0.0 }
 0x6a4   :  { %vm853_vm7 = vcmp.gt.f32.partialorder %v2494_v30, 0.0 }
 0x6a5   :  { %v861_v40 = vsel %vm853_vm7, 9.999995e-07, %v2170_v5  ;;  %vm1481_vm7 = vcmp.lt.s32.totalorder %v2457_v2, 7 }
 0x6a6   :  { %v869_v46 = vperm.slane %v861_v40, 0 }
 0x6aa   :  { %526 = vrot.lane.b32.xlu2 %v2414_v6, %s2169_s2  ;;  %v524_v63 = vpop.permute.xlu0 %523 }
 0x6ab   :  { %v2518_v4 = vsel %vm534_vm0, %v524_v63, 0.0 }
 0x6ac   :  { %vm854_vm13 = vcmp.gt.f32.partialorder %v2518_v4, 0.0 }
 0x6ad   :  { %v862_v10 = vsel %vm854_vm13, 9.999995e-07, %v2170_v5  ;;  %vm1656_vm13 = vcmask 60416  }
 0x6ae   :  { %v870_v16 = vperm.slane %v862_v10, 0 }
 0x6d7   :  { %v592_v7 = vpop.f32.mrf.mxu3 }
 0x6d8   :  { %v841_v8 = vmul.f32 0.5, %v592_v7 }
 0x6da   :  { %v2467_v12 = vadd.f32 %v865_v9, %v841_v8 }
 0x6dc   :  { %v882_v6 = vsel %vm881_vm11, %v2467_v12, -inf }
 0x6dd   :  { %883 = vmax.xlane.f32.xlu0 %v882_v6 }
 0x6df   :  { %v697_v14 = vpop.f32.mrf.mxu2  ;;  %v594_v15 = vpop.f32.mrf.mxu3 }
 0x6e0   :  { %v844_v41 = vmul.f32 0.5, %v697_v14 }
 0x6e2   :  { %v2092_v18 = vpop.trf.xlu2  ;;  %v876_v50 = vadd.f32 %v868_v45, %v844_v41 }
 0x6e3   :  { %1972 = vmatmul.msk.bf16.vlgmr.msra.gmra.mxu0 %vm202_vm5, %v2092_v18 }
 0x6e4   :  { %v627_v20 = vpop.f32.mrf.mxu0  ;;  %v891_v53 = vsel %vm881_vm11, %v876_v50, -inf }
 0x6e5   :  { %v842_v22 = vmul.f32 0.5, %v627_v20 }
 0x6e7   :  { %v2483_v25 = vadd.f32 %v866_v21, %v842_v22  ;;  %v699_v26 = vpop.f32.mrf.mxu2 }
 0x6e9   :  { %v885_v27 = vsel %vm881_vm11, %v2483_v25, -inf }
 0x6ea   :  { %886 = vmax.xlane.f32.xlu1 %v885_v27  ;;  %v2093_v32 = vpop.trf.xlu2 }
 0x6eb   :  { %1973 = vmatmul.msk.bf16.vlgmr.msrb.gmra.mxu1 %vm202_vm5, %v2093_v32 }
 0x6ec   :  { %v662_v33 = vpop.f32.mrf.mxu1  ;;  %v629_v34 = vpop.f32.mrf.mxu0 }
 0x6ed   :  { %v843_v36 = vmul.f32 0.5, %v662_v33 }
 0x6ef   :  { %v875_v38 = vadd.f32 %v867_v35, %v843_v36 }
 0x6f1   :  { %v888_v42 = vsel %vm881_vm11, %v875_v38, -inf }
 0x6f2   :  { %889 = vmax.xlane.f32.xlu2 %v888_v42  ;;  %v732_v44 = vpop.f32.mrf.mxu3 }
 0x6f3   :  { %v845_v47 = vmul.f32 0.5, %v732_v44 }
 0x6f4   :  { %v664_v48 = vpop.f32.mrf.mxu1 }
 0x6f5   :  { %v877_v49 = vadd.f32 %v869_v46, %v845_v47 }
 0x6f7   :  { %v894_v51 = vsel %vm881_vm11, %v877_v49, -inf }
 0x6f8   :  { %895 = vmax.xlane.f32.xlu0 %v894_v51 }
 0x6fa   :  { %v837_v0 = vpop.f32.mrf.mxu2  ;;  %892 = vmax.xlane.f32.xlu2 %v891_v53  ;;  %v734_v54 = vpop.f32.mrf.mxu3 }
 0x6fb   :  { %v848_v56 = vmul.f32 0.5, %v837_v0 }
 0x6fd   :  { %v2510_v57 = vadd.f32 %v872_v55, %v848_v56 }
 0x6ff   :  { %v903_v58 = vsel %vm881_vm11, %v2510_v57, -inf }
 0x700   :  { %904 = vmax.xlane.f32.xlu1 %v903_v58 }
 0x702   :  { %v839_v59 = vpop.f32.mrf.mxu2 }
 0x704   :  { %v527_v9 = vpop.permute.xlu2 %526 }
 0x705   :  { %v2525_v6 = vsel %vm534_vm0, %v527_v9, 0.0 }
 0x706   :  { %vm855_vm14 = vcmp.gt.f32.partialorder %v2525_v6, 0.0 }
 0x707   :  { %v863_v22 = vsel %vm855_vm14, 9.999995e-07, %v2170_v5 }
 0x708   :  { %v871_v33 = vperm.slane %v863_v22, 0 }
 0x719   :  { %434 = vrot.lane.b32.xlu1 %v369_v62, %s2159_s12  ;;  %s2171_s12 = smov 6  }
 0x750   :  { %v884_v7 = vpop.xlane.xlu0 %883 }
 0x751   :  { %v906_v8 = vsub.f32 %v2467_v12, %v884_v7 }
 0x753   :  { %v914_v61 = vmul.f32 1.442695, %v906_v8 }
 0x755   :  { %2103 = vpow2.f32 %v914_v61 }
 0x75b   :  { %v2104_v35 = vpop.eup %2103 }
 0x75c   :  { %v930_v40 = vsel %vm881_vm11, %v2104_v35, 0.0 }
 0x75d   :  { %v887_v14 = vpop.xlane.xlu1 %886 }
 0x75e   :  { %v907_v18 = vsub.f32 %v2483_v25, %v887_v14 }
 0x760   :  { %v767_v15 = vpop.f32.mrf.mxu0  ;;  %v916_v26 = vmul.f32 1.442695, %v907_v18 }
 0x761   :  { %v846_v17 = vmul.f32 0.5, %v767_v15 }
 0x762   :  { %2105 = vpow2.f32 %v916_v26 }
 0x763   :  { %v878_v20 = vadd.f32 %v870_v16, %v846_v17  ;;  %v970_v16 = vperm.slane %v2463_v3, 0  ;;  %v972_v3 = vperm.slane %v2480_v19, 0 }
 0x765   :  { %v890_v21 = vpop.xlane.xlu2 %889  ;;  %v897_v12 = vsel %vm881_vm11, %v878_v20, -inf }
 0x766   :  { %v908_v24 = vsub.f32 %v875_v38, %v890_v21  ;;  %898 = vmax.xlane.f32.xlu2 %v897_v12 }
 0x768   :  { %v918_v27 = vmul.f32 1.442695, %v908_v24  ;;  %v802_v29 = vpop.f32.mrf.mxu1  ;;  %v769_v32 = vpop.f32.mrf.mxu0 }
 0x769   :  { %v847_v34 = vmul.f32 0.5, %v802_v29  ;;  %v2106_v46 = vpop.eup %2105 }
 0x76a   :  { %2107 = vpow2.f32 %v918_v27  ;;  %v933_v48 = vsel %vm881_vm11, %v2106_v46, 0.0 }
 0x76b   :  { %v896_v36 = vpop.xlane.xlu0 %895  ;;  %v879_v37 = vadd.f32 %v871_v33, %v847_v34 }
 0x76c   :  { %v910_v25 = vsub.f32 %v877_v49, %v896_v36 }
 0x76d   :  { %v893_v39 = vpop.xlane.xlu2 %892  ;;  %v900_v41 = vsel %vm881_vm11, %v879_v37, -inf }
 0x76e   :  { %v909_v42 = vsub.f32 %v876_v50, %v893_v39  ;;  %931 = vadd.xlane.f32.xlu2 %v930_v40  ;;  %901 = vmax.xlane.f32.xlu0 %v900_v41  ;;  %v922_v38 = vmul.f32 1.442695, %v910_v25 }
 0x770   :  { %v920_v44 = vmul.f32 1.442695, %v909_v42  ;;  %v804_v45 = vpop.f32.mrf.mxu1  ;;  %v2108_v47 = vpop.eup %2107  ;;  %2109 = vpow2.f32 %v922_v38 }
 0x771   :  { %v936_v51 = vsel %vm881_vm11, %v2108_v47, 0.0  ;;  %v973_v45 = vperm.slane %v2489_v28, 0 }
 0x772   :  { %2111 = vpow2.f32 %v920_v44 }
 0x773   :  { %v905_v0 = vpop.xlane.xlu1 %904 }
 0x774   :  { %v913_v9 = vsub.f32 %v2510_v57, %v905_v0 }
 0x776   :  { %934 = vadd.xlane.f32.xlu2 %v933_v48  ;;  %937 = vadd.xlane.f32.xlu0 %v936_v51  ;;  %v2535_v49 = vpop.eup %2109  ;;  %v928_v15 = vmul.f32 1.442695, %v913_v9 }
 0x777   :  { %v942_v50 = vsel %vm881_vm11, %v2535_v49, 0.0 }
 0x778   :  { %v2537_v52 = vpop.eup %2111 }
 0x779   :  { %v939_v53 = vsel %vm881_vm11, %v2537_v52, 0.0 }
 0x77e   :  { %943 = vadd.xlane.f32.xlu2 %v942_v50  ;;  %940 = vadd.xlane.f32.xlu0 %v939_v53 }
 0x78b   :  { %v435_v54 = vpop.permute.xlu1 %434 }
 0x78c   :  { %v437_v55 = vsel %vm147_vm6, 0.0, %v435_v54  ;;  %vm1194_vm6 = vcmask 80896  }
 0x78d   :  { %v2545_v56 = vsel %vm431_vm15, %v437_v55, 0.0  ;;  %vm1196_vm15 = vcmask 97280  }
 0x78e   :  { %495 = vrot.lane.b32.xlu1 %v2545_v56, %s2166_s1  ;;  %v986_v40 = vpack.c.bf16 %v2545_v56, %v2545_v56  ;;  %s2173_s1 = smov 10  }
 0x796   :  { %489 = vrot.lane.b32.xlu1 %v2545_v56, %s2162_s3  ;;  %s2172_s3 = smov 4  }
 0x79e   :  { %507 = vrot.lane.b32.xlu1 %v2545_v56, %s2167_s25 }
 0x7a6   :  { %501 = vrot.lane.b32.xlu1 %v2545_v56, %s2168_s27 }
 0x7ae   :  { %504 = vrot.lane.b32.xlu1 %v2545_v56, %s2169_s2 }
 0x7d9   :  { %v899_v58 = vpop.xlane.xlu2 %898 }
 0x7da   :  { %v911_v59 = vsub.f32 %v878_v20, %v899_v58 }
 0x7dc   :  { %v924_v60 = vmul.f32 1.442695, %v911_v59 }
 0x7de   :  { %2113 = vpow2.f32 %v924_v60 }
 0x7e1   :  { %v902_v62 = vpop.xlane.xlu0 %901  ;;  %v932_v63 = vpop.xlane.xlu2 %931 }
 0x7e2   :  { %v912_v7 = vsub.f32 %v879_v37, %v902_v62  ;;  %2115 = vrcp.f32 %v932_v63  ;;  %v975_v62 = vperm.slane %v2518_v4, 0 }
 0x7e4   :  { %v2557_v8 = vpop.eup %2113  ;;  %v926_v10 = vmul.f32 1.442695, %v912_v7 }
 0x7e5   :  { %v945_v61 = vsel %vm881_vm11, %v2557_v8, 0.0 }
 0x7e6   :  { %2117 = vpow2.f32 %v926_v10  ;;  %946 = vadd.xlane.f32.xlu2 %v945_v61 }
 0x7e8   :  { %v2116_v14 = vpop.eup %2115 }
 0x7e9   :  { %v962_v17 = vmul.f32 %v2116_v14, %v2104_v35  ;;  %v938_v18 = vpop.xlane.xlu0 %937  ;;  %v935_v20 = vpop.xlane.xlu2 %934  ;;  %v971_v35 = vperm.slane %v2471_v13, 0 }
 0x7ea   :  { %2119 = vrcp.f32 %v938_v18 }
 0x7eb   :  { %2121 = vrcp.f32 %v935_v20  ;;  %v978_v21 = vmul.f32 %v970_v16, %v962_v17  ;;  %v976_v17 = vperm.slane %v2525_v6, 0 }
 0x7ec   :  { %v2563_v12 = vpop.eup %2117  ;;  %2123 = vpow2.f32 %v928_v15 }
 0x7ed   :  { %v948_v57 = vsel %vm881_vm11, %v2563_v12, 0.0  ;;  %v994_v22 = vpack.c.bf16 %v978_v21, %v978_v21 }
 0x7ee   :  { %949 = vadd.xlane.f32.xlu0 %v948_v57 }
 0x7ef   :  { %v1006_v24 = vsel %vm202_vm5, %v994_v22, 0 }
 0x7f0   :  { %v2120_v26 = vpop.eup %2119  ;;  %1015 = vmatpush.bf16.xpose.msra.mxu3 %v1006_v24  ;;  %v977_v24 = vperm.slane %v2504_v43, 0 }
 0x7f1   :  { %v2122_v27 = vpop.eup %2121  ;;  %v964_v29 = vmul.f32 %v2120_v26, %v2108_v47  ;;  %v941_v32 = vpop.xlane.xlu0 %940  ;;  %v974_v47 = vperm.slane %v2494_v30, 0 }
 0x7f2   :  { %v944_v33 = vpop.xlane.xlu2 %943  ;;  %v2569_v34 = vpop.eup %2123  ;;  %v963_v36 = vmul.f32 %v2122_v27, %v2106_v46  ;;  %2125 = vrcp.f32 %v941_v32 }
 0x7f3   :  { %2127 = vrcp.f32 %v944_v33  ;;  %v980_v37 = vmul.f32 %v972_v3, %v964_v29  ;;  %v951_v39 = vsel %vm881_vm11, %v2569_v34, 0.0  ;;  %vm1428_vm11 = vcmask 146432  }
 0x7f4   :  { %v979_v25 = vmul.f32 %v971_v35, %v963_v36 }
 0x7f5   :  { %v996_v41 = vpack.c.bf16 %v980_v37, %v980_v37 }
 0x7f6   :  { %952 = vadd.xlane.f32.xlu0 %v951_v39  ;;  %v995_v19 = vpack.c.bf16 %v979_v25, %v979_v25 }
 0x7f7   :  { %1975 = vmatmul.msk.bf16.vlgmr.msra.gmra.mxu3 %vm202_vm5, %v986_v40  ;;  %v1044_v42 = vsel %vm202_vm5, %v996_v41, 0 }
 0x7f8   :  { %v2126_v38 = vpop.eup %2125  ;;  %v1025_v13 = vsel %vm202_vm5, %v995_v19, 0  ;;  %1053 = vmatpush.bf16.xpose.msra.mxu1 %v1044_v42 }
 0x7f9   :  { %v2128_v44 = vpop.eup %2127  ;;  %v965_v46 = vmul.f32 %v2126_v38, %v2537_v52  ;;  %1034 = vmatpush.bf16.xpose.msrb.mxu0 %v1025_v13 }
 0x7fa   :  { %v966_v48 = vmul.f32 %v2128_v44, %v2535_v49 }
 0x7fb   :  { %v981_v51 = vmul.f32 %v973_v45, %v965_v46  ;;  %v1984_v46 = vld [vmem:[%s2836_s14 + $0x8] sm:$0xff] }
 0x7fc   :  { %v982_v50 = vmul.f32 %v974_v47, %v966_v48 }
 0x7fd   :  { %v997_v53 = vpack.c.bf16 %v981_v51, %v981_v51  ;;  %v1987_v51 = vld [vmem:[%s2830_s16 + $0x8] sm:$0xff] }
 0x7fe   :  { %492 = vrot.lane.b32.xlu2 %v2545_v56, %s2165_s24  ;;  %v998_v0 = vpack.c.bf16 %v982_v50, %v982_v50 }
 0x7ff   :  { %v1063_v54 = vsel %vm202_vm5, %v997_v53, 0 }
 0x800   :  { %v496_v55 = vpop.permute.xlu1 %495  ;;  %1072 = vmatpush.bf16.xpose.msra.mxu2 %v1063_v54  ;;  %v1082_v28 = vsel %vm202_vm5, %v998_v0, 0  ;;  %v1998_v54 = vld [vmem:[%s2831_s6 + $0x10] sm:$0xff] }
 0x801   :  { %1091 = vmatpush.bf16.xpose.msrb.mxu3 %v1082_v28  ;;  %v989_v52 = vpack.c.bf16 %v496_v55, %v496_v55 }
 0x807   :  { %1978 = vmatmul.msk.bf16.vlgmr.msra.gmra.mxu2 %vm202_vm5, %v989_v52 }
 0x808   :  { %v490_v30 = vpop.permute.xlu1 %489 }
 0x809   :  { %v987_v58 = vpack.c.bf16 %v490_v30, %v490_v30  ;;  %v2006_v30 = vld [vmem:[%s2832_s10 + $0x8] sm:$0xf] }
 0x80a   :  { %498 = vrot.lane.b32.xlu0 %v2545_v56, %s2164_s0 }
 0x80b   :  { %1976 = vmatmul.msk.bf16.vlgmr.msrb.gmra.mxu0 %vm202_vm5, %v987_v58  ;;  %v2003_v58 = vld [vmem:[%s2833_s8 + $0x8] sm:$0xf] }
 0x810   :  { %v508_v59 = vpop.permute.xlu1 %507 }
 0x811   :  { %v993_v35 = vpack.c.bf16 %v508_v59, %v508_v59 }
 0x818   :  { %v502_v16 = vpop.permute.xlu1 %501 }
 0x819   :  { %v991_v20 = vpack.c.bf16 %v502_v16, %v502_v16 }
 0x820   :  { %v505_v27 = vpop.permute.xlu1 %504 }
 0x821   :  { %v992_v6 = vpack.c.bf16 %v505_v27, %v505_v27 }
 0x859   :  { %v947_v49 = vpop.xlane.xlu2 %946 }
 0x85a   :  { %2129 = vrcp.f32 %v947_v49 }
 0x860   :  { %v2130_v60 = vpop.eup %2129 }
 0x861   :  { %v967_v63 = vmul.f32 %v2130_v60, %v2557_v8  ;;  %v950_v7 = vpop.xlane.xlu0 %949  ;;  %v493_v9 = vpop.permute.xlu2 %492 }
 0x862   :  { %2131 = vrcp.f32 %v950_v7  ;;  %v988_v10 = vpack.c.bf16 %v493_v9, %v493_v9 }
 0x863   :  { %v983_v61 = vmul.f32 %v975_v62, %v967_v63 }
 0x864   :  { %1977 = vmatmul.msk.bf16.vlgmr.msra.gmra.mxu1 %vm202_vm5, %v988_v10 }
 0x865   :  { %v999_v14 = vpack.c.bf16 %v983_v61, %v983_v61 }
 0x867   :  { %v1101_v56 = vsel %vm202_vm5, %v999_v14, 0 }
 0x868   :  { %v2132_v15 = vpop.eup %2131  ;;  %1110 = vmatpush.bf16.xpose.msra.mxu0 %v1101_v56 }
 0x869   :  { %v968_v18 = vmul.f32 %v2132_v15, %v2563_v12  ;;  %v953_v4 = vpop.xlane.xlu0 %952 }
 0x86a   :  { %2133 = vrcp.f32 %v953_v4 }
 0x86b   :  { %v984_v8 = vmul.f32 %v976_v17, %v968_v18 }
 0x86d   :  { %v1000_v21 = vpack.c.bf16 %v984_v8, %v984_v8 }
 0x86f   :  { %1980 = vmatmul.msk.bf16.vlgmr.msra.gmra.mxu0 %vm202_vm5, %v991_v20  ;;  %v1120_v57 = vsel %vm202_vm5, %v1000_v21, 0  ;;  %v1983_v20 = vld [vmem:[%s2835_s13 + $0x4] sm:$0xf] }
 0x870   :  { %v2134_v22 = vpop.eup %2133  ;;  %1129 = vmatpush.bf16.xpose.msrb.mxu1 %v1120_v57 }
 0x871   :  { %v969_v26 = vmul.f32 %v2134_v22, %v2569_v34 }
 0x873   :  { %v985_v3 = vmul.f32 %v977_v24, %v969_v26  ;;  %v2639_v24 = vld [vmem:[%s2857_s22] ss:$0 sm:$0xff] }
 0x875   :  { %v1001_v29 = vpack.c.bf16 %v985_v3, %v985_v3 }
 0x877   :  { %1981 = vmatmul.msk.bf16.vlgmr.msrb.gmra.mxu1 %vm202_vm5, %v992_v6  ;;  %v1139_v12 = vsel %vm202_vm5, %v1001_v29, 0 }
 0x878   :  { %1148 = vmatpush.bf16.xpose.msrb.mxu2 %v1139_v12  ;;  %v1986_v12 = vld [vmem:[%s2837_s15 + $0x4] sm:$0xf] }
 0x87a   :  { %v1017_v32 = vpop.f32.mrf.mxu3 }
 0x87b   :  { %v1154_v59 = vmax.f32 %v1017_v32, 0.0 }
 0x87c   :  { %v499_v33 = vpop.permute.xlu0 %498 }
 0x87d   :  { %v990_v36 = vpack.c.bf16 %v499_v33, %v499_v33 }
 0x87f   :  { %1979 = vmatmul.msk.bf16.vlgmr.msrb.gmra.mxu3 %vm202_vm5, %v990_v36  ;;  %1982 = vmatmul.msk.bf16.vlgmr.msrb.gmra.mxu2 %vm202_vm5, %v993_v35 }
 0x880   :  { %1363 = vmatpush.bf16.msra.mxu2 %v2312_v11 }
 0x882   :  { %v1019_v43 = vpop.f32.mrf.mxu3 }
 0x888   :  { %v1036_v34 = vpop.f32.mrf.mxu0 }
 0x889   :  { %v1155_v37 = vmax.f32 %v1036_v34, 0.0 }
 0x88a   :  { %v1074_v25 = vpop.f32.mrf.mxu2 }
 0x88b   :  { %1163 = vrot.lane.b32.xlu0 %v1155_v37, %s2161_s28  ;;  %v1157_v39 = vmax.f32 %v1074_v25, 0.0  ;;  %v2025_v25 = vld [vmem:[%s2834_s5 + $0x18] sm:$0xff] }
 0x88d   :  { %1171 = vrot.lane.b32.xlu1 %v1157_v39, %s2171_s12 }
 0x890   :  { %v1038_v40 = vpop.f32.mrf.mxu0 }
 0x892   :  { %v1076_v41 = vpop.f32.mrf.mxu2 }
 0x8e1   :  { %v1055_v11 = vpop.f32.mrf.mxu1 }
 0x8e2   :  { %v1156_v19 = vmax.f32 %v1055_v11, 0.0 }
 0x8e4   :  { %1167 = vrot.lane.b32.xlu2 %v1156_v19, %s2172_s3 }
 0x8e9   :  { %v1057_v42 = vpop.f32.mrf.mxu1 }
 0x8ec   :  { %v1112_v38 = vpop.f32.mrf.mxu0 }
 0x8ed   :  { %v1159_v13 = vmax.f32 %v1112_v38, 0.0 }
 0x8ef   :  { %1179 = vrot.lane.b32.xlu2 %v1159_v13, %s2173_s1  ;;  %s2175_s1 = smov 8  }
 0x8f4   :  { %v1114_v44 = vpop.f32.mrf.mxu0  ;;  %v1131_v45 = vpop.f32.mrf.mxu1 }
 0x8f5   :  { %v1160_v47 = vmax.f32 %v1131_v45, 0.0 }
 0x8f7   :  { %1206 = vperm.xlu2 %2046, %v1984_v46   ;;  %1183 = vrot.lane.b32.xlu1 %v1160_v47, %s2847_s29 }
 0x8fc   :  { %v1133_v48 = vpop.f32.mrf.mxu1 }
 0x8fd   :  { %v1164_v49 = vpop.permute.xlu0 %1163 }
 0x8fe   :  { %v1190_v62 = vsel %vm298_vm8, %v1154_v59, %v1164_v49 }
 0x8ff   :  { %1237 = vperm.xlu1 %2094, %v1987_v51   ;;  %v1172_v7 = vpop.permute.xlu1 %1171 }
 0x902   :  { %v1093_v50 = vpop.f32.mrf.mxu3  ;;  %v1150_v53 = vpop.f32.mrf.mxu2 }
 0x903   :  { %v1158_v0 = vmax.f32 %v1093_v50, 0.0  ;;  %v1161_v52 = vmax.f32 %v1150_v53, 0.0 }
 0x905   :  { %1175 = vrot.lane.b32.xlu0 %v1158_v0, %s2175_s1 }
 0x907   :  { %1317 = vperm.xlu1 %2094, %v1998_v54  }
 0x90a   :  { %v1095_v55 = vpop.f32.mrf.mxu3  ;;  %v1152_v28 = vpop.f32.mrf.mxu2 }
 0x90d   :  { %1187 = vrot.lane.b32.xlu0 %v1161_v52, %s2176_s4 }
 0x90f   :  { %1404 = vperm.xlu1 %2094, %v2006_v30  }
 0x917   :  { %1376 = vperm.xlu1 %2094, %v2003_v58  }
 0x93e   :  { %v1168_v60 = vpop.permute.xlu2 %1167 }
 0x93f   :  { %v1191_v63 = vsel %vm202_vm5, %v1190_v62, %v1168_v60 }
 0x940   :  { %v1192_v10 = vsel %vm76_vm1, %v1191_v63, %v1172_v7 }
 0x949   :  { %v1180_v14 = vpop.permute.xlu2 %1179 }
 0x951   :  { %v1207_v21 = vpop.permute.xlu2 %1206 }
 0x969   :  { %v1184_v15 = vpop.permute.xlu1 %1183 }
 0x971   :  { %v1238_v32 = vpop.permute.xlu1 %1237 }
 0x977   :  { %v1176_v9 = vpop.permute.xlu0 %1175 }
 0x978   :  { %v1193_v61 = vsel %vm114_vm3, %v1192_v10, %v1176_v9 }
 0x979   :  { %v1195_v56 = vsel %vm1194_vm6, %v1193_v61, %v1180_v14  ;;  %v1318_v48 = vpop.permute.xlu1 %1317 }
 0x97a   :  { %v1197_v17 = vsel %vm1196_vm15, %v1195_v56, %v1184_v15  ;;  %v2002_v15 = vld [vmem:[%s2838_s7 + $0x4] sm:$0x3] }
 0x97f   :  { %v1188_v16 = vpop.permute.xlu0 %1187 }
 0x980   :  { %v1198_v18 = vsel %vm305_vm9, %v1197_v17, %v1188_v16 }
 0x981   :  { %v1201_v4 = vpack.c.bf16 %v1198_v18, %v1198_v18  ;;  %v1405_v16 = vpop.permute.xlu1 %1404 }
 0x983   :  { %v1213_v8 = vsel %vm206_vm4, %v1201_v4, 0 }
 0x984   :  { %1222 = vmatpush.bf16.msra.mxu3 %v1213_v8 }
 0x987   :  { %1985 = vmatmul.msk.bf16.vlgmr.msra.gmra.mxu3 %vm202_vm5, %v1983_v20 }
 0x989   :  { %v1377_v4 = vpop.permute.xlu1 %1376 }
 0xa0a   :  { %v1224_v57 = vpop.f32.mrf.mxu3 }
 0xa0b   :  { %v1225_v22 = vadd.f32 %v1224_v57, %v1207_v21 }
 0xa0d   :  { %v1228_v26 = vmul.f32 %v2639_v24, %v1225_v22 }
 0xa0f   :  { %v1229_v27 = vadd.f32 %v1228_v26, %v2384_v23 }
 0xa11   :  { %v1232_v3 = vpack.c.bf16 %v1229_v27, %v1229_v27 }
 0xa12   :  { %v1226_v6 = vpop.f32.mrf.mxu3 }
 0xa13   :  { %v1244_v29 = vsel %vm121_vm2, %v1232_v3, 0 }
 0xa14   :  { %1253 = vmatpush.bf16.msrb.mxu0 %v1244_v29 }
 0xa17   :  { %1988 = vmatmul.msk.bf16.vlgmr.msrb.gmra.mxu0 %vm114_vm3, %v1986_v12 }
 0xa94   :  { %v1255_v33 = vpop.f32.mrf.mxu0 }
 0xa95   :  { %v1256_v35 = vadd.f32 %v1255_v33, %v1238_v32 }
 0xa97   :  { %v1259_v36 = vadd.f32 %v1256_v35, %v2367_v1  ;;  %v1991_v1 = vld [vmem:[%s2834_s5 + $0x20] sm:$0xf] }
 0xa98   :  { %v1271_v39 = vunpack.c.l.b16 %v1991_v1  ;;  %v1999_v1 = vld [vmem:[%s2829_s11 + $0x4] sm:$0x3] }
 0xa99   :  { %v2650_v43 = vmul.f32 %v2639_v24, %v1259_v36  ;;  %2001 = vmatmul.msk.bf16.vlgmr.msra.gmra.mxu2 %vm114_vm3, %v1999_v1 }
 0xa9a   :  { %v1273_v40 = vpack.c.b16 %v1271_v39, %v1271_v39 }
 0xa9b   :  { %v1265_v23 = vpack.c.bf16 %v2650_v43, %v2650_v43 }
 0xa9c   :  { %v1257_v34 = vpop.f32.mrf.mxu0 }
 0xa9d   :  { %v1281_v37 = vsel %vm121_vm2, %v1265_v23, 0 }
 0xa9e   :  { %1290 = vmatpush.bf16.msra.mxu1 %v1281_v37 }
 0xaa1   :  { %1996 = vmatmul.msk.bf16.vlgmr.msra.gmra.mxu1 %vm114_vm3, %v2025_v25 }
 0xab1   :  { %1997 = vmatmul.msk.bf16.gmra.mxu1 %vm114_vm3, %v1273_v40 }
 0xb1e   :  { %v1292_v41 = vpop.f32.mrf.mxu1 }
 0xb1f   :  { %1302 = vrot.lane.b32.xlu0 %v1292_v41, %s2172_s3 }
 0xb26   :  { %v1294_v11 = vpop.f32.mrf.mxu1 }
 0xb2e   :  { %v1297_v19 = vpop.f32.mrf.mxu1 }
 0xb2f   :  { %1308 = vrot.lane.b32.xlu2 %v1297_v19, %s2165_s24 }
 0xb36   :  { %v1299_v42 = vpop.f32.mrf.mxu1 }
 0xb89   :  { %v1309_v38 = vpop.permute.xlu2 %1308 }
 0xb8a   :  { %v1311_v45 = vsel %vm1196_vm15, %v1309_v38, 0.0 }
 0xb91   :  { %v1303_v13 = vpop.permute.xlu0 %1302 }
 0xb92   :  { %v1305_v44 = vsel %vm202_vm5, 0.0, %v1303_v13 }
 0xb93   :  { %v1306_v46 = vadd.f32 %v1305_v44, %v1294_v11  ;;  %v1365_v44 = vpop.f32.mrf.mxu2 }
 0xb95   :  { %v1312_v47 = vadd.f32 %v1311_v45, %v1306_v46 }
 0xb97   :  { %v1320_v51 = vadd.f32 %v1318_v48, %v1312_v47 }
 0xb99   :  { %v2667_v50 = vmax.f32 %v1320_v51, 0.0 }
 0xb9b   :  { %v1322_v53 = vsel %vm317_vm10, %v2667_v50, 0.0  ;;  %v1367_v51 = vpop.f32.mrf.mxu2 }
 0xb9c   :  { %1323 = vadd.xlane.f32.xlu0 %v1322_v53  ;;  %v2000_v53 = vld [vmem:[%s2859_s26 + $0x8] sm:$0xf] }
 0xc0f   :  { %v1324_v0 = vpop.xlane.xlu0 %1323 }
 0xc10   :  { %v1325_v54 = vmul.f32 %v1324_v0, %v2388_v31 }
 0xc12   :  { %v1326_v55 = vsub.f32 %v2667_v50, %v1325_v54 }
 0xc14   :  { %v1327_v28 = vmul.f32 %v1326_v55, %v1326_v55 }
 0xc16   :  { %v1328_v52 = vsel %vm317_vm10, %v1327_v28, 0.0 }
 0xc17   :  { %1329 = vadd.xlane.f32.xlu2 %v1328_v52 }
 0xc8a   :  { %v1330_v30 = vpop.xlane.xlu2 %1329 }
 0xc8b   :  { %v1331_v58 = vmul.f32 %v1330_v30, %v2388_v31  ;;  %v2005_v31 = vld [vmem:[%s2839_s9 + $0x4] sm:$0x3] }
 0xc8d   :  { %v1332_v49 = vadd.f32 1e-05, %v1331_v58 }
 0xc8f   :  { %2135 = vrsqrt.f32 %v1332_v49  ;;  %vm1339_vm9 = vweird.f32 %v1332_v49 }
 0xc95   :  { %v2136_v59 = vpop.eup %2135 }
 0xc96   :  { %v1334_v60 = vmul.f32 %v2136_v59, %v1332_v49  ;;  %vm1340_vm1 = vweird.f32 %v2136_v59 }
 0xc97   :  { %vm1341_vm0 = vmor %vm1339_vm9, %vm1340_vm1 }
 0xc98   :  { %v1335_v62 = vmul.f32 %v2136_v59, %v1334_v60 }
 0xc9a   :  { %v1336_v63 = vmul.f32 0.5, %v1335_v62 }
 0xc9c   :  { %v1337_v7 = vsub.f32 1.5, %v1336_v63 }
 0xc9e   :  { %v1338_v9 = vmul.f32 %v2136_v59, %v1337_v7 }
 0xca0   :  { %v1342_v10 = vsel %vm1341_vm0, %v2136_v59, %v1338_v9 }
 0xca1   :  { %v1343_v61 = vmul.f32 %v1342_v10, %v1326_v55 }
 0xca3   :  { %v1371_v14 = vpack.c.bf16 %v1343_v61, %v1343_v61 }
 0xca5   :  { %v1383_v56 = vsel %vm121_vm2, %v1371_v14, 0 }
 0xca6   :  { %1392 = vmatpush.bf16.msrb.mxu3 %v1383_v56  ;;  %1417 = vmatpush.bf16.msra.mxu0 %v1383_v56 }
 0xca9   :  { %2004 = vmatmul.msk.bf16.vlgmr.msrb.gmra.mxu3 %vm114_vm3, %v2002_v15  ;;  %2007 = vmatmul.msk.bf16.vlgmr.msra.gmra.mxu0 %vm114_vm3, %v2005_v31 }
 0xd26   :  { %v1419_v17 = vpop.f32.mrf.mxu0 }
 0xd27   :  { %v1420_v18 = vadd.f32 %v1419_v17, %v1405_v16 }
 0xd29   :  { %1424 = vrot.lane.b32.xlu1 %v1420_v18, %s2161_s28 }
 0xd2c   :  { %v1394_v8 = vpop.f32.mrf.mxu3 }
 0xd2d   :  { %v1395_v20 = vadd.f32 %v1394_v8, %v1377_v4 }
 0xd2e   :  { %v1421_v21 = vpop.f32.mrf.mxu0 }
 0xd2f   :  { %1448 = vrot.lane.b32.xlu0 %v1395_v20, %s2169_s2  ;;  %v1488_v32 = vpack.c.bf16 %v1395_v20, %v1395_v20 }
 0xd31   :  { %1442 = vrot.lane.b32.xlu1 %v1395_v20, %s2165_s24 }
 0xd34   :  { %v1396_v57 = vpop.f32.mrf.mxu3 }
 0xd39   :  { %1445 = vrot.lane.b32.xlu1 %v1395_v20, %s2164_s0 }
 0xd9b   :  { %v1425_v22 = vpop.permute.xlu1 %1424 }
 0xd9c   :  { %v1427_v26 = vsel %vm298_vm8, 0.0, %v1425_v22 }
 0xd9d   :  { %v1429_v27 = vsel %vm1428_vm11, %v1427_v26, 0.0 }
 0xd9e   :  { %1452 = vrot.lane.b32.xlu2 %v1429_v27, %s2165_s24  ;;  %1455 = vrot.lane.b32.xlu1 %v1429_v27, %s2164_s0  ;;  %v1492_v3 = vpack.c.bf16 %v1429_v27, %v1429_v27 }
 0xda0   :  { %v1516_v6 = vsel %vm206_vm4, %v1492_v3, 0 }
 0xda1   :  { %1525 = vmatpush.bf16.msrb.mxu2 %v1516_v6  ;;  %v1449_v33 = vpop.permute.xlu0 %1448 }
 0xda2   :  { %v1491_v36 = vpack.c.bf16 %v1449_v33, %v1449_v33 }
 0xda3   :  { %v1443_v29 = vpop.permute.xlu1 %1442 }
 0xda4   :  { %v1489_v12 = vpack.c.bf16 %v1443_v29, %v1443_v29 }
 0xda6   :  { %1458 = vrot.lane.b32.xlu1 %v1429_v27, %s2169_s2  ;;  %1531 = vxpose.xlu0.c.b16.start.end [1/1] (short) (narrow) %v1489_v12, 16 }
 0xdab   :  { %v1446_v35 = vpop.permute.xlu1 %1445 }
 0xdac   :  { %v1490_v23 = vpack.c.bf16 %v1446_v35, %v1446_v35 }
 0xdc4   :  { %1496 = vxpose.xlu2.c.b16.start.end [1/1] (short) (narrow) %v1488_v32, 16 }
 0xddb   :  { %2095 = vxpose.binary.xlu1.c.b16.start.end [1/2] (short) (narrow) %v1491_v36, %v1490_v23, 16 }
 0xdf8   :  { %v1453_v34 = vpop.permute.xlu2 %1452 }
 0xdf9   :  { %v1493_v37 = vpack.c.bf16 %v1453_v34, %v1453_v34 }
 0xdfb   :  { %v1551_v25 = vsel %vm206_vm4, %v1493_v37, 0 }
 0xdfc   :  { %1560 = vmatpush.bf16.msra.mxu3 %v1551_v25 }
 0xe10   :  { %v1456_v39 = vpop.permute.xlu1 %1455 }
 0xe11   :  { %v1494_v40 = vpack.c.bf16 %v1456_v39, %v1456_v39 }
 0xe13   :  { %v1586_v41 = vsel %vm206_vm4, %v1494_v40, 0 }
 0xe14   :  { %1436 = vrot.lane.b32.xlu0 %v2639_v24, %s2161_s28  ;;  %1595 = vmatpush.bf16.msrb.mxu0 %v1586_v41 }
 0xe18   :  { %v1459_v11 = vpop.permute.xlu1 %1458 }
 0xe19   :  { %v1495_v19 = vpack.c.bf16 %v1459_v11, %v1459_v11 }
 0xe1b   :  { %v1621_v42 = vsel %vm206_vm4, %v1495_v19, 0 }
 0xe1c   :  { %1630 = vmatpush.bf16.msrb.mxu1 %v1621_v42 }
 0xe52   :  { %v1539_v38 = vpop.trf.xlu0 }
 0xe53   :  { %2009 = vmatmul.msk.bf16.vlgmr.msra.gmra.mxu3 %vm202_vm5, %v1539_v38 }
 0xe65   :  { %v1504_v13 = vpop.trf.xlu2 }
 0xe66   :  { %2008 = vmatmul.msk.bf16.vlgmr.msrb.gmra.mxu2 %vm202_vm5, %v1504_v13 }
 0xe86   :  { %v1437_v45 = vpop.permute.xlu0 %1436 }
 0xe87   :  { %v1439_v46 = vsel %vm298_vm8, 0.0, %v1437_v45  ;;  %v2096_v47 = vpop.trf.xlu1 }
 0xe88   :  { %v1440_v48 = vsel %vm1428_vm11, %v1439_v46, 0.0  ;;  %2010 = vmatmul.msk.bf16.vlgmr.msrb.gmra.mxu0 %vm202_vm5, %v2096_v47 }
 0xe89   :  { %1475 = vrot.lane.b32.xlu1 %v1440_v48, %s2164_s0  ;;  %1472 = vrot.lane.b32.xlu2 %v1440_v48, %s2165_s24  ;;  %v2735_v31 = vsel %vm1481_vm7, %v1440_v48, 0.0 }
 0xe8a   :  { %1478 = vrot.lane.b32.xlu0 %v1440_v48, %s2169_s2  ;;  %vm1640_vm1 = vcmp.gt.f32.partialorder %v2735_v31, 0.0 }
 0xe8b   :  { %v1644_v20 = vsel %vm1640_vm1, 9.999995e-07, %v2170_v5 }
 0xe8c   :  { %v1648_v22 = vperm.slane %v1644_v20, 0 }
 0xe8f   :  { %v2097_v0 = vpop.trf.xlu1 }
 0xe90   :  { %2011 = vmatmul.msk.bf16.vlgmr.msrb.gmra.mxu1 %vm202_vm5, %v2097_v0 }
 0xe91   :  { %1350 = vperm.xlu1 %2094, %v2000_v53  }
 0xed6   :  { %v1562_v54 = vpop.f32.mrf.mxu3 }
 0xed7   :  { %v1637_v30 = vmul.f32 0.5, %v1562_v54 }
 0xede   :  { %v1564_v55 = vpop.f32.mrf.mxu3 }
 0xee3   :  { %v1473_v28 = vpop.permute.xlu2 %1472 }
 0xee4   :  { %v2718_v52 = vsel %vm1481_vm7, %v1473_v28, 0.0 }
 0xee5   :  { %vm1641_vm12 = vcmp.gt.f32.partialorder %v2718_v52, 0.0 }
 0xee6   :  { %v1645_v58 = vsel %vm1641_vm12, 9.999995e-07, %v2170_v5 }
 0xee7   :  { %v1649_v49 = vperm.slane %v1645_v58, 0 }
 0xee9   :  { %v1527_v59 = vpop.f32.mrf.mxu2  ;;  %v1653_v60 = vadd.f32 %v1649_v49, %v1637_v30 }
 0xeea   :  { %v1636_v21 = vmul.f32 0.5, %v1527_v59 }
 0xeeb   :  { %v1660_v62 = vsel %vm1656_vm13, %v1653_v60, -inf }
 0xeec   :  { %1661 = vmax.xlane.f32.xlu2 %v1660_v62  ;;  %v1652_v6 = vadd.f32 %v1648_v22, %v1636_v21 }
 0xeee   :  { %v1657_v12 = vsel %vm1656_vm13, %v1652_v6, -inf }
 0xef1   :  { %v1529_v63 = vpop.f32.mrf.mxu2 }
 0xefb   :  { %v1476_v7 = vpop.permute.xlu1 %1475 }
 0xefc   :  { %v2725_v9 = vsel %vm1481_vm7, %v1476_v7, 0.0  ;;  %v1479_v10 = vpop.permute.xlu0 %1478 }
 0xefd   :  { %vm1642_vm14 = vcmp.gt.f32.partialorder %v2725_v9, 0.0  ;;  %v2731_v56 = vsel %vm1481_vm7, %v1479_v10, 0.0  ;;  %v1703_v28 = vperm.slane %v2725_v9, 0  ;;  %v1701_v10 = vperm.slane %v2735_v31, 0 }
 0xefe   :  { %v1646_v61 = vsel %vm1642_vm14, 9.999995e-07, %v2170_v5  ;;  %vm1643_vm6 = vcmp.gt.f32.partialorder %v2731_v56, 0.0 }
 0xeff   :  { %v1650_v15 = vperm.slane %v1646_v61, 0  ;;  %v1647_v8 = vsel %vm1643_vm6, 9.999995e-07, %v2170_v5 }
 0xf00   :  { %v1651_v57 = vperm.slane %v1647_v8, 0 }
 0xf03   :  { %v1351_v14 = vpop.permute.xlu1 %1350 }
 0xf04   :  { %v1366_v16 = vadd.f32 %v1365_v44, %v1351_v14  ;;  %v1704_v14 = vperm.slane %v2731_v56, 0 }
 0xf05   :  { %v1597_v17 = vpop.f32.mrf.mxu0 }
 0xf06   :  { %v1638_v18 = vmul.f32 0.5, %v1597_v17  ;;  %1431 = vrot.lane.b32.xlu2 %v1366_v16, %s2161_s28 }
 0xf08   :  { %v1654_v4 = vadd.f32 %v1650_v15, %v1638_v18 }
 0xf0a   :  { %v1663_v2 = vsel %vm1656_vm13, %v1654_v4, -inf }
 0xf0b   :  { %1664 = vmax.xlane.f32.xlu0 %v1663_v2  ;;  %v1702_v2 = vperm.slane %v2718_v52, 0 }
 0xf0d   :  { %v1632_v26 = vpop.f32.mrf.mxu1  ;;  %v1599_v27 = vpop.f32.mrf.mxu0 }
 0xf0e   :  { %v1639_v3 = vmul.f32 0.5, %v1632_v26 }
 0xf10   :  { %v1655_v29 = vadd.f32 %v1651_v57, %v1639_v3 }
 0xf12   :  { %v1666_v32 = vsel %vm1656_vm13, %v1655_v29, -inf }
 0xf13   :  { %1658 = vmax.xlane.f32.xlu0 %v1657_v12  ;;  %1667 = vmax.xlane.f32.xlu1 %v1666_v32 }
 0xf15   :  { %v1634_v33 = vpop.f32.mrf.mxu1 }
 0xf5f   :  { %v1662_v35 = vpop.xlane.xlu2 %1661 }
 0xf60   :  { %v1670_v38 = vsub.f32 %v1653_v60, %v1662_v35 }
 0xf62   :  { %v1675_v44 = vmul.f32 1.442695, %v1670_v38 }
 0xf67   :  { %v1432_v5 = vpop.permute.xlu2 %1431 }
 0xf68   :  { %v1434_v36 = vsel %vm298_vm8, 0.0, %v1432_v5 }
 0xf69   :  { %v2747_v23 = vsel %vm1428_vm11, %v1434_v36, 0.0 }
 0xf6a   :  { %1468 = vrot.lane.b32.xlu2 %v2747_v23, %s2169_s2  ;;  %v1709_v56 = vpack.c.bf16 %v2747_v23, %v2747_v23 }
 0xf7e   :  { %v1665_v34 = vpop.xlane.xlu0 %1664 }
 0xf7f   :  { %v1671_v37 = vsub.f32 %v1654_v4, %v1665_v34 }
 0xf81   :  { %v1677_v25 = vmul.f32 1.442695, %v1671_v37 }
 0xf83   :  { %2137 = vpow2.f32 %v1677_v25  ;;  %v2017_v25 = vld [vmem:[%s2836_s14 + $0x10] sm:$0xff] }
 0xf86   :  { %v1659_v1 = vpop.xlane.xlu0 %1658  ;;  %v1668_v39 = vpop.xlane.xlu1 %1667 }
 0xf87   :  { %v1669_v40 = vsub.f32 %v1652_v6, %v1659_v1  ;;  %v1672_v41 = vsub.f32 %v1655_v29, %v1668_v39 }
 0xf89   :  { %v2138_v11 = vpop.eup %2137  ;;  %v1673_v19 = vmul.f32 1.442695, %v1669_v40  ;;  %v1679_v42 = vmul.f32 1.442695, %v1672_v41  ;;  %v1876_v40 = vld [vmem:[%s2840_s18] sm:$0x3f] }
 0xf8a   :  { %v1687_v13 = vsel %vm1656_vm13, %v2138_v11, 0.0  ;;  %v2020_v41 = vld [vmem:[%s2830_s16 + $0x10] sm:$0xff] }
 0xf8b   :  { %2139 = vpow2.f32 %v1673_v19  ;;  %1688 = vadd.xlane.f32.xlu0 %v1687_v13 }
 0xf8c   :  { %2141 = vpow2.f32 %v1679_v42 }
 0xf8d   :  { %2143 = vpow2.f32 %v1675_v44 }
 0xf91   :  { %v2140_v45 = vpop.eup %2139 }
 0xf92   :  { %v2142_v46 = vpop.eup %2141  ;;  %v1681_v47 = vsel %vm1656_vm13, %v2140_v45, 0.0 }
 0xf93   :  { %1682 = vadd.xlane.f32.xlu2 %v1681_v47  ;;  %v1690_v48 = vsel %vm1656_vm13, %v2142_v46, 0.0  ;;  %v2144_v51 = vpop.eup %2143 }
 0xf94   :  { %1691 = vadd.xlane.f32.xlu1 %v1690_v48  ;;  %v1684_v53 = vsel %vm1656_vm13, %v2144_v51, 0.0  ;;  %v2016_v48 = vld [vmem:[%s2835_s13 + $0x8] sm:$0xf] }
 0xf9c   :  { %1685 = vadd.xlane.f32.xlu1 %v1684_v53 }
 0xf9f   :  { %1462 = vrot.lane.b32.xlu0 %v2747_v23, %s2165_s24 }
 0xfb5   :  { %1465 = vrot.lane.b32.xlu1 %v2747_v23, %s2164_s0  ;;  %s2860_s0 = smov 12  }
 0xfc4   :  { %v1469_v0 = vpop.permute.xlu2 %1468 }
 0xfc5   :  { %v1712_v22 = vpack.c.bf16 %v1469_v0, %v1469_v0 }
 0xffe   :  { %v1689_v54 = vpop.xlane.xlu0 %1688 }
 0xfff   :  { %2145 = vrcp.f32 %v1689_v54 }
0x1005   :  { %v2146_v55 = vpop.eup %2145 }
0x1006   :  { %v1699_v30 = vmul.f32 %v2146_v55, %v2138_v11  ;;  %v1683_v58 = vpop.xlane.xlu2 %1682 }
0x1007   :  { %2147 = vrcp.f32 %v1683_v58  ;;  %v1692_v49 = vpop.xlane.xlu1 %1691 }
0x1008   :  { %2149 = vrcp.f32 %v1692_v49  ;;  %v1707_v59 = vmul.f32 %v1703_v28, %v1699_v30  ;;  %v2019_v49 = vld [vmem:[%s2837_s15 + $0x8] sm:$0xf] }
0x100a   :  { %v1715_v60 = vpack.c.bf16 %v1707_v59, %v1707_v59 }
0x100c   :  { %v1759_v62 = vsel %vm114_vm3, %v1715_v60, 0 }
0x100d   :  { %v2148_v63 = vpop.eup %2147  ;;  %1768 = vmatpush.bf16.xpose.msra.mxu0 %v1759_v62 }
0x100e   :  { %v2150_v7 = vpop.eup %2149  ;;  %v1697_v61 = vmul.f32 %v2148_v63, %v2140_v45 }
0x100f   :  { %v1700_v15 = vmul.f32 %v2150_v7, %v2142_v46  ;;  %v1686_v16 = vpop.xlane.xlu1 %1685 }
0x1010   :  { %2151 = vrcp.f32 %v1686_v16  ;;  %v1705_v9 = vmul.f32 %v1701_v10, %v1697_v61 }
0x1011   :  { %v1708_v17 = vmul.f32 %v1704_v14, %v1700_v15  ;;  %v1463_v3 = vpop.permute.xlu0 %1462  ;;  %v1874_v14 = vld [vmem:[%s2842_s17] sm:$0x7] }
0x1012   :  { %v1713_v18 = vpack.c.bf16 %v1705_v9, %v1705_v9  ;;  %v1710_v6 = vpack.c.bf16 %v1463_v3, %v1463_v3 }
0x1013   :  { %v1716_v4 = vpack.c.bf16 %v1708_v17, %v1708_v17 }
0x1014   :  { %v1721_v8 = vsel %vm114_vm3, %v1713_v18, 0 }
0x1015   :  { %1730 = vmatpush.bf16.xpose.msra.mxu2 %v1721_v8  ;;  %v1778_v20 = vsel %vm114_vm3, %v1716_v4, 0 }
0x1016   :  { %v2152_v21 = vpop.eup %2151  ;;  %1787 = vmatpush.bf16.xpose.msra.mxu1 %v1778_v20 }
0x1017   :  { %v1698_v31 = vmul.f32 %v2152_v21, %v2144_v51 }
0x1019   :  { %v1706_v57 = vmul.f32 %v1702_v2, %v1698_v31 }
0x101b   :  { %v1714_v26 = vpack.c.bf16 %v1706_v57, %v1706_v57 }
0x101c   :  { %2012 = vmatmul.msk.bf16.vlgmr.msra.gmra.mxu2 %vm114_vm3, %v1709_v56 }
0x101d   :  { %2015 = vmatmul.msk.bf16.vlgmr.msra.gmra.mxu1 %vm114_vm3, %v1712_v22  ;;  %v1740_v27 = vsel %vm114_vm3, %v1714_v26, 0 }
0x101e   :  { %1749 = vmatpush.bf16.xpose.msrb.mxu3 %v1740_v27 }
0x1025   :  { %2013 = vmatmul.msk.bf16.vlgmr.msrb.gmra.mxu3 %vm114_vm3, %v1710_v6 }
0x1027   :  { %v1466_v29 = vpop.permute.xlu1 %1465 }
0x1028   :  { %v1711_v52 = vpack.c.bf16 %v1466_v29, %v1466_v29 }
0x102a   :  { %2014 = vmatmul.msk.bf16.vlgmr.msra.gmra.mxu0 %vm114_vm3, %v1711_v52 }
0x109a   :  { %v1789_v12 = vpop.f32.mrf.mxu1 }
0x109b   :  { %v1796_v39 = vmax.f32 %v1789_v12, 0.0 }
0x109f   :  { %v1732_v32 = vpop.f32.mrf.mxu2 }
0x10a0   :  { %v1793_v19 = vmax.f32 %v1732_v32, 0.0 }
0x10a2   :  { %v1791_v33 = vpop.f32.mrf.mxu1 }
0x10a7   :  { %v1770_v35 = vpop.f32.mrf.mxu0  ;;  %v1734_v5 = vpop.f32.mrf.mxu2 }
0x10a8   :  { %v1795_v36 = vmax.f32 %v1770_v35, 0.0  ;;  %v1751_v23 = vpop.f32.mrf.mxu3 }
0x10a9   :  { %v1794_v34 = vmax.f32 %v1751_v23, 0.0 }
0x10aa   :  { %1802 = vrot.lane.b32.xlu1 %v1795_v36, %s2175_s1 }
0x10ab   :  { %1798 = vrot.lane.b32.xlu0 %v1794_v34, %s2172_s3 }
0x10af   :  { %v1772_v37 = vpop.f32.mrf.mxu0 }
0x10b0   :  { %v1753_v1 = vpop.f32.mrf.mxu3 }
0x10b2   :  { %1819 = vperm.xlu1 %2094, %v2017_v25  }
0x10b3   :  { %1806 = vrot.lane.b32.xlu0 %v1796_v39, %s2860_s0 }
0x10ba   :  { %1879 = vperm.xlu1 %2094, %v1876_v40  }
0x10bb   :  { %1850 = vperm.xlu0 %2045, %v2020_v41  }
0x111c   :  { %v1803_v38 = vpop.permute.xlu1 %1802 }
0x111d   :  { %v1799_v11 = vpop.permute.xlu0 %1798 }
0x111e   :  { %v1809_v42 = vsel %vm202_vm5, %v1793_v19, %v1799_v11 }
0x111f   :  { %v1810_v13 = vsel %vm114_vm3, %v1809_v42, %v1803_v38 }
0x1124   :  { %v1820_v51 = vpop.permute.xlu1 %1819 }
0x1125   :  { %v1807_v44 = vpop.permute.xlu0 %1806 }
0x1126   :  { %v1811_v45 = vsel %vm1196_vm15, %v1810_v13, %v1807_v44 }
0x1127   :  { %v1814_v46 = vpack.c.bf16 %v1811_v45, %v1811_v45 }
0x1129   :  { %v1826_v47 = vsel %vm206_vm4, %v1814_v46, 0  ;;  %vm1902_vm4 = vcmask 128000  }
0x112a   :  { %1835 = vmatpush.bf16.msrb.mxu2 %v1826_v47 }
0x112c   :  { %v1880_v15 = vpop.permute.xlu1 %1879 }
0x112d   :  { %2018 = vmatmul.msk.bf16.vlgmr.msrb.gmra.mxu2 %vm202_vm5, %v2016_v48  ;;  %v1851_v59 = vpop.permute.xlu0 %1850 }
0x11b0   :  { %v1837_v53 = vpop.f32.mrf.mxu2 }
0x11b1   :  { %v1838_v0 = vadd.f32 %v1837_v53, %v1820_v51 }
0x11b3   :  { %v1841_v54 = vmul.f32 %v2639_v24, %v1838_v0 }
0x11b5   :  { %v1842_v55 = vadd.f32 %v1841_v54, %v2667_v50 }
0x11b7   :  { %v1845_v28 = vpack.c.bf16 %v1842_v55, %v1842_v55 }
0x11b8   :  { %v1839_v30 = vpop.f32.mrf.mxu2 }
0x11b9   :  { %v1857_v58 = vsel %vm121_vm2, %v1845_v28, 0 }
0x11ba   :  { %1866 = vmatpush.bf16.msra.mxu3 %v1857_v58 }
0x11bd   :  { %2021 = vmatmul.msk.bf16.vlgmr.msra.gmra.mxu3 %vm114_vm3, %v2019_v49 }
0x1240   :  { %v1868_v60 = vpop.f32.mrf.mxu3 }
0x1241   :  { %v1869_v62 = vadd.f32 %v1868_v60, %v1851_v59 }
0x1243   :  { %v1872_v63 = vadd.f32 %v1869_v62, %v2650_v43 }
0x1245   :  { %v1873_v7 = vmul.f32 %v2639_v24, %v1872_v63 }
0x1247   :  { %1904 = vst.msk [vmem:[%s2841_s20] sm:$0xff] %vm317_vm10, %v1873_v7  ;;  %v1875_v50 = vpack.c.bf16 %v1873_v7, %v1873_v7 }
0x1248   :  { %v1870_v10 = vpop.f32.mrf.mxu3 }
0x1249   :  { %v1886_v61 = vsel %vm121_vm2, %v1875_v50, 0 }
0x124a   :  { %1895 = vmatpush.bf16.msrb.mxu0 %v1886_v61 }
0x124d   :  { %2022 = vmatmul.msk.bf16.vlgmr.msrb.gmra.mxu0 %vm114_vm3, %v1874_v14 }
0x12ca   :  { %v1897_v43 = vpop.f32.mrf.mxu0 }
0x12cb   :  { %v1898_v16 = vadd.f32 %v1897_v43, %v1880_v15 }
0x12cd   :  { %v1901_v9 = vmul.f32 %v2639_v24, %v1898_v16 }
0x12cf   :  { %1903 = vst.msk [vmem:[%s2843_s19] sm:$0x3f] %vm1902_vm4, %v1901_v9  ;;  %v1905_v17 = vsel %vm1902_vm4, %v1901_v9, -inf }
0x12d0   :  { %v1906_v18 = vrot.slane %v1905_v17, 4 }
0x12d2   :  { %v1907_v4 = vmax.f32 %v1905_v17, %v1906_v18  ;;  %v1899_v8 = vpop.f32.mrf.mxu0 }
0x12d4   :  { %v1908_v20 = vrot.slane %v1907_v4, 2 }
0x12d6   :  { %v1909_v21 = vmax.f32 %v1907_v4, %v1908_v20 }
0x12d8   :  { %v1910_v2 = vrot.slane %v1909_v21, 1 }
0x12da   :  { %v1911_v31 = vmax.f32 %v1909_v21, %v1910_v2 }
0x12dc   :  { %v1912_v57 = vsub.f32 %v1901_v9, %v1911_v31 }
0x12de   :  { %v1913_v56 = vmul.f32 1.442695, %v1912_v57 }
0x12e0   :  { %2153 = vpow2.f32 %v1913_v56 }
0x12e6   :  { %v2154_v22 = vpop.eup %2153 }
0x12e7   :  { %v1915_v26 = vsel %vm1902_vm4, %v2154_v22, 0.0 }
0x12e8   :  { %v1916_v27 = vrot.slane %v1915_v26, 4 }
0x12ea   :  { %v1917_v3 = vadd.f32 %v1916_v27, %v1915_v26 }
0x12ec   :  { %v1918_v6 = vrot.slane %v1917_v3, 2 }
0x12ee   :  { %v1919_v29 = vadd.f32 %v1918_v6, %v1917_v3 }
0x12f0   :  { %v1920_v52 = vrot.slane %v1919_v29, 1 }
0x12f2   :  { %v1921_v12 = vadd.f32 %v1920_v52, %v1919_v29 }
0x12f4   :  { %2155 = vrcp.f32 %v1921_v12 }
0x12fa   :  { %v2156_v32 = vpop.eup %2155 }
0x12fb   :  { %v1923_v33 = vmul.f32 %v2156_v32, %v2154_v22 }
0x12fd   :  { %v1924_v35 = vmul.f32 %v2639_v24, %v1923_v33 }
0x12ff   :  { %1925 = vst.msk [vmem:[%s2844_s21] sm:$0x3f] %vm1902_vm4, %v1924_v35 }

// kernel: my_transformer_fwd.3
= control target key start
LH: loop header
LB: loop body
LE: loop exit
PB: predicated region body
PF: predicated region fallthrough
CT: control target
= control target key end

     0   :  { %v2174_v2 = vmov 0   ;;  %vm74_vm0 = vcmask 130048   ;;  %vm110_vm1 = vcmask 1043456   ;;  %vm103_vm2 = vcmask 64512   ;;  %s2175_s22 = smov 1   ;;  %s2176_s25 = smov 127   ;;  %s2857_s0 = inlined_call_operand.vmem [shape: f32[16,16], index: 0, kind: input, shape index: {}]   ;;  %s2858_s3 = inlined_call_operand.vmem [shape: f32[8,1], index: 3, kind: input, shape index: {}]   ;;  %s2859_s2 = inlined_call_operand.vmem [shape: bf16[8,16], index: 2, kind: input, shape index: {}]   ;;  %s2860_s4 = inlined_call_operand.vmem [shape: bf16[3,24,8], index: 4, kind: input, shape index: {}]   ;;  %s2861_s11 = inlined_call_operand.vmem [shape: f32[3,4,1], index: 11, kind: input, shape index: {}]   ;;  %s2862_s5 = inlined_call_operand.vmem [shape: f32[3,8,1], index: 5, kind: input, shape index: {}]   ;;  %s2863_s13 = inlined_call_operand.vmem [shape: f32[3,8,1], index: 13, kind: input, shape index: {}]   ;;  %s2864_s1 = inlined_call_operand.vmem [shape: f32[1,16], index: 1, kind: input, shape index: {}]   ;;  %s2865_s10 = inlined_call_operand.vmem [shape: bf16[3,4,8], index: 10, kind: input, shape index: {}]   ;;  %s2866_s12 = inlined_call_operand.vmem [shape: bf16[3,8,4], index: 12, kind: input, shape index: {}]   ;;  %s2867_s15 = inlined_call_operand.vmem [shape: f32[3,8,1], index: 15, kind: input, shape index: {}]   ;;  %s2868_s9 = inlined_call_operand.vmem [shape: f32[3,4,1], index: 9, kind: input, shape index: {}]   ;;  %s2869_s7 = inlined_call_operand.vmem [shape: f32[3,4,1], index: 7, kind: input, shape index: {}]   ;;  %s2870_s14 = inlined_call_operand.vmem [shape: bf16[3,8,8], index: 14, kind: input, shape index: {}]   ;;  %s2871_s6 = inlined_call_operand.vmem [shape: bf16[3,4,8], index: 6, kind: input, shape index: {}]   ;;  %s2872_s8 = inlined_call_operand.vmem [shape: bf16[3,4,8], index: 8, kind: input, shape index: {}]   ;;  %s2873_s17 = inlined_call_operand.vmem [shape: f32[6,1], index: 17, kind: input, shape index: {}]   ;;  %s2874_s19 = inlined_call_operand.vmem [shape: f32[8,16], index: 19, kind: output, shape index: {1}]   ;;  %s2875_s16 = inlined_call_operand.vmem [shape: bf16[6,8], index: 16, kind: input, shape index: {}]   ;;  %s2876_s18 = inlined_call_operand.vmem [shape: f32[6,16], index: 18, kind: output, shape index: {0}]   ;;  %s2877_s20 = inlined_call_operand.vmem [shape: f32[6,16], index: 20, kind: output, shape index: {2}]  }
   0x1   :  { %2887 = sst [smem:[#allocation2_spill]] %s2857_s0  ;;  %2059 = vset.pattern.permute.xlu0 %v2174_v2  ;;  %2060 = vset.pattern.permute.xlu1 %v2174_v2  ;;  %v146_v20 = vld [vmem:[%s2862_s5] sm:$0xff]  ;;  %vm136_vm3 = vcmask 7168   ;;  %vm143_vm4 = vcmask 121856   ;;  %v2177_v33 = vmov 16.0   ;;  %vm227_vm9 = vcmask 1041408  }
   0x2   :  { %2888 = sst [smem:[#allocation3_spill]] %s2858_s3  ;;  %2061 = vset.pattern.permute.xlu2 %v2174_v2  ;;  %v217_v22 = vld [vmem:[%s2863_s13] sm:$0xff]  ;;  %2113 = vrcp.f32 %v2177_v33  ;;  %vm223_vm10 = vcmask 31744   ;;  %s2881_s24 = smov 2   ;;  %vm319_vm11 = vcmask 15360   ;;  %vm326_vm12 = vcmask 113664  }
   0x3   :  { %2889 = sst [smem:[#allocation4_spill]] %s2859_s2  ;;  %v183_v58 = vld [vmem:[%s2865_s10] sm:$0x3]  ;;  %vm444_vm13 = vcmask 138240   ;;  %s2885_s27 = smov 120  }
   0x4   :  { %2890 = sst [smem:[#allocation5_spill]] %s2860_s4  ;;  %v2112_v59 = vld [vmem:[%s2864_s1] ss:$0 sm:$0xff]  ;;  %s2181_s28 = smov 118  }
   0x5   :  { %2891 = sst [smem:[#allocation6_spill]] %s2861_s11  ;;  %s2183_s29 = smov 122  }
   0x6   :  { %s2892_s23 = sld [smem:[#allocation2_spill]]  ;;  %s2184_s30 = smov 114  }
   0x7   :  { %s2893_s26 = sld [smem:[#allocation3_spill]]  ;;  %s2185_s3 = smov 116  }
   0x8   :  { %s2894_s11 = sld [smem:[#allocation4_spill]]  ;;  %v2114_v34 = vpop.eup %2113  ;;  %s2884_s4 = smov 12  }
   0x9   :  { %s2895_s0 = sld [smem:[#allocation5_spill]]  ;;  %v158_v35 = vmul.f32 16.0, %v2114_v34  ;;  %vm162_vm5 = vweird.f32 %v2114_v34 }
   0xa   :  { %s2896_s2 = sld [smem:[#allocation6_spill]] }
   0xb   :  { %v159_v36 = vsub.f32 1.0, %v158_v35 }
   0xc   :  { %v65_v0 = vld [vmem:[%s2892_s23] sm:$0xff]  ;;  %v66_v1 = vld [vmem:[%s2892_s23 + $0x8] sm:$0xff]  ;;  %s2883_s23 = smov 8  }
   0xd   :  { %v67_v3 = vpack.c.bf16 %v66_v1, %v65_v0  ;;  %v68_v4 = vld [vmem:[%s2893_s26] sm:$0xff]  ;;  %v160_v37 = vmul.f32 %v2114_v34, %v159_v36  ;;  %s2179_s26 = smov 126  }
   0xe   :  { %71 = vperm.xlu0 %2059, %v68_v4   ;;  %v64_v5 = vld [vmem:[%s2894_s11] sm:$0xf]  ;;  %s2182_s11 = smov 124  }
   0xf   :  { %85 = vmatpush.bf16.msra.mxu0 %v67_v3  ;;  %v2037_v11 = vld [vmem:[%s2895_s0] sm:$0xff]  ;;  %v93_v13 = vld [vmem:[%s2895_s0 + $0x8] sm:$0xf]  ;;  %v161_v38 = vadd.f32 %v2114_v34, %v160_v37 }
  0x10   :  { %v100_v14 = vunpack.c.l.b16 %v93_v13  ;;  %v185_v17 = vld [vmem:[%s2896_s2] sm:$0xf] }
  0x11   :  { %v2339_v39 = vsel %vm162_vm5, %v2114_v34, %v161_v38  ;;  %v215_v4 = vld [vmem:[%s2866_s12] sm:$0xf] }
  0x12   :  { %1952 = vmatmul.msk.bf16.vlgmr.msra.gmra.mxu0 %vm74_vm0, %v64_v5  ;;  %v102_v15 = vpack.c.b16 %v100_v14, %v100_v14  ;;  %v248_v5 = vld [vmem:[%s2867_s15] sm:$0xff] }
  0x80   :  { %v72_v6 = vpop.permute.xlu0 %71 }
  0x8f   :  { %v87_v7 = vpop.f32.mrf.mxu0 }
  0x90   :  { %v2311_v8 = vadd.f32 %v87_v7, %v72_v6  ;;  %v1979_v6 = vld [vmem:[%s2868_s9 + $0x4] sm:$0xf] }
  0x91   :  { %v1976_v7 = vld [vmem:[%s2869_s7 + $0x4] sm:$0xf] }
  0x92   :  { %v94_v9 = vpack.c.bf16 %v2311_v8, %v2311_v8 }
  0x94   :  { %v112_v10 = vsel %vm110_vm1, %v94_v9, 0 }
  0x95   :  { %121 = vmatpush.bf16.msra.mxu1 %v112_v10 }
  0x97   :  { %v89_v12 = vpop.f32.mrf.mxu0 }
  0x98   :  { %1957 = vmatmul.msk.bf16.vlgmr.msra.gmra.mxu1 %vm103_vm2, %v2037_v11 }
  0xa8   :  { %1958 = vmatmul.msk.bf16.gmra.mxu1 %vm103_vm2, %v102_v15 }
 0x115   :  { %v123_v16 = vpop.f32.mrf.mxu1 }
 0x116   :  { %133 = vrot.lane.b32.xlu0 %v123_v16, %s2175_s22 }
 0x11d   :  { %v125_v18 = vpop.f32.mrf.mxu1 }
 0x11e   :  { %188 = vperm.xlu0 %2059, %v185_v17   ;;  %v246_v17 = vld [vmem:[%s2870_s14] sm:$0xf] }
 0x125   :  { %v128_v19 = vpop.f32.mrf.mxu1 }
 0x126   :  { %140 = vrot.lane.b32.xlu1 %v128_v19, %s2176_s25  ;;  %s2190_s25 = smov 6  }
 0x12d   :  { %v130_v21 = vpop.f32.mrf.mxu1 }
 0x12e   :  { %149 = vperm.xlu1 %2060, %v146_v20  }
 0x136   :  { %220 = vperm.xlu1 %2060, %v217_v22  }
 0x188   :  { %v134_v23 = vpop.permute.xlu0 %133 }
 0x189   :  { %v137_v25 = vsel %vm136_vm3, 0.0, %v134_v23 }
 0x18a   :  { %v138_v27 = vadd.f32 %v137_v25, %v125_v18 }
 0x190   :  { %v189_v60 = vpop.permute.xlu0 %188 }
 0x198   :  { %v141_v24 = vpop.permute.xlu1 %140 }
 0x199   :  { %v144_v26 = vsel %vm143_vm4, %v141_v24, 0.0 }
 0x19a   :  { %v145_v28 = vadd.f32 %v144_v26, %v138_v27  ;;  %v2038_v26 = vld [vmem:[%s2895_s0 + $0xc] sm:$0xff]  ;;  %v1964_v27 = vld [vmem:[%s2895_s0 + $0x14] sm:$0xf] }
 0x1a0   :  { %v150_v29 = vpop.permute.xlu1 %149 }
 0x1a1   :  { %v152_v30 = vadd.f32 %v150_v29, %v145_v28 }
 0x1a3   :  { %v2335_v31 = vmax.f32 %v152_v30, 0.0  ;;  %v1971_v30 = vld [vmem:[%s2862_s5 + $0x8] sm:$0xff] }
 0x1a5   :  { %v154_v32 = vsel %vm74_vm0, %v2335_v31, 0.0 }
 0x1a6   :  { %155 = vadd.xlane.f32.xlu2 %v154_v32 }
 0x1a8   :  { %v221_v9 = vpop.permute.xlu1 %220 }
 0x219   :  { %v156_v40 = vpop.xlane.xlu2 %155 }
 0x21a   :  { %v164_v41 = vmul.f32 %v2339_v39, %v156_v40 }
 0x21c   :  { %v165_v42 = vsub.f32 %v2335_v31, %v164_v41 }
 0x21e   :  { %v166_v43 = vmul.f32 %v165_v42, %v165_v42 }
 0x220   :  { %v167_v44 = vsel %vm74_vm0, %v166_v43, 0.0 }
 0x221   :  { %168 = vadd.xlane.f32.xlu2 %v167_v44 }
 0x239   :  { %251 = vperm.xlu2 %2061, %v248_v5   ;;  %v1978_v5 = vld [vmem:[%s2872_s8 + $0x2] sm:$0x3] }
 0x241   :  { %420 = vperm.xlu2 %2061, %v1979_v6   ;;  %v1972_v6 = vld [vmem:[%s2865_s10 + $0x2] sm:$0x3] }
 0x249   :  { %395 = vperm.xlu2 %2061, %v1976_v7  }
 0x251   :  { %452 = vrot.lane.b32.xlu2 %v2112_v59, %s2175_s22 }
 0x294   :  { %v169_v45 = vpop.xlane.xlu2 %168 }
 0x295   :  { %v170_v46 = vmul.f32 %v169_v45, %v2339_v39 }
 0x297   :  { %v171_v47 = vadd.f32 1e-05, %v170_v46 }
 0x299   :  { %2115 = vrsqrt.f32 %v171_v47  ;;  %vm178_vm7 = vweird.f32 %v171_v47 }
 0x29c   :  { %v252_v18 = vpop.permute.xlu2 %251 }
 0x29f   :  { %v2116_v48 = vpop.eup %2115 }
 0x2a0   :  { %v173_v49 = vmul.f32 %v2116_v48, %v171_v47  ;;  %vm179_vm6 = vweird.f32 %v2116_v48 }
 0x2a1   :  { %vm180_vm8 = vmor %vm178_vm7, %vm179_vm6  ;;  %vm894_vm7 = vcmask 25600  }
 0x2a2   :  { %v174_v50 = vmul.f32 %v2116_v48, %v173_v49 }
 0x2a4   :  { %v175_v51 = vmul.f32 0.5, %v174_v50  ;;  %v421_v50 = vpop.permute.xlu2 %420 }
 0x2a6   :  { %v176_v52 = vsub.f32 1.5, %v175_v51 }
 0x2a8   :  { %v177_v53 = vmul.f32 %v2116_v48, %v176_v52 }
 0x2aa   :  { %v181_v54 = vsel %vm180_vm8, %v2116_v48, %v177_v53 }
 0x2ab   :  { %v182_v55 = vmul.f32 %v181_v54, %v165_v42 }
 0x2ac   :  { %v396_v51 = vpop.permute.xlu2 %395 }
 0x2ad   :  { %v184_v56 = vpack.c.bf16 %v182_v55, %v182_v55 }
 0x2af   :  { %v195_v57 = vsel %vm110_vm1, %v184_v56, 0 }
 0x2b0   :  { %204 = vmatpush.bf16.msra.mxu2 %v195_v57 }
 0x2b3   :  { %1959 = vmatmul.msk.bf16.vlgmr.msra.gmra.mxu2 %vm103_vm2, %v183_v58 }
 0x2b4   :  { %v453_v53 = vpop.permute.xlu2 %452 }
 0x2b5   :  { %v455_v55 = vsel %vm136_vm3, 0.0, %v453_v53 }
 0x2b6   :  { %v2405_v56 = vsel %vm444_vm13, %v455_v55, 0.0 }
 0x2b7   :  { %533 = vrot.lane.b32.xlu2 %v2405_v56, %s2885_s27 }
 0x2bf   :  { %536 = vrot.lane.b32.xlu2 %v2405_v56, %s2181_s28 }
 0x336   :  { %v206_v61 = vpop.f32.mrf.mxu2 }
 0x337   :  { %v207_v62 = vadd.f32 %v206_v61, %v189_v60 }
 0x339   :  { %v213_v63 = vmul.f32 %v2112_v59, %v207_v62 }
 0x33b   :  { %v214_v0 = vmax.f32 %v213_v63, 0.0 }
 0x33d   :  { %v216_v1 = vpack.c.bf16 %v214_v0, %v214_v0 }
 0x33e   :  { %v208_v2 = vpop.f32.mrf.mxu2 }
 0x33f   :  { %v229_v3 = vsel %vm227_vm9, %v216_v1, 0 }
 0x340   :  { %238 = vmatpush.bf16.msra.mxu3 %v229_v3 }
 0x343   :  { %1960 = vmatmul.msk.bf16.vlgmr.msra.gmra.mxu3 %vm223_vm10, %v215_v4  ;;  %v1975_v4 = vld [vmem:[%s2871_s6 + $0x2] sm:$0x3] }
 0x3c6   :  { %v240_v10 = vpop.f32.mrf.mxu3 }
 0x3c7   :  { %v241_v11 = vadd.f32 %v240_v10, %v221_v9 }
 0x3c9   :  { %v244_v12 = vmul.f32 %v2112_v59, %v241_v11 }
 0x3cb   :  { %v245_v13 = vadd.f32 %v244_v12, %v2335_v31 }
 0x3cd   :  { %v247_v14 = vpack.c.bf16 %v245_v13, %v245_v13  ;;  %v2433_v13 = vpop.permute.xlu2 %533 }
 0x3ce   :  { %v242_v15 = vpop.f32.mrf.mxu3 }
 0x3cf   :  { %v258_v16 = vsel %vm110_vm1, %v247_v14, 0 }
 0x3d0   :  { %267 = vmatpush.bf16.msrb.mxu0 %v258_v16 }
 0x3d3   :  { %1961 = vmatmul.msk.bf16.vlgmr.msrb.gmra.mxu0 %vm103_vm2, %v246_v17 }
 0x3d5   :  { %v2435_v14 = vpop.permute.xlu2 %536 }
 0x450   :  { %v269_v19 = vpop.f32.mrf.mxu0 }
 0x451   :  { %v270_v20 = vadd.f32 %v269_v19, %v252_v18 }
 0x453   :  { %v273_v21 = vadd.f32 %v270_v20, %v2311_v8  ;;  %v285_v8 = vunpack.c.l.b16 %v1964_v27 }
 0x455   :  { %v2375_v22 = vmul.f32 %v2112_v59, %v273_v21  ;;  %v287_v28 = vpack.c.b16 %v285_v8, %v285_v8 }
 0x457   :  { %v279_v23 = vpack.c.bf16 %v2375_v22, %v2375_v22 }
 0x458   :  { %v271_v24 = vpop.f32.mrf.mxu0 }
 0x459   :  { %v295_v25 = vsel %vm110_vm1, %v279_v23, 0  ;;  %v1973_v23 = vld [vmem:[%s2896_s2 + $0x4] sm:$0xf] }
 0x45a   :  { %304 = vmatpush.bf16.msrb.mxu2 %v295_v25 }
 0x45d   :  { %1969 = vmatmul.msk.bf16.vlgmr.msrb.gmra.mxu2 %vm103_vm2, %v2038_v26 }
 0x46d   :  { %1970 = vmatmul.msk.bf16.gmra.mxu2 %vm103_vm2, %v287_v28 }
 0x4e0   :  { %v306_v29 = vpop.f32.mrf.mxu2 }
 0x4e1   :  { %316 = vrot.lane.b32.xlu0 %v306_v29, %s2881_s24 }
 0x4e8   :  { %v308_v31 = vpop.f32.mrf.mxu2 }
 0x4e9   :  { %333 = vperm.xlu0 %2059, %v1971_v30  }
 0x4f0   :  { %v311_v32 = vpop.f32.mrf.mxu2 }
 0x4f1   :  { %323 = vrot.lane.b32.xlu1 %v311_v32, %s2179_s26 }
 0x4f8   :  { %v313_v33 = vpop.f32.mrf.mxu2 }
 0x553   :  { %v317_v34 = vpop.permute.xlu0 %316 }
 0x554   :  { %v320_v35 = vsel %vm319_vm11, 0.0, %v317_v34 }
 0x555   :  { %v321_v36 = vadd.f32 %v320_v35, %v308_v31 }
 0x55b   :  { %v334_v41 = vpop.permute.xlu0 %333 }
 0x563   :  { %v324_v37 = vpop.permute.xlu1 %323 }
 0x564   :  { %v327_v38 = vsel %vm326_vm12, %v324_v37, 0.0 }
 0x565   :  { %v328_v40 = vadd.f32 %v327_v38, %v321_v36 }
 0x567   :  { %v336_v42 = vadd.f32 %v334_v41, %v328_v40 }
 0x569   :  { %v2395_v43 = vmax.f32 %v336_v42, 0.0 }
 0x56b   :  { %v338_v44 = vsel %vm74_vm0, %v2395_v43, 0.0 }
 0x56c   :  { %339 = vadd.xlane.f32.xlu1 %v338_v44 }
 0x585   :  { %524 = vrot.lane.b32.xlu1 %v2405_v56, %s2179_s26 }
 0x58d   :  { %527 = vrot.lane.b32.xlu1 %v2405_v56, %s2182_s11 }
 0x595   :  { %542 = vrot.lane.b32.xlu1 %v2405_v56, %s2184_s30 }
 0x5df   :  { %v340_v45 = vpop.xlane.xlu1 %339 }
 0x5e0   :  { %v341_v46 = vmul.f32 %v340_v45, %v2339_v39 }
 0x5e2   :  { %v342_v47 = vsub.f32 %v2395_v43, %v341_v46 }
 0x5e4   :  { %v343_v48 = vmul.f32 %v342_v47, %v342_v47 }
 0x5e6   :  { %v344_v49 = vsel %vm74_vm0, %v343_v48, 0.0 }
 0x5e7   :  { %345 = vadd.xlane.f32.xlu0 %v344_v49 }
 0x5f7   :  { %v2450_v24 = vpop.permute.xlu1 %524 }
 0x5fb   :  { %530 = vrot.lane.b32.xlu0 %v2405_v56, %s2183_s29 }
 0x5ff   :  { %v2454_v31 = vpop.permute.xlu1 %527 }
 0x607   :  { %v2460_v40 = vpop.permute.xlu1 %542 }
 0x65a   :  { %v346_v52 = vpop.xlane.xlu0 %345 }
 0x65b   :  { %v347_v54 = vmul.f32 %v346_v52, %v2339_v39 }
 0x65d   :  { %v348_v57 = vadd.f32 1e-05, %v347_v54 }
 0x65f   :  { %2117 = vrsqrt.f32 %v348_v57  ;;  %vm355_vm15 = vweird.f32 %v348_v57 }
 0x665   :  { %v2118_v58 = vpop.eup %2117 }
 0x666   :  { %v350_v59 = vmul.f32 %v2118_v58, %v348_v57  ;;  %vm356_vm14 = vweird.f32 %v2118_v58 }
 0x667   :  { %vm357_vm4 = vmor %vm355_vm15, %vm356_vm14 }
 0x668   :  { %v351_v60 = vmul.f32 %v2118_v58, %v350_v59 }
 0x66a   :  { %v352_v61 = vmul.f32 0.5, %v351_v60 }
 0x66c   :  { %v353_v62 = vsub.f32 1.5, %v352_v61 }
 0x66d   :  { %v2458_v38 = vpop.permute.xlu0 %530 }
 0x66e   :  { %v354_v63 = vmul.f32 %v2118_v58, %v353_v62 }
 0x670   :  { %v358_v0 = vsel %vm357_vm4, %v2118_v58, %v354_v63 }
 0x671   :  { %v359_v1 = vmul.f32 %v358_v0, %v342_v47 }
 0x673   :  { %v362_v2 = vpack.c.bf16 %v359_v1, %v359_v1 }
 0x675   :  { %v374_v3 = vsel %vm110_vm1, %v362_v2, 0 }
 0x676   :  { %383 = vmatpush.bf16.msrb.mxu3 %v374_v3  ;;  %408 = vmatpush.bf16.msra.mxu0 %v374_v3 }
 0x677   :  { %433 = vmatpush.bf16.msrb.mxu1 %v374_v3 }
 0x679   :  { %1977 = vmatmul.msk.bf16.vlgmr.msra.gmra.mxu0 %vm103_vm2, %v1975_v4  ;;  %1974 = vmatmul.msk.bf16.vlgmr.msrb.gmra.mxu3 %vm103_vm2, %v1972_v6 }
 0x67a   :  { %1980 = vmatmul.msk.bf16.vlgmr.msrb.gmra.mxu1 %vm103_vm2, %v1978_v5 }
 0x6f6   :  { %v410_v7 = vpop.f32.mrf.mxu0 }
 0x6f7   :  { %v435_v9 = vpop.f32.mrf.mxu1  ;;  %v411_v16 = vadd.f32 %v410_v7, %v396_v51 }
 0x6f8   :  { %v436_v10 = vadd.f32 %v435_v9, %v421_v50 }
 0x6f9   :  { %v558_v30 = vpack.c.bf16 %v411_v16, %v411_v16 }
 0x6fa   :  { %440 = vrot.lane.b32.xlu2 %v436_v10, %s2175_s22 }
 0x6fc   :  { %v2452_v25 = vpop.f32.mrf.mxu3 }
 0x6fe   :  { %v412_v11 = vpop.f32.mrf.mxu0 }
 0x6ff   :  { %v437_v12 = vpop.f32.mrf.mxu1 }
 0x704   :  { %v387_v33 = vpop.f32.mrf.mxu3 }
 0x754   :  { %v441_v15 = vpop.permute.xlu2 %440 }
 0x755   :  { %v443_v17 = vsel %vm136_vm3, 0.0, %v441_v15 }
 0x756   :  { %v445_v18 = vsel %vm444_vm13, %v443_v17, 0.0 }
 0x757   :  { %v2082_v19 = vpack.i.bf16 %v445_v18, %v411_v16  ;;  %v566_v20 = vpack.c.bf16 %v445_v18, %v445_v18 }
 0x759   :  { %2083 = vrot.lane.b32.xlu0 %v2082_v19, %s2184_s30  ;;  %2073 = vrot.lane.b32.xlu1 %v2082_v19, %s2182_s11  ;;  %v594_v21 = vsel %vm227_vm9, %v566_v20, 0 }
 0x75a   :  { %2063 = vrot.lane.b32.xlu2 %v2082_v19, %s2183_s29  ;;  %603 = vmatpush.bf16.msra.mxu3 %v594_v21 }
 0x761   :  { %367 = vperm.xlu0 %2059, %v1973_v23  }
 0x762   :  { %2068 = vrot.lane.b32.xlu2 %v2082_v19, %s2179_s26 }
 0x76a   :  { %2078 = vrot.lane.b32.xlu2 %v2082_v19, %s2885_s27 }
 0x772   :  { %2088 = vrot.lane.b32.xlu2 %v2082_v19, %s2181_s28 }
 0x77a   :  { %2093 = vrot.lane.b32.xlu2 %v2082_v19, %s2185_s3 }
 0x7b4   :  { %v2064_v26 = vpop.permute.xlu2 %2063 }
 0x7b5   :  { %v2066_v27 = vunpack.i.h.bf16 %v2064_v26  ;;  %v2065_v8 = vunpack.i.l.bf16 %v2064_v26  ;;  %v545_v26 = vlaneseq }
 0x7b7   :  { %v569_v28 = vpack.c.bf16 %v2066_v27, %v2066_v27  ;;  %v561_v29 = vpack.c.bf16 %v2065_v8, %v2065_v8  ;;  %v2479_v27 = vand.u32 127, %v545_v26 }
 0x7b9   :  { %2097 = vxpose.binary.xlu1.c.b16.start.end [1/2] (short) (narrow) %v561_v29, %v558_v30, 16  ;;  %v699_v32 = vsel %vm227_vm9, %v569_v28, 0  ;;  %vm547_vm5 = vcmp.lt.s32.totalorder %v2479_v27, 3  ;;  %v2186_v28 = vmov -13.815511  }
 0x7ba   :  { %708 = vmatpush.bf16.msra.mxu2 %v699_v32  ;;  %v2485_v8 = vsel %vm547_vm5, %v2405_v56, 0.0  ;;  %v2492_v30 = vsel %vm547_vm5, %v2458_v38, 0.0 }
 0x7bb   :  { %vm862_vm6 = vcmp.gt.f32.partialorder %v2485_v8, 0.0  ;;  %vm865_vm8 = vcmp.gt.f32.partialorder %v2492_v30, 0.0 }
 0x7bc   :  { %v2069_v34 = vpop.permute.xlu2 %2068  ;;  %v870_v29 = vsel %vm862_vm6, 9.999995e-07, %v2186_v28 }
 0x7bd   :  { %v2071_v35 = vunpack.i.h.bf16 %v2069_v34  ;;  %v2070_v47 = vunpack.i.l.bf16 %v2069_v34  ;;  %v878_v34 = vperm.slane %v870_v29, 0 }
 0x7bf   :  { %v567_v36 = vpack.c.bf16 %v2071_v35, %v2071_v35  ;;  %v559_v62 = vpack.c.bf16 %v2070_v47, %v2070_v47 }
 0x7c1   :  { %v629_v37 = vsel %vm227_vm9, %v567_v36, 0  ;;  %v873_v36 = vsel %vm865_vm8, 9.999995e-07, %v2186_v28 }
 0x7c2   :  { %638 = vmatpush.bf16.msrb.mxu0 %v629_v37  ;;  %v2503_v37 = vsel %vm547_vm5, %v2433_v13, 0.0 }
 0x7c3   :  { %vm866_vm14 = vcmp.gt.f32.partialorder %v2503_v37, 0.0 }
 0x7c4   :  { %v2079_v41 = vpop.permute.xlu2 %2078  ;;  %v874_v13 = vsel %vm866_vm14, 9.999995e-07, %v2186_v28 }
 0x7c5   :  { %v2081_v42 = vunpack.i.h.bf16 %v2079_v41  ;;  %v2080_v45 = vunpack.i.l.bf16 %v2079_v41 }
 0x7c7   :  { %v570_v44 = vpack.c.bf16 %v2081_v42, %v2081_v42  ;;  %v562_v55 = vpack.c.bf16 %v2080_v45, %v2080_v45  ;;  %v881_v42 = vperm.slane %v873_v36, 0  ;;  %v2508_v45 = vsel %vm547_vm5, %v2450_v24, 0.0 }
 0x7c8   :  { %vm863_vm15 = vcmp.gt.f32.partialorder %v2508_v45, 0.0 }
 0x7c9   :  { %v734_v46 = vsel %vm227_vm9, %v570_v44, 0 }
 0x7ca   :  { %743 = vmatpush.bf16.msrb.mxu3 %v734_v46 }
 0x7cb   :  { %v2084_v48 = vpop.permute.xlu0 %2083  ;;  %v2074_v49 = vpop.permute.xlu1 %2073 }
 0x7cc   :  { %v2086_v50 = vunpack.i.h.bf16 %v2084_v48  ;;  %v2085_v51 = vunpack.i.l.bf16 %v2084_v48  ;;  %v2076_v52 = vunpack.i.h.bf16 %v2074_v49  ;;  %v2075_v53 = vunpack.i.l.bf16 %v2074_v49  ;;  %v2089_v54 = vpop.permute.xlu2 %2088 }
 0x7cd   :  { %v2091_v57 = vunpack.i.h.bf16 %v2089_v54  ;;  %v2090_v7 = vunpack.i.l.bf16 %v2089_v54  ;;  %v871_v48 = vsel %vm863_vm15, 9.999995e-07, %v2186_v28  ;;  %v2521_v49 = vsel %vm547_vm5, %v2460_v40, 0.0 }
 0x7ce   :  { %v573_v58 = vpack.c.bf16 %v2086_v50, %v2086_v50  ;;  %v565_v59 = vpack.c.bf16 %v2085_v51, %v2085_v51  ;;  %v568_v60 = vpack.c.bf16 %v2076_v52, %v2076_v52  ;;  %v560_v61 = vpack.c.bf16 %v2075_v53, %v2075_v53 }
 0x7cf   :  { %v571_v63 = vpack.c.bf16 %v2091_v57, %v2091_v57  ;;  %v563_v10 = vpack.c.bf16 %v2090_v7, %v2090_v7  ;;  %v882_v51 = vperm.slane %v874_v13, 0  ;;  %v2526_v53 = vsel %vm547_vm5, %v2454_v31, 0.0 }
 0x7d0   :  { %2103 = vxpose.binary.xlu2.c.b16.start.end [1/2] (short) (narrow) %v565_v59, %v562_v55, 16  ;;  %v664_v0 = vsel %vm227_vm9, %v568_v60, 0  ;;  %v839_v1 = vsel %vm227_vm9, %v573_v58, 0  ;;  %v879_v55 = vperm.slane %v871_v48, 0  ;;  %vm869_vm4 = vcmp.gt.f32.partialorder %v2521_v49, 0.0 }
 0x7d1   :  { %2100 = vxpose.binary.xlu0.c.b16.start.end [1/2] (short) (narrow) %v560_v61, %v559_v62, 16  ;;  %v769_v2 = vsel %vm227_vm9, %v571_v63, 0  ;;  %vm864_vm6 = vcmp.gt.f32.partialorder %v2526_v53, 0.0  ;;  %v877_v60 = vsel %vm869_vm4, 9.999995e-07, %v2186_v28  ;;  %vm1442_vm4 = vcmask 146432  }
 0x7d2   :  { %673 = vmatpush.bf16.msra.mxu1 %v664_v0  ;;  %778 = vmatpush.bf16.msra.mxu0 %v769_v2  ;;  %v872_v61 = vsel %vm864_vm6, 9.999995e-07, %v2186_v28  ;;  %v885_v0 = vperm.slane %v877_v60, 0  ;;  %v2543_v2 = vsel %vm547_vm5, %v2435_v14, 0.0  ;;  %vm1495_vm6 = vcmp.lt.s32.totalorder %v2479_v27, 7 }
 0x7d3   :  { %848 = vmatpush.bf16.msrb.mxu2 %v839_v1  ;;  %v2471_v17 = vpop.permute.xlu0 %367  ;;  %vm867_vm8 = vcmp.gt.f32.partialorder %v2543_v2, 0.0 }
 0x7d4   :  { %v2094_v3 = vpop.permute.xlu2 %2093 }
 0x7d5   :  { %v2096_v4 = vunpack.i.h.bf16 %v2094_v3  ;;  %v2095_v9 = vunpack.i.l.bf16 %v2094_v3 }
 0x7d7   :  { %v572_v5 = vpack.c.bf16 %v2096_v4, %v2096_v4  ;;  %v564_v11 = vpack.c.bf16 %v2095_v9, %v2095_v9 }
 0x7d9   :  { %v804_v6 = vsel %vm227_vm9, %v572_v5, 0  ;;  %v880_v5 = vperm.slane %v872_v61, 0 }
 0x7da   :  { %813 = vmatpush.bf16.msrb.mxu1 %v804_v6 }
 0x7e1   :  { %2106 = vxpose.binary.xlu0.c.b16.start.end [1/2] (short) (narrow) %v564_v11, %v563_v10, 16 }
 0x813   :  { %539 = vrot.lane.b32.xlu1 %v2405_v56, %s2185_s3 }
 0x865   :  { %v2098_v12 = vpop.trf.xlu1 }
 0x866   :  { %1981 = vmatmul.msk.bf16.vlgmr.msra.gmra.mxu3 %vm223_vm10, %v2098_v12 }
 0x86d   :  { %v2099_v15 = vpop.trf.xlu1 }
 0x86e   :  { %1984 = vmatmul.msk.bf16.vlgmr.msra.gmra.mxu2 %vm223_vm10, %v2099_v15  ;;  %v875_v15 = vsel %vm867_vm8, 9.999995e-07, %v2186_v28 }
 0x871   :  { %v2104_v16 = vpop.trf.xlu2 }
 0x876   :  { %1985 = vmatmul.msk.bf16.vlgmr.msrb.gmra.mxu3 %vm223_vm10, %v2104_v16 }
 0x879   :  { %v2105_v18 = vpop.trf.xlu2 }
 0x87d   :  { %v2101_v19 = vpop.trf.xlu0 }
 0x87e   :  { %1982 = vmatmul.msk.bf16.vlgmr.msrb.gmra.mxu0 %vm223_vm10, %v2101_v19  ;;  %1988 = vmatmul.msk.bf16.vlgmr.msrb.gmra.mxu2 %vm223_vm10, %v2105_v18 }
 0x885   :  { %v2102_v20 = vpop.trf.xlu0  ;;  %v540_v10 = vpop.permute.xlu1 %539 }
 0x886   :  { %1983 = vmatmul.msk.bf16.vlgmr.msra.gmra.mxu1 %vm223_vm10, %v2102_v20  ;;  %v2554_v16 = vsel %vm547_vm5, %v540_v10, 0.0  ;;  %v883_v20 = vperm.slane %v875_v15, 0  ;;  %vm1210_vm5 = vcmask 97280  }
 0x887   :  { %vm868_vm14 = vcmp.gt.f32.partialorder %v2554_v16, 0.0 }
 0x888   :  { %v876_v29 = vsel %vm868_vm14, 9.999995e-07, %v2186_v28 }
 0x88d   :  { %v2107_v21 = vpop.trf.xlu0 }
 0x88e   :  { %1986 = vmatmul.msk.bf16.vlgmr.msra.gmra.mxu0 %vm223_vm10, %v2107_v21 }
 0x895   :  { %v2108_v23 = vpop.trf.xlu0 }
 0x896   :  { %1987 = vmatmul.msk.bf16.vlgmr.msrb.gmra.mxu1 %vm223_vm10, %v2108_v23 }
 0x8e9   :  { %v605_v32 = vpop.f32.mrf.mxu3 }
 0x8ea   :  { %v854_v33 = vmul.f32 0.5, %v605_v32 }
 0x8ec   :  { %v2495_v35 = vadd.f32 %v878_v34, %v854_v33  ;;  %v884_v34 = vperm.slane %v876_v29, 0 }
 0x8ee   :  { %v895_v56 = vsel %vm894_vm7, %v2495_v35, -inf }
 0x8ef   :  { %896 = vmax.xlane.f32.xlu2 %v895_v56 }
 0x8f1   :  { %v607_v38 = vpop.f32.mrf.mxu3  ;;  %v710_v41 = vpop.f32.mrf.mxu2 }
 0x8f2   :  { %v857_v44 = vmul.f32 0.5, %v710_v41  ;;  %v386_v41 = vadd.f32 %v2452_v25, %v2471_v17 }
 0x8f4   :  { %v2511_v46 = vadd.f32 %v881_v42, %v857_v44 }
 0x8f6   :  { %v904_v47 = vsel %vm894_vm7, %v2511_v46, -inf }
 0x8f7   :  { %905 = vmax.xlane.f32.xlu1 %v904_v47 }
 0x8f9   :  { %v712_v24 = vpop.f32.mrf.mxu2  ;;  %v745_v50 = vpop.f32.mrf.mxu3 }
 0x8fa   :  { %v858_v52 = vmul.f32 0.5, %v745_v50 }
 0x8fb   :  { %v640_v54 = vpop.f32.mrf.mxu0 }
 0x8fc   :  { %v855_v57 = vmul.f32 0.5, %v640_v54  ;;  %v2529_v58 = vadd.f32 %v882_v51, %v858_v52 }
 0x8fe   :  { %v907_v40 = vsel %vm894_vm7, %v2529_v58, -inf  ;;  %v2534_v59 = vadd.f32 %v879_v55, %v855_v57 }
 0x8ff   :  { %908 = vmax.xlane.f32.xlu1 %v907_v40 }
 0x900   :  { %v898_v31 = vsel %vm894_vm7, %v2534_v59, -inf }
 0x901   :  { %899 = vmax.xlane.f32.xlu0 %v898_v31  ;;  %v850_v62 = vpop.f32.mrf.mxu2  ;;  %v747_v63 = vpop.f32.mrf.mxu3 }
 0x902   :  { %v861_v1 = vmul.f32 0.5, %v850_v62 }
 0x903   :  { %v642_v3 = vpop.f32.mrf.mxu0  ;;  %v675_v4 = vpop.f32.mrf.mxu1 }
 0x904   :  { %v856_v6 = vmul.f32 0.5, %v675_v4  ;;  %v893_v7 = vadd.f32 %v885_v0, %v861_v1 }
 0x906   :  { %v2546_v9 = vadd.f32 %v880_v5, %v856_v6  ;;  %v916_v11 = vsel %vm894_vm7, %v893_v7, -inf }
 0x908   :  { %v901_v12 = vsel %vm894_vm7, %v2546_v9, -inf }
 0x909   :  { %917 = vmax.xlane.f32.xlu0 %v916_v11  ;;  %902 = vmax.xlane.f32.xlu2 %v901_v12  ;;  %v852_v14 = vpop.f32.mrf.mxu2 }
 0x90b   :  { %v677_v18 = vpop.f32.mrf.mxu1  ;;  %v780_v19 = vpop.f32.mrf.mxu0 }
 0x90c   :  { %v859_v21 = vmul.f32 0.5, %v780_v19 }
 0x90e   :  { %v891_v23 = vadd.f32 %v883_v20, %v859_v21 }
 0x910   :  { %v910_v26 = vsel %vm894_vm7, %v891_v23, -inf }
 0x911   :  { %911 = vmax.xlane.f32.xlu2 %v910_v26 }
 0x913   :  { %v815_v32 = vpop.f32.mrf.mxu1  ;;  %v782_v33 = vpop.f32.mrf.mxu0 }
 0x914   :  { %v860_v56 = vmul.f32 0.5, %v815_v32 }
 0x916   :  { %v892_v36 = vadd.f32 %v884_v34, %v860_v56  ;;  %v983_v34 = vperm.slane %v2485_v8, 0 }
 0x918   :  { %v913_v38 = vsel %vm894_vm7, %v892_v36, -inf }
 0x919   :  { %914 = vmax.xlane.f32.xlu1 %v913_v38 }
 0x91b   :  { %v817_v42 = vpop.f32.mrf.mxu1 }
 0x91d   :  { %447 = vrot.lane.b32.xlu0 %v386_v41, %s2175_s22  ;;  %s2897_s22 = smov 2  }
 0x962   :  { %v897_v44 = vpop.xlane.xlu2 %896 }
 0x963   :  { %v919_v47 = vsub.f32 %v2495_v35, %v897_v44 }
 0x965   :  { %v927_v13 = vmul.f32 1.442695, %v919_v47 }
 0x967   :  { %2119 = vpow2.f32 %v927_v13 }
 0x96a   :  { %v906_v40 = vpop.xlane.xlu1 %905 }
 0x96b   :  { %v922_v15 = vsub.f32 %v2511_v46, %v906_v40 }
 0x96d   :  { %v2564_v48 = vpop.eup %2119  ;;  %v933_v18 = vmul.f32 1.442695, %v922_v15 }
 0x96e   :  { %v943_v24 = vsel %vm894_vm7, %v2564_v48, 0.0 }
 0x96f   :  { %944 = vadd.xlane.f32.xlu2 %v943_v24  ;;  %v984_v24 = vperm.slane %v2508_v45, 0 }
 0x972   :  { %v909_v62 = vpop.xlane.xlu1 %908 }
 0x973   :  { %v923_v63 = vsub.f32 %v2529_v58, %v909_v62 }
 0x974   :  { %v900_v50 = vpop.xlane.xlu0 %899 }
 0x975   :  { %v920_v60 = vsub.f32 %v2534_v59, %v900_v50  ;;  %v935_v0 = vmul.f32 1.442695, %v923_v63 }
 0x977   :  { %v929_v61 = vmul.f32 1.442695, %v920_v60 }
 0x97c   :  { %v918_v51 = vpop.xlane.xlu0 %917  ;;  %v903_v31 = vpop.xlane.xlu2 %902 }
 0x97d   :  { %v926_v52 = vsub.f32 %v893_v7, %v918_v51  ;;  %v921_v5 = vsub.f32 %v2546_v9, %v903_v31 }
 0x97f   :  { %v941_v54 = vmul.f32 1.442695, %v926_v52  ;;  %v931_v10 = vmul.f32 1.442695, %v921_v5 }
 0x981   :  { %2121 = vpow2.f32 %v941_v54 }
 0x982   :  { %2123 = vpow2.f32 %v929_v61 }
 0x983   :  { %2125 = vpow2.f32 %v935_v0 }
 0x984   :  { %v912_v1 = vpop.xlane.xlu2 %911 }
 0x985   :  { %v924_v4 = vsub.f32 %v891_v23, %v912_v1 }
 0x987   :  { %v2568_v25 = vpop.eup %2121  ;;  %v937_v7 = vmul.f32 1.442695, %v924_v4  ;;  %v988_v4 = vperm.slane %v2543_v2, 0 }
 0x988   :  { %v964_v17 = vsel %vm894_vm7, %v2568_v25, 0.0  ;;  %v2124_v3 = vpop.eup %2123 }
 0x989   :  { %965 = vadd.xlane.f32.xlu0 %v964_v17  ;;  %v946_v6 = vsel %vm894_vm7, %v2124_v3, 0.0  ;;  %v2126_v59 = vpop.eup %2125  ;;  %2127 = vpow2.f32 %v937_v7  ;;  %v985_v7 = vperm.slane %v2526_v53, 0 }
 0x98a   :  { %2129 = vpow2.f32 %v931_v10  ;;  %v955_v58 = vsel %vm894_vm7, %v2126_v59, 0.0 }
 0x98c   :  { %v915_v11 = vpop.xlane.xlu1 %914 }
 0x98d   :  { %v925_v12 = vsub.f32 %v892_v36, %v915_v11 }
 0x98f   :  { %v448_v35 = vpop.permute.xlu0 %447  ;;  %v939_v14 = vmul.f32 1.442695, %v925_v12  ;;  %v2128_v19 = vpop.eup %2127 }
 0x990   :  { %v450_v55 = vsel %vm136_vm3, 0.0, %v448_v35  ;;  %v2585_v20 = vpop.eup %2129  ;;  %v958_v9 = vsel %vm894_vm7, %v2128_v19, 0.0  ;;  %vm1205_vm3 = vcmask 48128  }
 0x991   :  { %v451_v57 = vsel %vm444_vm13, %v450_v55, 0.0  ;;  %2131 = vpow2.f32 %v939_v14  ;;  %v949_v21 = vsel %vm894_vm7, %v2585_v20, 0.0  ;;  %vm1208_vm13 = vcmask 80896  }
 0x992   :  { %502 = vrot.lane.b32.xlu2 %v451_v57, %s2179_s26  ;;  %508 = vrot.lane.b32.xlu1 %v451_v57, %s2183_s29  ;;  %2133 = vpow2.f32 %v933_v18  ;;  %v999_v42 = vpack.c.bf16 %v451_v57, %v451_v57  ;;  %s2187_s26 = smov 10  }
 0x997   :  { %v2590_v23 = vpop.eup %2131 }
 0x998   :  { %v2592_v46 = vpop.eup %2133  ;;  %v961_v26 = vsel %vm894_vm7, %v2590_v23, 0.0 }
 0x999   :  { %v952_v29 = vsel %vm894_vm7, %v2592_v46, 0.0 }
 0x99a   :  { %505 = vrot.lane.b32.xlu1 %v451_v57, %s2182_s11 }
 0x99d   :  { %514 = vrot.lane.b32.xlu0 %v451_v57, %s2181_s28  ;;  %s2188_s28 = smov 4  }
 0x9a2   :  { %511 = vrot.lane.b32.xlu1 %v451_v57, %s2885_s27  ;;  %s2900_s27 = smov 12  }
 0x9bb   :  { %947 = vadd.xlane.f32.xlu2 %v946_v6 }
 0x9c3   :  { %956 = vadd.xlane.f32.xlu2 %v955_v58 }
 0x9cb   :  { %959 = vadd.xlane.f32.xlu2 %v958_v9  ;;  %v990_v9 = vperm.slane %v2521_v49, 0 }
 0x9cc   :  { %950 = vadd.xlane.f32.xlu1 %v949_v21  ;;  %v989_v21 = vperm.slane %v2554_v16, 0 }
 0x9d3   :  { %962 = vadd.xlane.f32.xlu2 %v961_v26 }
 0x9d4   :  { %953 = vadd.xlane.f32.xlu1 %v952_v29  ;;  %v986_v29 = vperm.slane %v2492_v30, 0 }
 0x9e2   :  { %v945_v32 = vpop.xlane.xlu2 %944 }
 0x9e3   :  { %2135 = vrcp.f32 %v945_v32 }
 0x9e9   :  { %v2136_v33 = vpop.eup %2135 }
 0x9ea   :  { %v975_v56 = vmul.f32 %v2136_v33, %v2564_v48 }
 0x9eb   :  { %517 = vrot.lane.b32.xlu2 %v451_v57, %s2185_s3 }
 0x9ec   :  { %v991_v36 = vmul.f32 %v983_v34, %v975_v56  ;;  %v503_v47 = vpop.permute.xlu2 %502 }
 0x9ed   :  { %520 = vrot.lane.b32.xlu1 %v451_v57, %s2184_s30  ;;  %v987_v57 = vperm.slane %v2503_v37, 0  ;;  %v1000_v45 = vpack.c.bf16 %v503_v47, %v503_v47 }
 0x9ee   :  { %v1007_v38 = vpack.c.bf16 %v991_v36, %v991_v36 }
 0x9f0   :  { %v1019_v41 = vsel %vm223_vm10, %v1007_v38, 0 }
 0x9f1   :  { %1028 = vmatpush.bf16.xpose.msra.mxu3 %v1019_v41 }
 0x9f8   :  { %1989 = vmatmul.msk.bf16.vlgmr.msra.gmra.mxu3 %vm223_vm10, %v999_v42 }
 0x9fc   :  { %v966_v40 = vpop.xlane.xlu0 %965 }
 0xa04   :  { %v2604_v44 = vpop.permute.xlu1 %508 }
 0xa0c   :  { %v2606_v13 = vpop.permute.xlu1 %505 }
 0xa0d   :  { %v1001_v41 = vpack.c.bf16 %v2606_v13, %v2606_v13 }
 0xa0f   :  { %v515_v32 = vpop.permute.xlu0 %514 }
 0xa10   :  { %v1004_v56 = vpack.c.bf16 %v515_v32, %v515_v32 }
 0xa14   :  { %v512_v52 = vpop.permute.xlu1 %511 }
 0xa15   :  { %v1003_v58 = vpack.c.bf16 %v512_v52, %v512_v52 }
 0xa2e   :  { %v948_v8 = vpop.xlane.xlu2 %947 }
 0xa2f   :  { %2137 = vrcp.f32 %v948_v8 }
 0xa35   :  { %v2138_v48 = vpop.eup %2137 }
 0xa36   :  { %v976_v50 = vmul.f32 %v2138_v48, %v2124_v3  ;;  %v957_v51 = vpop.xlane.xlu2 %956 }
 0xa37   :  { %2139 = vrcp.f32 %v957_v51 }
 0xa38   :  { %v992_v54 = vmul.f32 %v984_v24, %v976_v50 }
 0xa3a   :  { %v1008_v17 = vpack.c.bf16 %v992_v54, %v992_v54 }
 0xa3c   :  { %v1038_v35 = vsel %vm223_vm10, %v1008_v17, 0 }
 0xa3d   :  { %v2140_v55 = vpop.eup %2139  ;;  %1047 = vmatpush.bf16.xpose.msrb.mxu0 %v1038_v35 }
 0xa3e   :  { %v979_v60 = vmul.f32 %v2140_v55, %v2126_v59  ;;  %v960_v31 = vpop.xlane.xlu2 %959 }
 0xa3f   :  { %2141 = vrcp.f32 %v960_v31  ;;  %v951_v61 = vpop.xlane.xlu1 %950  ;;  %v1998_v31 = vld [vmem:[%s2863_s13 + $0x8] sm:$0xff] }
 0xa40   :  { %2143 = vrcp.f32 %v951_v61  ;;  %v995_v62 = vmul.f32 %v987_v57, %v979_v60 }
 0xa41   :  { %2145 = vrcp.f32 %v966_v40 }
 0xa42   :  { %v1011_v63 = vpack.c.bf16 %v995_v62, %v995_v62 }
 0xa44   :  { %1990 = vmatmul.msk.bf16.vlgmr.msrb.gmra.mxu0 %vm223_vm10, %v1000_v45  ;;  %v1095_v0 = vsel %vm223_vm10, %v1011_v63, 0 }
 0xa45   :  { %v2142_v1 = vpop.eup %2141  ;;  %1104 = vmatpush.bf16.xpose.msrb.mxu3 %v1095_v0 }
 0xa46   :  { %v2144_v3 = vpop.eup %2143  ;;  %v980_v37 = vmul.f32 %v2142_v1, %v2128_v19  ;;  %v963_v5 = vpop.xlane.xlu2 %962 }
 0xa47   :  { %v2146_v6 = vpop.eup %2145  ;;  %v977_v10 = vmul.f32 %v2144_v3, %v2585_v20  ;;  %2147 = vrcp.f32 %v963_v5  ;;  %v954_v11 = vpop.xlane.xlu1 %953  ;;  %v2001_v5 = vld [vmem:[%s2867_s15 + $0x8] sm:$0xff] }
 0xa48   :  { %2149 = vrcp.f32 %v954_v11  ;;  %v996_v59 = vmul.f32 %v988_v4, %v980_v37  ;;  %v982_v15 = vmul.f32 %v2146_v6, %v2568_v25  ;;  %v2020_v11 = vld [vmem:[%s2868_s9 + $0x8] sm:$0xf] }
 0xa49   :  { %v993_v12 = vmul.f32 %v985_v7, %v977_v10  ;;  %v2012_v10 = vld [vmem:[%s2862_s5 + $0x10] sm:$0xff] }
 0xa4a   :  { %v1012_v14 = vpack.c.bf16 %v996_v59, %v996_v59  ;;  %v998_v25 = vmul.f32 %v990_v9, %v982_v15  ;;  %v2017_v59 = vld [vmem:[%s2869_s7 + $0x8] sm:$0xf] }
 0xa4b   :  { %v1009_v18 = vpack.c.bf16 %v993_v12, %v993_v12 }
 0xa4c   :  { %1993 = vmatmul.msk.bf16.vlgmr.msrb.gmra.mxu3 %vm223_vm10, %v1003_v58  ;;  %v1114_v2 = vsel %vm223_vm10, %v1012_v14, 0  ;;  %v1014_v38 = vpack.c.bf16 %v998_v25, %v998_v25 }
 0xa4d   :  { %v2148_v19 = vpop.eup %2147  ;;  %1123 = vmatpush.bf16.xpose.msra.mxu0 %v1114_v2  ;;  %v1057_v53 = vsel %vm223_vm10, %v1009_v18, 0 }
 0xa4e   :  { %v2150_v20 = vpop.eup %2149  ;;  %v981_v26 = vmul.f32 %v2148_v19, %v2590_v23  ;;  %1066 = vmatpush.bf16.xpose.msra.mxu1 %v1057_v53  ;;  %v1152_v23 = vsel %vm223_vm10, %v1014_v38, 0  ;;  %v518_v47 = vpop.permute.xlu2 %517 }
 0xa4f   :  { %v978_v49 = vmul.f32 %v2150_v20, %v2592_v46  ;;  %v1002_v46 = vpack.c.bf16 %v2604_v44, %v2604_v44  ;;  %v1005_v13 = vpack.c.bf16 %v518_v47, %v518_v47  ;;  %v2000_v47 = vld [vmem:[%s2870_s14 + $0x4] sm:$0xf] }
 0xa50   :  { %v997_v33 = vmul.f32 %v989_v21, %v981_v26 }
 0xa51   :  { %v994_v34 = vmul.f32 %v986_v29, %v978_v49 }
 0xa52   :  { %v1013_v36 = vpack.c.bf16 %v997_v33, %v997_v33 }
 0xa53   :  { %v1010_v42 = vpack.c.bf16 %v994_v34, %v994_v34  ;;  %v1997_v34 = vld [vmem:[%s2866_s12 + $0x4] sm:$0xf] }
 0xa54   :  { %1994 = vmatmul.msk.bf16.vlgmr.msra.gmra.mxu0 %vm223_vm10, %v1004_v56  ;;  %v1133_v16 = vsel %vm223_vm10, %v1013_v36, 0 }
 0xa55   :  { %1991 = vmatmul.msk.bf16.vlgmr.msra.gmra.mxu1 %vm223_vm10, %v1001_v41  ;;  %v1076_v30 = vsel %vm223_vm10, %v1010_v42, 0  ;;  %v2669_v41 = vld [vmem:[%s2864_s1] ss:$0 sm:$0xff] }
 0xa56   :  { %1142 = vmatpush.bf16.xpose.msrb.mxu1 %v1133_v16  ;;  %1085 = vmatpush.bf16.xpose.msra.mxu2 %v1076_v30 }
 0xa5d   :  { %1992 = vmatmul.msk.bf16.vlgmr.msra.gmra.mxu2 %vm223_vm10, %v1002_v46 }
 0xa5e   :  { %1161 = vmatpush.bf16.xpose.msrb.mxu2 %v1152_v23 }
 0xa5f   :  { %v521_v8 = vpop.permute.xlu1 %520 }
 0xa60   :  { %v1006_v48 = vpack.c.bf16 %v521_v8, %v521_v8 }
 0xa65   :  { %1995 = vmatmul.msk.bf16.vlgmr.msrb.gmra.mxu1 %vm223_vm10, %v1005_v13 }
 0xa6d   :  { %1996 = vmatmul.msk.bf16.vlgmr.msrb.gmra.mxu2 %vm223_vm10, %v1006_v48 }
 0xa7b   :  { %v1030_v24 = vpop.f32.mrf.mxu3 }
 0xa7c   :  { %v1167_v58 = vmax.f32 %v1030_v24, 0.0 }
 0xa83   :  { %v1032_v50 = vpop.f32.mrf.mxu3 }
 0xac1   :  { %v1049_v51 = vpop.f32.mrf.mxu0 }
 0xac2   :  { %v1168_v52 = vmax.f32 %v1049_v51, 0.0 }
 0xac4   :  { %1176 = vrot.lane.b32.xlu1 %v1168_v52, %s2897_s22 }
 0xac9   :  { %v1051_v54 = vpop.f32.mrf.mxu0 }
 0xaca   :  { %v2039_v54 = vld [vmem:[%s2895_s0 + $0x18] sm:$0xff] }
 0xacf   :  { %v1106_v17 = vpop.f32.mrf.mxu3 }
 0xad0   :  { %v1171_v62 = vmax.f32 %v1106_v17, 0.0 }
 0xad1   :  { %v1125_v35 = vpop.f32.mrf.mxu0 }
 0xad2   :  { %v1172_v44 = vmax.f32 %v1125_v35, 0.0  ;;  %v1068_v55 = vpop.f32.mrf.mxu1 }
 0xad3   :  { %v1169_v57 = vmax.f32 %v1068_v55, 0.0 }
 0xad4   :  { %1192 = vrot.lane.b32.xlu0 %v1172_v44, %s2187_s26  ;;  %s2192_s26 = smov 14  }
 0xad5   :  { %1180 = vrot.lane.b32.xlu2 %v1169_v57, %s2188_s28 }
 0xad7   :  { %v1108_v40 = vpop.f32.mrf.mxu3 }
 0xad9   :  { %v1127_v60 = vpop.f32.mrf.mxu0 }
 0xada   :  { %v1070_v61 = vpop.f32.mrf.mxu1 }
 0xadc   :  { %1220 = vperm.xlu0 %2059, %v1998_v31  }
 0xadd   :  { %1188 = vrot.lane.b32.xlu2 %v1171_v62, %s2883_s23 }
 0xae0   :  { %v1087_v45 = vpop.f32.mrf.mxu2 }
 0xae1   :  { %v1170_v63 = vmax.f32 %v1087_v45, 0.0 }
 0xae2   :  { %v1144_v0 = vpop.f32.mrf.mxu1 }
 0xae3   :  { %1184 = vrot.lane.b32.xlu1 %v1170_v63, %s2190_s25  ;;  %v1173_v3 = vmax.f32 %v1144_v0, 0.0 }
 0xae8   :  { %v1089_v1 = vpop.f32.mrf.mxu2 }
 0xaea   :  { %v1146_v4 = vpop.f32.mrf.mxu1 }
 0xaeb   :  { %1196 = vrot.lane.b32.xlu1 %v1173_v3, %s2884_s4 }
 0xaf0   :  { %v1163_v37 = vpop.f32.mrf.mxu2 }
 0xaf1   :  { %v1174_v6 = vmax.f32 %v1163_v37, 0.0 }
 0xaf3   :  { %1251 = vperm.xlu1 %2060, %v2001_v5   ;;  %1200 = vrot.lane.b32.xlu2 %v1174_v6, %s2192_s26 }
 0xaf8   :  { %v1165_v7 = vpop.f32.mrf.mxu2 }
 0xafb   :  { %1331 = vperm.xlu1 %2060, %v2012_v10  }
 0xb03   :  { %1418 = vperm.xlu1 %2060, %v2020_v11  }
 0xb0b   :  { %1393 = vperm.xlu1 %2060, %v2017_v59  }
 0xb2f   :  { %v1181_v12 = vpop.permute.xlu2 %1180 }
 0xb36   :  { %v1177_v15 = vpop.permute.xlu1 %1176 }
 0xb37   :  { %v1203_v14 = vsel %vm319_vm11, %v1167_v58, %v1177_v15  ;;  %v1189_v9 = vpop.permute.xlu2 %1188 }
 0xb38   :  { %v1204_v2 = vsel %vm223_vm10, %v1203_v14, %v1181_v12 }
 0xb46   :  { %v1193_v20 = vpop.permute.xlu0 %1192 }
 0xb4d   :  { %v1201_v25 = vpop.permute.xlu2 %1200 }
 0xb4e   :  { %v1221_v56 = vpop.permute.xlu0 %1220 }
 0xb55   :  { %v1185_v18 = vpop.permute.xlu1 %1184 }
 0xb56   :  { %v1206_v19 = vsel %vm1205_vm3, %v1204_v2, %v1185_v18  ;;  %vm1670_vm3 = vcmask 60416  }
 0xb57   :  { %v1207_v53 = vsel %vm103_vm2, %v1206_v19, %v1189_v9 }
 0xb58   :  { %v1209_v26 = vsel %vm1208_vm13, %v1207_v53, %v1193_v20 }
 0xb5d   :  { %v1197_v21 = vpop.permute.xlu1 %1196 }
 0xb5e   :  { %v1211_v29 = vsel %vm1210_vm5, %v1209_v26, %v1197_v21  ;;  %v2019_v26 = vld [vmem:[%s2872_s8 + $0x4] sm:$0x3] }
 0xb5f   :  { %v1212_v32 = vsel %vm326_vm12, %v1211_v29, %v1201_v25 }
 0xb60   :  { %v1215_v49 = vpack.c.bf16 %v1212_v32, %v1212_v32 }
 0xb62   :  { %v1227_v33 = vsel %vm227_vm9, %v1215_v49, 0 }
 0xb63   :  { %1236 = vmatpush.bf16.msra.mxu3 %v1227_v33 }
 0xb65   :  { %v1252_v13 = vpop.permute.xlu1 %1251 }
 0xb66   :  { %1999 = vmatmul.msk.bf16.vlgmr.msra.gmra.mxu3 %vm223_vm10, %v1997_v34 }
 0xb6d   :  { %v1332_v0 = vpop.permute.xlu1 %1331 }
 0xb75   :  { %v1419_v25 = vpop.permute.xlu1 %1418 }
 0xb7d   :  { %v1394_v49 = vpop.permute.xlu1 %1393 }
 0xbe9   :  { %v1238_v36 = vpop.f32.mrf.mxu3 }
 0xbea   :  { %v1239_v38 = vadd.f32 %v1238_v36, %v1221_v56 }
 0xbec   :  { %v1242_v42 = vmul.f32 %v2669_v41, %v1239_v38 }
 0xbee   :  { %v1243_v16 = vadd.f32 %v1242_v42, %v2395_v43 }
 0xbf0   :  { %v1246_v30 = vpack.c.bf16 %v1243_v16, %v1243_v16 }
 0xbf1   :  { %v1240_v23 = vpop.f32.mrf.mxu3 }
 0xbf2   :  { %v1258_v46 = vsel %vm110_vm1, %v1246_v30, 0 }
 0xbf3   :  { %1267 = vmatpush.bf16.msrb.mxu0 %v1258_v46 }
 0xbf6   :  { %2002 = vmatmul.msk.bf16.vlgmr.msrb.gmra.mxu0 %vm103_vm2, %v2000_v47 }
 0xc73   :  { %v1269_v8 = vpop.f32.mrf.mxu0 }
 0xc74   :  { %v1270_v48 = vadd.f32 %v1269_v8, %v1252_v13 }
 0xc76   :  { %v1273_v24 = vadd.f32 %v1270_v48, %v2375_v22  ;;  %v2005_v22 = vld [vmem:[%s2895_s0 + $0x20] sm:$0xf] }
 0xc77   :  { %v1285_v17 = vunpack.c.l.b16 %v2005_v22 }
 0xc78   :  { %v2680_v50 = vmul.f32 %v2669_v41, %v1273_v24 }
 0xc79   :  { %v1287_v35 = vpack.c.b16 %v1285_v17, %v1285_v17 }
 0xc7a   :  { %v1279_v43 = vpack.c.bf16 %v2680_v50, %v2680_v50 }
 0xc7b   :  { %v1271_v51 = vpop.f32.mrf.mxu0 }
 0xc7c   :  { %v1295_v52 = vsel %vm110_vm1, %v1279_v43, 0  ;;  %v2013_v51 = vld [vmem:[%s2865_s10 + $0x4] sm:$0x3] }
 0xc7d   :  { %1304 = vmatpush.bf16.msra.mxu1 %v1295_v52 }
 0xc80   :  { %2010 = vmatmul.msk.bf16.vlgmr.msra.gmra.mxu1 %vm103_vm2, %v2039_v54 }
 0xc90   :  { %2011 = vmatmul.msk.bf16.gmra.mxu1 %vm103_vm2, %v1287_v35 }
 0xcfd   :  { %v1306_v44 = vpop.f32.mrf.mxu1 }
 0xcfe   :  { %1316 = vrot.lane.b32.xlu2 %v1306_v44, %s2188_s28 }
 0xd05   :  { %v1308_v55 = vpop.f32.mrf.mxu1 }
 0xd0d   :  { %v1311_v57 = vpop.f32.mrf.mxu1 }
 0xd0e   :  { %1322 = vrot.lane.b32.xlu0 %v1311_v57, %s2182_s11 }
 0xd15   :  { %v1313_v40 = vpop.f32.mrf.mxu1 }
 0xd58   :  { %v1317_v60 = vpop.permute.xlu2 %1316 }
 0xd59   :  { %v1319_v31 = vsel %vm223_vm10, 0.0, %v1317_v60 }
 0xd5a   :  { %v1320_v61 = vadd.f32 %v1319_v31, %v1308_v55  ;;  %v2014_v31 = vld [vmem:[%s2896_s2 + $0x8] sm:$0xf]  ;;  %s2899_s2 = smov 8  }
 0xd80   :  { %v1323_v62 = vpop.permute.xlu0 %1322 }
 0xd81   :  { %v1325_v45 = vsel %vm1210_vm5, %v1323_v62, 0.0 }
 0xd82   :  { %v1326_v63 = vadd.f32 %v1325_v45, %v1320_v61 }
 0xd84   :  { %v1334_v1 = vadd.f32 %v1332_v0, %v1326_v63 }
 0xd86   :  { %v2697_v3 = vmax.f32 %v1334_v1, 0.0 }
 0xd88   :  { %v1336_v4 = vsel %vm74_vm0, %v2697_v3, 0.0 }
 0xd89   :  { %1337 = vadd.xlane.f32.xlu2 %v1336_v4 }
 0xdfc   :  { %v1338_v37 = vpop.xlane.xlu2 %1337 }
 0xdfd   :  { %v1339_v5 = vmul.f32 %v1338_v37, %v2339_v39 }
 0xdff   :  { %v1340_v6 = vsub.f32 %v2697_v3, %v1339_v5 }
 0xe01   :  { %v1341_v7 = vmul.f32 %v1340_v6, %v1340_v6 }
 0xe03   :  { %v1342_v10 = vsel %vm74_vm0, %v1341_v7, 0.0 }
 0xe04   :  { %1343 = vadd.xlane.f32.xlu0 %v1342_v10 }
 0xe77   :  { %v1344_v11 = vpop.xlane.xlu0 %1343 }
 0xe78   :  { %v1345_v59 = vmul.f32 %v1344_v11, %v2339_v39  ;;  %v2016_v39 = vld [vmem:[%s2871_s6 + $0x4] sm:$0x3]  ;;  %s2898_s6 = smov 120  }
 0xe7a   :  { %v1346_v12 = vadd.f32 1e-05, %v1345_v59 }
 0xe7c   :  { %2151 = vrsqrt.f32 %v1346_v12  ;;  %vm1353_vm7 = vweird.f32 %v1346_v12 }
 0xe82   :  { %v2152_v15 = vpop.eup %2151 }
 0xe83   :  { %v1348_v58 = vmul.f32 %v2152_v15, %v1346_v12  ;;  %vm1354_vm12 = vweird.f32 %v2152_v15 }
 0xe84   :  { %vm1355_vm15 = vmor %vm1353_vm7, %vm1354_vm12 }
 0xe85   :  { %v1349_v14 = vmul.f32 %v2152_v15, %v1348_v58 }
 0xe87   :  { %v1350_v18 = vmul.f32 0.5, %v1349_v14 }
 0xe89   :  { %v1351_v9 = vsub.f32 1.5, %v1350_v18 }
 0xe8b   :  { %v1352_v2 = vmul.f32 %v2152_v15, %v1351_v9 }
 0xe8d   :  { %v1356_v19 = vsel %vm1355_vm15, %v2152_v15, %v1352_v2 }
 0xe8e   :  { %v1357_v53 = vmul.f32 %v1356_v19, %v1340_v6 }
 0xe90   :  { %v1360_v20 = vpack.c.bf16 %v1357_v53, %v1357_v53 }
 0xe92   :  { %v1372_v21 = vsel %vm110_vm1, %v1360_v20, 0 }
 0xe93   :  { %1381 = vmatpush.bf16.msra.mxu2 %v1372_v21  ;;  %1406 = vmatpush.bf16.msrb.mxu3 %v1372_v21 }
 0xe94   :  { %1431 = vmatpush.bf16.msra.mxu0 %v1372_v21 }
 0xe96   :  { %2018 = vmatmul.msk.bf16.vlgmr.msrb.gmra.mxu3 %vm103_vm2, %v2016_v39  ;;  %2015 = vmatmul.msk.bf16.vlgmr.msra.gmra.mxu2 %vm103_vm2, %v2013_v51 }
 0xe97   :  { %2021 = vmatmul.msk.bf16.vlgmr.msra.gmra.mxu0 %vm103_vm2, %v2019_v26 }
 0xf14   :  { %v1433_v29 = vpop.f32.mrf.mxu0 }
 0xf15   :  { %v1434_v32 = vadd.f32 %v1433_v29, %v1419_v25 }
 0xf17   :  { %1438 = vrot.lane.b32.xlu1 %v1434_v32, %s2897_s22 }
 0xf19   :  { %v1408_v33 = vpop.f32.mrf.mxu3  ;;  %v1383_v45 = vpop.f32.mrf.mxu2 }
 0xf1a   :  { %v1409_v34 = vadd.f32 %v1408_v33, %v1394_v49 }
 0xf1c   :  { %1462 = vrot.lane.b32.xlu2 %v1409_v34, %s2185_s3  ;;  %v1435_v56 = vpop.f32.mrf.mxu0  ;;  %v1502_v38 = vpack.c.bf16 %v1409_v34, %v1409_v34 }
 0xf1f   :  { %1456 = vrot.lane.b32.xlu1 %v1409_v34, %s2182_s11 }
 0xf21   :  { %v1410_v36 = vpop.f32.mrf.mxu3  ;;  %v1385_v63 = vpop.f32.mrf.mxu2 }
 0xf27   :  { %1459 = vrot.lane.b32.xlu1 %v1409_v34, %s2898_s6 }
 0xf42   :  { %1510 = vxpose.xlu2.c.b16.start.end [1/1] (short) (narrow) %v1502_v38, 16 }
 0xf76   :  { %v1463_v13 = vpop.permute.xlu2 %1462 }
 0xf77   :  { %v1505_v48 = vpack.c.bf16 %v1463_v13, %v1463_v13 }
 0xf89   :  { %v1439_v42 = vpop.permute.xlu1 %1438 }
 0xf8a   :  { %v1441_v16 = vsel %vm319_vm11, 0.0, %v1439_v42 }
 0xf8b   :  { %v1443_v30 = vsel %vm1442_vm4, %v1441_v16, 0.0 }
 0xf8c   :  { %1466 = vrot.lane.b32.xlu0 %v1443_v30, %s2182_s11  ;;  %1469 = vrot.lane.b32.xlu1 %v1443_v30, %s2898_s6  ;;  %v1506_v23 = vpack.c.bf16 %v1443_v30, %v1443_v30 }
 0xf8e   :  { %v1530_v46 = vsel %vm227_vm9, %v1506_v23, 0 }
 0xf8f   :  { %1539 = vmatpush.bf16.msrb.mxu2 %v1530_v46 }
 0xf91   :  { %v1457_v47 = vpop.permute.xlu1 %1456 }
 0xf92   :  { %v1503_v43 = vpack.c.bf16 %v1457_v47, %v1457_v47 }
 0xf94   :  { %1472 = vrot.lane.b32.xlu1 %v1443_v30, %s2185_s3 }
 0xf99   :  { %v1460_v8 = vpop.permute.xlu1 %1459 }
 0xf9a   :  { %v1504_v24 = vpack.c.bf16 %v1460_v8, %v1460_v8 }
 0xfae   :  { %2109 = vxpose.binary.xlu0.c.b16.start.end [1/2] (short) (narrow) %v1505_v48, %v1504_v24, 16 }
 0xfc9   :  { %1545 = vxpose.xlu1.c.b16.start.end [1/1] (short) (narrow) %v1503_v43, 16 }
 0xfe3   :  { %v1518_v52 = vpop.trf.xlu2 }
 0xfe4   :  { %2022 = vmatmul.msk.bf16.vlgmr.msrb.gmra.mxu2 %vm223_vm10, %v1518_v52 }
 0xffe   :  { %v1467_v54 = vpop.permute.xlu0 %1466  ;;  %v1470_v22 = vpop.permute.xlu1 %1469 }
 0xfff   :  { %v1507_v17 = vpack.c.bf16 %v1467_v54, %v1467_v54  ;;  %v1508_v35 = vpack.c.bf16 %v1470_v22, %v1470_v22 }
0x1001   :  { %v1565_v44 = vsel %vm227_vm9, %v1507_v17, 0  ;;  %v1600_v55 = vsel %vm227_vm9, %v1508_v35, 0 }
0x1002   :  { %1574 = vmatpush.bf16.msra.mxu3 %v1565_v44  ;;  %1609 = vmatpush.bf16.msrb.mxu0 %v1600_v55 }
0x1006   :  { %v1473_v57 = vpop.permute.xlu1 %1472 }
0x1007   :  { %v1509_v40 = vpack.c.bf16 %v1473_v57, %v1473_v57 }
0x1009   :  { %v1635_v60 = vsel %vm227_vm9, %v1509_v40, 0 }
0x100a   :  { %1644 = vmatpush.bf16.msrb.mxu1 %v1635_v60 }
0x101c   :  { %1450 = vrot.lane.b32.xlu0 %v2669_v41, %s2897_s22 }
0x1024   :  { %1365 = vperm.xlu0 %2059, %v2014_v31  }
0x105a   :  { %v2110_v61 = vpop.trf.xlu0 }
0x105b   :  { %2024 = vmatmul.msk.bf16.vlgmr.msrb.gmra.mxu0 %vm223_vm10, %v2110_v61 }
0x1062   :  { %v2111_v62 = vpop.trf.xlu0 }
0x1063   :  { %2025 = vmatmul.msk.bf16.vlgmr.msrb.gmra.mxu1 %vm223_vm10, %v2111_v62 }
0x1067   :  { %v1541_v0 = vpop.f32.mrf.mxu2 }
0x1068   :  { %v1650_v10 = vmul.f32 0.5, %v1541_v0 }
0x106f   :  { %v1543_v4 = vpop.f32.mrf.mxu2 }
0x1075   :  { %v1553_v1 = vpop.trf.xlu1 }
0x1076   :  { %2023 = vmatmul.msk.bf16.vlgmr.msra.gmra.mxu3 %vm223_vm10, %v1553_v1 }
0x108e   :  { %v1451_v37 = vpop.permute.xlu0 %1450 }
0x108f   :  { %v1453_v5 = vsel %vm319_vm11, 0.0, %v1451_v37 }
0x1090   :  { %v1454_v6 = vsel %vm1442_vm4, %v1453_v5, 0.0 }
0x1091   :  { %1489 = vrot.lane.b32.xlu1 %v1454_v6, %s2898_s6  ;;  %1486 = vrot.lane.b32.xlu2 %v1454_v6, %s2182_s11  ;;  %v2747_v7 = vsel %vm1495_vm6, %v1454_v6, 0.0 }
0x1092   :  { %vm1654_vm8 = vcmp.gt.f32.partialorder %v2747_v7, 0.0 }
0x1093   :  { %v1658_v11 = vsel %vm1654_vm8, 9.999995e-07, %v2186_v28 }
0x1094   :  { %v1662_v59 = vperm.slane %v1658_v11, 0 }
0x1096   :  { %v2751_v12 = vadd.f32 %v1662_v59, %v1650_v10  ;;  %v1366_v47 = vpop.permute.xlu0 %1365 }
0x1097   :  { %v1384_v48 = vadd.f32 %v1383_v45, %v1366_v47 }
0x1098   :  { %v1671_v13 = vsel %vm1670_vm3, %v2751_v12, -inf }
0x1099   :  { %1492 = vrot.lane.b32.xlu1 %v1454_v6, %s2185_s3 }
0x10d8   :  { %v1611_v15 = vpop.f32.mrf.mxu0 }
0x10d9   :  { %v1652_v34 = vmul.f32 0.5, %v1611_v15 }
0x10e0   :  { %v1613_v58 = vpop.f32.mrf.mxu0  ;;  %v1646_v14 = vpop.f32.mrf.mxu1 }
0x10e1   :  { %v1653_v23 = vmul.f32 0.5, %v1646_v14 }
0x10e8   :  { %v1648_v18 = vpop.f32.mrf.mxu1 }
0x10eb   :  { %v1487_v9 = vpop.permute.xlu2 %1486 }
0x10ec   :  { %v2756_v2 = vsel %vm1495_vm6, %v1487_v9, 0.0 }
0x10ed   :  { %vm1655_vm14 = vcmp.gt.f32.partialorder %v2756_v2, 0.0 }
0x10ee   :  { %v1659_v19 = vsel %vm1655_vm14, 9.999995e-07, %v2186_v28 }
0x10ef   :  { %v1663_v20 = vperm.slane %v1659_v19, 0 }
0x10f9   :  { %v1576_v53 = vpop.f32.mrf.mxu3 }
0x10fa   :  { %v1651_v21 = vmul.f32 0.5, %v1576_v53 }
0x10fc   :  { %v1667_v39 = vadd.f32 %v1663_v20, %v1651_v21 }
0x10fe   :  { %v1674_v26 = vsel %vm1670_vm3, %v1667_v39, -inf }
0x10ff   :  { %1675 = vmax.xlane.f32.xlu2 %v1674_v26 }
0x1101   :  { %v1578_v25 = vpop.f32.mrf.mxu3 }
0x1102   :  { %v1716_v25 = vperm.slane %v2756_v2, 0 }
0x1103   :  { %v1490_v29 = vpop.permute.xlu1 %1489 }
0x1104   :  { %v2763_v32 = vsel %vm1495_vm6, %v1490_v29, 0.0 }
0x1105   :  { %vm1656_vm13 = vcmp.gt.f32.partialorder %v2763_v32, 0.0  ;;  %v1717_v6 = vperm.slane %v2763_v32, 0 }
0x1106   :  { %v1660_v49 = vsel %vm1656_vm13, 9.999995e-07, %v2186_v28 }
0x1107   :  { %v1664_v33 = vperm.slane %v1660_v49, 0 }
0x1109   :  { %v1668_v56 = vadd.f32 %v1664_v33, %v1652_v34 }
0x110b   :  { %v1493_v36 = vpop.permute.xlu1 %1492  ;;  %v1677_v38 = vsel %vm1670_vm3, %v1668_v56, -inf }
0x110c   :  { %v2770_v42 = vsel %vm1495_vm6, %v1493_v36, 0.0  ;;  %1678 = vmax.xlane.f32.xlu1 %v1677_v38  ;;  %v1715_v36 = vperm.slane %v2747_v7, 0 }
0x110d   :  { %vm1657_vm12 = vcmp.gt.f32.partialorder %v2770_v42, 0.0  ;;  %v1718_v14 = vperm.slane %v2770_v42, 0 }
0x110e   :  { %v1661_v16 = vsel %vm1657_vm12, 9.999995e-07, %v2186_v28 }
0x110f   :  { %v1665_v30 = vperm.slane %v1661_v16, 0 }
0x1111   :  { %v1669_v46 = vadd.f32 %v1665_v30, %v1653_v23 }
0x1113   :  { %v1680_v8 = vsel %vm1670_vm3, %v1669_v46, -inf }
0x1114   :  { %1672 = vmax.xlane.f32.xlu1 %v1671_v13  ;;  %1681 = vmax.xlane.f32.xlu0 %v1680_v8 }
0x1117   :  { %1445 = vrot.lane.b32.xlu2 %v1384_v48, %s2897_s22 }
0x1172   :  { %v1676_v27 = vpop.xlane.xlu2 %1675 }
0x1173   :  { %v1684_v55 = vsub.f32 %v1667_v39, %v1676_v27  ;;  %v2031_v27 = vld [vmem:[%s2863_s13 + $0x10] sm:$0xff] }
0x1175   :  { %v1689_v40 = vmul.f32 1.442695, %v1684_v55 }
0x117a   :  { %v1446_v24 = vpop.permute.xlu2 %1445 }
0x117b   :  { %v1448_v43 = vsel %vm319_vm11, 0.0, %v1446_v24  ;;  %v1890_v24 = vld [vmem:[%s2873_s17] sm:$0x3f] }
0x117c   :  { %v2780_v28 = vsel %vm1442_vm4, %v1448_v43, 0.0 }
0x117d   :  { %1479 = vrot.lane.b32.xlu2 %v2780_v28, %s2898_s6  ;;  %v1723_v13 = vpack.c.bf16 %v2780_v28, %v2780_v28 }
0x117f   :  { %v1679_v51 = vpop.xlane.xlu1 %1678 }
0x1180   :  { %v1685_v52 = vsub.f32 %v1668_v56, %v1679_v51 }
0x1182   :  { %v1691_v54 = vmul.f32 1.442695, %v1685_v52 }
0x1184   :  { %2153 = vpow2.f32 %v1691_v54 }
0x1187   :  { %v1682_v22 = vpop.xlane.xlu0 %1681  ;;  %v1673_v60 = vpop.xlane.xlu1 %1672 }
0x1188   :  { %v1686_v17 = vsub.f32 %v1669_v46, %v1682_v22  ;;  %v1683_v61 = vsub.f32 %v2751_v12, %v1673_v60 }
0x118a   :  { %v2154_v35 = vpop.eup %2153  ;;  %v1693_v44 = vmul.f32 1.442695, %v1686_v17  ;;  %v1687_v45 = vmul.f32 1.442695, %v1683_v61 }
0x118b   :  { %v1701_v57 = vsel %vm1670_vm3, %v2154_v35, 0.0 }
0x118c   :  { %1702 = vadd.xlane.f32.xlu1 %v1701_v57  ;;  %2155 = vpow2.f32 %v1693_v44 }
0x118d   :  { %2157 = vpow2.f32 %v1689_v40 }
0x118e   :  { %2159 = vpow2.f32 %v1687_v45 }
0x1192   :  { %v2156_v31 = vpop.eup %2155 }
0x1193   :  { %v1704_v62 = vsel %vm1670_vm3, %v2156_v31, 0.0  ;;  %v2158_v63 = vpop.eup %2157 }
0x1194   :  { %1705 = vadd.xlane.f32.xlu0 %v1704_v62  ;;  %v1698_v0 = vsel %vm1670_vm3, %v2158_v63, 0.0  ;;  %v2160_v1 = vpop.eup %2159 }
0x1195   :  { %v1695_v4 = vsel %vm1670_vm3, %v2160_v1, 0.0 }
0x119c   :  { %1699 = vadd.xlane.f32.xlu0 %v1698_v0  ;;  %v2030_v0 = vld [vmem:[%s2866_s12 + $0x8] sm:$0xf] }
0x11a5   :  { %1476 = vrot.lane.b32.xlu1 %v2780_v28, %s2182_s11 }
0x11a6   :  { %1696 = vadd.xlane.f32.xlu2 %v1695_v4 }
0x11b0   :  { %1482 = vrot.lane.b32.xlu0 %v2780_v28, %s2185_s3 }
0x11d7   :  { %v1480_v18 = vpop.permute.xlu2 %1479 }
0x11d8   :  { %v1725_v20 = vpack.c.bf16 %v1480_v18, %v1480_v18 }
0x11ff   :  { %v1703_v37 = vpop.xlane.xlu1 %1702 }
0x1200   :  { %2161 = vrcp.f32 %v1703_v37 }
0x1206   :  { %v2162_v5 = vpop.eup %2161 }
0x1207   :  { %v1713_v10 = vmul.f32 %v2162_v5, %v2154_v35  ;;  %v1706_v11 = vpop.xlane.xlu0 %1705  ;;  %v2034_v35 = vld [vmem:[%s2867_s15 + $0x10] sm:$0xff] }
0x1208   :  { %2163 = vrcp.f32 %v1706_v11 }
0x1209   :  { %v1721_v59 = vmul.f32 %v1717_v6, %v1713_v10 }
0x120b   :  { %v1729_v12 = vpack.c.bf16 %v1721_v59, %v1721_v59 }
0x120d   :  { %v1773_v15 = vsel %vm103_vm2, %v1729_v12, 0  ;;  %v2033_v12 = vld [vmem:[%s2870_s14 + $0x8] sm:$0xf] }
0x120e   :  { %1782 = vmatpush.bf16.xpose.msra.mxu0 %v1773_v15  ;;  %v2164_v58 = vpop.eup %2163 }
0x120f   :  { %v1714_v9 = vmul.f32 %v2164_v58, %v2156_v31  ;;  %v1700_v19 = vpop.xlane.xlu0 %1699 }
0x1210   :  { %2165 = vrcp.f32 %v1700_v19 }
0x1211   :  { %v1722_v53 = vmul.f32 %v1718_v14, %v1714_v9 }
0x1213   :  { %v1730_v21 = vpack.c.bf16 %v1722_v53, %v1722_v53 }
0x1215   :  { %2028 = vmatmul.msk.bf16.vlgmr.msra.gmra.mxu0 %vm103_vm2, %v1725_v20  ;;  %v1792_v39 = vsel %vm103_vm2, %v1730_v21, 0  ;;  %v1888_v20 = vld [vmem:[%s2875_s16] sm:$0x7] }
0x1216   :  { %v2166_v26 = vpop.eup %2165  ;;  %1801 = vmatpush.bf16.xpose.msra.mxu1 %v1792_v39 }
0x1217   :  { %v1712_v29 = vmul.f32 %v2166_v26, %v2158_v63  ;;  %v1477_v38 = vpop.permute.xlu1 %1476 }
0x1218   :  { %v1724_v23 = vpack.c.bf16 %v1477_v38, %v1477_v38 }
0x1219   :  { %v1697_v32 = vpop.xlane.xlu2 %1696  ;;  %v1720_v49 = vmul.f32 %v1716_v25, %v1712_v29 }
0x121a   :  { %2167 = vrcp.f32 %v1697_v32 }
0x121b   :  { %v1728_v33 = vpack.c.bf16 %v1720_v49, %v1720_v49 }
0x121d   :  { %v1754_v34 = vsel %vm103_vm2, %v1728_v33, 0 }
0x121e   :  { %1763 = vmatpush.bf16.xpose.msrb.mxu3 %v1754_v34 }
0x1220   :  { %v2168_v56 = vpop.eup %2167 }
0x1221   :  { %v1711_v42 = vmul.f32 %v2168_v56, %v2160_v1 }
0x1222   :  { %v1483_v16 = vpop.permute.xlu0 %1482 }
0x1223   :  { %v1719_v30 = vmul.f32 %v1715_v36, %v1711_v42  ;;  %v1726_v46 = vpack.c.bf16 %v1483_v16, %v1483_v16 }
0x1225   :  { %v1727_v47 = vpack.c.bf16 %v1719_v30, %v1719_v30  ;;  %2027 = vmatmul.msk.bf16.vlgmr.msrb.gmra.mxu3 %vm103_vm2, %v1724_v23  ;;  %2029 = vmatmul.msk.bf16.vlgmr.msra.gmra.mxu1 %vm103_vm2, %v1726_v46 }
0x1227   :  { %v1735_v2 = vsel %vm103_vm2, %v1727_v47, 0 }
0x1228   :  { %1744 = vmatpush.bf16.xpose.msra.mxu2 %v1735_v2 }
0x122f   :  { %2026 = vmatmul.msk.bf16.vlgmr.msra.gmra.mxu2 %vm103_vm2, %v1723_v13 }
0x1292   :  { %v1784_v7 = vpop.f32.mrf.mxu0 }
0x1293   :  { %v1809_v8 = vmax.f32 %v1784_v7, 0.0 }
0x1295   :  { %1816 = vrot.lane.b32.xlu1 %v1809_v8, %s2899_s2 }
0x129a   :  { %v1786_v48 = vpop.f32.mrf.mxu0 }
0x129d   :  { %1833 = vperm.xlu1 %2060, %v2031_v27  }
0x12a2   :  { %v1803_v43 = vpop.f32.mrf.mxu1 }
0x12a3   :  { %v1810_v22 = vmax.f32 %v1803_v43, 0.0 }
0x12a5   :  { %1893 = vperm.xlu1 %2060, %v1890_v24  }
0x12a8   :  { %v1765_v51 = vpop.f32.mrf.mxu3 }
0x12a9   :  { %v1808_v28 = vmax.f32 %v1765_v51, 0.0 }
0x12aa   :  { %v1805_v52 = vpop.f32.mrf.mxu1 }
0x12ab   :  { %1812 = vrot.lane.b32.xlu0 %v1808_v28, %s2188_s28 }
0x12b0   :  { %v1767_v54 = vpop.f32.mrf.mxu3 }
0x12b2   :  { %v1746_v17 = vpop.f32.mrf.mxu2 }
0x12b3   :  { %1820 = vrot.lane.b32.xlu0 %v1810_v22, %s2900_s27  ;;  %v1807_v57 = vmax.f32 %v1746_v17, 0.0 }
0x12ba   :  { %v1748_v44 = vpop.f32.mrf.mxu2 }
0x12bb   :  { %1864 = vperm.xlu0 %2059, %v2034_v35  }
0x1307   :  { %v1817_v60 = vpop.permute.xlu1 %1816 }
0x130f   :  { %v1834_v1 = vpop.permute.xlu1 %1833 }
0x1317   :  { %v1894_v21 = vpop.permute.xlu1 %1893 }
0x131d   :  { %v1813_v55 = vpop.permute.xlu0 %1812 }
0x131e   :  { %v1823_v40 = vsel %vm223_vm10, %v1807_v57, %v1813_v55 }
0x131f   :  { %v1824_v31 = vsel %vm103_vm2, %v1823_v40, %v1817_v60 }
0x1325   :  { %v1821_v61 = vpop.permute.xlu0 %1820 }
0x1326   :  { %v1825_v62 = vsel %vm1210_vm5, %v1824_v31, %v1821_v61 }
0x1327   :  { %v1828_v45 = vpack.c.bf16 %v1825_v62, %v1825_v62 }
0x1329   :  { %v1840_v63 = vsel %vm227_vm9, %v1828_v45, 0  ;;  %vm1916_vm9 = vcmask 128000  }
0x132a   :  { %1849 = vmatpush.bf16.msrb.mxu2 %v1840_v63 }
0x132d   :  { %2032 = vmatmul.msk.bf16.vlgmr.msrb.gmra.mxu2 %vm223_vm10, %v2030_v0  ;;  %v1865_v15 = vpop.permute.xlu0 %1864 }
0x13b0   :  { %v1851_v4 = vpop.f32.mrf.mxu2 }
0x13b1   :  { %v1852_v37 = vadd.f32 %v1851_v4, %v1834_v1 }
0x13b3   :  { %v1855_v5 = vmul.f32 %v2669_v41, %v1852_v37 }
0x13b5   :  { %v1856_v6 = vadd.f32 %v1855_v5, %v2697_v3 }
0x13b7   :  { %v1859_v10 = vpack.c.bf16 %v1856_v6, %v1856_v6 }
0x13b8   :  { %v1853_v11 = vpop.f32.mrf.mxu2 }
0x13b9   :  { %v1871_v59 = vsel %vm110_vm1, %v1859_v10, 0 }
0x13ba   :  { %1880 = vmatpush.bf16.msra.mxu3 %v1871_v59 }
0x13bd   :  { %2035 = vmatmul.msk.bf16.vlgmr.msra.gmra.mxu3 %vm103_vm2, %v2033_v12 }
0x1440   :  { %v1882_v58 = vpop.f32.mrf.mxu3 }
0x1441   :  { %v1883_v14 = vadd.f32 %v1882_v58, %v1865_v15 }
0x1443   :  { %v1886_v18 = vadd.f32 %v1883_v14, %v2680_v50 }
0x1445   :  { %v1887_v9 = vmul.f32 %v2669_v41, %v1886_v18 }
0x1447   :  { %1918 = vst.msk [vmem:[%s2874_s19] sm:$0xff] %vm74_vm0, %v1887_v9  ;;  %v1889_v3 = vpack.c.bf16 %v1887_v9, %v1887_v9 }
0x1448   :  { %v1884_v19 = vpop.f32.mrf.mxu3 }
0x1449   :  { %v1900_v53 = vsel %vm110_vm1, %v1889_v3, 0 }
0x144a   :  { %1909 = vmatpush.bf16.msrb.mxu0 %v1900_v53 }
0x144d   :  { %2036 = vmatmul.msk.bf16.vlgmr.msrb.gmra.mxu0 %vm103_vm2, %v1888_v20 }
0x14ca   :  { %v1911_v50 = vpop.f32.mrf.mxu0 }
0x14cb   :  { %v1912_v39 = vadd.f32 %v1911_v50, %v1894_v21 }
0x14cd   :  { %v1915_v26 = vmul.f32 %v2669_v41, %v1912_v39 }
0x14cf   :  { %1917 = vst.msk [vmem:[%s2876_s18] sm:$0x3f] %vm1916_vm9, %v1915_v26  ;;  %v1919_v25 = vsel %vm1916_vm9, %v1915_v26, -inf }
0x14d0   :  { %v1920_v29 = vrot.slane %v1919_v25, 4 }
0x14d2   :  { %v1921_v32 = vmax.f32 %v1919_v25, %v1920_v29  ;;  %v1913_v49 = vpop.f32.mrf.mxu0 }
0x14d4   :  { %v1922_v33 = vrot.slane %v1921_v32, 2 }
0x14d6   :  { %v1923_v34 = vmax.f32 %v1921_v32, %v1922_v33 }
0x14d8   :  { %v1924_v56 = vrot.slane %v1923_v34, 1 }
0x14da   :  { %v1925_v36 = vmax.f32 %v1923_v34, %v1924_v56 }
0x14dc   :  { %v1926_v38 = vsub.f32 %v1915_v26, %v1925_v36 }
0x14de   :  { %v1927_v42 = vmul.f32 1.442695, %v1926_v38 }
0x14e0   :  { %2169 = vpow2.f32 %v1927_v42 }
0x14e6   :  { %v2170_v16 = vpop.eup %2169 }
0x14e7   :  { %v1929_v30 = vsel %vm1916_vm9, %v2170_v16, 0.0 }
0x14e8   :  { %v1930_v23 = vrot.slane %v1929_v30, 4 }
0x14ea   :  { %v1931_v46 = vadd.f32 %v1930_v23, %v1929_v30 }
0x14ec   :  { %v1932_v47 = vrot.slane %v1931_v46, 2 }
0x14ee   :  { %v1933_v2 = vadd.f32 %v1932_v47, %v1931_v46 }
0x14f0   :  { %v1934_v13 = vrot.slane %v1933_v2, 1 }
0x14f2   :  { %v1935_v7 = vadd.f32 %v1934_v13, %v1933_v2 }
0x14f4   :  { %2171 = vrcp.f32 %v1935_v7 }
0x14fa   :  { %v2172_v8 = vpop.eup %2171 }
0x14fb   :  { %v1937_v48 = vmul.f32 %v2172_v8, %v2170_v16 }
0x14fd   :  { %v1938_v27 = vmul.f32 %v2669_v41, %v1937_v48 }
0x14ff   :  { %1939 = vst.msk [vmem:[%s2877_s20] sm:$0x3f] %vm1916_vm9, %v1938_v27 }

// kernel: my_transformer_fwd.5
= control target key start
LH: loop header
LB: loop body
LE: loop exit
PB: predicated region body
PF: predicated region fallthrough
CT: control target
= control target key end

     0   :  { %s2908_s0 = inlined_call_operand.vmem [shape: f32[6,16], index: 0, kind: input, shape index: {}]   ;;  %s2909_s1 = inlined_call_operand.vmem [shape: f32[8,16], index: 1, kind: input, shape index: {}]   ;;  %s2910_s2 = inlined_call_operand.vmem [shape: f32[1,16], index: 2, kind: input, shape index: {}]   ;;  %s2911_s3 = inlined_call_operand.vmem [shape: bf16[8,6], index: 3, kind: input, shape index: {}]   ;;  %s2912_s4 = inlined_call_operand.vmem [shape: f32[8,1], index: 4, kind: input, shape index: {}]   ;;  %s2913_s5 = inlined_call_operand.vmem [shape: bf16[3,24,8], index: 5, kind: input, shape index: {}]   ;;  %s2914_s6 = inlined_call_operand.vmem [shape: f32[3,8,1], index: 6, kind: input, shape index: {}]   ;;  %s2915_s7 = inlined_call_operand.vmem [shape: bf16[3,4,8], index: 7, kind: input, shape index: {}]   ;;  %s2916_s8 = inlined_call_operand.vmem [shape: f32[3,4,1], index: 8, kind: input, shape index: {}]   ;;  %s2917_s9 = inlined_call_operand.vmem [shape: bf16[3,4,8], index: 9, kind: input, shape index: {}]   ;;  %s2918_s10 = inlined_call_operand.vmem [shape: f32[3,4,1], index: 10, kind: input, shape index: {}]   ;;  %s2919_s11 = inlined_call_operand.vmem [shape: bf16[3,4,8], index: 11, kind: input, shape index: {}]   ;;  %s2920_s12 = inlined_call_operand.vmem [shape: f32[3,4,1], index: 12, kind: input, shape index: {}]   ;;  %s2921_s13 = inlined_call_operand.vmem [shape: bf16[3,8,4], index: 13, kind: input, shape index: {}]   ;;  %s2922_s14 = inlined_call_operand.vmem [shape: f32[3,8,1], index: 14, kind: input, shape index: {}]   ;;  %s2923_s15 = inlined_call_operand.vmem [shape: bf16[3,8,8], index: 15, kind: input, shape index: {}]   ;;  %s2924_s16 = inlined_call_operand.vmem [shape: f32[3,8,1], index: 16, kind: input, shape index: {}]   ;;  %s2925_s17 = inlined_call_operand.vmem [shape: bf16[6,8], index: 17, kind: input, shape index: {}]   ;;  %s2926_s18 = inlined_call_operand.vmem [shape: f32[6,1], index: 18, kind: input, shape index: {}]   ;;  %s2927_s19 = inlined_call_operand.vmem [shape: f32[6,16], index: 19, kind: output, shape index: {0}]   ;;  %s2928_s20 = inlined_call_operand.hbm [shape: f32[8,16], index: 20, kind: output, shape index: {1}]   ;;  %s2929_s21 = inlined_call_operand.hbm [shape: f32[6,16], index: 21, kind: output, shape index: {2}]  }
   0x1   :  { %2933 = sst [smem:[#allocation8_spill]] %s2908_s0 }
   0x2   :  { %2934 = sst [smem:[#allocation9_spill]] %s2909_s1 }
   0x3   :  { %2935 = sst [smem:[#allocation10_spill]] %s2910_s2 }
   0x4   :  { %2936 = sst [smem:[#allocation11_spill]] %s2911_s3 }
   0x5   :  { %2937 = sst [smem:[#allocation12_spill]] %s2912_s4 }
   0x6   :  { %2938 = sst [smem:[#allocation13_spill]] %s2913_s5 }
   0x7   :  { %27 = vsyncpa [#allocation3], 0  ;;  %s2939_s26 = sld [smem:[#allocation12_spill]]  ;;  %vm82_vm0 = vcmask 1042432   ;;  %v2241_v2 = vmov 0   ;;  %vm78_vm1 = vcmask 48128  }
   0x8   :  { %s2940_s28 = sld [smem:[#allocation8_spill]]  ;;  %2076 = vset.pattern.permute.xlu0 %v2241_v2  ;;  %2077 = vset.pattern.permute.xlu2 %v2241_v2 }
   0x9   :  { %s2941_s4 = sld [smem:[#allocation9_spill]] }
   0xa   :  { %s2942_s22 = sld [smem:[#allocation10_spill]] }
   0xb   :  { %s2943_s24 = sld [smem:[#allocation11_spill]] }
   0xd   :  { %v72_v0 = vld [vmem:[%s2939_s26] sm:$0xff] }
   0xe   :  { %v70_v1 = vld [vmem:[%s2940_s28] sm:$0x3f]  ;;  %75 = vperm.xlu0 %2076, %v72_v0  }
   0xf   :  { %v71_v3 = vpack.c.bf16 %v70_v1, %v70_v1  ;;  %v99_v4 = vld [vmem:[%s2941_s4] sm:$0xff] }
  0x10   :  { %v2386_v5 = vld [vmem:[%s2942_s22] ss:$0 sm:$0xff] }
  0x11   :  { %v84_v6 = vsel %vm82_vm0, %v71_v3, 0  ;;  %v69_v7 = vld [vmem:[%s2943_s24] sm:$0xf]  ;;  %v103_v8 = vmul.f32 %v2386_v5, %v99_v4 }
  0x12   :  { %93 = vmatpush.bf16.msra.mxu0 %v84_v6 }
  0x13   :  { %28 = vsyncpa [#allocation5], 0  ;;  %vm123_vm2 = vcmask 1043456   ;;  %v168_v9 = vpack.c.bf16 %v103_v8, %v103_v8  ;;  %v169_v10 = vld [vmem:[%s2920_s12] sm:$0xf]  ;;  %vm116_vm3 = vcmask 64512  }
  0x14   :  { %v167_v12 = vld [vmem:[%s2919_s11] sm:$0x3]  ;;  %v1986_v14 = vld [vmem:[%s2914_s6 + $0x8] sm:$0xff]  ;;  %v1994_v15 = vld [vmem:[%s2918_s10 + $0x4] sm:$0xf]  ;;  %s2944_s2 = sld [smem:[#allocation13_spill]] }
  0x15   :  { %1967 = vmatmul.msk.bf16.vlgmr.msra.gmra.mxu0 %vm78_vm1, %v69_v7  ;;  %v2397_v11 = vsel %vm123_vm2, %v168_v9, 0  ;;  %v230_v13 = vld [vmem:[%s2924_s16] sm:$0xff]  ;;  %vm208_vm4 = vcmask 1041408   ;;  %vm204_vm5 = vcmask 31744   ;;  %s2242_s30 = smov 1   ;;  %s2243_s5 = smov 127  }
  0x16   :  { %188 = vmatpush.bf16.msra.mxu2 %v2397_v11  ;;  %172 = vperm.xlu0 %2076, %v169_v10   ;;  %v1991_v16 = vld [vmem:[%s2916_s8 + $0x4] sm:$0xf]  ;;  %v196_v35 = vld [vmem:[%s2921_s13] sm:$0xf]  ;;  %vm149_vm6 = vcmask 7168   ;;  %vm156_vm7 = vcmask 121856  }
  0x17   :  { %v198_v36 = vld [vmem:[%s2922_s14] sm:$0xff]  ;;  %s2244_s3 = smov 2   ;;  %s2245_s28 = smov 126   ;;  %vm301_vm8 = vcmask 15360   ;;  %vm308_vm9 = vcmask 113664   ;;  %vm320_vm10 = vcmask 130048  }
  0x18   :  { %201 = vperm.xlu2 %2077, %v198_v36   ;;  %v159_v37 = vld [vmem:[%s2914_s6] sm:$0xff]  ;;  %vm434_vm15 = vcmask 138240   ;;  %s2247_s23 = smov 120   ;;  %s2248_s1 = smov 124  }
  0x19   :  { %1974 = vmatmul.msk.bf16.vlgmr.msra.gmra.mxu2 %vm116_vm3, %v167_v12  ;;  %v228_v60 = vld [vmem:[%s2923_s15] sm:$0xf]  ;;  %s2249_s24 = smov 122   ;;  %s2250_s25 = smov 114  }
  0x1a   :  { %v2052_v22 = vld [vmem:[%s2944_s2] sm:$0xff]  ;;  %v106_v28 = vld [vmem:[%s2944_s2 + $0x8] sm:$0xf]  ;;  %v2053_v7 = vld [vmem:[%s2944_s2 + $0xc] sm:$0xff]  ;;  %s2251_s26 = smov 118   ;;  %s2252_s27 = smov 116  }
  0x1b   :  { %v113_v30 = vunpack.c.l.b16 %v106_v28  ;;  %v1979_v8 = vld [vmem:[%s2944_s2 + $0x14] sm:$0xf]  ;;  %s2932_s29 = smov 12   ;;  %s2259_s0 = smov 14  }
  0x1c   :  { %v267_v9 = vunpack.c.l.b16 %v1979_v8  ;;  %v1987_v8 = vld [vmem:[%s2919_s11 + $0x2] sm:$0x3] }
  0x1d   :  { %v115_v34 = vpack.c.b16 %v113_v30, %v113_v30 }
  0x1e   :  { %233 = vperm.xlu0 %2076, %v230_v13   ;;  %v269_v10 = vpack.c.b16 %v267_v9, %v267_v9 }
  0x20   :  { %162 = vperm.xlu2 %2077, %v159_v37  }
  0x26   :  { %315 = vperm.xlu0 %2076, %v1986_v14  }
  0x2e   :  { %410 = vperm.xlu0 %2076, %v1994_v15  }
  0x36   :  { %382 = vperm.xlu0 %2076, %v1991_v16  }
  0x72   :  { %v202_v45 = vpop.permute.xlu2 %201 }
  0x7a   :  { %v163_v53 = vpop.permute.xlu2 %162 }
  0x80   :  { %v76_v17 = vpop.permute.xlu0 %75 }
  0x88   :  { %v173_v24 = vpop.permute.xlu0 %172 }
  0x90   :  { %v234_v61 = vpop.permute.xlu0 %233 }
  0x92   :  { %v95_v18 = vpop.f32.mrf.mxu0 }
  0x93   :  { %v2416_v19 = vadd.f32 %v95_v18, %v76_v17 }
  0x95   :  { %v107_v20 = vpack.c.bf16 %v2416_v19, %v2416_v19 }
  0x97   :  { %v125_v21 = vsel %vm123_vm2, %v107_v20, 0 }
  0x98   :  { %134 = vmatpush.bf16.msra.mxu1 %v125_v21 }
  0x9a   :  { %v97_v23 = vpop.f32.mrf.mxu0 }
  0x9b   :  { %1972 = vmatmul.msk.bf16.vlgmr.msra.gmra.mxu1 %vm116_vm3, %v2052_v22  ;;  %v316_v22 = vpop.permute.xlu0 %315 }
  0x9c   :  { %v190_v25 = vpop.f32.mrf.mxu2 }
  0x9d   :  { %v191_v26 = vadd.f32 %v190_v25, %v173_v24 }
  0x9f   :  { %v194_v27 = vmul.f32 %v2386_v5, %v191_v26  ;;  %v2246_v26 = vmov 16.0  }
  0xa0   :  { %2130 = vrcp.f32 %v2246_v26 }
  0xa1   :  { %v195_v29 = vmax.f32 %v194_v27, 0.0 }
  0xa3   :  { %v197_v31 = vpack.c.bf16 %v195_v29, %v195_v29 }
  0xa4   :  { %v192_v32 = vpop.f32.mrf.mxu2 }
  0xa5   :  { %v210_v33 = vsel %vm208_vm4, %v197_v31, 0 }
  0xa6   :  { %219 = vmatpush.bf16.msra.mxu3 %v210_v33  ;;  %v2131_v27 = vpop.eup %2130 }
  0xa7   :  { %v325_v28 = vmul.f32 16.0, %v2131_v27  ;;  %vm329_vm11 = vweird.f32 %v2131_v27 }
  0xa9   :  { %1975 = vmatmul.msk.bf16.vlgmr.msra.gmra.mxu3 %vm204_vm5, %v196_v35  ;;  %v326_v29 = vsub.f32 1.0, %v325_v28 }
  0xaa   :  { %369 = vmatpush.bf16.msrb.mxu3 %v2397_v11 }
  0xab   :  { %1973 = vmatmul.msk.bf16.gmra.mxu1 %vm116_vm3, %v115_v34  ;;  %v327_v30 = vmul.f32 %v2131_v27, %v326_v29 }
  0xad   :  { %v328_v31 = vadd.f32 %v2131_v27, %v327_v30 }
  0xaf   :  { %v2473_v32 = vsel %vm329_vm11, %v2131_v27, %v328_v31  ;;  %vm884_vm11 = vcmask 25600  }
  0xb9   :  { %1989 = vmatmul.msk.bf16.vlgmr.msrb.gmra.mxu3 %vm116_vm3, %v1987_v8 }
 0x118   :  { %v136_v38 = vpop.f32.mrf.mxu1 }
 0x119   :  { %146 = vrot.lane.b32.xlu1 %v136_v38, %s2242_s30 }
 0x120   :  { %v138_v39 = vpop.f32.mrf.mxu1 }
 0x128   :  { %v141_v40 = vpop.f32.mrf.mxu1 }
 0x129   :  { %153 = vrot.lane.b32.xlu1 %v141_v40, %s2243_s5 }
 0x12c   :  { %v221_v42 = vpop.f32.mrf.mxu3 }
 0x12d   :  { %v222_v47 = vadd.f32 %v221_v42, %v202_v45 }
 0x12f   :  { %v225_v51 = vmul.f32 %v2386_v5, %v222_v47 }
 0x130   :  { %v143_v41 = vpop.f32.mrf.mxu1 }
 0x131   :  { %v226_v55 = vmul.f32 0.049787067, %v225_v51  ;;  %v1990_v51 = vld [vmem:[%s2915_s7 + $0x2] sm:$0x3] }
 0x134   :  { %v223_v43 = vpop.f32.mrf.mxu3 }
 0x18b   :  { %v147_v44 = vpop.permute.xlu1 %146 }
 0x18c   :  { %v150_v46 = vsel %vm149_vm6, 0.0, %v147_v44 }
 0x18d   :  { %v151_v48 = vadd.f32 %v150_v46, %v138_v39 }
 0x19b   :  { %v154_v49 = vpop.permute.xlu1 %153 }
 0x19c   :  { %v157_v50 = vsel %vm156_vm7, %v154_v49, 0.0 }
 0x19d   :  { %v158_v52 = vadd.f32 %v157_v50, %v151_v48 }
 0x19f   :  { %v165_v54 = vadd.f32 %v163_v53, %v158_v52  ;;  %v1993_v52 = vld [vmem:[%s2917_s9 + $0x2] sm:$0x3]  ;;  %v411_v53 = vpop.permute.xlu0 %410 }
 0x1a1   :  { %v166_v56 = vmax.f32 %v165_v54, 0.0 }
 0x1a3   :  { %v227_v57 = vadd.f32 %v226_v55, %v166_v56 }
 0x1a5   :  { %v229_v58 = vpack.c.bf16 %v227_v57, %v227_v57 }
 0x1a7   :  { %v240_v59 = vsel %vm123_vm2, %v229_v58, 0 }
 0x1a8   :  { %249 = vmatpush.bf16.msrb.mxu0 %v240_v59  ;;  %v383_v59 = vpop.permute.xlu0 %382 }
 0x1ab   :  { %1976 = vmatmul.msk.bf16.vlgmr.msrb.gmra.mxu0 %vm116_vm3, %v228_v60 }
 0x228   :  { %v251_v62 = vpop.f32.mrf.mxu0 }
 0x229   :  { %v252_v63 = vadd.f32 %v251_v62, %v234_v61 }
 0x22b   :  { %v255_v0 = vadd.f32 %v252_v63, %v2416_v19 }
 0x22d   :  { %v2452_v1 = vmul.f32 %v2386_v5, %v255_v0 }
 0x22f   :  { %v261_v3 = vpack.c.bf16 %v2452_v1, %v2452_v1 }
 0x230   :  { %v253_v4 = vpop.f32.mrf.mxu0 }
 0x231   :  { %v277_v6 = vsel %vm123_vm2, %v261_v3, 0 }
 0x232   :  { %286 = vmatpush.bf16.msrb.mxu2 %v277_v6 }
 0x235   :  { %1984 = vmatmul.msk.bf16.vlgmr.msrb.gmra.mxu2 %vm116_vm3, %v2053_v7 }
 0x245   :  { %1985 = vmatmul.msk.bf16.gmra.mxu2 %vm116_vm3, %v269_v10 }
 0x2b8   :  { %v288_v12 = vpop.f32.mrf.mxu2 }
 0x2b9   :  { %298 = vrot.lane.b32.xlu1 %v288_v12, %s2244_s3 }
 0x2c0   :  { %v290_v13 = vpop.f32.mrf.mxu2 }
 0x2c8   :  { %v293_v14 = vpop.f32.mrf.mxu2 }
 0x2c9   :  { %305 = vrot.lane.b32.xlu2 %v293_v14, %s2245_s28 }
 0x2d0   :  { %v295_v15 = vpop.f32.mrf.mxu2 }
 0x323   :  { %v306_v16 = vpop.permute.xlu2 %305 }
 0x324   :  { %v309_v19 = vsel %vm308_vm9, %v306_v16, 0.0 }
 0x32b   :  { %v299_v17 = vpop.permute.xlu1 %298 }
 0x32c   :  { %v302_v18 = vsel %vm301_vm8, 0.0, %v299_v17 }
 0x32d   :  { %v303_v20 = vadd.f32 %v302_v18, %v290_v13 }
 0x32f   :  { %v310_v21 = vadd.f32 %v309_v19, %v303_v20 }
 0x331   :  { %v318_v23 = vadd.f32 %v316_v22, %v310_v21 }
 0x333   :  { %v2469_v24 = vmax.f32 %v318_v23, 0.0 }
 0x335   :  { %v321_v25 = vsel %vm320_vm10, %v2469_v24, 0.0 }
 0x336   :  { %322 = vadd.xlane.f32.xlu1 %v321_v25 }
 0x3a9   :  { %v323_v33 = vpop.xlane.xlu1 %322 }
 0x3aa   :  { %v331_v34 = vmul.f32 %v2473_v32, %v323_v33 }
 0x3ac   :  { %v332_v35 = vsub.f32 %v2469_v24, %v331_v34 }
 0x3ae   :  { %v333_v36 = vmul.f32 %v332_v35, %v332_v35 }
 0x3b0   :  { %v334_v37 = vsel %vm320_vm10, %v333_v36, 0.0 }
 0x3b1   :  { %335 = vadd.xlane.f32.xlu2 %v334_v37 }
 0x424   :  { %v336_v38 = vpop.xlane.xlu2 %335 }
 0x425   :  { %v337_v39 = vmul.f32 %v336_v38, %v2473_v32 }
 0x427   :  { %v338_v40 = vadd.f32 1e-05, %v337_v39 }
 0x429   :  { %2132 = vrsqrt.f32 %v338_v40  ;;  %vm345_vm13 = vweird.f32 %v338_v40 }
 0x42f   :  { %v2133_v41 = vpop.eup %2132 }
 0x430   :  { %v340_v42 = vmul.f32 %v2133_v41, %v338_v40  ;;  %vm346_vm12 = vweird.f32 %v2133_v41 }
 0x431   :  { %vm347_vm14 = vmor %vm345_vm13, %vm346_vm12 }
 0x432   :  { %v341_v43 = vmul.f32 %v2133_v41, %v340_v42 }
 0x434   :  { %v342_v44 = vmul.f32 0.5, %v341_v43 }
 0x436   :  { %v343_v45 = vsub.f32 1.5, %v342_v44 }
 0x438   :  { %v344_v46 = vmul.f32 %v2133_v41, %v343_v45 }
 0x43a   :  { %v348_v47 = vsel %vm347_vm14, %v2133_v41, %v344_v46 }
 0x43b   :  { %v349_v48 = vmul.f32 %v348_v47, %v332_v35 }
 0x43d   :  { %v377_v49 = vpack.c.bf16 %v349_v48, %v349_v48 }
 0x43f   :  { %v389_v50 = vsel %vm123_vm2, %v377_v49, 0 }
 0x440   :  { %398 = vmatpush.bf16.msra.mxu0 %v389_v50  ;;  %423 = vmatpush.bf16.msrb.mxu1 %v389_v50 }
 0x443   :  { %1992 = vmatmul.msk.bf16.vlgmr.msra.gmra.mxu0 %vm116_vm3, %v1990_v51  ;;  %1995 = vmatmul.msk.bf16.vlgmr.msrb.gmra.mxu1 %vm116_vm3, %v1993_v52 }
 0x4c0   :  { %v400_v54 = vpop.f32.mrf.mxu0  ;;  %v425_v55 = vpop.f32.mrf.mxu1 }
 0x4c1   :  { %v426_v56 = vadd.f32 %v425_v55, %v411_v53  ;;  %v401_v61 = vadd.f32 %v400_v54, %v383_v59 }
 0x4c3   :  { %430 = vrot.lane.b32.xlu0 %v426_v56, %s2242_s30  ;;  %v548_v22 = vpack.c.bf16 %v401_v61, %v401_v61 }
 0x4c8   :  { %v427_v57 = vpop.f32.mrf.mxu1  ;;  %v402_v58 = vpop.f32.mrf.mxu0 }
 0x4cb   :  { %442 = vrot.lane.b32.xlu0 %v2386_v5, %s2242_s30 }
 0x535   :  { %v431_v60 = vpop.permute.xlu0 %430 }
 0x536   :  { %v433_v62 = vsel %vm149_vm6, 0.0, %v431_v60 }
 0x537   :  { %v435_v63 = vsel %vm434_vm15, %v433_v62, 0.0  ;;  %v2538_v62 = vpop.f32.mrf.mxu3 }
 0x538   :  { %v2093_v0 = vpack.i.bf16 %v435_v63, %v401_v61  ;;  %v556_v3 = vpack.c.bf16 %v435_v63, %v435_v63  ;;  %v1988_v61 = vld [vmem:[%s2920_s12 + $0x4] sm:$0xf] }
 0x53a   :  { %2094 = vrot.lane.b32.xlu1 %v2093_v0, %s2247_s23  ;;  %2089 = vrot.lane.b32.xlu2 %v2093_v0, %s2248_s1  ;;  %v584_v4 = vsel %vm208_vm4, %v556_v3, 0 }
 0x53b   :  { %2079 = vrot.lane.b32.xlu0 %v2093_v0, %s2249_s24  ;;  %593 = vmatpush.bf16.msra.mxu3 %v584_v4 }
 0x53d   :  { %v443_v5 = vpop.permute.xlu0 %442 }
 0x53e   :  { %v445_v6 = vsel %vm149_vm6, 0.0, %v443_v5  ;;  %v2253_v5 = vmov -13.815511  }
 0x53f   :  { %v2499_v7 = vsel %vm434_vm15, %v445_v6, 0.0  ;;  %v373_v63 = vpop.f32.mrf.mxu3 }
 0x542   :  { %514 = vrot.lane.b32.xlu1 %v2499_v7, %s2245_s28 }
 0x543   :  { %2084 = vrot.lane.b32.xlu0 %v2093_v0, %s2245_s28 }
 0x54b   :  { %2099 = vrot.lane.b32.xlu0 %v2093_v0, %s2250_s25 }
 0x553   :  { %2104 = vrot.lane.b32.xlu0 %v2093_v0, %s2251_s26 }
 0x55b   :  { %2109 = vrot.lane.b32.xlu0 %v2093_v0, %s2252_s27  ;;  %v535_v0 = vlaneseq }
 0x55d   :  { %v2542_v3 = vand.u32 127, %v535_v0 }
 0x55f   :  { %vm537_vm0 = vcmp.lt.s32.totalorder %v2542_v3, 3 }
 0x560   :  { %v2548_v4 = vsel %vm537_vm0, %v2499_v7, 0.0 }
 0x561   :  { %vm852_vm7 = vcmp.gt.f32.partialorder %v2548_v4, 0.0 }
 0x562   :  { %v860_v6 = vsel %vm852_vm7, 9.999995e-07, %v2253_v5 }
 0x594   :  { %v2090_v9 = vpop.permute.xlu2 %2089 }
 0x595   :  { %v2092_v10 = vunpack.i.h.bf16 %v2090_v9  ;;  %v2091_v26 = vunpack.i.l.bf16 %v2090_v9 }
 0x597   :  { %v558_v12 = vpack.c.bf16 %v2092_v10, %v2092_v10  ;;  %v550_v30 = vpack.c.bf16 %v2091_v26, %v2091_v26  ;;  %v868_v10 = vperm.slane %v860_v6, 0 }
 0x599   :  { %v654_v13 = vsel %vm208_vm4, %v558_v12, 0 }
 0x59a   :  { %663 = vmatpush.bf16.msra.mxu1 %v654_v13 }
 0x5ac   :  { %v2095_v14 = vpop.permute.xlu1 %2094 }
 0x5ad   :  { %v2097_v15 = vunpack.i.h.bf16 %v2095_v14  ;;  %v2080_v16 = vpop.permute.xlu0 %2079  ;;  %v2096_v35 = vunpack.i.l.bf16 %v2095_v14 }
 0x5ae   :  { %v2082_v17 = vunpack.i.h.bf16 %v2080_v16  ;;  %v2081_v18 = vunpack.i.l.bf16 %v2080_v16 }
 0x5af   :  { %v560_v19 = vpack.c.bf16 %v2097_v15, %v2097_v15  ;;  %v552_v39 = vpack.c.bf16 %v2096_v35, %v2096_v35 }
 0x5b0   :  { %v559_v20 = vpack.c.bf16 %v2082_v17, %v2082_v17  ;;  %v551_v21 = vpack.c.bf16 %v2081_v18, %v2081_v18 }
 0x5b1   :  { %v724_v23 = vsel %vm208_vm4, %v560_v19, 0 }
 0x5b2   :  { %2113 = vxpose.binary.xlu2.c.b16.start.end [1/2] (short) (narrow) %v551_v21, %v548_v22, 16  ;;  %v689_v25 = vsel %vm208_vm4, %v559_v20, 0 }
 0x5b3   :  { %698 = vmatpush.bf16.msra.mxu2 %v689_v25  ;;  %733 = vmatpush.bf16.msrb.mxu3 %v724_v23 }
 0x5b4   :  { %v515_v56 = vpop.permute.xlu1 %514 }
 0x5b5   :  { %v2085_v27 = vpop.permute.xlu0 %2084  ;;  %v2556_v14 = vsel %vm537_vm0, %v515_v56, 0.0 }
 0x5b6   :  { %v2087_v28 = vunpack.i.h.bf16 %v2085_v27  ;;  %v2086_v29 = vunpack.i.l.bf16 %v2085_v27  ;;  %vm853_vm12 = vcmp.gt.f32.partialorder %v2556_v14, 0.0 }
 0x5b7   :  { %v861_v18 = vsel %vm853_vm12, 9.999995e-07, %v2253_v5 }
 0x5b8   :  { %v557_v31 = vpack.c.bf16 %v2087_v28, %v2087_v28  ;;  %v549_v33 = vpack.c.bf16 %v2086_v29, %v2086_v29  ;;  %v869_v22 = vperm.slane %v861_v18, 0 }
 0x5ba   :  { %2116 = vxpose.binary.xlu1.c.b16.start.end [1/2] (short) (narrow) %v550_v30, %v549_v33, 16  ;;  %v619_v34 = vsel %vm208_vm4, %v557_v31, 0 }
 0x5bb   :  { %628 = vmatpush.bf16.msrb.mxu0 %v619_v34 }
 0x5bd   :  { %v2100_v36 = vpop.permute.xlu0 %2099 }
 0x5be   :  { %v2102_v37 = vunpack.i.h.bf16 %v2100_v36  ;;  %v2101_v38 = vunpack.i.l.bf16 %v2100_v36 }
 0x5c0   :  { %v563_v40 = vpack.c.bf16 %v2102_v37, %v2102_v37  ;;  %v555_v41 = vpack.c.bf16 %v2101_v38, %v2101_v38 }
 0x5c2   :  { %2119 = vxpose.binary.xlu0.c.b16.start.end [1/2] (short) (narrow) %v555_v41, %v552_v39, 16  ;;  %v829_v42 = vsel %vm208_vm4, %v563_v40, 0 }
 0x5c3   :  { %838 = vmatpush.bf16.msrb.mxu2 %v829_v42 }
 0x5c5   :  { %v2105_v43 = vpop.permute.xlu0 %2104 }
 0x5c6   :  { %v2107_v44 = vunpack.i.h.bf16 %v2105_v43  ;;  %v2106_v51 = vunpack.i.l.bf16 %v2105_v43 }
 0x5c8   :  { %v561_v45 = vpack.c.bf16 %v2107_v44, %v2107_v44  ;;  %v553_v53 = vpack.c.bf16 %v2106_v51, %v2106_v51 }
 0x5ca   :  { %v759_v46 = vsel %vm208_vm4, %v561_v45, 0 }
 0x5cb   :  { %768 = vmatpush.bf16.msra.mxu0 %v759_v46 }
 0x5cd   :  { %v2110_v47 = vpop.permute.xlu0 %2109 }
 0x5ce   :  { %v2112_v48 = vunpack.i.h.bf16 %v2110_v47  ;;  %v2111_v52 = vunpack.i.l.bf16 %v2110_v47 }
 0x5d0   :  { %v562_v49 = vpack.c.bf16 %v2112_v48, %v2112_v48  ;;  %v554_v54 = vpack.c.bf16 %v2111_v52, %v2111_v52 }
 0x5d2   :  { %v794_v50 = vsel %vm208_vm4, %v562_v49, 0 }
 0x5d3   :  { %803 = vmatpush.bf16.msrb.mxu1 %v794_v50 }
 0x60d   :  { %2125 = vset.pattern.permute.xlu1 %v2241_v2 }
 0x614   :  { %517 = vrot.lane.b32.xlu1 %v2499_v7, %s2248_s1 }
 0x61b   :  { %520 = vrot.lane.b32.xlu2 %v2499_v7, %s2249_s24 }
 0x61c   :  { %532 = vrot.lane.b32.xlu1 %v2499_v7, %s2250_s25 }
 0x624   :  { %356 = vperm.xlu1 %2125, %v1988_v61  }
 0x630   :  { %523 = vrot.lane.b32.xlu0 %v2499_v7, %s2247_s23 }
 0x638   :  { %526 = vrot.lane.b32.xlu0 %v2499_v7, %s2251_s26 }
 0x641   :  { %2122 = vxpose.binary.xlu2.c.b16.start.end [1/2] (short) (narrow) %v554_v54, %v553_v53, 16 }
 0x653   :  { %v2114_v2 = vpop.trf.xlu2 }
 0x654   :  { %1996 = vmatmul.msk.bf16.vlgmr.msra.gmra.mxu3 %vm204_vm5, %v2114_v2 }
 0x65b   :  { %v2115_v55 = vpop.trf.xlu2 }
 0x65c   :  { %1999 = vmatmul.msk.bf16.vlgmr.msra.gmra.mxu2 %vm204_vm5, %v2115_v55 }
 0x666   :  { %v2117_v57 = vpop.trf.xlu1 }
 0x667   :  { %1997 = vmatmul.msk.bf16.vlgmr.msrb.gmra.mxu0 %vm204_vm5, %v2117_v57 }
 0x66e   :  { %v2120_v58 = vpop.trf.xlu0  ;;  %v2118_v59 = vpop.trf.xlu1 }
 0x66f   :  { %1998 = vmatmul.msk.bf16.vlgmr.msra.gmra.mxu1 %vm204_vm5, %v2118_v59  ;;  %2000 = vmatmul.msk.bf16.vlgmr.msrb.gmra.mxu3 %vm204_vm5, %v2120_v58 }
 0x675   :  { %v521_v12 = vpop.permute.xlu2 %520 }
 0x676   :  { %v2121_v60 = vpop.trf.xlu0  ;;  %v2574_v29 = vsel %vm537_vm0, %v521_v12, 0.0 }
 0x677   :  { %2003 = vmatmul.msk.bf16.vlgmr.msrb.gmra.mxu2 %vm204_vm5, %v2121_v60  ;;  %vm855_vm14 = vcmp.gt.f32.partialorder %v2574_v29, 0.0 }
 0x678   :  { %v863_v40 = vsel %vm855_vm14, 9.999995e-07, %v2253_v5 }
 0x679   :  { %v871_v46 = vperm.slane %v863_v40, 0 }
 0x686   :  { %v518_v17 = vpop.permute.xlu1 %517 }
 0x687   :  { %v2565_v20 = vsel %vm537_vm0, %v518_v17, 0.0 }
 0x688   :  { %vm854_vm13 = vcmp.gt.f32.partialorder %v2565_v20, 0.0 }
 0x689   :  { %v862_v30 = vsel %vm854_vm13, 9.999995e-07, %v2253_v5 }
 0x68a   :  { %v870_v36 = vperm.slane %v862_v30, 0 }
 0x68e   :  { %v533_v38 = vpop.permute.xlu1 %532 }
 0x68f   :  { %v2589_v44 = vsel %vm537_vm0, %v533_v38, 0.0 }
 0x690   :  { %vm859_vm12 = vcmp.gt.f32.partialorder %v2589_v44, 0.0 }
 0x691   :  { %v867_v53 = vsel %vm859_vm12, 9.999995e-07, %v2253_v5 }
 0x692   :  { %v875_v56 = vperm.slane %v867_v53, 0 }
 0x696   :  { %v357_v61 = vpop.permute.xlu1 %356 }
 0x697   :  { %v372_v63 = vadd.f32 %v2538_v62, %v357_v61 }
 0x6a2   :  { %v524_v25 = vpop.permute.xlu0 %523 }
 0x6a3   :  { %v2579_v31 = vsel %vm537_vm0, %v524_v25, 0.0 }
 0x6a4   :  { %vm856_vm7 = vcmp.gt.f32.partialorder %v2579_v31, 0.0 }
 0x6a5   :  { %v864_v41 = vsel %vm856_vm7, 9.999995e-07, %v2253_v5  ;;  %vm1485_vm7 = vcmp.lt.s32.totalorder %v2542_v3, 7 }
 0x6a6   :  { %v872_v47 = vperm.slane %v864_v41, 0 }
 0x6aa   :  { %529 = vrot.lane.b32.xlu2 %v2499_v7, %s2252_s27  ;;  %v527_v0 = vpop.permute.xlu0 %526 }
 0x6ab   :  { %v2603_v6 = vsel %vm537_vm0, %v527_v0, 0.0 }
 0x6ac   :  { %vm857_vm13 = vcmp.gt.f32.partialorder %v2603_v6, 0.0 }
 0x6ad   :  { %v865_v12 = vsel %vm857_vm13, 9.999995e-07, %v2253_v5  ;;  %vm1660_vm13 = vcmask 60416  }
 0x6ae   :  { %v873_v17 = vperm.slane %v865_v12, 0 }
 0x6d7   :  { %v595_v8 = vpop.f32.mrf.mxu3 }
 0x6d8   :  { %v844_v9 = vmul.f32 0.5, %v595_v8 }
 0x6da   :  { %v2552_v13 = vadd.f32 %v868_v10, %v844_v9 }
 0x6dc   :  { %v885_v7 = vsel %vm884_vm11, %v2552_v13, -inf }
 0x6dd   :  { %886 = vmax.xlane.f32.xlu0 %v885_v7 }
 0x6df   :  { %v700_v15 = vpop.f32.mrf.mxu2  ;;  %v597_v16 = vpop.f32.mrf.mxu3 }
 0x6e0   :  { %v847_v42 = vmul.f32 0.5, %v700_v15 }
 0x6e2   :  { %v2123_v19 = vpop.trf.xlu2  ;;  %v879_v51 = vadd.f32 %v871_v46, %v847_v42 }
 0x6e3   :  { %2001 = vmatmul.msk.bf16.vlgmr.msra.gmra.mxu0 %vm204_vm5, %v2123_v19 }
 0x6e4   :  { %v630_v21 = vpop.f32.mrf.mxu0  ;;  %v894_v54 = vsel %vm884_vm11, %v879_v51, -inf }
 0x6e5   :  { %v845_v23 = vmul.f32 0.5, %v630_v21 }
 0x6e7   :  { %v2568_v26 = vadd.f32 %v869_v22, %v845_v23  ;;  %v702_v27 = vpop.f32.mrf.mxu2 }
 0x6e9   :  { %v888_v28 = vsel %vm884_vm11, %v2568_v26, -inf }
 0x6ea   :  { %889 = vmax.xlane.f32.xlu1 %v888_v28  ;;  %v2124_v33 = vpop.trf.xlu2 }
 0x6eb   :  { %2002 = vmatmul.msk.bf16.vlgmr.msrb.gmra.mxu1 %vm204_vm5, %v2124_v33 }
 0x6ec   :  { %v665_v34 = vpop.f32.mrf.mxu1  ;;  %v632_v35 = vpop.f32.mrf.mxu0 }
 0x6ed   :  { %v846_v37 = vmul.f32 0.5, %v665_v34 }
 0x6ef   :  { %v878_v39 = vadd.f32 %v870_v36, %v846_v37 }
 0x6f1   :  { %v891_v43 = vsel %vm884_vm11, %v878_v39, -inf }
 0x6f2   :  { %892 = vmax.xlane.f32.xlu2 %v891_v43  ;;  %v735_v45 = vpop.f32.mrf.mxu3 }
 0x6f3   :  { %v848_v48 = vmul.f32 0.5, %v735_v45 }
 0x6f4   :  { %v667_v49 = vpop.f32.mrf.mxu1 }
 0x6f5   :  { %v880_v50 = vadd.f32 %v872_v47, %v848_v48 }
 0x6f7   :  { %v897_v52 = vsel %vm884_vm11, %v880_v50, -inf }
 0x6f8   :  { %898 = vmax.xlane.f32.xlu0 %v897_v52 }
 0x6fa   :  { %895 = vmax.xlane.f32.xlu2 %v894_v54  ;;  %v840_v2 = vpop.f32.mrf.mxu2  ;;  %v737_v55 = vpop.f32.mrf.mxu3 }
 0x6fb   :  { %v851_v57 = vmul.f32 0.5, %v840_v2 }
 0x6fd   :  { %v2595_v58 = vadd.f32 %v875_v56, %v851_v57 }
 0x6ff   :  { %v906_v59 = vsel %vm884_vm11, %v2595_v58, -inf }
 0x700   :  { %907 = vmax.xlane.f32.xlu1 %v906_v59 }
 0x702   :  { %v842_v60 = vpop.f32.mrf.mxu2 }
 0x704   :  { %v530_v10 = vpop.permute.xlu2 %529 }
 0x705   :  { %v2610_v7 = vsel %vm537_vm0, %v530_v10, 0.0 }
 0x706   :  { %vm858_vm14 = vcmp.gt.f32.partialorder %v2610_v7, 0.0 }
 0x707   :  { %v866_v23 = vsel %vm858_vm14, 9.999995e-07, %v2253_v5 }
 0x708   :  { %v874_v34 = vperm.slane %v866_v23, 0 }
 0x719   :  { %437 = vrot.lane.b32.xlu1 %v372_v63, %s2242_s30  ;;  %s2254_s30 = smov 6  }
 0x750   :  { %v887_v8 = vpop.xlane.xlu0 %886 }
 0x751   :  { %v909_v9 = vsub.f32 %v2552_v13, %v887_v8 }
 0x753   :  { %v917_v62 = vmul.f32 1.442695, %v909_v9 }
 0x755   :  { %2134 = vpow2.f32 %v917_v62 }
 0x75b   :  { %v2135_v36 = vpop.eup %2134 }
 0x75c   :  { %v933_v42 = vsel %vm884_vm11, %v2135_v36, 0.0 }
 0x75d   :  { %v890_v15 = vpop.xlane.xlu1 %889 }
 0x75e   :  { %v910_v19 = vsub.f32 %v2568_v26, %v890_v15 }
 0x760   :  { %v770_v16 = vpop.f32.mrf.mxu0  ;;  %v919_v27 = vmul.f32 1.442695, %v910_v19 }
 0x761   :  { %v849_v18 = vmul.f32 0.5, %v770_v16 }
 0x762   :  { %2136 = vpow2.f32 %v919_v27 }
 0x763   :  { %v881_v21 = vadd.f32 %v873_v17, %v849_v18  ;;  %v973_v17 = vperm.slane %v2548_v4, 0  ;;  %v975_v4 = vperm.slane %v2565_v20, 0 }
 0x765   :  { %v893_v22 = vpop.xlane.xlu2 %892  ;;  %v900_v13 = vsel %vm884_vm11, %v881_v21, -inf }
 0x766   :  { %v911_v25 = vsub.f32 %v878_v39, %v893_v22  ;;  %901 = vmax.xlane.f32.xlu2 %v900_v13 }
 0x768   :  { %v921_v28 = vmul.f32 1.442695, %v911_v25  ;;  %v805_v30 = vpop.f32.mrf.mxu1  ;;  %v772_v33 = vpop.f32.mrf.mxu0 }
 0x769   :  { %v850_v35 = vmul.f32 0.5, %v805_v30  ;;  %v2137_v47 = vpop.eup %2136 }
 0x76a   :  { %2138 = vpow2.f32 %v921_v28  ;;  %v936_v52 = vsel %vm884_vm11, %v2137_v47, 0.0 }
 0x76b   :  { %v899_v37 = vpop.xlane.xlu0 %898  ;;  %v882_v38 = vadd.f32 %v874_v34, %v850_v35 }
 0x76c   :  { %v913_v26 = vsub.f32 %v880_v50, %v899_v37 }
 0x76d   :  { %v896_v40 = vpop.xlane.xlu2 %895  ;;  %v903_v41 = vsel %vm884_vm11, %v882_v38, -inf }
 0x76e   :  { %v912_v43 = vsub.f32 %v879_v51, %v896_v40  ;;  %904 = vmax.xlane.f32.xlu0 %v903_v41  ;;  %934 = vadd.xlane.f32.xlu2 %v933_v42  ;;  %v925_v39 = vmul.f32 1.442695, %v913_v26 }
 0x770   :  { %v923_v45 = vmul.f32 1.442695, %v912_v43  ;;  %v807_v46 = vpop.f32.mrf.mxu1  ;;  %v2139_v48 = vpop.eup %2138  ;;  %2140 = vpow2.f32 %v925_v39 }
 0x771   :  { %v939_v49 = vsel %vm884_vm11, %v2139_v48, 0.0  ;;  %v976_v46 = vperm.slane %v2574_v29, 0 }
 0x772   :  { %2142 = vpow2.f32 %v923_v45 }
 0x773   :  { %v908_v2 = vpop.xlane.xlu1 %907 }
 0x774   :  { %v916_v10 = vsub.f32 %v2595_v58, %v908_v2 }
 0x776   :  { %940 = vadd.xlane.f32.xlu0 %v939_v49  ;;  %937 = vadd.xlane.f32.xlu2 %v936_v52  ;;  %v2620_v50 = vpop.eup %2140  ;;  %v931_v16 = vmul.f32 1.442695, %v916_v10 }
 0x777   :  { %v945_v51 = vsel %vm884_vm11, %v2620_v50, 0.0 }
 0x778   :  { %v2622_v53 = vpop.eup %2142 }
 0x779   :  { %v942_v54 = vsel %vm884_vm11, %v2622_v53, 0.0 }
 0x77e   :  { %946 = vadd.xlane.f32.xlu2 %v945_v51  ;;  %943 = vadd.xlane.f32.xlu0 %v942_v54 }
 0x78b   :  { %v438_v55 = vpop.permute.xlu1 %437 }
 0x78c   :  { %v440_v56 = vsel %vm149_vm6, 0.0, %v438_v55  ;;  %vm1197_vm6 = vcmask 80896  }
 0x78d   :  { %v2630_v57 = vsel %vm434_vm15, %v440_v56, 0.0  ;;  %vm1199_vm15 = vcmask 97280  }
 0x78e   :  { %498 = vrot.lane.b32.xlu1 %v2630_v57, %s2249_s24  ;;  %v989_v41 = vpack.c.bf16 %v2630_v57, %v2630_v57  ;;  %s2256_s24 = smov 10  }
 0x796   :  { %492 = vrot.lane.b32.xlu1 %v2630_v57, %s2245_s28  ;;  %s2255_s28 = smov 4  }
 0x79e   :  { %510 = vrot.lane.b32.xlu1 %v2630_v57, %s2250_s25  ;;  %s2260_s25 = smov [#allocation2]  }
 0x7a6   :  { %504 = vrot.lane.b32.xlu1 %v2630_v57, %s2251_s26  ;;  %s1938_s26 = sshll.u32 %s2260_s25, 4  ;;  %s1939_s26 = int_to_ptr.vmem [resolvable:$true] %s1938_s26 }
 0x7ae   :  { %507 = vrot.lane.b32.xlu1 %v2630_v57, %s2252_s27 }
 0x7d9   :  { %v902_v59 = vpop.xlane.xlu2 %901 }
 0x7da   :  { %v914_v60 = vsub.f32 %v881_v21, %v902_v59 }
 0x7dc   :  { %v927_v61 = vmul.f32 1.442695, %v914_v60 }
 0x7de   :  { %2144 = vpow2.f32 %v927_v61 }
 0x7e1   :  { %v905_v63 = vpop.xlane.xlu0 %904  ;;  %v935_v0 = vpop.xlane.xlu2 %934 }
 0x7e2   :  { %v915_v8 = vsub.f32 %v882_v38, %v905_v63  ;;  %2146 = vrcp.f32 %v935_v0  ;;  %v978_v63 = vperm.slane %v2603_v6, 0 }
 0x7e4   :  { %v2642_v9 = vpop.eup %2144  ;;  %v929_v12 = vmul.f32 1.442695, %v915_v8 }
 0x7e5   :  { %v948_v62 = vsel %vm884_vm11, %v2642_v9, 0.0 }
 0x7e6   :  { %2148 = vpow2.f32 %v929_v12  ;;  %949 = vadd.xlane.f32.xlu2 %v948_v62 }
 0x7e8   :  { %v2147_v15 = vpop.eup %2146 }
 0x7e9   :  { %v965_v18 = vmul.f32 %v2147_v15, %v2135_v36  ;;  %v941_v19 = vpop.xlane.xlu0 %940  ;;  %v938_v21 = vpop.xlane.xlu2 %937  ;;  %v974_v36 = vperm.slane %v2556_v14, 0 }
 0x7ea   :  { %2150 = vrcp.f32 %v941_v19 }
 0x7eb   :  { %2152 = vrcp.f32 %v938_v21  ;;  %v981_v22 = vmul.f32 %v973_v17, %v965_v18  ;;  %v979_v18 = vperm.slane %v2610_v7, 0 }
 0x7ec   :  { %v2648_v13 = vpop.eup %2148  ;;  %2154 = vpow2.f32 %v931_v16 }
 0x7ed   :  { %v951_v58 = vsel %vm884_vm11, %v2648_v13, 0.0  ;;  %v997_v23 = vpack.c.bf16 %v981_v22, %v981_v22 }
 0x7ee   :  { %952 = vadd.xlane.f32.xlu0 %v951_v58 }
 0x7ef   :  { %v1009_v25 = vsel %vm204_vm5, %v997_v23, 0 }
 0x7f0   :  { %v2151_v27 = vpop.eup %2150  ;;  %1018 = vmatpush.bf16.xpose.msra.mxu3 %v1009_v25  ;;  %v980_v25 = vperm.slane %v2589_v44, 0 }
 0x7f1   :  { %v2153_v28 = vpop.eup %2152  ;;  %v967_v30 = vmul.f32 %v2151_v27, %v2139_v48  ;;  %v944_v33 = vpop.xlane.xlu0 %943  ;;  %v977_v48 = vperm.slane %v2579_v31, 0 }
 0x7f2   :  { %v947_v34 = vpop.xlane.xlu2 %946  ;;  %v2654_v35 = vpop.eup %2154  ;;  %v966_v37 = vmul.f32 %v2153_v28, %v2137_v47  ;;  %2156 = vrcp.f32 %v944_v33 }
 0x7f3   :  { %2158 = vrcp.f32 %v947_v34  ;;  %v983_v38 = vmul.f32 %v975_v4, %v967_v30  ;;  %v954_v40 = vsel %vm884_vm11, %v2654_v35, 0.0  ;;  %vm1432_vm11 = vcmask 146432  }
 0x7f4   :  { %v982_v26 = vmul.f32 %v974_v36, %v966_v37 }
 0x7f5   :  { %v999_v42 = vpack.c.bf16 %v983_v38, %v983_v38 }
 0x7f6   :  { %955 = vadd.xlane.f32.xlu0 %v954_v40  ;;  %v998_v20 = vpack.c.bf16 %v982_v26, %v982_v26 }
 0x7f7   :  { %2004 = vmatmul.msk.bf16.vlgmr.msra.gmra.mxu3 %vm204_vm5, %v989_v41  ;;  %v1047_v43 = vsel %vm204_vm5, %v999_v42, 0 }
 0x7f8   :  { %v2157_v39 = vpop.eup %2156  ;;  %v1028_v14 = vsel %vm204_vm5, %v998_v20, 0  ;;  %1056 = vmatpush.bf16.xpose.msra.mxu1 %v1047_v43 }
 0x7f9   :  { %v2159_v45 = vpop.eup %2158  ;;  %v968_v47 = vmul.f32 %v2157_v39, %v2622_v53  ;;  %1037 = vmatpush.bf16.xpose.msrb.mxu0 %v1028_v14 }
 0x7fa   :  { %v969_v49 = vmul.f32 %v2159_v45, %v2620_v50 }
 0x7fb   :  { %v984_v52 = vmul.f32 %v976_v46, %v968_v47  ;;  %v2013_v47 = vld [vmem:[%s2922_s14 + $0x8] sm:$0xff] }
 0x7fc   :  { %v985_v51 = vmul.f32 %v977_v48, %v969_v49 }
 0x7fd   :  { %v1000_v54 = vpack.c.bf16 %v984_v52, %v984_v52  ;;  %v2016_v52 = vld [vmem:[%s2924_s16 + $0x8] sm:$0xff] }
 0x7fe   :  { %495 = vrot.lane.b32.xlu2 %v2630_v57, %s2248_s1  ;;  %v1001_v2 = vpack.c.bf16 %v985_v51, %v985_v51 }
 0x7ff   :  { %v1066_v55 = vsel %vm204_vm5, %v1000_v54, 0 }
 0x800   :  { %1075 = vmatpush.bf16.xpose.msra.mxu2 %v1066_v55  ;;  %v1085_v56 = vsel %vm204_vm5, %v1001_v2, 0  ;;  %v499_v29 = vpop.permute.xlu1 %498  ;;  %v2027_v55 = vld [vmem:[%s2914_s6 + $0x10] sm:$0xff]  ;;  %s1951_s6 = sshll.u32 %s2929_s21, 4  ;;  %s1952_s6 = int_to_ptr.hbm [resolvable:$true] %s1951_s6 }
 0x801   :  { %1094 = vmatpush.bf16.xpose.msrb.mxu3 %v1085_v56  ;;  %v992_v53 = vpack.c.bf16 %v499_v29, %v499_v29 }
 0x807   :  { %2007 = vmatmul.msk.bf16.vlgmr.msra.gmra.mxu2 %vm204_vm5, %v992_v53 }
 0x808   :  { %v493_v31 = vpop.permute.xlu1 %492 }
 0x809   :  { %v990_v59 = vpack.c.bf16 %v493_v31, %v493_v31  ;;  %v2035_v31 = vld [vmem:[%s2918_s10 + $0x8] sm:$0xf] }
 0x80a   :  { %501 = vrot.lane.b32.xlu0 %v2630_v57, %s2247_s23 }
 0x80b   :  { %2005 = vmatmul.msk.bf16.vlgmr.msrb.gmra.mxu0 %vm204_vm5, %v990_v59  ;;  %v2032_v59 = vld [vmem:[%s2916_s8 + $0x8] sm:$0xf] }
 0x810   :  { %v511_v60 = vpop.permute.xlu1 %510 }
 0x811   :  { %v996_v36 = vpack.c.bf16 %v511_v60, %v511_v60 }
 0x818   :  { %v505_v17 = vpop.permute.xlu1 %504 }
 0x819   :  { %v994_v21 = vpack.c.bf16 %v505_v17, %v505_v17 }
 0x820   :  { %v508_v28 = vpop.permute.xlu1 %507 }
 0x821   :  { %v995_v7 = vpack.c.bf16 %v508_v28, %v508_v28 }
 0x859   :  { %v950_v50 = vpop.xlane.xlu2 %949 }
 0x85a   :  { %2160 = vrcp.f32 %v950_v50 }
 0x860   :  { %v2161_v61 = vpop.eup %2160 }
 0x861   :  { %v970_v0 = vmul.f32 %v2161_v61, %v2642_v9  ;;  %v953_v8 = vpop.xlane.xlu0 %952  ;;  %v496_v10 = vpop.permute.xlu2 %495 }
 0x862   :  { %2162 = vrcp.f32 %v953_v8  ;;  %v991_v12 = vpack.c.bf16 %v496_v10, %v496_v10 }
 0x863   :  { %v986_v62 = vmul.f32 %v978_v63, %v970_v0 }
 0x864   :  { %2006 = vmatmul.msk.bf16.vlgmr.msra.gmra.mxu1 %vm204_vm5, %v991_v12 }
 0x865   :  { %v1002_v15 = vpack.c.bf16 %v986_v62, %v986_v62 }
 0x867   :  { %v1104_v57 = vsel %vm204_vm5, %v1002_v15, 0 }
 0x868   :  { %v2163_v16 = vpop.eup %2162  ;;  %1113 = vmatpush.bf16.xpose.msra.mxu0 %v1104_v57 }
 0x869   :  { %v971_v19 = vmul.f32 %v2163_v16, %v2648_v13  ;;  %v956_v6 = vpop.xlane.xlu0 %955 }
 0x86a   :  { %2164 = vrcp.f32 %v956_v6 }
 0x86b   :  { %v987_v9 = vmul.f32 %v979_v18, %v971_v19 }
 0x86d   :  { %v1003_v22 = vpack.c.bf16 %v987_v9, %v987_v9 }
 0x86f   :  { %2009 = vmatmul.msk.bf16.vlgmr.msra.gmra.mxu0 %vm204_vm5, %v994_v21  ;;  %v1123_v58 = vsel %vm204_vm5, %v1003_v22, 0  ;;  %v2012_v21 = vld [vmem:[%s2921_s13 + $0x4] sm:$0xf] }
 0x870   :  { %v2165_v23 = vpop.eup %2164  ;;  %1132 = vmatpush.bf16.xpose.msrb.mxu1 %v1123_v58 }
 0x871   :  { %v972_v27 = vmul.f32 %v2165_v23, %v2654_v35 }
 0x873   :  { %v988_v4 = vmul.f32 %v980_v25, %v972_v27  ;;  %v2724_v25 = vld [vmem:[%s2942_s22] ss:$0 sm:$0xff]  ;;  %s1940_s22 = sshll.u32 %s2928_s20, 4  ;;  %s1941_s22 = int_to_ptr.hbm [resolvable:$true] %s1940_s22 }
 0x875   :  { %v1004_v30 = vpack.c.bf16 %v988_v4, %v988_v4 }
 0x877   :  { %2010 = vmatmul.msk.bf16.vlgmr.msrb.gmra.mxu1 %vm204_vm5, %v995_v7  ;;  %v1142_v13 = vsel %vm204_vm5, %v1004_v30, 0 }
 0x878   :  { %1151 = vmatpush.bf16.xpose.msrb.mxu2 %v1142_v13 }
 0x87a   :  { %v1020_v33 = vpop.f32.mrf.mxu3 }
 0x87b   :  { %v1157_v60 = vmax.f32 %v1020_v33, 0.0  ;;  %v2015_v33 = vld [vmem:[%s2923_s15 + $0x4] sm:$0xf] }
 0x87c   :  { %v502_v34 = vpop.permute.xlu0 %501 }
 0x87d   :  { %v993_v37 = vpack.c.bf16 %v502_v34, %v502_v34 }
 0x87f   :  { %2008 = vmatmul.msk.bf16.vlgmr.msrb.gmra.mxu3 %vm204_vm5, %v993_v37  ;;  %2011 = vmatmul.msk.bf16.vlgmr.msrb.gmra.mxu2 %vm204_vm5, %v996_v36 }
 0x880   :  { %1367 = vmatpush.bf16.msra.mxu2 %v2397_v11 }
 0x882   :  { %v1022_v44 = vpop.f32.mrf.mxu3 }
 0x888   :  { %v1039_v35 = vpop.f32.mrf.mxu0 }
 0x889   :  { %v1158_v38 = vmax.f32 %v1039_v35, 0.0 }
 0x88a   :  { %v1077_v26 = vpop.f32.mrf.mxu2 }
 0x88b   :  { %1166 = vrot.lane.b32.xlu0 %v1158_v38, %s2244_s3  ;;  %v1160_v40 = vmax.f32 %v1077_v26, 0.0 }
 0x88d   :  { %1174 = vrot.lane.b32.xlu1 %v1160_v40, %s2254_s30  ;;  %v2054_v40 = vld [vmem:[%s2944_s2 + $0x18] sm:$0xff] }
 0x890   :  { %v1041_v41 = vpop.f32.mrf.mxu0 }
 0x892   :  { %v1079_v42 = vpop.f32.mrf.mxu2 }
 0x8e1   :  { %v1058_v11 = vpop.f32.mrf.mxu1 }
 0x8e2   :  { %v1159_v20 = vmax.f32 %v1058_v11, 0.0 }
 0x8e4   :  { %1170 = vrot.lane.b32.xlu2 %v1159_v20, %s2255_s28 }
 0x8e9   :  { %v1060_v43 = vpop.f32.mrf.mxu1 }
 0x8ec   :  { %v1115_v39 = vpop.f32.mrf.mxu0 }
 0x8ed   :  { %v1162_v14 = vmax.f32 %v1115_v39, 0.0 }
 0x8ef   :  { %1182 = vrot.lane.b32.xlu2 %v1162_v14, %s2256_s24  ;;  %s2258_s24 = smov 8  }
 0x8f4   :  { %v1117_v45 = vpop.f32.mrf.mxu0  ;;  %v1134_v46 = vpop.f32.mrf.mxu1 }
 0x8f5   :  { %v1163_v48 = vmax.f32 %v1134_v46, 0.0 }
 0x8f7   :  { %1209 = vperm.xlu2 %2077, %v2013_v47   ;;  %1186 = vrot.lane.b32.xlu1 %v1163_v48, %s2932_s29 }
 0x8fc   :  { %v1136_v49 = vpop.f32.mrf.mxu1 }
 0x8fd   :  { %v1167_v50 = vpop.permute.xlu0 %1166 }
 0x8fe   :  { %v1193_v63 = vsel %vm301_vm8, %v1157_v60, %v1167_v50 }
 0x8ff   :  { %1241 = vperm.xlu1 %2125, %v2016_v52   ;;  %v1175_v8 = vpop.permute.xlu1 %1174 }
 0x902   :  { %v1096_v51 = vpop.f32.mrf.mxu3  ;;  %v1153_v54 = vpop.f32.mrf.mxu2 }
 0x903   :  { %v1161_v2 = vmax.f32 %v1096_v51, 0.0  ;;  %v1164_v53 = vmax.f32 %v1153_v54, 0.0 }
 0x905   :  { %1178 = vrot.lane.b32.xlu0 %v1161_v2, %s2258_s24 }
 0x907   :  { %1321 = vperm.xlu1 %2125, %v2027_v55  }
 0x90a   :  { %v1098_v56 = vpop.f32.mrf.mxu3  ;;  %v1155_v29 = vpop.f32.mrf.mxu2 }
 0x90d   :  { %1190 = vrot.lane.b32.xlu0 %v1164_v53, %s2259_s0 }
 0x90f   :  { %1408 = vperm.xlu1 %2125, %v2035_v31  }
 0x917   :  { %1380 = vperm.xlu1 %2125, %v2032_v59  }
 0x93e   :  { %v1171_v61 = vpop.permute.xlu2 %1170 }
 0x93f   :  { %v1194_v0 = vsel %vm204_vm5, %v1193_v63, %v1171_v61 }
 0x940   :  { %v1195_v12 = vsel %vm78_vm1, %v1194_v0, %v1175_v8 }
 0x949   :  { %v1183_v15 = vpop.permute.xlu2 %1182 }
 0x951   :  { %v1210_v22 = vpop.permute.xlu2 %1209 }
 0x969   :  { %v1187_v16 = vpop.permute.xlu1 %1186 }
 0x971   :  { %v1242_v34 = vpop.permute.xlu1 %1241 }
 0x977   :  { %v1179_v10 = vpop.permute.xlu0 %1178 }
 0x978   :  { %v1196_v62 = vsel %vm116_vm3, %v1195_v12, %v1179_v10 }
 0x979   :  { %v1198_v57 = vsel %vm1197_vm6, %v1196_v62, %v1183_v15  ;;  %v1322_v52 = vpop.permute.xlu1 %1321 }
 0x97a   :  { %v1200_v17 = vsel %vm1199_vm15, %v1198_v57, %v1187_v16 }
 0x97f   :  { %v1191_v18 = vpop.permute.xlu0 %1190 }
 0x980   :  { %v1201_v19 = vsel %vm308_vm9, %v1200_v17, %v1191_v18  ;;  %v2034_v17 = vld [vmem:[%s2917_s9 + $0x4] sm:$0x3] }
 0x981   :  { %v1204_v6 = vpack.c.bf16 %v1201_v19, %v1201_v19  ;;  %v1409_v18 = vpop.permute.xlu1 %1408 }
 0x983   :  { %v1216_v9 = vsel %vm208_vm4, %v1204_v6, 0 }
 0x984   :  { %1225 = vmatpush.bf16.msra.mxu3 %v1216_v9 }
 0x987   :  { %2014 = vmatmul.msk.bf16.vlgmr.msra.gmra.mxu3 %vm204_vm5, %v2012_v21 }
 0x989   :  { %v1381_v9 = vpop.permute.xlu1 %1380 }
 0xa0a   :  { %v1227_v58 = vpop.f32.mrf.mxu3 }
 0xa0b   :  { %v1228_v23 = vadd.f32 %v1227_v58, %v1210_v22 }
 0xa0d   :  { %v1231_v27 = vmul.f32 %v2724_v25, %v1228_v23 }
 0xa0f   :  { %v1232_v28 = vmul.f32 0.049787067, %v1231_v27 }
 0xa11   :  { %v1233_v4 = vadd.f32 %v1232_v28, %v2469_v24 }
 0xa12   :  { %v1229_v7 = vpop.f32.mrf.mxu3 }
 0xa13   :  { %v1236_v30 = vpack.c.bf16 %v1233_v4, %v1233_v4 }
 0xa15   :  { %v1248_v13 = vsel %vm123_vm2, %v1236_v30, 0 }
 0xa16   :  { %1257 = vmatpush.bf16.msrb.mxu0 %v1248_v13 }
 0xa19   :  { %2017 = vmatmul.msk.bf16.vlgmr.msrb.gmra.mxu0 %vm116_vm3, %v2015_v33 }
 0xa96   :  { %v1259_v36 = vpop.f32.mrf.mxu0 }
 0xa97   :  { %v1260_v37 = vadd.f32 %v1259_v36, %v1242_v34 }
 0xa99   :  { %v1263_v44 = vadd.f32 %v1260_v37, %v2452_v1  ;;  %v2020_v1 = vld [vmem:[%s2944_s2 + $0x20] sm:$0xf] }
 0xa9a   :  { %v1275_v41 = vunpack.c.l.b16 %v2020_v1  ;;  %v2028_v1 = vld [vmem:[%s2919_s11 + $0x4] sm:$0x3] }
 0xa9b   :  { %v2735_v35 = vmul.f32 %v2724_v25, %v1263_v44  ;;  %2030 = vmatmul.msk.bf16.vlgmr.msra.gmra.mxu2 %vm116_vm3, %v2028_v1 }
 0xa9c   :  { %v1277_v42 = vpack.c.b16 %v1275_v41, %v1275_v41 }
 0xa9d   :  { %v1269_v24 = vpack.c.bf16 %v2735_v35, %v2735_v35 }
 0xa9e   :  { %v1261_v38 = vpop.f32.mrf.mxu0 }
 0xa9f   :  { %v1285_v26 = vsel %vm123_vm2, %v1269_v24, 0 }
 0xaa0   :  { %1294 = vmatpush.bf16.msra.mxu1 %v1285_v26 }
 0xaa3   :  { %2025 = vmatmul.msk.bf16.vlgmr.msra.gmra.mxu1 %vm116_vm3, %v2054_v40 }
 0xab3   :  { %2026 = vmatmul.msk.bf16.gmra.mxu1 %vm116_vm3, %v1277_v42 }
 0xb20   :  { %v1296_v11 = vpop.f32.mrf.mxu1 }
 0xb21   :  { %1306 = vrot.lane.b32.xlu0 %v1296_v11, %s2255_s28 }
 0xb28   :  { %v1298_v20 = vpop.f32.mrf.mxu1 }
 0xb30   :  { %v1301_v43 = vpop.f32.mrf.mxu1 }
 0xb31   :  { %1312 = vrot.lane.b32.xlu2 %v1301_v43, %s2248_s1 }
 0xb38   :  { %v1303_v39 = vpop.f32.mrf.mxu1 }
 0xb8b   :  { %v1313_v14 = vpop.permute.xlu2 %1312 }
 0xb8c   :  { %v1315_v47 = vsel %vm1199_vm15, %v1313_v14, 0.0 }
 0xb93   :  { %v1307_v45 = vpop.permute.xlu0 %1306 }
 0xb94   :  { %v1309_v46 = vsel %vm204_vm5, 0.0, %v1307_v45 }
 0xb95   :  { %v1310_v48 = vadd.f32 %v1309_v46, %v1298_v20  ;;  %v1369_v46 = vpop.f32.mrf.mxu2 }
 0xb97   :  { %v1316_v49 = vadd.f32 %v1315_v47, %v1310_v48 }
 0xb99   :  { %v1324_v51 = vadd.f32 %v1322_v52, %v1316_v49 }
 0xb9b   :  { %v2752_v54 = vmax.f32 %v1324_v51, 0.0 }
 0xb9d   :  { %v1326_v2 = vsel %vm320_vm10, %v2752_v54, 0.0  ;;  %v1371_v51 = vpop.f32.mrf.mxu2 }
 0xb9e   :  { %1327 = vadd.xlane.f32.xlu0 %v1326_v2  ;;  %v2029_v2 = vld [vmem:[%s2920_s12 + $0x8] sm:$0xf] }
 0xc11   :  { %v1328_v55 = vpop.xlane.xlu0 %1327 }
 0xc12   :  { %v1329_v56 = vmul.f32 %v1328_v55, %v2473_v32 }
 0xc14   :  { %v1330_v29 = vsub.f32 %v2752_v54, %v1329_v56 }
 0xc16   :  { %v1331_v53 = vmul.f32 %v1330_v29, %v1330_v29 }
 0xc18   :  { %v1332_v31 = vsel %vm320_vm10, %v1331_v53, 0.0 }
 0xc19   :  { %1333 = vadd.xlane.f32.xlu2 %v1332_v31 }
 0xc8c   :  { %v1334_v59 = vpop.xlane.xlu2 %1333 }
 0xc8d   :  { %v1335_v50 = vmul.f32 %v1334_v59, %v2473_v32  ;;  %v2031_v32 = vld [vmem:[%s2915_s7 + $0x4] sm:$0x3] }
 0xc8f   :  { %v1336_v60 = vadd.f32 1e-05, %v1335_v50 }
 0xc91   :  { %2166 = vrsqrt.f32 %v1336_v60  ;;  %vm1343_vm9 = vweird.f32 %v1336_v60 }
 0xc97   :  { %v2167_v61 = vpop.eup %2166 }
 0xc98   :  { %v1338_v63 = vmul.f32 %v2167_v61, %v1336_v60  ;;  %vm1344_vm1 = vweird.f32 %v2167_v61 }
 0xc99   :  { %vm1345_vm0 = vmor %vm1343_vm9, %vm1344_vm1 }
 0xc9a   :  { %v1339_v0 = vmul.f32 %v2167_v61, %v1338_v63 }
 0xc9c   :  { %v1340_v8 = vmul.f32 0.5, %v1339_v0 }
 0xc9e   :  { %v1341_v10 = vsub.f32 1.5, %v1340_v8 }
 0xca0   :  { %v1342_v12 = vmul.f32 %v2167_v61, %v1341_v10 }
 0xca2   :  { %v1346_v62 = vsel %vm1345_vm0, %v2167_v61, %v1342_v12 }
 0xca3   :  { %v1347_v15 = vmul.f32 %v1346_v62, %v1330_v29 }
 0xca5   :  { %v1375_v57 = vpack.c.bf16 %v1347_v15, %v1347_v15 }
 0xca7   :  { %v1387_v16 = vsel %vm123_vm2, %v1375_v57, 0 }
 0xca8   :  { %1396 = vmatpush.bf16.msrb.mxu3 %v1387_v16  ;;  %1421 = vmatpush.bf16.msra.mxu0 %v1387_v16 }
 0xcab   :  { %2033 = vmatmul.msk.bf16.vlgmr.msrb.gmra.mxu3 %vm116_vm3, %v2031_v32  ;;  %2036 = vmatmul.msk.bf16.vlgmr.msra.gmra.mxu0 %vm116_vm3, %v2034_v17 }
 0xd28   :  { %v1423_v19 = vpop.f32.mrf.mxu0 }
 0xd29   :  { %v1424_v6 = vadd.f32 %v1423_v19, %v1409_v18 }
 0xd2b   :  { %1428 = vrot.lane.b32.xlu1 %v1424_v6, %s2244_s3 }
 0xd2e   :  { %v1398_v21 = vpop.f32.mrf.mxu3 }
 0xd2f   :  { %v1399_v22 = vadd.f32 %v1398_v21, %v1381_v9 }
 0xd30   :  { %v1425_v58 = vpop.f32.mrf.mxu0 }
 0xd31   :  { %1452 = vrot.lane.b32.xlu0 %v1399_v22, %s2252_s27  ;;  %v1492_v34 = vpack.c.bf16 %v1399_v22, %v1399_v22 }
 0xd33   :  { %1446 = vrot.lane.b32.xlu1 %v1399_v22, %s2248_s1 }
 0xd36   :  { %v1400_v23 = vpop.f32.mrf.mxu3 }
 0xd3b   :  { %1449 = vrot.lane.b32.xlu1 %v1399_v22, %s2247_s23 }
 0xd9d   :  { %v1429_v27 = vpop.permute.xlu1 %1428 }
 0xd9e   :  { %v1431_v28 = vsel %vm301_vm8, 0.0, %v1429_v27 }
 0xd9f   :  { %v1433_v4 = vsel %vm1432_vm11, %v1431_v28, 0.0 }
 0xda0   :  { %1456 = vrot.lane.b32.xlu2 %v1433_v4, %s2248_s1  ;;  %1459 = vrot.lane.b32.xlu1 %v1433_v4, %s2247_s23  ;;  %v1496_v7 = vpack.c.bf16 %v1433_v4, %v1433_v4 }
 0xda2   :  { %v1520_v30 = vsel %vm208_vm4, %v1496_v7, 0 }
 0xda3   :  { %1529 = vmatpush.bf16.msrb.mxu2 %v1520_v30  ;;  %v1453_v36 = vpop.permute.xlu0 %1452 }
 0xda4   :  { %v1495_v44 = vpack.c.bf16 %v1453_v36, %v1453_v36 }
 0xda5   :  { %v1447_v13 = vpop.permute.xlu1 %1446 }
 0xda6   :  { %v1493_v33 = vpack.c.bf16 %v1447_v13, %v1447_v13 }
 0xda8   :  { %1462 = vrot.lane.b32.xlu1 %v1433_v4, %s2252_s27  ;;  %1535 = vxpose.xlu0.c.b16.start.end [1/1] (short) (narrow) %v1493_v33, 16 }
 0xdad   :  { %v1450_v37 = vpop.permute.xlu1 %1449 }
 0xdae   :  { %v1494_v24 = vpack.c.bf16 %v1450_v37, %v1450_v37 }
 0xdc6   :  { %1500 = vxpose.xlu2.c.b16.start.end [1/1] (short) (narrow) %v1492_v34, 16 }
 0xddd   :  { %2126 = vxpose.binary.xlu1.c.b16.start.end [1/2] (short) (narrow) %v1495_v44, %v1494_v24, 16 }
 0xdfa   :  { %v1457_v38 = vpop.permute.xlu2 %1456 }
 0xdfb   :  { %v1497_v26 = vpack.c.bf16 %v1457_v38, %v1457_v38 }
 0xdfd   :  { %v1555_v40 = vsel %vm208_vm4, %v1497_v26, 0 }
 0xdfe   :  { %1564 = vmatpush.bf16.msra.mxu3 %v1555_v40 }
 0xe12   :  { %v1460_v41 = vpop.permute.xlu1 %1459 }
 0xe13   :  { %v1498_v42 = vpack.c.bf16 %v1460_v41, %v1460_v41 }
 0xe15   :  { %v1590_v11 = vsel %vm208_vm4, %v1498_v42, 0 }
 0xe16   :  { %1440 = vrot.lane.b32.xlu0 %v2724_v25, %s2244_s3  ;;  %1599 = vmatpush.bf16.msrb.mxu0 %v1590_v11 }
 0xe1a   :  { %v1463_v20 = vpop.permute.xlu1 %1462 }
 0xe1b   :  { %v1499_v43 = vpack.c.bf16 %v1463_v20, %v1463_v20 }
 0xe1d   :  { %v1625_v39 = vsel %vm208_vm4, %v1499_v43, 0 }
 0xe1e   :  { %1634 = vmatpush.bf16.msrb.mxu1 %v1625_v39 }
 0xe54   :  { %v1543_v14 = vpop.trf.xlu0 }
 0xe55   :  { %2038 = vmatmul.msk.bf16.vlgmr.msra.gmra.mxu3 %vm204_vm5, %v1543_v14 }
 0xe67   :  { %v1508_v45 = vpop.trf.xlu2 }
 0xe68   :  { %2037 = vmatmul.msk.bf16.vlgmr.msrb.gmra.mxu2 %vm204_vm5, %v1508_v45 }
 0xe88   :  { %v1441_v47 = vpop.permute.xlu0 %1440 }
 0xe89   :  { %v1443_v48 = vsel %vm301_vm8, 0.0, %v1441_v47  ;;  %v2127_v49 = vpop.trf.xlu1 }
 0xe8a   :  { %v1444_v52 = vsel %vm1432_vm11, %v1443_v48, 0.0  ;;  %2039 = vmatmul.msk.bf16.vlgmr.msrb.gmra.mxu0 %vm204_vm5, %v2127_v49 }
 0xe8b   :  { %1479 = vrot.lane.b32.xlu1 %v1444_v52, %s2247_s23  ;;  %1476 = vrot.lane.b32.xlu2 %v1444_v52, %s2248_s1  ;;  %v2820_v32 = vsel %vm1485_vm7, %v1444_v52, 0.0 }
 0xe8c   :  { %1482 = vrot.lane.b32.xlu0 %v1444_v52, %s2252_s27  ;;  %vm1644_vm1 = vcmp.gt.f32.partialorder %v2820_v32, 0.0 }
 0xe8d   :  { %v1648_v22 = vsel %vm1644_vm1, 9.999995e-07, %v2253_v5 }
 0xe8e   :  { %v1652_v27 = vperm.slane %v1648_v22, 0 }
 0xe91   :  { %v2128_v55 = vpop.trf.xlu1 }
 0xe92   :  { %2040 = vmatmul.msk.bf16.vlgmr.msrb.gmra.mxu1 %vm204_vm5, %v2128_v55 }
 0xe93   :  { %1354 = vperm.xlu1 %2125, %v2029_v2  }
 0xed8   :  { %v1566_v56 = vpop.f32.mrf.mxu3 }
 0xed9   :  { %v1641_v59 = vmul.f32 0.5, %v1566_v56 }
 0xee0   :  { %v1568_v29 = vpop.f32.mrf.mxu3 }
 0xee5   :  { %v1477_v53 = vpop.permute.xlu2 %1476 }
 0xee6   :  { %v2803_v31 = vsel %vm1485_vm7, %v1477_v53, 0.0 }
 0xee7   :  { %vm1645_vm12 = vcmp.gt.f32.partialorder %v2803_v31, 0.0 }
 0xee8   :  { %v1649_v50 = vsel %vm1645_vm12, 9.999995e-07, %v2253_v5 }
 0xee9   :  { %v1653_v60 = vperm.slane %v1649_v50, 0 }
 0xeeb   :  { %v1531_v61 = vpop.f32.mrf.mxu2  ;;  %v1657_v63 = vadd.f32 %v1653_v60, %v1641_v59 }
 0xeec   :  { %v1640_v58 = vmul.f32 0.5, %v1531_v61 }
 0xeed   :  { %v1664_v0 = vsel %vm1660_vm13, %v1657_v63, -inf }
 0xeee   :  { %1665 = vmax.xlane.f32.xlu2 %v1664_v0  ;;  %v1656_v30 = vadd.f32 %v1652_v27, %v1640_v58 }
 0xef0   :  { %v1661_v34 = vsel %vm1660_vm13, %v1656_v30, -inf }
 0xef3   :  { %v1533_v8 = vpop.f32.mrf.mxu2 }
 0xefd   :  { %v1480_v10 = vpop.permute.xlu1 %1479 }
 0xefe   :  { %v2810_v12 = vsel %vm1485_vm7, %v1480_v10, 0.0  ;;  %v1483_v62 = vpop.permute.xlu0 %1482 }
 0xeff   :  { %vm1646_vm14 = vcmp.gt.f32.partialorder %v2810_v12, 0.0  ;;  %v2816_v16 = vsel %vm1485_vm7, %v1483_v62, 0.0  ;;  %v1707_v53 = vperm.slane %v2810_v12, 0 }
 0xf00   :  { %v1650_v15 = vsel %vm1646_vm14, 9.999995e-07, %v2253_v5  ;;  %vm1647_vm6 = vcmp.gt.f32.partialorder %v2816_v16, 0.0  ;;  %v1708_v62 = vperm.slane %v2816_v16, 0 }
 0xf01   :  { %v1654_v17 = vperm.slane %v1650_v15, 0  ;;  %v1651_v21 = vsel %vm1647_vm6, 9.999995e-07, %v2253_v5 }
 0xf02   :  { %v1655_v23 = vperm.slane %v1651_v21, 0 }
 0xf05   :  { %v1355_v57 = vpop.permute.xlu1 %1354 }
 0xf06   :  { %v1370_v18 = vadd.f32 %v1369_v46, %v1355_v57 }
 0xf07   :  { %v1601_v19 = vpop.f32.mrf.mxu0 }
 0xf08   :  { %v1642_v6 = vmul.f32 0.5, %v1601_v19  ;;  %1435 = vrot.lane.b32.xlu2 %v1370_v18, %s2244_s3 }
 0xf0a   :  { %v1658_v9 = vadd.f32 %v1654_v17, %v1642_v6  ;;  %v1705_v17 = vperm.slane %v2820_v32, 0 }
 0xf0c   :  { %v1667_v3 = vsel %vm1660_vm13, %v1658_v9, -inf }
 0xf0d   :  { %1668 = vmax.xlane.f32.xlu0 %v1667_v3  ;;  %v1706_v3 = vperm.slane %v2803_v31, 0 }
 0xf0f   :  { %v1636_v28 = vpop.f32.mrf.mxu1  ;;  %v1603_v4 = vpop.f32.mrf.mxu0 }
 0xf10   :  { %v1643_v7 = vmul.f32 0.5, %v1636_v28 }
 0xf12   :  { %v1659_v13 = vadd.f32 %v1655_v23, %v1643_v7 }
 0xf14   :  { %v1670_v33 = vsel %vm1660_vm13, %v1659_v13, -inf }
 0xf15   :  { %1671 = vmax.xlane.f32.xlu1 %v1670_v33  ;;  %1662 = vmax.xlane.f32.xlu0 %v1661_v34 }
 0xf17   :  { %v1638_v36 = vpop.f32.mrf.mxu1 }
 0xf61   :  { %v1666_v37 = vpop.xlane.xlu2 %1665 }
 0xf62   :  { %v1674_v43 = vsub.f32 %v1657_v63, %v1666_v37 }
 0xf64   :  { %v1679_v46 = vmul.f32 1.442695, %v1674_v43 }
 0xf69   :  { %v1436_v5 = vpop.permute.xlu2 %1435 }
 0xf6a   :  { %v1438_v44 = vsel %vm301_vm8, 0.0, %v1436_v5 }
 0xf6b   :  { %v2832_v24 = vsel %vm1432_vm11, %v1438_v44, 0.0 }
 0xf6c   :  { %1472 = vrot.lane.b32.xlu2 %v2832_v24, %s2252_s27  ;;  %v1713_v32 = vpack.c.bf16 %v2832_v24, %v2832_v24 }
 0xf80   :  { %v1669_v38 = vpop.xlane.xlu0 %1668 }
 0xf81   :  { %v1675_v26 = vsub.f32 %v1658_v9, %v1669_v38 }
 0xf83   :  { %v1681_v40 = vmul.f32 1.442695, %v1675_v26 }
 0xf85   :  { %2168 = vpow2.f32 %v1681_v40  ;;  %v2046_v40 = vld [vmem:[%s2922_s14 + $0x10] sm:$0xff] }
 0xf88   :  { %v1672_v1 = vpop.xlane.xlu1 %1671  ;;  %v1663_v41 = vpop.xlane.xlu0 %1662 }
 0xf89   :  { %v1676_v42 = vsub.f32 %v1659_v13, %v1672_v1  ;;  %v1673_v11 = vsub.f32 %v1656_v30, %v1663_v41 }
 0xf8b   :  { %v2169_v20 = vpop.eup %2168  ;;  %v1683_v39 = vmul.f32 1.442695, %v1676_v42  ;;  %v1677_v14 = vmul.f32 1.442695, %v1673_v11  ;;  %v1881_v42 = vld [vmem:[%s2926_s18] sm:$0x3f] }
 0xf8c   :  { %v1691_v45 = vsel %vm1660_vm13, %v2169_v20, 0.0  ;;  %v2049_v11 = vld [vmem:[%s2924_s16 + $0x10] sm:$0xff] }
 0xf8d   :  { %2170 = vpow2.f32 %v1683_v39  ;;  %1692 = vadd.xlane.f32.xlu0 %v1691_v45 }
 0xf8e   :  { %2172 = vpow2.f32 %v1677_v14 }
 0xf8f   :  { %2174 = vpow2.f32 %v1679_v46 }
 0xf93   :  { %v2171_v47 = vpop.eup %2170 }
 0xf94   :  { %v2173_v48 = vpop.eup %2172  ;;  %v1694_v49 = vsel %vm1660_vm13, %v2171_v47, 0.0 }
 0xf95   :  { %1695 = vadd.xlane.f32.xlu1 %v1694_v49  ;;  %v1685_v52 = vsel %vm1660_vm13, %v2173_v48, 0.0  ;;  %v2175_v51 = vpop.eup %2174 }
 0xf96   :  { %1686 = vadd.xlane.f32.xlu2 %v1685_v52  ;;  %v1688_v2 = vsel %vm1660_vm13, %v2175_v51, 0.0  ;;  %v2045_v52 = vld [vmem:[%s2921_s13 + $0x8] sm:$0xf] }
 0xf9d   :  { %1689 = vadd.xlane.f32.xlu1 %v1688_v2 }
 0xfa1   :  { %1466 = vrot.lane.b32.xlu0 %v2832_v24, %s2248_s1 }
 0xfb6   :  { %1469 = vrot.lane.b32.xlu1 %v2832_v24, %s2247_s23  ;;  %s2945_s23 = smov 12  }
 0xfc6   :  { %v1473_v56 = vpop.permute.xlu2 %1472 }
 0xfc7   :  { %v1716_v27 = vpack.c.bf16 %v1473_v56, %v1473_v56 }
0x1000   :  { %v1693_v55 = vpop.xlane.xlu0 %1692 }
0x1001   :  { %2176 = vrcp.f32 %v1693_v55 }
0x1007   :  { %v2177_v29 = vpop.eup %2176 }
0x1008   :  { %v1703_v59 = vmul.f32 %v2177_v29, %v2169_v20  ;;  %v1696_v50 = vpop.xlane.xlu1 %1695 }
0x1009   :  { %2178 = vrcp.f32 %v1696_v50  ;;  %v1687_v60 = vpop.xlane.xlu2 %1686 }
0x100a   :  { %2180 = vrcp.f32 %v1687_v60  ;;  %v1711_v61 = vmul.f32 %v1707_v53, %v1703_v59 }
0x100c   :  { %v1719_v63 = vpack.c.bf16 %v1711_v61, %v1711_v61  ;;  %v2048_v61 = vld [vmem:[%s2923_s15 + $0x8] sm:$0xf] }
0x100e   :  { %v1763_v0 = vsel %vm116_vm3, %v1719_v63, 0 }
0x100f   :  { %v2179_v8 = vpop.eup %2178  ;;  %1772 = vmatpush.bf16.xpose.msra.mxu0 %v1763_v0 }
0x1010   :  { %v2181_v10 = vpop.eup %2180  ;;  %v1704_v15 = vmul.f32 %v2179_v8, %v2171_v47  ;;  %v1690_v57 = vpop.xlane.xlu1 %1689 }
0x1011   :  { %v1701_v18 = vmul.f32 %v2181_v10, %v2173_v48  ;;  %2182 = vrcp.f32 %v1690_v57 }
0x1012   :  { %v1712_v12 = vmul.f32 %v1708_v62, %v1704_v15 }
0x1013   :  { %v1709_v19 = vmul.f32 %v1705_v17, %v1701_v18  ;;  %v1467_v7 = vpop.permute.xlu0 %1466  ;;  %v1879_v17 = vld [vmem:[%s2925_s17] sm:$0x7] }
0x1014   :  { %v1720_v6 = vpack.c.bf16 %v1712_v12, %v1712_v12  ;;  %v1714_v30 = vpack.c.bf16 %v1467_v7, %v1467_v7 }
0x1015   :  { %v1717_v9 = vpack.c.bf16 %v1709_v19, %v1709_v19 }
0x1016   :  { %v1782_v21 = vsel %vm116_vm3, %v1720_v6, 0 }
0x1017   :  { %v2183_v22 = vpop.eup %2182  ;;  %v1725_v58 = vsel %vm116_vm3, %v1717_v9, 0  ;;  %1791 = vmatpush.bf16.xpose.msra.mxu1 %v1782_v21 }
0x1018   :  { %v1702_v23 = vmul.f32 %v2183_v22, %v2175_v51  ;;  %1734 = vmatpush.bf16.xpose.msra.mxu2 %v1725_v58 }
0x101a   :  { %v1710_v16 = vmul.f32 %v1706_v3, %v1702_v23 }
0x101c   :  { %v1718_v28 = vpack.c.bf16 %v1710_v16, %v1710_v16 }
0x101e   :  { %2044 = vmatmul.msk.bf16.vlgmr.msra.gmra.mxu1 %vm116_vm3, %v1716_v27  ;;  %v1744_v4 = vsel %vm116_vm3, %v1718_v28, 0 }
0x101f   :  { %2041 = vmatmul.msk.bf16.vlgmr.msra.gmra.mxu2 %vm116_vm3, %v1713_v32  ;;  %1753 = vmatpush.bf16.xpose.msrb.mxu3 %v1744_v4 }
0x1026   :  { %2042 = vmatmul.msk.bf16.vlgmr.msrb.gmra.mxu3 %vm116_vm3, %v1714_v30 }
0x1028   :  { %v1470_v31 = vpop.permute.xlu1 %1469 }
0x1029   :  { %v1715_v13 = vpack.c.bf16 %v1470_v31, %v1470_v31 }
0x102b   :  { %2043 = vmatmul.msk.bf16.vlgmr.msra.gmra.mxu0 %vm116_vm3, %v1715_v13 }
0x109b   :  { %v1793_v33 = vpop.f32.mrf.mxu1 }
0x109c   :  { %v1800_v41 = vmax.f32 %v1793_v33, 0.0 }
0x10a2   :  { %v1736_v34 = vpop.f32.mrf.mxu2 }
0x10a3   :  { %v1795_v36 = vpop.f32.mrf.mxu1  ;;  %v1797_v43 = vmax.f32 %v1736_v34, 0.0 }
0x10a8   :  { %v1774_v37 = vpop.f32.mrf.mxu0 }
0x10a9   :  { %v1799_v5 = vmax.f32 %v1774_v37, 0.0  ;;  %v1755_v44 = vpop.f32.mrf.mxu3 }
0x10aa   :  { %v1738_v24 = vpop.f32.mrf.mxu2  ;;  %v1798_v38 = vmax.f32 %v1755_v44, 0.0 }
0x10ab   :  { %1806 = vrot.lane.b32.xlu1 %v1799_v5, %s2258_s24 }
0x10ac   :  { %1802 = vrot.lane.b32.xlu0 %v1798_v38, %s2255_s28 }
0x10b0   :  { %v1776_v26 = vpop.f32.mrf.mxu0 }
0x10b1   :  { %v1757_v1 = vpop.f32.mrf.mxu3 }
0x10b3   :  { %1823 = vperm.xlu1 %2125, %v2046_v40  }
0x10b4   :  { %1810 = vrot.lane.b32.xlu0 %v1800_v41, %s2945_s23 }
0x10bb   :  { %1884 = vperm.xlu1 %2125, %v1881_v42  }
0x10bc   :  { %1855 = vperm.xlu0 %2076, %v2049_v11  }
0x111d   :  { %v1807_v14 = vpop.permute.xlu1 %1806 }
0x111e   :  { %v1803_v20 = vpop.permute.xlu0 %1802 }
0x111f   :  { %v1813_v39 = vsel %vm204_vm5, %v1797_v43, %v1803_v20 }
0x1120   :  { %v1814_v46 = vsel %vm116_vm3, %v1813_v39, %v1807_v14 }
0x1125   :  { %v1824_v51 = vpop.permute.xlu1 %1823 }
0x1126   :  { %v1811_v45 = vpop.permute.xlu0 %1810 }
0x1127   :  { %v1815_v47 = vsel %vm1199_vm15, %v1814_v46, %v1811_v45 }
0x1128   :  { %v1818_v48 = vpack.c.bf16 %v1815_v47, %v1815_v47 }
0x112a   :  { %v1830_v49 = vsel %vm208_vm4, %v1818_v48, 0 }
0x112b   :  { %1839 = vmatpush.bf16.msrb.mxu2 %v1830_v49 }
0x112e   :  { %2047 = vmatmul.msk.bf16.vlgmr.msrb.gmra.mxu2 %vm204_vm5, %v2045_v52  ;;  %v1856_v63 = vpop.permute.xlu0 %1855 }
0x11b1   :  { %v1841_v2 = vpop.f32.mrf.mxu2 }
0x11b2   :  { %v1842_v55 = vadd.f32 %v1841_v2, %v1824_v51 }
0x11b4   :  { %v1845_v56 = vmul.f32 %v2724_v25, %v1842_v55 }
0x11b6   :  { %v1846_v29 = vmul.f32 0.049787067, %v1845_v56 }
0x11b8   :  { %v1847_v53 = vadd.f32 %v1846_v29, %v2752_v54 }
0x11b9   :  { %v1843_v59 = vpop.f32.mrf.mxu2 }
0x11ba   :  { %v1850_v50 = vpack.c.bf16 %v1847_v53, %v1847_v53 }
0x11bc   :  { %v1862_v60 = vsel %vm123_vm2, %v1850_v50, 0 }
0x11bd   :  { %1871 = vmatpush.bf16.msra.mxu3 %v1862_v60 }
0x11c0   :  { %2050 = vmatmul.msk.bf16.vlgmr.msra.gmra.mxu3 %vm116_vm3, %v2048_v61 }
0x1243   :  { %v1873_v0 = vpop.f32.mrf.mxu3 }
0x1244   :  { %v1874_v8 = vadd.f32 %v1873_v0, %v1856_v63 }
0x1246   :  { %v1877_v10 = vadd.f32 %v1874_v8, %v2735_v35  ;;  %v1885_v35 = vpop.permute.xlu1 %1884 }
0x1248   :  { %v1878_v62 = vmul.f32 %v2724_v25, %v1877_v10 }
0x124a   :  { %1909 = vst.msk [vmem:[#allocation2] sm:$0xff] %vm320_vm10, %v1878_v62  ;;  %v1880_v54 = vpack.c.bf16 %v1878_v62, %v1878_v62 }
0x124b   :  { %v1875_v15 = vpop.f32.mrf.mxu3  ;;  %1943 = dma.vmem_to_hbm [thread:$0]  %s1939_s26, 128, %s1941_s22, [#allocation3]  }
0x124c   :  { %v1891_v57 = vsel %vm123_vm2, %v1880_v54, 0  ;;  %vm1907_vm2 = vcmask 128000  }
0x124d   :  { %1900 = vmatpush.bf16.msrb.mxu0 %v1891_v57 }
0x1250   :  { %2051 = vmatmul.msk.bf16.vlgmr.msrb.gmra.mxu0 %vm116_vm3, %v1879_v17 }
0x12cd   :  { %v1902_v18 = vpop.f32.mrf.mxu0 }
0x12ce   :  { %v1903_v12 = vadd.f32 %v1902_v18, %v1885_v35 }
0x12d0   :  { %v1906_v19 = vmul.f32 %v2724_v25, %v1903_v12 }
0x12d2   :  { %1908 = vst.msk [vmem:[%s2927_s19] sm:$0x3f] %vm1907_vm2, %v1906_v19  ;;  %v1910_v6 = vsel %vm1907_vm2, %v1906_v19, -inf  ;;  %s2261_s19 = smov [#allocation4]  }
0x12d3   :  { %v1911_v9 = vrot.slane %v1910_v6, 4  ;;  %s1949_s20 = sshll.u32 %s2261_s19, 4  ;;  %s1950_s20 = int_to_ptr.vmem [resolvable:$true] %s1949_s20 }
0x12d5   :  { %v1912_v21 = vmax.f32 %v1910_v6, %v1911_v9  ;;  %v1904_v22 = vpop.f32.mrf.mxu0 }
0x12d7   :  { %v1913_v58 = vrot.slane %v1912_v21, 2 }
0x12d9   :  { %v1914_v3 = vmax.f32 %v1912_v21, %v1913_v58 }
0x12db   :  { %v1915_v23 = vrot.slane %v1914_v3, 1 }
0x12dd   :  { %v1916_v16 = vmax.f32 %v1914_v3, %v1915_v23 }
0x12df   :  { %v1917_v27 = vsub.f32 %v1906_v19, %v1916_v16 }
0x12e1   :  { %v1918_v28 = vmul.f32 1.442695, %v1917_v27 }
0x12e3   :  { %2184 = vpow2.f32 %v1918_v28 }
0x12e9   :  { %v2185_v32 = vpop.eup %2184 }
0x12ea   :  { %v1920_v4 = vsel %vm1907_vm2, %v2185_v32, 0.0 }
0x12eb   :  { %v1921_v7 = vrot.slane %v1920_v4, 4 }
0x12ed   :  { %v1922_v30 = vadd.f32 %v1921_v7, %v1920_v4 }
0x12ef   :  { %v1923_v31 = vrot.slane %v1922_v30, 2 }
0x12f1   :  { %v1924_v13 = vadd.f32 %v1923_v31, %v1922_v30 }
0x12f3   :  { %v1925_v33 = vrot.slane %v1924_v13, 1 }
0x12f5   :  { %v1926_v34 = vadd.f32 %v1925_v33, %v1924_v13 }
0x12f7   :  { %2186 = vrcp.f32 %v1926_v34 }
0x12fd   :  { %v2187_v36 = vpop.eup %2186 }
0x12fe   :  { %v1928_v37 = vmul.f32 %v2187_v36, %v2185_v32 }
0x1300   :  { %v1929_v5 = vmul.f32 %v2724_v25, %v1928_v37 }
0x1302   :  { %1930 = vst.msk [vmem:[#allocation4] sm:$0x3f] %vm1907_vm2, %v1929_v5 }
0x1303   :  { %1954 = dma.vmem_to_hbm [thread:$0]  %s1950_s20, 128, %s1952_s6, [#allocation5]  }
0x1304   :  { %2237 = dma.done.wait [#allocation3], 128  }
0x1305   :  { %2238 = vsyncadd [#allocation3], 4294967168 }
0x1306   :  { %2239 = dma.done.wait [#allocation5], 128  }
0x1307   :  { %2240 = vsyncadd [#allocation5], 4294967168 }
0x1308   :  { %1965 = vsyncpa [#allocation3], 1 }
0x1309   :  { %1966 = vsyncpa [#allocation5], 1 }

</bundles_post_ra>
